<compile_context>
chip_gen: v5e
topology: v5e:2x2
jax: 0.10.0
libtpu: 0.0.40
codegen_flags: <defaults>
</compile_context>

<pallas_src>
import functools

import jax
import jax.numpy as jnp
import numpy as np
from jax.experimental import pallas as pl
from jax.experimental.pallas import tpu as pltpu


# ---------------------------------------------------------------------------
# Kernels
# ---------------------------------------------------------------------------

def _conv_mm_kernel(p_ref, w_ref, b_ref, o_ref, *, relu):
    # p_ref : (Keff, Mt)  bf16 im2col patches (spatial in lanes)
    # w_ref : (Cout, Keff) bf16 reshaped conv weights
    # b_ref : (Cout, 1)    f32 bias
    # o_ref : (Cout, Mt)   bf16 lane-dense output
    acc = jnp.dot(w_ref[...], p_ref[...], preferred_element_type=jnp.float32)
    acc = acc + b_ref[...]                       # f32 epilogue
    if relu:
        acc = jnp.maximum(acc, 0.0)
    o_ref[...] = acc.astype(o_ref.dtype)


def _conv_mm_fused_kernel(p_ref, w3_ref, b3_ref, w4_ref, b4_ref, o_ref, *, scale):
    # Conv3 (3x3x3, 64->32) + ReLU, then fused Conv4 (1x1x1, 32->3) + scale.
    # p_ref : (Keff3, Mt) bf16 patches of the 64-channel activation
    # w3_ref: (32, Keff3) bf16 ; b3_ref: (32, 1) f32
    # w4_ref: (3, 32)     f32  ; b4_ref: (3, 1)  f32
    # o_ref : (3, Mt)     f32 lane-dense output
    h = jnp.dot(w3_ref[...], p_ref[...], preferred_element_type=jnp.float32)
    h = jnp.maximum(h + b3_ref[...], 0.0)                       # (32, Mt) f32
    out = jnp.dot(w4_ref[...], h, preferred_element_type=jnp.float32)
    o_ref[...] = (out + b4_ref[...]) * scale


# ---------------------------------------------------------------------------
# Wrappers
# ---------------------------------------------------------------------------

def _pick_mtile(M):
    for mt in (512, 256, 128):
        if M % mt == 0:
            return mt
    return M


def _im2col_cf(x_cf, k):
    """x_cf: (C, N, D, H, W) -> (k^3*C, N*D*H*W) patch matrix (same dtype)."""
    C, N, D, H, W = x_cf.shape
    if k == 1:
        return x_cf.reshape(C, N * D * H * W)
    p = k // 2
    xp = jnp.pad(x_cf, ((0, 0), (0, 0), (p, p), (p, p), (p, p)))
    taps = []
    for kd in range(k):
        for kh in range(k):
            for kw in range(k):
                taps.append(xp[:, :, kd:kd + D, kh:kh + H, kw:kw + W])
    pat = jnp.stack(taps, axis=0)              # (k^3, C, N, D, H, W)
    return pat.reshape(k * k * k * C, N * D * H * W)


def _conv_mm(patches, w_dhwio, bias, *, relu, mt):
    """patches: (Keff, M) bf16; w_dhwio: (k,k,k,Cin,Cout); bias: (Cout,)."""
    Keff, M = patches.shape
    Cout = w_dhwio.shape[-1]
    wmat = w_dhwio.reshape(Keff, Cout).T.astype(jnp.bfloat16)   # (Cout, Keff)
    b2 = bias.reshape(Cout, 1).astype(jnp.float32)

    flops = 2 * Cout * Keff * M
    bytes_acc = patches.size * 2 + wmat.size * 2 + b2.size * 4 + Cout * M * 2

    return pl.pallas_call(
        functools.partial(_conv_mm_kernel, relu=relu),
        out_shape=jax.ShapeDtypeStruct((Cout, M), jnp.bfloat16),
        grid=(M // mt,),
        in_specs=[
            pl.BlockSpec((Keff, mt), lambda j: (0, j)),
            pl.BlockSpec((Cout, Keff), lambda j: (0, 0)),
            pl.BlockSpec((Cout, 1), lambda j: (0, 0)),
        ],
        out_specs=pl.BlockSpec((Cout, mt), lambda j: (0, j)),
        compiler_params=pltpu.CompilerParams(
            dimension_semantics=("parallel",)),
        cost_estimate=pl.CostEstimate(
            flops=flops, transcendentals=0, bytes_accessed=bytes_acc),
    )(patches, wmat, b2)


def _conv_mm_fused(patches, w3, b3, w4, b4, *, scale, mt):
    """Fused conv3 (3x3x3, 64->32, ReLU) + conv4 (1x1, 32->3) + scale."""
    Keff, M = patches.shape
    C3 = w3.shape[-1]                       # 32
    Cout = w4.shape[-1]                     # 3
    w3m = w3.reshape(Keff, C3).T.astype(jnp.bfloat16)            # (32, Keff)
    b3m = b3.reshape(C3, 1).astype(jnp.float32)
    w4m = w4.reshape(C3, Cout).T.astype(jnp.float32)             # (3, 32)
    b4m = b4.reshape(Cout, 1).astype(jnp.float32)

    flops = 2 * C3 * Keff * M + 2 * Cout * C3 * M
    bytes_acc = (patches.size * 2 + w3m.size * 2 + b3m.size * 4
                 + w4m.size * 4 + b4m.size * 4 + Cout * M * 4)

    return pl.pallas_call(
        functools.partial(_conv_mm_fused_kernel, scale=float(scale)),
        out_shape=jax.ShapeDtypeStruct((Cout, M), jnp.float32),
        grid=(M // mt,),
        in_specs=[
            pl.BlockSpec((Keff, mt), lambda j: (0, j)),
            pl.BlockSpec((C3, Keff), lambda j: (0, 0)),
            pl.BlockSpec((C3, 1), lambda j: (0, 0)),
            pl.BlockSpec((Cout, C3), lambda j: (0, 0)),
            pl.BlockSpec((Cout, 1), lambda j: (0, 0)),
        ],
        out_specs=pl.BlockSpec((Cout, mt), lambda j: (0, j)),
        compiler_params=pltpu.CompilerParams(
            dimension_semantics=("parallel",)),
        cost_estimate=pl.CostEstimate(
            flops=flops, transcendentals=0, bytes_accessed=bytes_acc),
    )(patches, w3m, b3m, w4m, b4m)


# ---------------------------------------------------------------------------
# Model
# ---------------------------------------------------------------------------

def init_params(key, in_channels=3, out_channels=3):
    """Deterministic Conv3d params (PyTorch-style uniform bounds), DHWIO layout."""
    layer_defs = [(in_channels, 32, 3), (32, 64, 3), (64, 32, 3), (32, out_channels, 1)]
    params = []
    for cin, cout, k in layer_defs:
        key, kw_key, kb_key = jax.random.split(key, 3)
        fan_in = cin * k ** 3
        bound = 1.0 / (fan_in ** 0.5)
        w = jax.random.uniform(kw_key, (k, k, k, cin, cout), jnp.float32, -bound, bound)
        b = jax.random.uniform(kb_key, (cout,), jnp.float32, -bound, bound)
        params.append((w, b))
    return params


def hybrid_cfd_forward(params, x_ncdhw, velocity_scale=5.0):
    """x_ncdhw: (N, Cin, D, H, W) f32 -> (N, Cout, D, H, W) f32."""
    N, Cin, D, H, W = x_ncdhw.shape
    M = N * D * H * W
    mt = _pick_mtile(M)

    (w1, b1), (w2, b2), (w3, b3), (w4, b4) = params

    # Channels-first, flattened-spatial layout (lane-dense along N*D*H*W).
    x_cf = jnp.transpose(x_ncdhw, (1, 0, 2, 3, 4)).astype(jnp.bfloat16)

    p1 = _im2col_cf(x_cf, 3)                                   # (27*Cin, M)
    h1 = _conv_mm(p1, w1, b1, relu=True, mt=mt)                # (32, M) bf16

    p2 = _im2col_cf(h1.reshape(32, N, D, H, W), 3)             # (864, M)
    h2 = _conv_mm(p2, w2, b2, relu=True, mt=mt)                # (64, M) bf16

    p3 = _im2col_cf(h2.reshape(64, N, D, H, W), 3)             # (1728, M)
    out_cf = _conv_mm_fused(p3, w3, b3, w4, b4,
                            scale=velocity_scale, mt=mt)        # (3, M) f32

    Cout = w4.shape[-1]
    return jnp.transpose(out_cf.reshape(Cout, N, D, H, W), (1, 0, 2, 3, 4))


def reference_forward(params, x_ncdhw, velocity_scale=5.0):
    """Pure-JAX f32 reference in the PyTorch NCDHW layout."""
    def conv(h, w, b):
        y = jax.lax.conv_general_dilated(
            h, w, window_strides=(1, 1, 1), padding="SAME",
            dimension_numbers=("NCDHW", "DHWIO", "NCDHW"),
            precision=jax.lax.Precision.HIGHEST)
        return y + b.reshape(1, -1, 1, 1, 1)

    h = jax.nn.relu(conv(x_ncdhw, *params[0]))
    h = jax.nn.relu(conv(h, *params[1]))
    h = jax.nn.relu(conv(h, *params[2]))
    return conv(h, *params[3]) * velocity_scale


if __name__ == "__main__":
    key = jax.random.PRNGKey(0)
    pkey, xkey = jax.random.split(key)
    params = init_params(pkey, in_channels=3, out_channels=3)

    # PyTorch layout NCDHW: (batch=2, C=3, D=8, H=8, W=8)
    N, C, D, H, W = 2, 3, 8, 8, 8
    x = jax.random.normal(xkey, (N, C, D, H, W), jnp.float32)

    fwd = jax.jit(hybrid_cfd_forward, static_argnames=("velocity_scale",))
    out = jax.block_until_ready(fwd(params, x, velocity_scale=5.0))
    assert out.shape == (N, 3, D, H, W), out.shape

    ref = jax.block_until_ready(reference_forward(params, x, velocity_scale=5.0))
    np.testing.assert_allclose(np.asarray(out), np.asarray(ref), rtol=2e-2, atol=2e-2)

    print("KERNEL_OK")
</pallas_src>

<mosaic_0001>
module attributes {stable_mosaic.version = 11 : i64} {
  func.func @_conv_mm_kernel(%arg0: i32, %arg1: memref<81x512xbf16, #tpu.memory_space<vmem>>, %arg2: memref<32x81xbf16, #tpu.memory_space<vmem>>, %arg3: memref<32x1xf32, #tpu.memory_space<vmem>>, %arg4: memref<32x512xbf16, #tpu.memory_space<vmem>>) attributes {dimension_semantics = [#tpu.dimension_semantics<parallel>], iteration_bounds = array<i64: 2>, scalar_prefetch = 0 : i64, scratch_operands = 0 : i64, tpu.core_type = #tpu.core_type<tc>, window_params = [{transform_indices = @transform_0, window_bounds = array<i64: 81, 512>}, {pipeline_mode = #tpu.pipeline_mode<synchronous>, transform_indices = @transform_1, window_bounds = array<i64: 32, 81>}, {pipeline_mode = #tpu.pipeline_mode<synchronous>, transform_indices = @transform_2, window_bounds = array<i64: 32, 1>}, {transform_indices = @transform_3, window_bounds = array<i64: 32, 512>}]} {
    %c0 = arith.constant 0 : index
    %c0_0 = arith.constant 0 : index
    %0 = vector.load %arg2[%c0, %c0_0] : memref<32x81xbf16, #tpu.memory_space<vmem>>, vector<32x81xbf16>
    %c0_1 = arith.constant 0 : index
    %c0_2 = arith.constant 0 : index
    %1 = vector.load %arg1[%c0_1, %c0_2] : memref<81x512xbf16, #tpu.memory_space<vmem>>, vector<81x512xbf16>
    %cst = arith.constant dense<0.000000e+00> : vector<32x512xf32>
    %2 = tpu.matmul %0, %1, %cst {dimension_numbers = #tpu.dot_dimension_numbers<[1], [0], [0], [1], [0, 0, 1, 1], [], []>} : vector<32x81xbf16>, vector<81x512xbf16>, vector<32x512xf32> -> vector<32x512xf32>
    %c0_3 = arith.constant 0 : index
    %c0_4 = arith.constant 0 : index
    %3 = vector.load %arg3[%c0_3, %c0_4] : memref<32x1xf32, #tpu.memory_space<vmem>>, vector<32x1xf32>
    %4 = vector.broadcast %3 : vector<32x1xf32> to vector<32x512xf32>
    %5 = arith.addf %2, %4 : vector<32x512xf32>
    %cst_5 = arith.constant 0.000000e+00 : f32
    %6 = vector.broadcast %cst_5 : f32 to vector<32x512xf32>
    %7 = arith.maximumf %5, %6 : vector<32x512xf32>
    %8 = arith.truncf %7 : vector<32x512xf32> to vector<32x512xbf16>
    %c0_6 = arith.constant 0 : index
    %c0_7 = arith.constant 0 : index
    %9 = vector.load %arg4[%c0_6, %c0_7] : memref<32x512xbf16, #tpu.memory_space<vmem>>, vector<32x512xbf16>
    tpu.vector_store %arg4[%c0_6, %c0_7], %8 {strides = array<i32>} : memref<32x512xbf16, #tpu.memory_space<vmem>>, vector<32x512xbf16>,
    return
  }
  func.func @transform_0(%arg0: i32) -> (i32, i32) {
    %c0_i32 = arith.constant 0 : i32
    %c0_i32_0 = arith.constant 0 : i32
    return %c0_i32, %arg0 : i32, i32
  }
  func.func @transform_1(%arg0: i32) -> (i32, i32) {
    %c0_i32 = arith.constant 0 : i32
    %c0_i32_0 = arith.constant 0 : i32
    %c0_i32_1 = arith.constant 0 : i32
    return %c0_i32, %c0_i32_0 : i32, i32
  }
  func.func @transform_2(%arg0: i32) -> (i32, i32) {
    %c0_i32 = arith.constant 0 : i32
    %c0_i32_0 = arith.constant 0 : i32
    %c0_i32_1 = arith.constant 0 : i32
    return %c0_i32, %c0_i32_0 : i32, i32
  }
  func.func @transform_3(%arg0: i32) -> (i32, i32) {
    %c0_i32 = arith.constant 0 : i32
    %c0_i32_0 = arith.constant 0 : i32
    return %c0_i32, %arg0 : i32, i32
  }
}

module attributes {stable_mosaic.version = 11 : i64} {
  func.func @_conv_mm_kernel(%arg0: i32, %arg1: memref<864x512xbf16, #tpu.memory_space<vmem>>, %arg2: memref<64x864xbf16, #tpu.memory_space<vmem>>, %arg3: memref<64x1xf32, #tpu.memory_space<vmem>>, %arg4: memref<64x512xbf16, #tpu.memory_space<vmem>>) attributes {dimension_semantics = [#tpu.dimension_semantics<parallel>], iteration_bounds = array<i64: 2>, scalar_prefetch = 0 : i64, scratch_operands = 0 : i64, tpu.core_type = #tpu.core_type<tc>, window_params = [{transform_indices = @transform_0, window_bounds = array<i64: 864, 512>}, {pipeline_mode = #tpu.pipeline_mode<synchronous>, transform_indices = @transform_1, window_bounds = array<i64: 64, 864>}, {pipeline_mode = #tpu.pipeline_mode<synchronous>, transform_indices = @transform_2, window_bounds = array<i64: 64, 1>}, {transform_indices = @transform_3, window_bounds = array<i64: 64, 512>}]} {
    %c0 = arith.constant 0 : index
    %c0_0 = arith.constant 0 : index
    %0 = vector.load %arg2[%c0, %c0_0] : memref<64x864xbf16, #tpu.memory_space<vmem>>, vector<64x864xbf16>
    %c0_1 = arith.constant 0 : index
    %c0_2 = arith.constant 0 : index
    %1 = vector.load %arg1[%c0_1, %c0_2] : memref<864x512xbf16, #tpu.memory_space<vmem>>, vector<864x512xbf16>
    %cst = arith.constant dense<0.000000e+00> : vector<64x512xf32>
    %2 = tpu.matmul %0, %1, %cst {dimension_numbers = #tpu.dot_dimension_numbers<[1], [0], [0], [1], [0, 0, 1, 1], [], []>} : vector<64x864xbf16>, vector<864x512xbf16>, vector<64x512xf32> -> vector<64x512xf32>
    %c0_3 = arith.constant 0 : index
    %c0_4 = arith.constant 0 : index
    %3 = vector.load %arg3[%c0_3, %c0_4] : memref<64x1xf32, #tpu.memory_space<vmem>>, vector<64x1xf32>
    %4 = vector.broadcast %3 : vector<64x1xf32> to vector<64x512xf32>
    %5 = arith.addf %2, %4 : vector<64x512xf32>
    %cst_5 = arith.constant 0.000000e+00 : f32
    %6 = vector.broadcast %cst_5 : f32 to vector<64x512xf32>
    %7 = arith.maximumf %5, %6 : vector<64x512xf32>
    %8 = arith.truncf %7 : vector<64x512xf32> to vector<64x512xbf16>
    %c0_6 = arith.constant 0 : index
    %c0_7 = arith.constant 0 : index
    %9 = vector.load %arg4[%c0_6, %c0_7] : memref<64x512xbf16, #tpu.memory_space<vmem>>, vector<64x512xbf16>
    tpu.vector_store %arg4[%c0_6, %c0_7], %8 {strides = array<i32>} : memref<64x512xbf16, #tpu.memory_space<vmem>>, vector<64x512xbf16>,
    return
  }
  func.func @transform_0(%arg0: i32) -> (i32, i32) {
    %c0_i32 = arith.constant 0 : i32
    %c0_i32_0 = arith.constant 0 : i32
    return %c0_i32, %arg0 : i32, i32
  }
  func.func @transform_1(%arg0: i32) -> (i32, i32) {
    %c0_i32 = arith.constant 0 : i32
    %c0_i32_0 = arith.constant 0 : i32
    %c0_i32_1 = arith.constant 0 : i32
    return %c0_i32, %c0_i32_0 : i32, i32
  }
  func.func @transform_2(%arg0: i32) -> (i32, i32) {
    %c0_i32 = arith.constant 0 : i32
    %c0_i32_0 = arith.constant 0 : i32
    %c0_i32_1 = arith.constant 0 : i32
    return %c0_i32, %c0_i32_0 : i32, i32
  }
  func.func @transform_3(%arg0: i32) -> (i32, i32) {
    %c0_i32 = arith.constant 0 : i32
    %c0_i32_0 = arith.constant 0 : i32
    return %c0_i32, %arg0 : i32, i32
  }
}

module attributes {stable_mosaic.version = 11 : i64} {
  func.func @_conv_mm_fused_kernel(%arg0: i32, %arg1: memref<1728x512xbf16, #tpu.memory_space<vmem>>, %arg2: memref<32x1728xbf16, #tpu.memory_space<vmem>>, %arg3: memref<32x1xf32, #tpu.memory_space<vmem>>, %arg4: memref<3x32xf32, #tpu.memory_space<vmem>>, %arg5: memref<3x1xf32, #tpu.memory_space<vmem>>, %arg6: memref<3x512xf32, #tpu.memory_space<vmem>>) attributes {dimension_semantics = [#tpu.dimension_semantics<parallel>], iteration_bounds = array<i64: 2>, scalar_prefetch = 0 : i64, scratch_operands = 0 : i64, tpu.core_type = #tpu.core_type<tc>, window_params = [{transform_indices = @transform_0, window_bounds = array<i64: 1728, 512>}, {pipeline_mode = #tpu.pipeline_mode<synchronous>, transform_indices = @transform_1, window_bounds = array<i64: 32, 1728>}, {pipeline_mode = #tpu.pipeline_mode<synchronous>, transform_indices = @transform_2, window_bounds = array<i64: 32, 1>}, {pipeline_mode = #tpu.pipeline_mode<synchronous>, transform_indices = @transform_3, window_bounds = array<i64: 3, 32>}, {pipeline_mode = #tpu.pipeline_mode<synchronous>, transform_indices = @transform_4, window_bounds = array<i64: 3, 1>}, {transform_indices = @transform_5, window_bounds = array<i64: 3, 512>}]} {
    %c0 = arith.constant 0 : index
    %c0_0 = arith.constant 0 : index
    %0 = vector.load %arg2[%c0, %c0_0] : memref<32x1728xbf16, #tpu.memory_space<vmem>>, vector<32x1728xbf16>
    %c0_1 = arith.constant 0 : index
    %c0_2 = arith.constant 0 : index
    %1 = vector.load %arg1[%c0_1, %c0_2] : memref<1728x512xbf16, #tpu.memory_space<vmem>>, vector<1728x512xbf16>
    %cst = arith.constant dense<0.000000e+00> : vector<32x512xf32>
    %2 = tpu.matmul %0, %1, %cst {dimension_numbers = #tpu.dot_dimension_numbers<[1], [0], [0], [1], [0, 0, 1, 1], [], []>} : vector<32x1728xbf16>, vector<1728x512xbf16>, vector<32x512xf32> -> vector<32x512xf32>
    %c0_3 = arith.constant 0 : index
    %c0_4 = arith.constant 0 : index
    %3 = vector.load %arg3[%c0_3, %c0_4] : memref<32x1xf32, #tpu.memory_space<vmem>>, vector<32x1xf32>
    %4 = vector.broadcast %3 : vector<32x1xf32> to vector<32x512xf32>
    %5 = arith.addf %2, %4 : vector<32x512xf32>
    %cst_5 = arith.constant 0.000000e+00 : f32
    %6 = vector.broadcast %cst_5 : f32 to vector<32x512xf32>
    %7 = arith.maximumf %5, %6 : vector<32x512xf32>
    %c0_6 = arith.constant 0 : index
    %c0_7 = arith.constant 0 : index
    %8 = vector.load %arg4[%c0_6, %c0_7] : memref<3x32xf32, #tpu.memory_space<vmem>>, vector<3x32xf32>
    %cst_8 = arith.constant dense<0.000000e+00> : vector<3x512xf32>
    %9 = tpu.matmul %8, %7, %cst_8 {dimension_numbers = #tpu.dot_dimension_numbers<[1], [0], [0], [1], [0, 0, 1, 1], [], []>} : vector<3x32xf32>, vector<32x512xf32>, vector<3x512xf32> -> vector<3x512xf32>
    %c0_9 = arith.constant 0 : index
    %c0_10 = arith.constant 0 : index
    %10 = vector.load %arg5[%c0_9, %c0_10] : memref<3x1xf32, #tpu.memory_space<vmem>>, vector<3x1xf32>
    %11 = vector.broadcast %10 : vector<3x1xf32> to vector<3x512xf32>
    %12 = arith.addf %9, %11 : vector<3x512xf32>
    %cst_11 = arith.constant 5.000000e+00 : f32
    %13 = vector.broadcast %cst_11 : f32 to vector<3x512xf32>
    %14 = arith.mulf %12, %13 : vector<3x512xf32>
    %c0_12 = arith.constant 0 : index
    %c0_13 = arith.constant 0 : index
    %15 = vector.load %arg6[%c0_12, %c0_13] : memref<3x512xf32, #tpu.memory_space<vmem>>, vector<3x512xf32>
    tpu.vector_store %arg6[%c0_12, %c0_13], %14 {strides = array<i32>} : memref<3x512xf32, #tpu.memory_space<vmem>>, vector<3x512xf32>,
    return
  }
  func.func @transform_0(%arg0: i32) -> (i32, i32) {
    %c0_i32 = arith.constant 0 : i32
    %c0_i32_0 = arith.constant 0 : i32
    return %c0_i32, %arg0 : i32, i32
  }
  func.func @transform_1(%arg0: i32) -> (i32, i32) {
    %c0_i32 = arith.constant 0 : i32
    %c0_i32_0 = arith.constant 0 : i32
    %c0_i32_1 = arith.constant 0 : i32
    return %c0_i32, %c0_i32_0 : i32, i32
  }
  func.func @transform_2(%arg0: i32) -> (i32, i32) {
    %c0_i32 = arith.constant 0 : i32
    %c0_i32_0 = arith.constant 0 : i32
    %c0_i32_1 = arith.constant 0 : i32
    return %c0_i32, %c0_i32_0 : i32, i32
  }
  func.func @transform_3(%arg0: i32) -> (i32, i32) {
    %c0_i32 = arith.constant 0 : i32
    %c0_i32_0 = arith.constant 0 : i32
    %c0_i32_1 = arith.constant 0 : i32
    return %c0_i32, %c0_i32_0 : i32, i32
  }
  func.func @transform_4(%arg0: i32) -> (i32, i32) {
    %c0_i32 = arith.constant 0 : i32
    %c0_i32_0 = arith.constant 0 : i32
    %c0_i32_1 = arith.constant 0 : i32
    return %c0_i32, %c0_i32_0 : i32, i32
  }
  func.func @transform_5(%arg0: i32) -> (i32, i32) {
    %c0_i32 = arith.constant 0 : i32
    %c0_i32_0 = arith.constant 0 : i32
    return %c0_i32, %arg0 : i32, i32
  }
}

</mosaic_0001>

<bundles_post_ra>
// kernel: hybrid_cfd_forward.3
= control target key start
LH: loop header
LB: loop body
LE: loop exit
PB: predicated region body
PF: predicated region fallthrough
CT: control target
= control target key end

     0   :  { %s834_s12 = smov 0   ;;  %s836_s13 = smov 0   ;;  %s1026_s0 = inlined_call_operand.vmem [shape: bf16[81,1024], index: 0, kind: input, shape index: {}]   ;;  %s1027_s1 = inlined_call_operand.vmem [shape: bf16[32,81], index: 1, kind: input, shape index: {}]   ;;  %s1028_s2 = inlined_call_operand.vmem [shape: f32[32,1], index: 2, kind: input, shape index: {}]   ;;  %s1029_s3 = inlined_call_operand.vmem [shape: bf16[32,1024], index: 3, kind: output, shape index: {}]  }
   0x1   :  { %s838_s14 = smov 0  }
   0x2 LB: > { %s627_s15 = sadd.s32 4294967295, %s811_s14   ;;  %s851_s16 = sadd.s32 1, %s811_s14   ;;  %s811_s14 = sphi %s838_s14, %s1033_s14   ;;  %s807_s13 = sphi %s836_s13, %s1032_s13   ;;  %s803_s12 = sphi %s834_s12, %s1031_s12  }
   0x3   : > { %s17_s17 = ssub.s32 %s811_s14, %s851_s16  ;;  %s20_s18 = sadd.s32 1, %s807_s13 }
   0x4   : > { %p18_p0 = scmp.eq.s32.totalorder %s17_s17, 0  ;;  %p27_p1 = scmp.ne.s32.totalorder %s807_s13, %s803_s12 }
   0x5   : > { %p28_p2 = scmp.eq.s32.totalorder %s811_s14, 0  ;;  %p99_p3 = scmp.eq.s32.totalorder %s627_s15, 1 }
   0x6   : > { %s862_s19 = scalar_select %p18_p0, %s807_s13, %s20_s18  }
   0x7   : > { %p29_p4 = por %p28_p2, %p27_p1  ;;  %p864_p5 = por %p99_p3, %p27_p1 }
   0x8   : > { %p630_p6 = scmp.ge.s32.totalorder %s811_s14, 2 }
   0xa   : > { %127 = sbr.rel (%p630_p6) target bundleno = 41 (0x29), region = 24 }
   0xf   : > { %130 = sbr.rel (!%p29_p4) target bundleno = 41 (0x29), region = 28  ;;  %s132_s21 = sand.u32 (%p29_p4), 1, %s807_s13  }
  0x10   : > { %s736_s22 = sshll.u32 (%p29_p4), %s811_s14, 4  ;;  %s760_s23 = smul.u32 (%p29_p4), 176, %s132_s21 }
  0x11   : > { %s874_s26 = scalar_lea.vmem (%p29_p4), %s1026_s0, %s736_s22 }
  0x12   : > { %v150_v0 = vld [vmem:[%s874_s26] sm:$0xff] (%p29_p4)  ;;  %v152_v1 = vld [vmem:[%s874_s26 + $0x8] sm:$0xff] (%p29_p4)  ;;  %s879_s27 = scalar_lea.vmem (%p29_p4), [#allocation2], %s760_s23 }
  0x13   : > { %v154_v2 = vld [vmem:[%s874_s26 + $0x20] sm:$0xff] (%p29_p4)  ;;  %151 = vst [vmem:[%s879_s27] sm:$0xff] (%p29_p4), %v150_v0  ;;  %v156_v3 = vld [vmem:[%s874_s26 + $0x28] sm:$0xff] (%p29_p4) }
  0x14   : > { %153 = vst [vmem:[%s879_s27 + $0x8] sm:$0xff] %v152_v1  ;;  %v158_v4 = vld [vmem:[%s874_s26 + $0x40] sm:$0xff]  ;;  %v160_v5 = vld [vmem:[%s874_s26 + $0x48] sm:$0xff] }
  0x15   : > { %155 = vst [vmem:[%s879_s27 + $0x10] sm:$0xff] %v154_v2  ;;  %v162_v6 = vld [vmem:[%s874_s26 + $0x60] sm:$0xff]  ;;  %v164_v7 = vld [vmem:[%s874_s26 + $0x68] sm:$0xff] }
  0x16   : > { %157 = vst [vmem:[%s879_s27 + $0x18] sm:$0xff] %v156_v3  ;;  %v166_v8 = vld [vmem:[%s874_s26 + $0x80] sm:$0xff]  ;;  %v168_v9 = vld [vmem:[%s874_s26 + $0x88] sm:$0xff] }
  0x17   : > { %159 = vst [vmem:[%s879_s27 + $0x20] sm:$0xff] %v158_v4  ;;  %v170_v10 = vld [vmem:[%s874_s26 + $0xa0] sm:$0xff]  ;;  %v172_v11 = vld [vmem:[%s874_s26 + $0xa8] sm:$0xff] }
  0x18   : > { %161 = vst [vmem:[%s879_s27 + $0x28] sm:$0xff] %v160_v5  ;;  %v174_v12 = vld [vmem:[%s874_s26 + $0xc0] sm:$0xff]  ;;  %v176_v13 = vld [vmem:[%s874_s26 + $0xc8] sm:$0xff] }
  0x19   : > { %163 = vst [vmem:[%s879_s27 + $0x30] sm:$0xff] %v162_v6  ;;  %v178_v14 = vld [vmem:[%s874_s26 + $0xe0] sm:$0xff]  ;;  %v180_v15 = vld [vmem:[%s874_s26 + $0xe8] sm:$0xff] }
  0x1a   : > { %165 = vst [vmem:[%s879_s27 + $0x38] sm:$0xff] %v164_v7  ;;  %v182_v16 = vld [vmem:[%s874_s26 + $0x100] sm:$0xff]  ;;  %v184_v17 = vld [vmem:[%s874_s26 + $0x108] sm:$0xff] }
  0x1b   : > { %167 = vst [vmem:[%s879_s27 + $0x40] sm:$0xff] %v166_v8  ;;  %v186_v18 = vld [vmem:[%s874_s26 + $0x120] sm:$0xff]  ;;  %v188_v19 = vld [vmem:[%s874_s26 + $0x128] sm:$0xff] }
  0x1c   : > { %169 = vst [vmem:[%s879_s27 + $0x48] sm:$0xff] %v168_v9  ;;  %v190_v20 = vld [vmem:[%s874_s26 + $0x140] sm:$0xff]  ;;  %v192_v21 = vld [vmem:[%s874_s26 + $0x148] sm:$0xff] }
  0x1d   : > { %171 = vst [vmem:[%s879_s27 + $0x50] sm:$0xff] %v170_v10 }
  0x1e   : > { %173 = vst [vmem:[%s879_s27 + $0x58] sm:$0xff] %v172_v11 }
  0x1f   : > { %175 = vst [vmem:[%s879_s27 + $0x60] sm:$0xff] %v174_v12 }
  0x20   : > { %177 = vst [vmem:[%s879_s27 + $0x68] sm:$0xff] %v176_v13 }
  0x21   : > { %179 = vst [vmem:[%s879_s27 + $0x70] sm:$0xff] %v178_v14 }
  0x22   : > { %181 = vst [vmem:[%s879_s27 + $0x78] sm:$0xff] %v180_v15 }
  0x23   : > { %183 = vst [vmem:[%s879_s27 + $0x80] sm:$0xff] %v182_v16 }
  0x24   : > { %185 = vst [vmem:[%s879_s27 + $0x88] sm:$0xff] %v184_v17 }
  0x25   : > { %187 = vst [vmem:[%s879_s27 + $0x90] sm:$0xff] %v186_v18 }
  0x26   : > { %189 = vst [vmem:[%s879_s27 + $0x98] sm:$0xff] %v188_v19 }
  0x27   : > { %191 = vst [vmem:[%s879_s27 + $0xa0] sm:$0xff] %v190_v20 }
  0x28   : > { %193 = vst [vmem:[%s879_s27 + $0xa8] sm:$0xff] %v192_v21 }
  0x29 PF: > { %p633_p7 = scmp.ge.s32.totalorder %s811_s14, 1  ;;  %p198_p8 = scmp.lt.s32.totalorder %s811_s14, 3 }
  0x2b   : > { %p199_p9 = pnand %p633_p7, %p198_p8 }
  0x2c   : > { %s205_s28 = sand.u32 (!%p199_p9), 1, %s803_s12  }
  0x2d   : > { %202 = sbr.rel (%p199_p9) target bundleno = 251 (0xfb), region = 51  ;;  %s634_s23 = sshll.u32 (!%p199_p9), %s205_s28, 6 }
  0x2e   : > { %s761_s29 = smul.u32 (!%p199_p9), 176, %s205_s28  ;;  %s991_s24 = scalar_lea.vmem (!%p199_p9), [#allocation3], %s634_s23 }
  0x30   : > { %s930_s5 = scalar_lea.vmem (!%p199_p9), [#allocation2], %s761_s29 }
  0x32   : > { %v813_v22 = vmov 0   ;;  %vm407_vm0 = vcmask 1040384   ;;  %v256_v23 = vld [vmem:[%s1028_s2] sm:$0xff]  ;;  %v255_v25 = vld [vmem:[%s930_s5 + $0xa8] sm:$0x11]  ;;  %v258_v12 = vld [vmem:[%s1028_s2 + $0x10] sm:$0xff] }
  0x33   : > { %787 = vset.pattern.permute.xlu0 %v813_v22  ;;  %788 = vset.pattern.permute.xlu1 %v813_v22  ;;  %v254_v24 = vld [vmem:[%s930_s5 + $0xa0] sm:$0x11]  ;;  %v354_v28 = vunpack.c.l.b16 %v255_v25  ;;  %v355_v29 = vunpack.c.h.b16 %v255_v25  ;;  %v409_v30 = vsel %vm407_vm0, 65535, %v813_v22  ;;  %v757_v36 = vld [vmem:[%s930_s5 + $0x8c] sm:$0xf0]  ;;  %v257_v11 = vld [vmem:[%s1028_s2 + $0x8] sm:$0xff] }
  0x34   : > { %262 = vperm.xlu0 %787, %v256_v23   ;;  %v352_v26 = vunpack.c.l.b16 %v254_v24  ;;  %v353_v27 = vunpack.c.h.b16 %v254_v24  ;;  %v709_v35 = vld [vmem:[%s930_s5 + $0x80] sm:$0xf]  ;;  %v755_v37 = vld [vmem:[%s930_s5 + $0x84] sm:$0xf]  ;;  %v711_v38 = vld [vmem:[%s930_s5 + $0x90] sm:$0xf0]  ;;  %272 = vperm.xlu1 %788, %v258_v12  }
  0x35   : > { %v378_v33 = vpack.c.b16 %v354_v28, %v354_v28  ;;  %v379_v34 = vpack.c.b16 %v355_v29, %v355_v29  ;;  %v717_v39 = vld [vmem:[%s930_s5 + $0x88] sm:$0xf]  ;;  %v758_v44 = vld [vmem:[%s930_s5 + $0x94] sm:$0xf0]  ;;  %v756_v45 = vld [vmem:[%s930_s5 + $0x8c] sm:$0xf]  ;;  %v710_v47 = vor.u32 %v757_v36, %v709_v35  ;;  %v714_v48 = vor.u32 %v755_v37, %v711_v38 }
  0x36   : > { %v376_v31 = vpack.c.b16 %v352_v26, %v352_v26  ;;  %v377_v32 = vpack.c.b16 %v353_v27, %v353_v27  ;;  %v719_v46 = vld [vmem:[%s930_s5 + $0x98] sm:$0xf0]  ;;  %v693_v49 = vld [vmem:[%s930_s5 + $0x60] sm:$0xf]  ;;  %v753_v50 = vld [vmem:[%s930_s5 + $0x6c] sm:$0xf0]  ;;  %v718_v51 = vor.u32 %v758_v44, %v717_v39 }
  0x37   : > { %v417_v42 = vand.u32 %v409_v30, %v378_v33  ;;  %v420_v43 = vand.u32 %v409_v30, %v379_v34  ;;  %v722_v52 = vor.u32 %v756_v45, %v719_v46  ;;  %v751_v53 = vld [vmem:[%s930_s5 + $0x64] sm:$0xf]  ;;  %v695_v54 = vld [vmem:[%s930_s5 + $0x70] sm:$0xf0]  ;;  %v701_v55 = vld [vmem:[%s930_s5 + $0x68] sm:$0xf]  ;;  %v694_v59 = vor.u32 %v753_v50, %v693_v49 }
  0x38   : > { %v411_v40 = vand.u32 %v409_v30, %v376_v31  ;;  %v414_v41 = vand.u32 %v409_v30, %v377_v32  ;;  %v754_v56 = vld [vmem:[%s930_s5 + $0x74] sm:$0xf0]  ;;  %v752_v57 = vld [vmem:[%s930_s5 + $0x6c] sm:$0xf]  ;;  %v703_v58 = vld [vmem:[%s930_s5 + $0x78] sm:$0xf0]  ;;  %v698_v60 = vor.u32 %v751_v53, %v695_v54 }
  0x39   : > { %462 = vmatpush.bf16.msra.mxu2 %v417_v42  ;;  %481 = vmatpush.bf16.msra.mxu3 %v420_v43  ;;  %v677_v61 = vld [vmem:[%s930_s5 + $0x40] sm:$0xf]  ;;  %v749_v62 = vld [vmem:[%s930_s5 + $0x4c] sm:$0xf0]  ;;  %v702_v63 = vor.u32 %v754_v56, %v701_v55  ;;  %v706_v0 = vor.u32 %v752_v57, %v703_v58  ;;  %v747_v1 = vld [vmem:[%s930_s5 + $0x44] sm:$0xf] }
  0x3a   : > { %424 = vmatpush.bf16.msra.mxu0 %v411_v40  ;;  %443 = vmatpush.bf16.msra.mxu1 %v414_v41  ;;  %v679_v2 = vld [vmem:[%s930_s5 + $0x50] sm:$0xf0]  ;;  %v685_v3 = vld [vmem:[%s930_s5 + $0x48] sm:$0xf]  ;;  %v750_v4 = vld [vmem:[%s930_s5 + $0x54] sm:$0xf0]  ;;  %v678_v8 = vor.u32 %v749_v62, %v677_v61 }
  0x3b   : > { %v748_v5 = vld [vmem:[%s930_s5 + $0x4c] sm:$0xf]  ;;  %v687_v6 = vld [vmem:[%s930_s5 + $0x58] sm:$0xf0]  ;;  %v661_v7 = vld [vmem:[%s930_s5 + $0x20] sm:$0xf]  ;;  %v682_v9 = vor.u32 %v747_v1, %v679_v2  ;;  %v686_v13 = vor.u32 %v750_v4, %v685_v3 }
  0x3c   : > { %v745_v10 = vld [vmem:[%s930_s5 + $0x2c] sm:$0xf0]  ;;  %v690_v14 = vor.u32 %v748_v5, %v687_v6  ;;  %v743_v15 = vld [vmem:[%s930_s5 + $0x24] sm:$0xf]  ;;  %v663_v16 = vld [vmem:[%s930_s5 + $0x30] sm:$0xf0]  ;;  %267 = vperm.xlu0 %787, %v257_v11  }
  0x3d   : > { %463 = vmatpush.bf16.msra.mxu2 %v718_v51  ;;  %482 = vmatpush.bf16.msra.mxu3 %v722_v52  ;;  %v669_v17 = vld [vmem:[%s930_s5 + $0x28] sm:$0xf]  ;;  %v746_v18 = vld [vmem:[%s930_s5 + $0x34] sm:$0xf0]  ;;  %v744_v19 = vld [vmem:[%s930_s5 + $0x2c] sm:$0xf]  ;;  %v662_v21 = vor.u32 %v745_v10, %v661_v7  ;;  %v666_v22 = vor.u32 %v743_v15, %v663_v16 }
  0x3e   : > { %425 = vmatpush.bf16.msra.mxu0 %v710_v47  ;;  %444 = vmatpush.bf16.msra.mxu1 %v714_v48  ;;  %v671_v20 = vld [vmem:[%s930_s5 + $0x38] sm:$0xf0]  ;;  %v645_v23 = vld [vmem:[%s930_s5] sm:$0xf]  ;;  %v741_v24 = vld [vmem:[%s930_s5 + $0xc] sm:$0xf0]  ;;  %v670_v25 = vor.u32 %v746_v18, %v669_v17 }
  0x3f   : > { %v674_v26 = vor.u32 %v744_v19, %v671_v20  ;;  %v739_v27 = vld [vmem:[%s930_s5 + $0x4] sm:$0xf]  ;;  %v647_v28 = vld [vmem:[%s930_s5 + $0x10] sm:$0xf0]  ;;  %v653_v29 = vld [vmem:[%s930_s5 + $0x8] sm:$0xf]  ;;  %v646_v34 = vor.u32 %v741_v24, %v645_v23 }
  0x40   : > { %v742_v30 = vld [vmem:[%s930_s5 + $0x14] sm:$0xf0]  ;;  %v740_v31 = vld [vmem:[%s930_s5 + $0xc] sm:$0xf]  ;;  %v655_v32 = vld [vmem:[%s930_s5 + $0x18] sm:$0xf0]  ;;  %v650_v35 = vor.u32 %v739_v27, %v647_v28 }
  0x41   : > { %464 = vmatpush.bf16.msra.mxu2 %v702_v63  ;;  %483 = vmatpush.bf16.msra.mxu3 %v706_v0  ;;  %v259_v33 = vld [vmem:[%s1028_s2 + $0x18] sm:$0xff]  ;;  %v654_v36 = vor.u32 %v742_v30, %v653_v29  ;;  %v658_v37 = vor.u32 %v740_v31, %v655_v32  ;;  %v737_v38 = vld [vmem:[%s1027_s1] sm:$0xff]  ;;  %vm400_vm1 = vcmask 662528   ;;  %v738_v39 = vld [vmem:[%s1027_s1 + $0x8] sm:$0xff]  ;;  %s759_s12 = sshll.u32 (%p864_p5), %s627_s15, 4 }
  0x42   : > { %426 = vmatpush.bf16.msra.mxu0 %v694_v59  ;;  %445 = vmatpush.bf16.msra.mxu1 %v698_v60  ;;  %s539_s27 = scalar_lea.vmem (%p864_p5), %s1029_s3, %s759_s12 }
  0x43   : > { %277 = vperm.xlu1 %788, %v259_v33  }
  0x45   : > { %465 = vmatpush.bf16.msra.mxu2 %v686_v13  ;;  %484 = vmatpush.bf16.msra.mxu3 %v690_v14 }
  0x46   : > { %427 = vmatpush.bf16.msra.mxu0 %v678_v8  ;;  %446 = vmatpush.bf16.msra.mxu1 %v682_v9 }
  0x49   : > { %466 = vmatpush.bf16.msra.mxu2 %v670_v25  ;;  %485 = vmatpush.bf16.msra.mxu3 %v674_v26 }
  0x4a   : > { %428 = vmatpush.bf16.msra.mxu0 %v662_v21  ;;  %447 = vmatpush.bf16.msra.mxu1 %v666_v22 }
  0x4d   : > { %467 = vmatpush.bf16.msra.mxu2 %v654_v36  ;;  %486 = vmatpush.bf16.msra.mxu3 %v658_v37 }
  0x4e   : > { %429 = vmatpush.bf16.msra.mxu0 %v646_v34  ;;  %448 = vmatpush.bf16.msra.mxu1 %v650_v35 }
  0x50   : > { %727 = vmatmul.msk.bf16.vlgmr.msra.gmra.mxu2 %vm400_vm1, %v737_v38  ;;  %729 = vmatmul.msk.bf16.vlgmr.msra.gmra.mxu3 %vm400_vm1, %v737_v38 }
  0x51   : > { %723 = vmatmul.msk.bf16.vlgmr.msra.gmra.mxu0 %vm400_vm1, %v737_v38  ;;  %725 = vmatmul.msk.bf16.vlgmr.msra.gmra.mxu1 %vm400_vm1, %v737_v38 }
  0x60   : > { %728 = vmatmul.msk.bf16.gmra.mxu2 %vm400_vm1, %v738_v39  ;;  %730 = vmatmul.msk.bf16.gmra.mxu3 %vm400_vm1, %v738_v39 }
  0x61   : > { %724 = vmatmul.msk.bf16.gmra.mxu0 %vm400_vm1, %v738_v39  ;;  %726 = vmatmul.msk.bf16.gmra.mxu1 %vm400_vm1, %v738_v39 }
  0xa6   : > { %v263_v40 = vpop.permute.xlu0 %262  ;;  %v273_v62 = vpop.permute.xlu1 %272 }
  0xae   : > { %v268_v48 = vpop.permute.xlu0 %267 }
  0xb5   : > { %v278_v14 = vpop.permute.xlu1 %277 }
  0xce   : > { %v431_v41 = vpop.f32.mrf.mxu0  ;;  %v450_v42 = vpop.f32.mrf.mxu1 }
  0xcf   : > { %v432_v43 = vadd.f32 %v431_v41, %v263_v40  ;;  %v451_v44 = vadd.f32 %v450_v42, %v263_v40 }
  0xd1   : > { %v498_v45 = vmax.f32 %v432_v43, 0.0  ;;  %v499_v46 = vmax.f32 %v451_v44, 0.0 }
  0xd3   : > { %v514_v47 = vpack.c.bf16 %v499_v46, %v498_v45  ;;  %v469_v49 = vpop.f32.mrf.mxu2  ;;  %v488_v50 = vpop.f32.mrf.mxu3 }
  0xd4   : > { %v470_v51 = vadd.f32 %v469_v49, %v263_v40  ;;  %v489_v52 = vadd.f32 %v488_v50, %v263_v40 }
  0xd5   : > { %522 = vst [vmem:[%s991_s24] sm:$0xff] %v514_v47 }
  0xd6   : > { %v433_v53 = vpop.f32.mrf.mxu0  ;;  %v452_v54 = vpop.f32.mrf.mxu1  ;;  %v500_v57 = vmax.f32 %v470_v51, 0.0  ;;  %v501_v58 = vmax.f32 %v489_v52, 0.0 }
  0xd7   : > { %v434_v55 = vadd.f32 %v433_v53, %v268_v48  ;;  %v453_v56 = vadd.f32 %v452_v54, %v268_v48 }
  0xd8   : > { %v515_v61 = vpack.c.bf16 %v501_v58, %v500_v57 }
  0xd9   : > { %v502_v59 = vmax.f32 %v434_v55, 0.0  ;;  %v503_v60 = vmax.f32 %v453_v56, 0.0 }
  0xda   : > { %523 = vst [vmem:[%s991_s24 + $0x8] sm:$0xff] %v515_v61 }
  0xdb   : > { %v516_v63 = vpack.c.bf16 %v503_v60, %v502_v59  ;;  %v471_v0 = vpop.f32.mrf.mxu2  ;;  %v490_v1 = vpop.f32.mrf.mxu3 }
  0xdc   : > { %v472_v2 = vadd.f32 %v471_v0, %v268_v48  ;;  %v491_v3 = vadd.f32 %v490_v1, %v268_v48  ;;  %v552_v36 = vld [vmem:[%s991_s24] sm:$0xff] (%p864_p5) }
  0xdd   : > { %524 = vst [vmem:[%s991_s24 + $0x10] sm:$0xff] %v516_v63 }
  0xde   : > { %v436_v4 = vpop.f32.mrf.mxu0  ;;  %v455_v5 = vpop.f32.mrf.mxu1  ;;  %v504_v8 = vmax.f32 %v472_v2, 0.0  ;;  %v505_v9 = vmax.f32 %v491_v3, 0.0  ;;  %553 = vst [vmem:[%s539_s27] sm:$0xff] (%p864_p5), %v552_v36 }
  0xdf   : > { %v437_v6 = vadd.f32 %v436_v4, %v273_v62  ;;  %v456_v7 = vadd.f32 %v455_v5, %v273_v62 }
  0xe0   : > { %v517_v12 = vpack.c.bf16 %v505_v9, %v504_v8 }
  0xe1   : > { %v506_v10 = vmax.f32 %v437_v6, 0.0  ;;  %v507_v11 = vmax.f32 %v456_v7, 0.0  ;;  %v554_v37 = vld [vmem:[%s991_s24 + $0x8] sm:$0xff] (%p864_p5) }
  0xe2   : > { %525 = vst [vmem:[%s991_s24 + $0x18] sm:$0xff] %v517_v12 }
  0xe3   : > { %v518_v13 = vpack.c.bf16 %v507_v11, %v506_v10  ;;  %v474_v15 = vpop.f32.mrf.mxu2  ;;  %v493_v16 = vpop.f32.mrf.mxu3  ;;  %555 = vst [vmem:[%s539_s27 + $0x8] sm:$0xff] (%p864_p5), %v554_v37 }
  0xe4   : > { %v475_v17 = vadd.f32 %v474_v15, %v273_v62  ;;  %v494_v18 = vadd.f32 %v493_v16, %v273_v62  ;;  %v556_v38 = vld [vmem:[%s991_s24 + $0x10] sm:$0xff] (%p864_p5) }
  0xe5   : > { %526 = vst [vmem:[%s991_s24 + $0x20] sm:$0xff] %v518_v13 }
  0xe6   : > { %v438_v19 = vpop.f32.mrf.mxu0  ;;  %v457_v20 = vpop.f32.mrf.mxu1  ;;  %v508_v23 = vmax.f32 %v475_v17, 0.0  ;;  %v509_v24 = vmax.f32 %v494_v18, 0.0  ;;  %557 = vst [vmem:[%s539_s27 + $0x20] sm:$0xff] (%p864_p5), %v556_v38 }
  0xe7   : > { %v439_v21 = vadd.f32 %v438_v19, %v278_v14  ;;  %v458_v22 = vadd.f32 %v457_v20, %v278_v14 }
  0xe8   : > { %v519_v27 = vpack.c.bf16 %v509_v24, %v508_v23 }
  0xe9   : > { %v510_v25 = vmax.f32 %v439_v21, 0.0  ;;  %v511_v26 = vmax.f32 %v458_v22, 0.0  ;;  %v558_v39 = vld [vmem:[%s991_s24 + $0x18] sm:$0xff] (%p864_p5) }
  0xea   : > { %527 = vst [vmem:[%s991_s24 + $0x28] sm:$0xff] %v519_v27 }
  0xeb   : > { %v520_v28 = vpack.c.bf16 %v511_v26, %v510_v25  ;;  %v476_v29 = vpop.f32.mrf.mxu2  ;;  %v495_v30 = vpop.f32.mrf.mxu3  ;;  %559 = vst [vmem:[%s539_s27 + $0x28] sm:$0xff] (%p864_p5), %v558_v39 }
  0xec   : > { %v477_v31 = vadd.f32 %v476_v29, %v278_v14  ;;  %v496_v32 = vadd.f32 %v495_v30, %v278_v14  ;;  %v560_v40 = vld [vmem:[%s991_s24 + $0x20] sm:$0xff] (%p864_p5) }
  0xed   : > { %528 = vst [vmem:[%s991_s24 + $0x30] sm:$0xff] %v520_v28 }
  0xee   : > { %v512_v33 = vmax.f32 %v477_v31, 0.0  ;;  %v513_v34 = vmax.f32 %v496_v32, 0.0  ;;  %536 = sbr.rel (!%p864_p5) target bundleno = 251 (0xfb), region = 59  ;;  %561 = vst [vmem:[%s539_s27 + $0x40] sm:$0xff] (%p864_p5), %v560_v40 }
  0xf0   : > { %v521_v35 = vpack.c.bf16 %v513_v34, %v512_v33 }
  0xf1   : > { %v562_v41 = vld [vmem:[%s991_s24 + $0x28] sm:$0xff] (%p864_p5) }
  0xf2   : > { %529 = vst [vmem:[%s991_s24 + $0x38] sm:$0xff] %v521_v35 }
  0xf3   : > { %563 = vst [vmem:[%s539_s27 + $0x48] sm:$0xff] %v562_v41 }
  0xf4   : > { %v564_v42 = vld [vmem:[%s991_s24 + $0x30] sm:$0xff] }
  0xf5   : > { %565 = vst [vmem:[%s539_s27 + $0x60] sm:$0xff] %v564_v42 }
  0xf9   : > { %v566_v43 = vld [vmem:[%s991_s24 + $0x38] sm:$0xff] }
  0xfa   : > { %567 = vst [vmem:[%s539_s27 + $0x68] sm:$0xff] %v566_v43 }
  0xfb PF: > { %p10_p10 = scmp.ge.s32.totalorder %s851_s16, 4   ;;  %s1031_s12 = smov %s807_s13 }
  0xfc   : > { %s1032_s13 = smov %s862_s19  ;;  %s1033_s14 = smov %s851_s16 }
  0xfd   :  { %12 = sbr.rel (!%p10_p10) target bundleno = 2 (0x2), region = 113 }

// kernel: hybrid_cfd_forward.4
= control target key start
LH: loop header
LB: loop body
LE: loop exit
PB: predicated region body
PF: predicated region fallthrough
CT: control target
= control target key end

     0   :  { %s4462_s12 = smov 0   ;;  %s4464_s13 = smov 0   ;;  %s6106_s0 = inlined_call_operand.vmem [shape: bf16[864,1024], index: 0, kind: input, shape index: {}]   ;;  %s6107_s1 = inlined_call_operand.vmem [shape: bf16[64,864], index: 1, kind: input, shape index: {}]   ;;  %s6108_s2 = inlined_call_operand.vmem [shape: f32[64,1], index: 2, kind: input, shape index: {}]   ;;  %s6109_s3 = inlined_call_operand.vmem [shape: bf16[64,1024], index: 3, kind: output, shape index: {}]  }
   0x1   :  { %s4466_s14 = smov 0  }
   0x2 LB: > { %s3136_s15 = sadd.s32 4294967295, %s4439_s14   ;;  %s4479_s16 = sadd.s32 1, %s4439_s14   ;;  %s4439_s14 = sphi %s4466_s14, %s6201_s14   ;;  %s4435_s13 = sphi %s4464_s13, %s6200_s13   ;;  %s4431_s12 = sphi %s4462_s12, %s6199_s12  }
   0x3   : > { %s17_s17 = ssub.s32 %s4439_s14, %s4479_s16  ;;  %s20_s18 = sadd.s32 1, %s4435_s13 }
   0x4   : > { %p18_p0 = scmp.eq.s32.totalorder %s17_s17, 0  ;;  %p27_p1 = scmp.ne.s32.totalorder %s4435_s13, %s4431_s12 }
   0x5   : > { %p28_p2 = scmp.eq.s32.totalorder %s4439_s14, 0  ;;  %p99_p3 = scmp.eq.s32.totalorder %s3136_s15, 1 }
   0x6   : > { %s4490_s19 = scalar_select %p18_p0, %s4435_s13, %s20_s18  }
   0x7   : > { %p29_p4 = por %p28_p2, %p27_p1  ;;  %p4492_p5 = por %p99_p3, %p27_p1 }
   0x8   : > { %p3139_p6 = scmp.ge.s32.totalorder %s4439_s14, 2 }
   0xa   : > { %127 = sbr.rel (%p3139_p6) target bundleno = 235 (0xeb), region = 24 }
   0xf   : > { %130 = sbr.rel (!%p29_p4) target bundleno = 235 (0xeb), region = 28  ;;  %s132_s21 = sand.u32 (%p29_p4), 1, %s4435_s13  }
  0x10   : > { %s4141_s22 = sshll.u32 (%p29_p4), %s4439_s14, 4  ;;  %s4387_s23 = smul.u32 (%p29_p4), 1728, %s132_s21 }
  0x11   : > { %s4502_s26 = scalar_lea.vmem (%p29_p4), %s6106_s0, %s4141_s22 }
  0x12   : > { %v150_v0 = vld [vmem:[%s4502_s26] sm:$0xff] (%p29_p4)  ;;  %v152_v1 = vld [vmem:[%s4502_s26 + $0x8] sm:$0xff] (%p29_p4)  ;;  %s4507_s27 = scalar_lea.vmem (%p29_p4), [#allocation2], %s4387_s23 }
  0x13   : > { %v154_v2 = vld [vmem:[%s4502_s26 + $0x20] sm:$0xff] (%p29_p4)  ;;  %151 = vst [vmem:[%s4507_s27] sm:$0xff] (%p29_p4), %v150_v0  ;;  %v156_v3 = vld [vmem:[%s4502_s26 + $0x28] sm:$0xff] (%p29_p4) }
  0x14   : > { %153 = vst [vmem:[%s4507_s27 + $0x8] sm:$0xff] %v152_v1  ;;  %v158_v4 = vld [vmem:[%s4502_s26 + $0x40] sm:$0xff]  ;;  %v160_v5 = vld [vmem:[%s4502_s26 + $0x48] sm:$0xff] }
  0x15   : > { %155 = vst [vmem:[%s4507_s27 + $0x10] sm:$0xff] %v154_v2  ;;  %v162_v6 = vld [vmem:[%s4502_s26 + $0x60] sm:$0xff]  ;;  %v164_v7 = vld [vmem:[%s4502_s26 + $0x68] sm:$0xff] }
  0x16   : > { %157 = vst [vmem:[%s4507_s27 + $0x18] sm:$0xff] %v156_v3  ;;  %v166_v8 = vld [vmem:[%s4502_s26 + $0x80] sm:$0xff]  ;;  %v168_v9 = vld [vmem:[%s4502_s26 + $0x88] sm:$0xff] }
  0x17   : > { %159 = vst [vmem:[%s4507_s27 + $0x20] sm:$0xff] %v158_v4  ;;  %v170_v10 = vld [vmem:[%s4502_s26 + $0xa0] sm:$0xff]  ;;  %v172_v11 = vld [vmem:[%s4502_s26 + $0xa8] sm:$0xff] }
  0x18   : > { %161 = vst [vmem:[%s4507_s27 + $0x28] sm:$0xff] %v160_v5  ;;  %v174_v12 = vld [vmem:[%s4502_s26 + $0xc0] sm:$0xff]  ;;  %v176_v13 = vld [vmem:[%s4502_s26 + $0xc8] sm:$0xff] }
  0x19   : > { %163 = vst [vmem:[%s4507_s27 + $0x30] sm:$0xff] %v162_v6  ;;  %v178_v14 = vld [vmem:[%s4502_s26 + $0xe0] sm:$0xff]  ;;  %v180_v15 = vld [vmem:[%s4502_s26 + $0xe8] sm:$0xff] }
  0x1a   : > { %165 = vst [vmem:[%s4507_s27 + $0x38] sm:$0xff] %v164_v7  ;;  %v182_v16 = vld [vmem:[%s4502_s26 + $0x100] sm:$0xff]  ;;  %v184_v17 = vld [vmem:[%s4502_s26 + $0x108] sm:$0xff] }
  0x1b   : > { %167 = vst [vmem:[%s4507_s27 + $0x40] sm:$0xff] %v166_v8  ;;  %v186_v18 = vld [vmem:[%s4502_s26 + $0x120] sm:$0xff]  ;;  %v188_v19 = vld [vmem:[%s4502_s26 + $0x128] sm:$0xff] }
  0x1c   : > { %169 = vst [vmem:[%s4507_s27 + $0x48] sm:$0xff] %v168_v9  ;;  %v190_v20 = vld [vmem:[%s4502_s26 + $0x140] sm:$0xff]  ;;  %v192_v21 = vld [vmem:[%s4502_s26 + $0x148] sm:$0xff] }
  0x1d   : > { %171 = vst [vmem:[%s4507_s27 + $0x50] sm:$0xff] %v170_v10  ;;  %v194_v22 = vld [vmem:[%s4502_s26 + $0x160] sm:$0xff]  ;;  %v196_v23 = vld [vmem:[%s4502_s26 + $0x168] sm:$0xff] }
  0x1e   : > { %173 = vst [vmem:[%s4507_s27 + $0x58] sm:$0xff] %v172_v11  ;;  %v198_v24 = vld [vmem:[%s4502_s26 + $0x180] sm:$0xff]  ;;  %v200_v25 = vld [vmem:[%s4502_s26 + $0x188] sm:$0xff] }
  0x1f   : > { %175 = vst [vmem:[%s4507_s27 + $0x60] sm:$0xff] %v174_v12  ;;  %v202_v26 = vld [vmem:[%s4502_s26 + $0x1a0] sm:$0xff]  ;;  %v204_v27 = vld [vmem:[%s4502_s26 + $0x1a8] sm:$0xff] }
  0x20   : > { %177 = vst [vmem:[%s4507_s27 + $0x68] sm:$0xff] %v176_v13  ;;  %v206_v28 = vld [vmem:[%s4502_s26 + $0x1c0] sm:$0xff]  ;;  %v208_v29 = vld [vmem:[%s4502_s26 + $0x1c8] sm:$0xff] }
  0x21   : > { %179 = vst [vmem:[%s4507_s27 + $0x70] sm:$0xff] %v178_v14  ;;  %v210_v30 = vld [vmem:[%s4502_s26 + $0x1e0] sm:$0xff]  ;;  %v212_v31 = vld [vmem:[%s4502_s26 + $0x1e8] sm:$0xff] }
  0x22   : > { %181 = vst [vmem:[%s4507_s27 + $0x78] sm:$0xff] %v180_v15  ;;  %v214_v32 = vld [vmem:[%s4502_s26 + $0x200] sm:$0xff]  ;;  %v216_v33 = vld [vmem:[%s4502_s26 + $0x208] sm:$0xff] }
  0x23   : > { %183 = vst [vmem:[%s4507_s27 + $0x80] sm:$0xff] %v182_v16  ;;  %v218_v34 = vld [vmem:[%s4502_s26 + $0x220] sm:$0xff]  ;;  %v220_v35 = vld [vmem:[%s4502_s26 + $0x228] sm:$0xff] }
  0x24   : > { %185 = vst [vmem:[%s4507_s27 + $0x88] sm:$0xff] %v184_v17  ;;  %v222_v36 = vld [vmem:[%s4502_s26 + $0x240] sm:$0xff]  ;;  %v224_v37 = vld [vmem:[%s4502_s26 + $0x248] sm:$0xff] }
  0x25   : > { %187 = vst [vmem:[%s4507_s27 + $0x90] sm:$0xff] %v186_v18  ;;  %v226_v38 = vld [vmem:[%s4502_s26 + $0x260] sm:$0xff]  ;;  %v228_v39 = vld [vmem:[%s4502_s26 + $0x268] sm:$0xff] }
  0x26   : > { %189 = vst [vmem:[%s4507_s27 + $0x98] sm:$0xff] %v188_v19  ;;  %v230_v40 = vld [vmem:[%s4502_s26 + $0x280] sm:$0xff]  ;;  %v232_v41 = vld [vmem:[%s4502_s26 + $0x288] sm:$0xff] }
  0x27   : > { %191 = vst [vmem:[%s4507_s27 + $0xa0] sm:$0xff] %v190_v20  ;;  %v234_v42 = vld [vmem:[%s4502_s26 + $0x2a0] sm:$0xff]  ;;  %v236_v43 = vld [vmem:[%s4502_s26 + $0x2a8] sm:$0xff] }
  0x28   : > { %193 = vst [vmem:[%s4507_s27 + $0xa8] sm:$0xff] %v192_v21  ;;  %v238_v44 = vld [vmem:[%s4502_s26 + $0x2c0] sm:$0xff]  ;;  %v240_v45 = vld [vmem:[%s4502_s26 + $0x2c8] sm:$0xff] }
  0x29   : > { %195 = vst [vmem:[%s4507_s27 + $0xb0] sm:$0xff] %v194_v22  ;;  %v242_v46 = vld [vmem:[%s4502_s26 + $0x2e0] sm:$0xff]  ;;  %v244_v47 = vld [vmem:[%s4502_s26 + $0x2e8] sm:$0xff] }
  0x2a   : > { %197 = vst [vmem:[%s4507_s27 + $0xb8] sm:$0xff] %v196_v23  ;;  %v246_v48 = vld [vmem:[%s4502_s26 + $0x300] sm:$0xff]  ;;  %v248_v49 = vld [vmem:[%s4502_s26 + $0x308] sm:$0xff] }
  0x2b   : > { %199 = vst [vmem:[%s4507_s27 + $0xc0] sm:$0xff] %v198_v24  ;;  %v250_v50 = vld [vmem:[%s4502_s26 + $0x320] sm:$0xff]  ;;  %v252_v51 = vld [vmem:[%s4502_s26 + $0x328] sm:$0xff] }
  0x2c   : > { %201 = vst [vmem:[%s4507_s27 + $0xc8] sm:$0xff] %v200_v25  ;;  %v254_v52 = vld [vmem:[%s4502_s26 + $0x340] sm:$0xff]  ;;  %v256_v53 = vld [vmem:[%s4502_s26 + $0x348] sm:$0xff] }
  0x2d   : > { %203 = vst [vmem:[%s4507_s27 + $0xd0] sm:$0xff] %v202_v26  ;;  %v258_v54 = vld [vmem:[%s4502_s26 + $0x360] sm:$0xff]  ;;  %v260_v55 = vld [vmem:[%s4502_s26 + $0x368] sm:$0xff] }
  0x2e   : > { %205 = vst [vmem:[%s4507_s27 + $0xd8] sm:$0xff] %v204_v27  ;;  %v262_v56 = vld [vmem:[%s4502_s26 + $0x380] sm:$0xff]  ;;  %v264_v57 = vld [vmem:[%s4502_s26 + $0x388] sm:$0xff] }
  0x2f   : > { %207 = vst [vmem:[%s4507_s27 + $0xe0] sm:$0xff] %v206_v28  ;;  %v266_v58 = vld [vmem:[%s4502_s26 + $0x3a0] sm:$0xff]  ;;  %v268_v59 = vld [vmem:[%s4502_s26 + $0x3a8] sm:$0xff] }
  0x30   : > { %209 = vst [vmem:[%s4507_s27 + $0xe8] sm:$0xff] %v208_v29  ;;  %v270_v60 = vld [vmem:[%s4502_s26 + $0x3c0] sm:$0xff]  ;;  %v272_v61 = vld [vmem:[%s4502_s26 + $0x3c8] sm:$0xff] }
  0x31   : > { %211 = vst [vmem:[%s4507_s27 + $0xf0] sm:$0xff] %v210_v30  ;;  %v274_v62 = vld [vmem:[%s4502_s26 + $0x3e0] sm:$0xff]  ;;  %v276_v63 = vld [vmem:[%s4502_s26 + $0x3e8] sm:$0xff] }
  0x32   : > { %213 = vst [vmem:[%s4507_s27 + $0xf8] sm:$0xff] %v212_v31  ;;  %v278_v0 = vld [vmem:[%s4502_s26 + $0x400] sm:$0xff]  ;;  %v280_v1 = vld [vmem:[%s4502_s26 + $0x408] sm:$0xff] }
  0x33   : > { %215 = vst [vmem:[%s4507_s27 + $0x100] sm:$0xff] %v214_v32  ;;  %v282_v2 = vld [vmem:[%s4502_s26 + $0x420] sm:$0xff]  ;;  %v284_v3 = vld [vmem:[%s4502_s26 + $0x428] sm:$0xff] }
  0x34   : > { %217 = vst [vmem:[%s4507_s27 + $0x108] sm:$0xff] %v216_v33  ;;  %v286_v4 = vld [vmem:[%s4502_s26 + $0x440] sm:$0xff]  ;;  %v288_v5 = vld [vmem:[%s4502_s26 + $0x448] sm:$0xff] }
  0x35   : > { %219 = vst [vmem:[%s4507_s27 + $0x110] sm:$0xff] %v218_v34  ;;  %v290_v6 = vld [vmem:[%s4502_s26 + $0x460] sm:$0xff]  ;;  %v292_v7 = vld [vmem:[%s4502_s26 + $0x468] sm:$0xff] }
  0x36   : > { %221 = vst [vmem:[%s4507_s27 + $0x118] sm:$0xff] %v220_v35  ;;  %v294_v8 = vld [vmem:[%s4502_s26 + $0x480] sm:$0xff]  ;;  %v296_v9 = vld [vmem:[%s4502_s26 + $0x488] sm:$0xff] }
  0x37   : > { %223 = vst [vmem:[%s4507_s27 + $0x120] sm:$0xff] %v222_v36  ;;  %v298_v10 = vld [vmem:[%s4502_s26 + $0x4a0] sm:$0xff]  ;;  %v300_v11 = vld [vmem:[%s4502_s26 + $0x4a8] sm:$0xff] }
  0x38   : > { %225 = vst [vmem:[%s4507_s27 + $0x128] sm:$0xff] %v224_v37  ;;  %v302_v12 = vld [vmem:[%s4502_s26 + $0x4c0] sm:$0xff]  ;;  %v304_v13 = vld [vmem:[%s4502_s26 + $0x4c8] sm:$0xff] }
  0x39   : > { %227 = vst [vmem:[%s4507_s27 + $0x130] sm:$0xff] %v226_v38  ;;  %v306_v14 = vld [vmem:[%s4502_s26 + $0x4e0] sm:$0xff]  ;;  %v308_v15 = vld [vmem:[%s4502_s26 + $0x4e8] sm:$0xff] }
  0x3a   : > { %229 = vst [vmem:[%s4507_s27 + $0x138] sm:$0xff] %v228_v39  ;;  %v310_v16 = vld [vmem:[%s4502_s26 + $0x500] sm:$0xff]  ;;  %v312_v17 = vld [vmem:[%s4502_s26 + $0x508] sm:$0xff] }
  0x3b   : > { %231 = vst [vmem:[%s4507_s27 + $0x140] sm:$0xff] %v230_v40  ;;  %v314_v18 = vld [vmem:[%s4502_s26 + $0x520] sm:$0xff]  ;;  %v316_v19 = vld [vmem:[%s4502_s26 + $0x528] sm:$0xff] }
  0x3c   : > { %233 = vst [vmem:[%s4507_s27 + $0x148] sm:$0xff] %v232_v41  ;;  %v318_v20 = vld [vmem:[%s4502_s26 + $0x540] sm:$0xff]  ;;  %v320_v21 = vld [vmem:[%s4502_s26 + $0x548] sm:$0xff] }
  0x3d   : > { %235 = vst [vmem:[%s4507_s27 + $0x150] sm:$0xff] %v234_v42  ;;  %v322_v22 = vld [vmem:[%s4502_s26 + $0x560] sm:$0xff]  ;;  %v324_v23 = vld [vmem:[%s4502_s26 + $0x568] sm:$0xff] }
  0x3e   : > { %237 = vst [vmem:[%s4507_s27 + $0x158] sm:$0xff] %v236_v43  ;;  %v326_v24 = vld [vmem:[%s4502_s26 + $0x580] sm:$0xff]  ;;  %v328_v25 = vld [vmem:[%s4502_s26 + $0x588] sm:$0xff] }
  0x3f   : > { %239 = vst [vmem:[%s4507_s27 + $0x160] sm:$0xff] %v238_v44  ;;  %v330_v26 = vld [vmem:[%s4502_s26 + $0x5a0] sm:$0xff]  ;;  %v332_v27 = vld [vmem:[%s4502_s26 + $0x5a8] sm:$0xff] }
  0x40   : > { %241 = vst [vmem:[%s4507_s27 + $0x168] sm:$0xff] %v240_v45  ;;  %v334_v28 = vld [vmem:[%s4502_s26 + $0x5c0] sm:$0xff]  ;;  %v336_v29 = vld [vmem:[%s4502_s26 + $0x5c8] sm:$0xff] }
  0x41   : > { %243 = vst [vmem:[%s4507_s27 + $0x170] sm:$0xff] %v242_v46  ;;  %v338_v30 = vld [vmem:[%s4502_s26 + $0x5e0] sm:$0xff]  ;;  %v340_v31 = vld [vmem:[%s4502_s26 + $0x5e8] sm:$0xff] }
  0x42   : > { %245 = vst [vmem:[%s4507_s27 + $0x178] sm:$0xff] %v244_v47  ;;  %v342_v32 = vld [vmem:[%s4502_s26 + $0x600] sm:$0xff]  ;;  %v344_v33 = vld [vmem:[%s4502_s26 + $0x608] sm:$0xff] }
  0x43   : > { %247 = vst [vmem:[%s4507_s27 + $0x180] sm:$0xff] %v246_v48  ;;  %v346_v34 = vld [vmem:[%s4502_s26 + $0x620] sm:$0xff]  ;;  %v348_v35 = vld [vmem:[%s4502_s26 + $0x628] sm:$0xff] }
  0x44   : > { %249 = vst [vmem:[%s4507_s27 + $0x188] sm:$0xff] %v248_v49  ;;  %v350_v36 = vld [vmem:[%s4502_s26 + $0x640] sm:$0xff]  ;;  %v352_v37 = vld [vmem:[%s4502_s26 + $0x648] sm:$0xff] }
  0x45   : > { %251 = vst [vmem:[%s4507_s27 + $0x190] sm:$0xff] %v250_v50  ;;  %v354_v38 = vld [vmem:[%s4502_s26 + $0x660] sm:$0xff]  ;;  %v356_v39 = vld [vmem:[%s4502_s26 + $0x668] sm:$0xff] }
  0x46   : > { %253 = vst [vmem:[%s4507_s27 + $0x198] sm:$0xff] %v252_v51  ;;  %v358_v40 = vld [vmem:[%s4502_s26 + $0x680] sm:$0xff]  ;;  %v360_v41 = vld [vmem:[%s4502_s26 + $0x688] sm:$0xff] }
  0x47   : > { %255 = vst [vmem:[%s4507_s27 + $0x1a0] sm:$0xff] %v254_v52  ;;  %v362_v42 = vld [vmem:[%s4502_s26 + $0x6a0] sm:$0xff]  ;;  %v364_v43 = vld [vmem:[%s4502_s26 + $0x6a8] sm:$0xff] }
  0x48   : > { %257 = vst [vmem:[%s4507_s27 + $0x1a8] sm:$0xff] %v256_v53  ;;  %v366_v44 = vld [vmem:[%s4502_s26 + $0x6c0] sm:$0xff]  ;;  %v368_v45 = vld [vmem:[%s4502_s26 + $0x6c8] sm:$0xff] }
  0x49   : > { %259 = vst [vmem:[%s4507_s27 + $0x1b0] sm:$0xff] %v258_v54  ;;  %v370_v46 = vld [vmem:[%s4502_s26 + $0x6e0] sm:$0xff]  ;;  %v372_v47 = vld [vmem:[%s4502_s26 + $0x6e8] sm:$0xff] }
  0x4a   : > { %261 = vst [vmem:[%s4507_s27 + $0x1b8] sm:$0xff] %v260_v55  ;;  %v374_v48 = vld [vmem:[%s4502_s26 + $0x700] sm:$0xff]  ;;  %v376_v49 = vld [vmem:[%s4502_s26 + $0x708] sm:$0xff] }
  0x4b   : > { %263 = vst [vmem:[%s4507_s27 + $0x1c0] sm:$0xff] %v262_v56  ;;  %v378_v50 = vld [vmem:[%s4502_s26 + $0x720] sm:$0xff]  ;;  %v380_v51 = vld [vmem:[%s4502_s26 + $0x728] sm:$0xff] }
  0x4c   : > { %265 = vst [vmem:[%s4507_s27 + $0x1c8] sm:$0xff] %v264_v57  ;;  %v382_v52 = vld [vmem:[%s4502_s26 + $0x740] sm:$0xff]  ;;  %v384_v53 = vld [vmem:[%s4502_s26 + $0x748] sm:$0xff] }
  0x4d   : > { %267 = vst [vmem:[%s4507_s27 + $0x1d0] sm:$0xff] %v266_v58  ;;  %v386_v54 = vld [vmem:[%s4502_s26 + $0x760] sm:$0xff]  ;;  %v388_v55 = vld [vmem:[%s4502_s26 + $0x768] sm:$0xff] }
  0x4e   : > { %269 = vst [vmem:[%s4507_s27 + $0x1d8] sm:$0xff] %v268_v59  ;;  %v390_v56 = vld [vmem:[%s4502_s26 + $0x780] sm:$0xff]  ;;  %v392_v57 = vld [vmem:[%s4502_s26 + $0x788] sm:$0xff] }
  0x4f   : > { %271 = vst [vmem:[%s4507_s27 + $0x1e0] sm:$0xff] %v270_v60  ;;  %v394_v58 = vld [vmem:[%s4502_s26 + $0x7a0] sm:$0xff]  ;;  %v396_v59 = vld [vmem:[%s4502_s26 + $0x7a8] sm:$0xff] }
  0x50   : > { %273 = vst [vmem:[%s4507_s27 + $0x1e8] sm:$0xff] %v272_v61  ;;  %v398_v60 = vld [vmem:[%s4502_s26 + $0x7c0] sm:$0xff]  ;;  %v400_v61 = vld [vmem:[%s4502_s26 + $0x7c8] sm:$0xff] }
  0x51   : > { %275 = vst [vmem:[%s4507_s27 + $0x1f0] sm:$0xff] %v274_v62  ;;  %v402_v62 = vld [vmem:[%s4502_s26 + $0x7e0] sm:$0xff] }
  0x52   : > { %277 = vst [vmem:[%s4507_s27 + $0x1f8] sm:$0xff] %v276_v63  ;;  %v404_v63 = vld [vmem:[%s4502_s26 + $0x7e8] sm:$0xff] }
  0x53   : > { %279 = vst [vmem:[%s4507_s27 + $0x200] sm:$0xff] %v278_v0  ;;  %v406_v0 = vld [vmem:[%s4502_s26 + $0x800] sm:$0xff] }
  0x54   : > { %281 = vst [vmem:[%s4507_s27 + $0x208] sm:$0xff] %v280_v1  ;;  %v408_v1 = vld [vmem:[%s4502_s26 + $0x808] sm:$0xff] }
  0x55   : > { %283 = vst [vmem:[%s4507_s27 + $0x210] sm:$0xff] %v282_v2  ;;  %v410_v2 = vld [vmem:[%s4502_s26 + $0x820] sm:$0xff] }
  0x56   : > { %285 = vst [vmem:[%s4507_s27 + $0x218] sm:$0xff] %v284_v3  ;;  %v412_v3 = vld [vmem:[%s4502_s26 + $0x828] sm:$0xff] }
  0x57   : > { %287 = vst [vmem:[%s4507_s27 + $0x220] sm:$0xff] %v286_v4  ;;  %v414_v4 = vld [vmem:[%s4502_s26 + $0x840] sm:$0xff] }
  0x58   : > { %289 = vst [vmem:[%s4507_s27 + $0x228] sm:$0xff] %v288_v5  ;;  %v416_v5 = vld [vmem:[%s4502_s26 + $0x848] sm:$0xff] }
  0x59   : > { %291 = vst [vmem:[%s4507_s27 + $0x230] sm:$0xff] %v290_v6  ;;  %v418_v6 = vld [vmem:[%s4502_s26 + $0x860] sm:$0xff] }
  0x5a   : > { %293 = vst [vmem:[%s4507_s27 + $0x238] sm:$0xff] %v292_v7  ;;  %v420_v7 = vld [vmem:[%s4502_s26 + $0x868] sm:$0xff] }
  0x5b   : > { %295 = vst [vmem:[%s4507_s27 + $0x240] sm:$0xff] %v294_v8  ;;  %v422_v8 = vld [vmem:[%s4502_s26 + $0x880] sm:$0xff] }
  0x5c   : > { %297 = vst [vmem:[%s4507_s27 + $0x248] sm:$0xff] %v296_v9  ;;  %v424_v9 = vld [vmem:[%s4502_s26 + $0x888] sm:$0xff] }
  0x5d   : > { %299 = vst [vmem:[%s4507_s27 + $0x250] sm:$0xff] %v298_v10  ;;  %v426_v10 = vld [vmem:[%s4502_s26 + $0x8a0] sm:$0xff] }
  0x5e   : > { %301 = vst [vmem:[%s4507_s27 + $0x258] sm:$0xff] %v300_v11  ;;  %v428_v11 = vld [vmem:[%s4502_s26 + $0x8a8] sm:$0xff] }
  0x5f   : > { %303 = vst [vmem:[%s4507_s27 + $0x260] sm:$0xff] %v302_v12  ;;  %v430_v12 = vld [vmem:[%s4502_s26 + $0x8c0] sm:$0xff] }
  0x60   : > { %305 = vst [vmem:[%s4507_s27 + $0x268] sm:$0xff] %v304_v13  ;;  %v432_v13 = vld [vmem:[%s4502_s26 + $0x8c8] sm:$0xff] }
  0x61   : > { %307 = vst [vmem:[%s4507_s27 + $0x270] sm:$0xff] %v306_v14  ;;  %v434_v14 = vld [vmem:[%s4502_s26 + $0x8e0] sm:$0xff] }
  0x62   : > { %309 = vst [vmem:[%s4507_s27 + $0x278] sm:$0xff] %v308_v15  ;;  %v436_v15 = vld [vmem:[%s4502_s26 + $0x8e8] sm:$0xff] }
  0x63   : > { %311 = vst [vmem:[%s4507_s27 + $0x280] sm:$0xff] %v310_v16  ;;  %v438_v16 = vld [vmem:[%s4502_s26 + $0x900] sm:$0xff] }
  0x64   : > { %313 = vst [vmem:[%s4507_s27 + $0x288] sm:$0xff] %v312_v17  ;;  %v440_v17 = vld [vmem:[%s4502_s26 + $0x908] sm:$0xff] }
  0x65   : > { %315 = vst [vmem:[%s4507_s27 + $0x290] sm:$0xff] %v314_v18  ;;  %v442_v18 = vld [vmem:[%s4502_s26 + $0x920] sm:$0xff] }
  0x66   : > { %317 = vst [vmem:[%s4507_s27 + $0x298] sm:$0xff] %v316_v19  ;;  %v444_v19 = vld [vmem:[%s4502_s26 + $0x928] sm:$0xff] }
  0x67   : > { %319 = vst [vmem:[%s4507_s27 + $0x2a0] sm:$0xff] %v318_v20  ;;  %v446_v20 = vld [vmem:[%s4502_s26 + $0x940] sm:$0xff] }
  0x68   : > { %321 = vst [vmem:[%s4507_s27 + $0x2a8] sm:$0xff] %v320_v21  ;;  %v448_v21 = vld [vmem:[%s4502_s26 + $0x948] sm:$0xff] }
  0x69   : > { %323 = vst [vmem:[%s4507_s27 + $0x2b0] sm:$0xff] %v322_v22  ;;  %v450_v22 = vld [vmem:[%s4502_s26 + $0x960] sm:$0xff] }
  0x6a   : > { %325 = vst [vmem:[%s4507_s27 + $0x2b8] sm:$0xff] %v324_v23  ;;  %v452_v23 = vld [vmem:[%s4502_s26 + $0x968] sm:$0xff] }
  0x6b   : > { %327 = vst [vmem:[%s4507_s27 + $0x2c0] sm:$0xff] %v326_v24  ;;  %v454_v24 = vld [vmem:[%s4502_s26 + $0x980] sm:$0xff] }
  0x6c   : > { %329 = vst [vmem:[%s4507_s27 + $0x2c8] sm:$0xff] %v328_v25  ;;  %v456_v25 = vld [vmem:[%s4502_s26 + $0x988] sm:$0xff] }
  0x6d   : > { %331 = vst [vmem:[%s4507_s27 + $0x2d0] sm:$0xff] %v330_v26  ;;  %v458_v26 = vld [vmem:[%s4502_s26 + $0x9a0] sm:$0xff] }
  0x6e   : > { %333 = vst [vmem:[%s4507_s27 + $0x2d8] sm:$0xff] %v332_v27  ;;  %v460_v27 = vld [vmem:[%s4502_s26 + $0x9a8] sm:$0xff] }
  0x6f   : > { %335 = vst [vmem:[%s4507_s27 + $0x2e0] sm:$0xff] %v334_v28  ;;  %v462_v28 = vld [vmem:[%s4502_s26 + $0x9c0] sm:$0xff] }
  0x70   : > { %337 = vst [vmem:[%s4507_s27 + $0x2e8] sm:$0xff] %v336_v29  ;;  %v464_v29 = vld [vmem:[%s4502_s26 + $0x9c8] sm:$0xff] }
  0x71   : > { %339 = vst [vmem:[%s4507_s27 + $0x2f0] sm:$0xff] %v338_v30  ;;  %v466_v30 = vld [vmem:[%s4502_s26 + $0x9e0] sm:$0xff] }
  0x72   : > { %341 = vst [vmem:[%s4507_s27 + $0x2f8] sm:$0xff] %v340_v31  ;;  %v468_v31 = vld [vmem:[%s4502_s26 + $0x9e8] sm:$0xff] }
  0x73   : > { %343 = vst [vmem:[%s4507_s27 + $0x300] sm:$0xff] %v342_v32  ;;  %v470_v32 = vld [vmem:[%s4502_s26 + $0xa00] sm:$0xff] }
  0x74   : > { %345 = vst [vmem:[%s4507_s27 + $0x308] sm:$0xff] %v344_v33  ;;  %v472_v33 = vld [vmem:[%s4502_s26 + $0xa08] sm:$0xff] }
  0x75   : > { %347 = vst [vmem:[%s4507_s27 + $0x310] sm:$0xff] %v346_v34  ;;  %v474_v34 = vld [vmem:[%s4502_s26 + $0xa20] sm:$0xff] }
  0x76   : > { %349 = vst [vmem:[%s4507_s27 + $0x318] sm:$0xff] %v348_v35  ;;  %v476_v35 = vld [vmem:[%s4502_s26 + $0xa28] sm:$0xff] }
  0x77   : > { %351 = vst [vmem:[%s4507_s27 + $0x320] sm:$0xff] %v350_v36  ;;  %v478_v36 = vld [vmem:[%s4502_s26 + $0xa40] sm:$0xff] }
  0x78   : > { %353 = vst [vmem:[%s4507_s27 + $0x328] sm:$0xff] %v352_v37  ;;  %v480_v37 = vld [vmem:[%s4502_s26 + $0xa48] sm:$0xff] }
  0x79   : > { %355 = vst [vmem:[%s4507_s27 + $0x330] sm:$0xff] %v354_v38  ;;  %v482_v38 = vld [vmem:[%s4502_s26 + $0xa60] sm:$0xff] }
  0x7a   : > { %357 = vst [vmem:[%s4507_s27 + $0x338] sm:$0xff] %v356_v39  ;;  %v484_v39 = vld [vmem:[%s4502_s26 + $0xa68] sm:$0xff] }
  0x7b   : > { %359 = vst [vmem:[%s4507_s27 + $0x340] sm:$0xff] %v358_v40  ;;  %v486_v40 = vld [vmem:[%s4502_s26 + $0xa80] sm:$0xff] }
  0x7c   : > { %361 = vst [vmem:[%s4507_s27 + $0x348] sm:$0xff] %v360_v41  ;;  %v488_v41 = vld [vmem:[%s4502_s26 + $0xa88] sm:$0xff] }
  0x7d   : > { %363 = vst [vmem:[%s4507_s27 + $0x350] sm:$0xff] %v362_v42  ;;  %v490_v42 = vld [vmem:[%s4502_s26 + $0xaa0] sm:$0xff] }
  0x7e   : > { %365 = vst [vmem:[%s4507_s27 + $0x358] sm:$0xff] %v364_v43  ;;  %v492_v43 = vld [vmem:[%s4502_s26 + $0xaa8] sm:$0xff] }
  0x7f   : > { %367 = vst [vmem:[%s4507_s27 + $0x360] sm:$0xff] %v366_v44  ;;  %v494_v44 = vld [vmem:[%s4502_s26 + $0xac0] sm:$0xff] }
  0x80   : > { %369 = vst [vmem:[%s4507_s27 + $0x368] sm:$0xff] %v368_v45  ;;  %v496_v45 = vld [vmem:[%s4502_s26 + $0xac8] sm:$0xff] }
  0x81   : > { %371 = vst [vmem:[%s4507_s27 + $0x370] sm:$0xff] %v370_v46  ;;  %v498_v46 = vld [vmem:[%s4502_s26 + $0xae0] sm:$0xff] }
  0x82   : > { %373 = vst [vmem:[%s4507_s27 + $0x378] sm:$0xff] %v372_v47  ;;  %v500_v47 = vld [vmem:[%s4502_s26 + $0xae8] sm:$0xff] }
  0x83   : > { %375 = vst [vmem:[%s4507_s27 + $0x380] sm:$0xff] %v374_v48  ;;  %v502_v48 = vld [vmem:[%s4502_s26 + $0xb00] sm:$0xff] }
  0x84   : > { %377 = vst [vmem:[%s4507_s27 + $0x388] sm:$0xff] %v376_v49  ;;  %v504_v49 = vld [vmem:[%s4502_s26 + $0xb08] sm:$0xff] }
  0x85   : > { %379 = vst [vmem:[%s4507_s27 + $0x390] sm:$0xff] %v378_v50  ;;  %v506_v50 = vld [vmem:[%s4502_s26 + $0xb20] sm:$0xff] }
  0x86   : > { %381 = vst [vmem:[%s4507_s27 + $0x398] sm:$0xff] %v380_v51  ;;  %v508_v51 = vld [vmem:[%s4502_s26 + $0xb28] sm:$0xff] }
  0x87   : > { %383 = vst [vmem:[%s4507_s27 + $0x3a0] sm:$0xff] %v382_v52  ;;  %v510_v52 = vld [vmem:[%s4502_s26 + $0xb40] sm:$0xff] }
  0x88   : > { %385 = vst [vmem:[%s4507_s27 + $0x3a8] sm:$0xff] %v384_v53  ;;  %v512_v53 = vld [vmem:[%s4502_s26 + $0xb48] sm:$0xff] }
  0x89   : > { %387 = vst [vmem:[%s4507_s27 + $0x3b0] sm:$0xff] %v386_v54  ;;  %v514_v54 = vld [vmem:[%s4502_s26 + $0xb60] sm:$0xff] }
  0x8a   : > { %389 = vst [vmem:[%s4507_s27 + $0x3b8] sm:$0xff] %v388_v55  ;;  %v516_v55 = vld [vmem:[%s4502_s26 + $0xb68] sm:$0xff] }
  0x8b   : > { %391 = vst [vmem:[%s4507_s27 + $0x3c0] sm:$0xff] %v390_v56  ;;  %v518_v56 = vld [vmem:[%s4502_s26 + $0xb80] sm:$0xff] }
  0x8c   : > { %393 = vst [vmem:[%s4507_s27 + $0x3c8] sm:$0xff] %v392_v57  ;;  %v520_v57 = vld [vmem:[%s4502_s26 + $0xb88] sm:$0xff] }
  0x8d   : > { %395 = vst [vmem:[%s4507_s27 + $0x3d0] sm:$0xff] %v394_v58  ;;  %v522_v58 = vld [vmem:[%s4502_s26 + $0xba0] sm:$0xff] }
  0x8e   : > { %397 = vst [vmem:[%s4507_s27 + $0x3d8] sm:$0xff] %v396_v59  ;;  %v524_v59 = vld [vmem:[%s4502_s26 + $0xba8] sm:$0xff] }
  0x8f   : > { %399 = vst [vmem:[%s4507_s27 + $0x3e0] sm:$0xff] %v398_v60  ;;  %v526_v60 = vld [vmem:[%s4502_s26 + $0xbc0] sm:$0xff] }
  0x90   : > { %401 = vst [vmem:[%s4507_s27 + $0x3e8] sm:$0xff] %v400_v61  ;;  %v528_v61 = vld [vmem:[%s4502_s26 + $0xbc8] sm:$0xff] }
  0x91   : > { %403 = vst [vmem:[%s4507_s27 + $0x3f0] sm:$0xff] %v402_v62  ;;  %v530_v62 = vld [vmem:[%s4502_s26 + $0xbe0] sm:$0xff] }
  0x92   : > { %405 = vst [vmem:[%s4507_s27 + $0x3f8] sm:$0xff] %v404_v63  ;;  %v532_v63 = vld [vmem:[%s4502_s26 + $0xbe8] sm:$0xff] }
  0x93   : > { %407 = vst [vmem:[%s4507_s27 + $0x400] sm:$0xff] %v406_v0  ;;  %v534_v0 = vld [vmem:[%s4502_s26 + $0xc00] sm:$0xff] }
  0x94   : > { %409 = vst [vmem:[%s4507_s27 + $0x408] sm:$0xff] %v408_v1  ;;  %v536_v1 = vld [vmem:[%s4502_s26 + $0xc08] sm:$0xff] }
  0x95   : > { %411 = vst [vmem:[%s4507_s27 + $0x410] sm:$0xff] %v410_v2  ;;  %v538_v2 = vld [vmem:[%s4502_s26 + $0xc20] sm:$0xff] }
  0x96   : > { %413 = vst [vmem:[%s4507_s27 + $0x418] sm:$0xff] %v412_v3  ;;  %v540_v3 = vld [vmem:[%s4502_s26 + $0xc28] sm:$0xff] }
  0x97   : > { %415 = vst [vmem:[%s4507_s27 + $0x420] sm:$0xff] %v414_v4  ;;  %v542_v4 = vld [vmem:[%s4502_s26 + $0xc40] sm:$0xff] }
  0x98   : > { %417 = vst [vmem:[%s4507_s27 + $0x428] sm:$0xff] %v416_v5  ;;  %v544_v5 = vld [vmem:[%s4502_s26 + $0xc48] sm:$0xff] }
  0x99   : > { %419 = vst [vmem:[%s4507_s27 + $0x430] sm:$0xff] %v418_v6  ;;  %v546_v6 = vld [vmem:[%s4502_s26 + $0xc60] sm:$0xff] }
  0x9a   : > { %421 = vst [vmem:[%s4507_s27 + $0x438] sm:$0xff] %v420_v7  ;;  %v548_v7 = vld [vmem:[%s4502_s26 + $0xc68] sm:$0xff] }
  0x9b   : > { %423 = vst [vmem:[%s4507_s27 + $0x440] sm:$0xff] %v422_v8  ;;  %v550_v8 = vld [vmem:[%s4502_s26 + $0xc80] sm:$0xff] }
  0x9c   : > { %425 = vst [vmem:[%s4507_s27 + $0x448] sm:$0xff] %v424_v9  ;;  %v552_v9 = vld [vmem:[%s4502_s26 + $0xc88] sm:$0xff] }
  0x9d   : > { %427 = vst [vmem:[%s4507_s27 + $0x450] sm:$0xff] %v426_v10  ;;  %v554_v10 = vld [vmem:[%s4502_s26 + $0xca0] sm:$0xff] }
  0x9e   : > { %429 = vst [vmem:[%s4507_s27 + $0x458] sm:$0xff] %v428_v11  ;;  %v556_v11 = vld [vmem:[%s4502_s26 + $0xca8] sm:$0xff] }
  0x9f   : > { %431 = vst [vmem:[%s4507_s27 + $0x460] sm:$0xff] %v430_v12  ;;  %v558_v12 = vld [vmem:[%s4502_s26 + $0xcc0] sm:$0xff] }
  0xa0   : > { %433 = vst [vmem:[%s4507_s27 + $0x468] sm:$0xff] %v432_v13  ;;  %v560_v13 = vld [vmem:[%s4502_s26 + $0xcc8] sm:$0xff] }
  0xa1   : > { %435 = vst [vmem:[%s4507_s27 + $0x470] sm:$0xff] %v434_v14  ;;  %v562_v14 = vld [vmem:[%s4502_s26 + $0xce0] sm:$0xff] }
  0xa2   : > { %437 = vst [vmem:[%s4507_s27 + $0x478] sm:$0xff] %v436_v15  ;;  %v564_v15 = vld [vmem:[%s4502_s26 + $0xce8] sm:$0xff] }
  0xa3   : > { %439 = vst [vmem:[%s4507_s27 + $0x480] sm:$0xff] %v438_v16  ;;  %v566_v16 = vld [vmem:[%s4502_s26 + $0xd00] sm:$0xff] }
  0xa4   : > { %441 = vst [vmem:[%s4507_s27 + $0x488] sm:$0xff] %v440_v17  ;;  %v568_v17 = vld [vmem:[%s4502_s26 + $0xd08] sm:$0xff] }
  0xa5   : > { %443 = vst [vmem:[%s4507_s27 + $0x490] sm:$0xff] %v442_v18  ;;  %v570_v18 = vld [vmem:[%s4502_s26 + $0xd20] sm:$0xff] }
  0xa6   : > { %445 = vst [vmem:[%s4507_s27 + $0x498] sm:$0xff] %v444_v19  ;;  %v572_v19 = vld [vmem:[%s4502_s26 + $0xd28] sm:$0xff] }
  0xa7   : > { %447 = vst [vmem:[%s4507_s27 + $0x4a0] sm:$0xff] %v446_v20  ;;  %v574_v20 = vld [vmem:[%s4502_s26 + $0xd40] sm:$0xff] }
  0xa8   : > { %449 = vst [vmem:[%s4507_s27 + $0x4a8] sm:$0xff] %v448_v21  ;;  %v576_v21 = vld [vmem:[%s4502_s26 + $0xd48] sm:$0xff] }
  0xa9   : > { %451 = vst [vmem:[%s4507_s27 + $0x4b0] sm:$0xff] %v450_v22  ;;  %v578_v22 = vld [vmem:[%s4502_s26 + $0xd60] sm:$0xff] }
  0xaa   : > { %453 = vst [vmem:[%s4507_s27 + $0x4b8] sm:$0xff] %v452_v23  ;;  %v580_v23 = vld [vmem:[%s4502_s26 + $0xd68] sm:$0xff] }
  0xab   : > { %455 = vst [vmem:[%s4507_s27 + $0x4c0] sm:$0xff] %v454_v24 }
  0xac   : > { %457 = vst [vmem:[%s4507_s27 + $0x4c8] sm:$0xff] %v456_v25 }
  0xad   : > { %459 = vst [vmem:[%s4507_s27 + $0x4d0] sm:$0xff] %v458_v26 }
  0xae   : > { %461 = vst [vmem:[%s4507_s27 + $0x4d8] sm:$0xff] %v460_v27 }
  0xaf   : > { %463 = vst [vmem:[%s4507_s27 + $0x4e0] sm:$0xff] %v462_v28 }
  0xb0   : > { %465 = vst [vmem:[%s4507_s27 + $0x4e8] sm:$0xff] %v464_v29 }
  0xb1   : > { %467 = vst [vmem:[%s4507_s27 + $0x4f0] sm:$0xff] %v466_v30 }
  0xb2   : > { %469 = vst [vmem:[%s4507_s27 + $0x4f8] sm:$0xff] %v468_v31 }
  0xb3   : > { %471 = vst [vmem:[%s4507_s27 + $0x500] sm:$0xff] %v470_v32 }
  0xb4   : > { %473 = vst [vmem:[%s4507_s27 + $0x508] sm:$0xff] %v472_v33 }
  0xb5   : > { %475 = vst [vmem:[%s4507_s27 + $0x510] sm:$0xff] %v474_v34 }
  0xb6   : > { %477 = vst [vmem:[%s4507_s27 + $0x518] sm:$0xff] %v476_v35 }
  0xb7   : > { %479 = vst [vmem:[%s4507_s27 + $0x520] sm:$0xff] %v478_v36 }
  0xb8   : > { %481 = vst [vmem:[%s4507_s27 + $0x528] sm:$0xff] %v480_v37 }
  0xb9   : > { %483 = vst [vmem:[%s4507_s27 + $0x530] sm:$0xff] %v482_v38 }
  0xba   : > { %485 = vst [vmem:[%s4507_s27 + $0x538] sm:$0xff] %v484_v39 }
  0xbb   : > { %487 = vst [vmem:[%s4507_s27 + $0x540] sm:$0xff] %v486_v40 }
  0xbc   : > { %489 = vst [vmem:[%s4507_s27 + $0x548] sm:$0xff] %v488_v41 }
  0xbd   : > { %491 = vst [vmem:[%s4507_s27 + $0x550] sm:$0xff] %v490_v42 }
  0xbe   : > { %493 = vst [vmem:[%s4507_s27 + $0x558] sm:$0xff] %v492_v43 }
  0xbf   : > { %495 = vst [vmem:[%s4507_s27 + $0x560] sm:$0xff] %v494_v44 }
  0xc0   : > { %497 = vst [vmem:[%s4507_s27 + $0x568] sm:$0xff] %v496_v45 }
  0xc1   : > { %499 = vst [vmem:[%s4507_s27 + $0x570] sm:$0xff] %v498_v46 }
  0xc2   : > { %501 = vst [vmem:[%s4507_s27 + $0x578] sm:$0xff] %v500_v47 }
  0xc3   : > { %503 = vst [vmem:[%s4507_s27 + $0x580] sm:$0xff] %v502_v48 }
  0xc4   : > { %505 = vst [vmem:[%s4507_s27 + $0x588] sm:$0xff] %v504_v49 }
  0xc5   : > { %507 = vst [vmem:[%s4507_s27 + $0x590] sm:$0xff] %v506_v50 }
  0xc6   : > { %509 = vst [vmem:[%s4507_s27 + $0x598] sm:$0xff] %v508_v51 }
  0xc7   : > { %511 = vst [vmem:[%s4507_s27 + $0x5a0] sm:$0xff] %v510_v52 }
  0xc8   : > { %513 = vst [vmem:[%s4507_s27 + $0x5a8] sm:$0xff] %v512_v53 }
  0xc9   : > { %515 = vst [vmem:[%s4507_s27 + $0x5b0] sm:$0xff] %v514_v54 }
  0xca   : > { %517 = vst [vmem:[%s4507_s27 + $0x5b8] sm:$0xff] %v516_v55 }
  0xcb   : > { %519 = vst [vmem:[%s4507_s27 + $0x5c0] sm:$0xff] %v518_v56 }
  0xcc   : > { %521 = vst [vmem:[%s4507_s27 + $0x5c8] sm:$0xff] %v520_v57 }
  0xcd   : > { %523 = vst [vmem:[%s4507_s27 + $0x5d0] sm:$0xff] %v522_v58 }
  0xce   : > { %525 = vst [vmem:[%s4507_s27 + $0x5d8] sm:$0xff] %v524_v59 }
  0xcf   : > { %527 = vst [vmem:[%s4507_s27 + $0x5e0] sm:$0xff] %v526_v60 }
  0xd0   : > { %529 = vst [vmem:[%s4507_s27 + $0x5e8] sm:$0xff] %v528_v61 }
  0xd1   : > { %531 = vst [vmem:[%s4507_s27 + $0x5f0] sm:$0xff] %v530_v62 }
  0xd2   : > { %533 = vst [vmem:[%s4507_s27 + $0x5f8] sm:$0xff] %v532_v63 }
  0xd3   : > { %535 = vst [vmem:[%s4507_s27 + $0x600] sm:$0xff] %v534_v0 }
  0xd4   : > { %537 = vst [vmem:[%s4507_s27 + $0x608] sm:$0xff] %v536_v1 }
  0xd5   : > { %539 = vst [vmem:[%s4507_s27 + $0x610] sm:$0xff] %v538_v2 }
  0xd6   : > { %541 = vst [vmem:[%s4507_s27 + $0x618] sm:$0xff] %v540_v3 }
  0xd7   : > { %543 = vst [vmem:[%s4507_s27 + $0x620] sm:$0xff] %v542_v4 }
  0xd8   : > { %545 = vst [vmem:[%s4507_s27 + $0x628] sm:$0xff] %v544_v5 }
  0xd9   : > { %547 = vst [vmem:[%s4507_s27 + $0x630] sm:$0xff] %v546_v6 }
  0xda   : > { %549 = vst [vmem:[%s4507_s27 + $0x638] sm:$0xff] %v548_v7 }
  0xdb   : > { %551 = vst [vmem:[%s4507_s27 + $0x640] sm:$0xff] %v550_v8 }
  0xdc   : > { %553 = vst [vmem:[%s4507_s27 + $0x648] sm:$0xff] %v552_v9 }
  0xdd   : > { %555 = vst [vmem:[%s4507_s27 + $0x650] sm:$0xff] %v554_v10 }
  0xde   : > { %557 = vst [vmem:[%s4507_s27 + $0x658] sm:$0xff] %v556_v11 }
  0xdf   : > { %559 = vst [vmem:[%s4507_s27 + $0x660] sm:$0xff] %v558_v12 }
  0xe0   : > { %561 = vst [vmem:[%s4507_s27 + $0x668] sm:$0xff] %v560_v13 }
  0xe1   : > { %563 = vst [vmem:[%s4507_s27 + $0x670] sm:$0xff] %v562_v14 }
  0xe2   : > { %565 = vst [vmem:[%s4507_s27 + $0x678] sm:$0xff] %v564_v15 }
  0xe3   : > { %567 = vst [vmem:[%s4507_s27 + $0x680] sm:$0xff] %v566_v16 }
  0xe4   : > { %569 = vst [vmem:[%s4507_s27 + $0x688] sm:$0xff] %v568_v17 }
  0xe5   : > { %571 = vst [vmem:[%s4507_s27 + $0x690] sm:$0xff] %v570_v18 }
  0xe6   : > { %573 = vst [vmem:[%s4507_s27 + $0x698] sm:$0xff] %v572_v19 }
  0xe7   : > { %575 = vst [vmem:[%s4507_s27 + $0x6a0] sm:$0xff] %v574_v20 }
  0xe8   : > { %577 = vst [vmem:[%s4507_s27 + $0x6a8] sm:$0xff] %v576_v21 }
  0xe9   : > { %579 = vst [vmem:[%s4507_s27 + $0x6b0] sm:$0xff] %v578_v22 }
  0xea   : > { %581 = vst [vmem:[%s4507_s27 + $0x6b8] sm:$0xff] %v580_v23 }
  0xeb PF: > { %p3142_p7 = scmp.ge.s32.totalorder %s4439_s14, 1  ;;  %p586_p8 = scmp.lt.s32.totalorder %s4439_s14, 3 }
  0xed   : > { %p587_p9 = pnand %p3142_p7, %p586_p8 }
  0xef   : > { %590 = sbr.rel (%p587_p9) target bundleno = 875 (0x36b), region = 51 }
  0xf4   : > { %s593_s28 = sand.u32 1, %s4431_s12   ;;  %vm2134_vm0 = vcmask 785408  }
  0xf5   : > { %s4388_s29 = smul.u32 1728, %s593_s28  ;;  %s3143_s6 = sshll.u32 %s593_s28, 7 }
  0xf6   : > { %s5852_s12 = scalar_lea.vmem [#allocation3], %s3143_s6  ;;  %s4386_s28 = sshll.u32 (%p4492_p5), %s3136_s15, 4 }
  0xf7   : > { %s4943_s30 = scalar_lea.vmem [#allocation2], %s4388_s29  ;;  %s3032_s20 = scalar_lea.vmem (%p4492_p5), %s6109_s3, %s4386_s28 }
  0xf8   : > { %v3370_v24 = vld [vmem:[%s4943_s30 + $0xe0] sm:$0xf]  ;;  %v4200_v25 = vld [vmem:[%s4943_s30 + $0xec] sm:$0xf0] }
  0xf9   : > { %v3498_v26 = vld [vmem:[%s4943_s30 + $0x1e0] sm:$0xf]  ;;  %v3371_v27 = vor.u32 %v4200_v25, %v3370_v24  ;;  %v4232_v28 = vld [vmem:[%s4943_s30 + $0x1ec] sm:$0xf0] }
  0xfa   : > { %v3626_v29 = vld [vmem:[%s4943_s30 + $0x2e0] sm:$0xf]  ;;  %v4264_v30 = vld [vmem:[%s4943_s30 + $0x2ec] sm:$0xf0]  ;;  %v3499_v31 = vor.u32 %v4232_v28, %v3498_v26 }
  0xfb   : > { %v3627_v32 = vor.u32 %v4264_v30, %v3626_v29  ;;  %v3754_v33 = vld [vmem:[%s4943_s30 + $0x3e0] sm:$0xf]  ;;  %v4296_v34 = vld [vmem:[%s4943_s30 + $0x3ec] sm:$0xf0]  ;;  %2147 = vmatpush.bf16.msra.mxu0 %v3371_v27 }
  0xfc   : > { %v3354_v35 = vld [vmem:[%s4943_s30 + $0xc0] sm:$0xf]  ;;  %v3755_v36 = vor.u32 %v4296_v34, %v3754_v33  ;;  %v4196_v37 = vld [vmem:[%s4943_s30 + $0xcc] sm:$0xf0]  ;;  %2176 = vmatpush.bf16.msra.mxu1 %v3499_v31 }
  0xfd   : > { %v3482_v38 = vld [vmem:[%s4943_s30 + $0x1c0] sm:$0xf]  ;;  %v4228_v39 = vld [vmem:[%s4943_s30 + $0x1cc] sm:$0xf0]  ;;  %2205 = vmatpush.bf16.msra.mxu2 %v3627_v32  ;;  %v3355_v40 = vor.u32 %v4196_v37, %v3354_v35 }
  0xfe   : > { %v3483_v41 = vor.u32 %v4228_v39, %v3482_v38  ;;  %v3610_v42 = vld [vmem:[%s4943_s30 + $0x2c0] sm:$0xf]  ;;  %v4260_v43 = vld [vmem:[%s4943_s30 + $0x2cc] sm:$0xf0]  ;;  %2234 = vmatpush.bf16.msra.mxu3 %v3755_v36 }
  0xff   : > { %v3738_v44 = vld [vmem:[%s4943_s30 + $0x3c0] sm:$0xf]  ;;  %v3611_v45 = vor.u32 %v4260_v43, %v3610_v42  ;;  %v4292_v46 = vld [vmem:[%s4943_s30 + $0x3cc] sm:$0xf0]  ;;  %2148 = vmatpush.bf16.msra.mxu0 %v3355_v40 }
 0x100   : > { %v3338_v47 = vld [vmem:[%s4943_s30 + $0xa0] sm:$0xf]  ;;  %v4192_v48 = vld [vmem:[%s4943_s30 + $0xac] sm:$0xf0]  ;;  %v3739_v49 = vor.u32 %v4292_v46, %v3738_v44  ;;  %2177 = vmatpush.bf16.msra.mxu1 %v3483_v41 }
 0x101   : > { %v3466_v50 = vld [vmem:[%s4943_s30 + $0x1a0] sm:$0xf]  ;;  %v4224_v51 = vld [vmem:[%s4943_s30 + $0x1ac] sm:$0xf0]  ;;  %v3339_v53 = vor.u32 %v4192_v48, %v3338_v47  ;;  %2206 = vmatpush.bf16.msra.mxu2 %v3611_v45 }
 0x102   : > { %v3594_v52 = vld [vmem:[%s4943_s30 + $0x2a0] sm:$0xf]  ;;  %v4256_v54 = vld [vmem:[%s4943_s30 + $0x2ac] sm:$0xf0]  ;;  %v3467_v57 = vor.u32 %v4224_v51, %v3466_v50  ;;  %2235 = vmatpush.bf16.msra.mxu3 %v3739_v49 }
 0x103   : > { %v3722_v55 = vld [vmem:[%s4943_s30 + $0x3a0] sm:$0xf]  ;;  %v4288_v56 = vld [vmem:[%s4943_s30 + $0x3ac] sm:$0xf0]  ;;  %v3595_v58 = vor.u32 %v4256_v54, %v3594_v52  ;;  %2149 = vmatpush.bf16.msra.mxu0 %v3339_v53  ;;  %v4145_v53 = vld [vmem:[%s6107_s1 + $0x18] sm:$0xf0] }
 0x104   : > { %v3322_v59 = vld [vmem:[%s4943_s30 + $0x80] sm:$0xf]  ;;  %v4188_v60 = vld [vmem:[%s4943_s30 + $0x8c] sm:$0xf0]  ;;  %v3723_v62 = vor.u32 %v4288_v56, %v3722_v55  ;;  %2178 = vmatpush.bf16.msra.mxu1 %v3467_v57  ;;  %v4142_v54 = vld [vmem:[%s6107_s1 + $0x4] sm:$0xf] }
 0x105   : > { %v3450_v61 = vld [vmem:[%s4943_s30 + $0x180] sm:$0xf]  ;;  %v4220_v63 = vld [vmem:[%s4943_s30 + $0x18c] sm:$0xf0]  ;;  %v3323_v4 = vor.u32 %v4188_v60, %v3322_v59  ;;  %2207 = vmatpush.bf16.msra.mxu2 %v3595_v58  ;;  %v3154_v60 = vld [vmem:[%s6107_s1 + $0x8] sm:$0xf] }
 0x106   : > { %v3578_v0 = vld [vmem:[%s4943_s30 + $0x280] sm:$0xf]  ;;  %v4252_v1 = vld [vmem:[%s4943_s30 + $0x28c] sm:$0xf0]  ;;  %v3451_v5 = vor.u32 %v4220_v63, %v3450_v61  ;;  %2236 = vmatpush.bf16.msra.mxu3 %v3723_v62  ;;  %v4198_v61 = vld [vmem:[%s4943_s30 + $0xe4] sm:$0xf] }
 0x107   : > { %v3706_v2 = vld [vmem:[%s4943_s30 + $0x380] sm:$0xf]  ;;  %v4284_v3 = vld [vmem:[%s4943_s30 + $0x38c] sm:$0xf0]  ;;  %v3579_v6 = vor.u32 %v4252_v1, %v3578_v0  ;;  %2150 = vmatpush.bf16.msra.mxu0 %v3323_v4  ;;  %v3372_v62 = vld [vmem:[%s4943_s30 + $0xf0] sm:$0xf0] }
 0x108   : > { %v3306_v7 = vld [vmem:[%s4943_s30 + $0x60] sm:$0xf]  ;;  %v4184_v8 = vld [vmem:[%s4943_s30 + $0x6c] sm:$0xf0]  ;;  %v3707_v10 = vor.u32 %v4284_v3, %v3706_v2  ;;  %2179 = vmatpush.bf16.msra.mxu1 %v3451_v5  ;;  %v4441_v63 = vmov 0  }
 0x109   : > { %v3434_v9 = vld [vmem:[%s4943_s30 + $0x160] sm:$0xf]  ;;  %v4216_v11 = vld [vmem:[%s4943_s30 + $0x16c] sm:$0xf0]  ;;  %v3307_v16 = vor.u32 %v4184_v8, %v3306_v7  ;;  %2208 = vmatpush.bf16.msra.mxu2 %v3579_v6  ;;  %4414 = vset.pattern.permute.xlu0 %v4441_v63  ;;  %v4146_v2 = vld [vmem:[%s6107_s1 + $0x20] sm:$0xf0] }
 0x10a   : > { %v3562_v12 = vld [vmem:[%s4943_s30 + $0x260] sm:$0xf]  ;;  %v4248_v13 = vld [vmem:[%s4943_s30 + $0x26c] sm:$0xf0]  ;;  %v3435_v17 = vor.u32 %v4216_v11, %v3434_v9  ;;  %2237 = vmatpush.bf16.msra.mxu3 %v3707_v10  ;;  %v4143_v3 = vld [vmem:[%s6107_s1 + $0xc] sm:$0xf]  ;;  %v3375_v11 = vor.u32 %v4198_v61, %v3372_v62  ;;  %4415 = vset.pattern.permute.xlu1 %v4441_v63 }
 0x10b   : > { %v3690_v14 = vld [vmem:[%s4943_s30 + $0x360] sm:$0xf]  ;;  %v4280_v15 = vld [vmem:[%s4943_s30 + $0x36c] sm:$0xf0]  ;;  %v3563_v18 = vor.u32 %v4248_v13, %v3562_v12  ;;  %2151 = vmatpush.bf16.msra.mxu0 %v3307_v16  ;;  %v3156_v4 = vld [vmem:[%s6107_s1 + $0x24] sm:$0xf0]  ;;  %4416 = vset.pattern.permute.xlu2 %v4441_v63  ;;  %v5050_v16 = vor.u32 %v4146_v2, %v3154_v60 }
 0x10c   : > { %v3290_v19 = vld [vmem:[%s4943_s30 + $0x40] sm:$0xf]  ;;  %v4180_v20 = vld [vmem:[%s4943_s30 + $0x4c] sm:$0xf0]  ;;  %v3691_v22 = vor.u32 %v4280_v15, %v3690_v14  ;;  %2180 = vmatpush.bf16.msra.mxu1 %v3435_v17  ;;  %v4194_v17 = vld [vmem:[%s4943_s30 + $0xc4] sm:$0xf] }
 0x10d   : > { %v3418_v21 = vld [vmem:[%s4943_s30 + $0x140] sm:$0xf]  ;;  %v4212_v23 = vld [vmem:[%s4943_s30 + $0x14c] sm:$0xf0]  ;;  %v3291_v28 = vor.u32 %v4180_v20, %v3290_v19  ;;  %2209 = vmatpush.bf16.msra.mxu2 %v3563_v18  ;;  %v3356_v18 = vld [vmem:[%s4943_s30 + $0xd0] sm:$0xf0]  ;;  %v5054_v19 = vor.u32 %v4143_v3, %v3156_v4 }
 0x10e   : > { %v3546_v24 = vld [vmem:[%s4943_s30 + $0x240] sm:$0xf]  ;;  %v4244_v25 = vld [vmem:[%s4943_s30 + $0x24c] sm:$0xf0]  ;;  %v3419_v29 = vor.u32 %v4212_v23, %v3418_v21  ;;  %2238 = vmatpush.bf16.msra.mxu3 %v3691_v22  ;;  %v4150_v60 = vld [vmem:[%s6107_s1 + $0x44] sm:$0xf] }
 0x10f   : > { %v3674_v26 = vld [vmem:[%s4943_s30 + $0x340] sm:$0xf]  ;;  %v4276_v27 = vld [vmem:[%s4943_s30 + $0x34c] sm:$0xf0]  ;;  %v3547_v30 = vor.u32 %v4244_v25, %v3546_v24  ;;  %2152 = vmatpush.bf16.msra.mxu0 %v3291_v28  ;;  %6137 = vst [vmem:[#allocation4_spill] sm:$0xff] %v5054_v19 }
 0x110   : > { %v3274_v31 = vld [vmem:[%s4943_s30 + $0x20] sm:$0xf]  ;;  %v4176_v32 = vld [vmem:[%s4943_s30 + $0x2c] sm:$0xf0]  ;;  %v3675_v34 = vor.u32 %v4276_v27, %v3674_v26  ;;  %2181 = vmatpush.bf16.msra.mxu1 %v3419_v29  ;;  %v3359_v26 = vor.u32 %v4194_v17, %v3356_v18  ;;  %v4190_v28 = vld [vmem:[%s4943_s30 + $0xa4] sm:$0xf] }
 0x111   : > { %v3402_v33 = vld [vmem:[%s4943_s30 + $0x120] sm:$0xf]  ;;  %v4208_v35 = vld [vmem:[%s4943_s30 + $0x12c] sm:$0xf0]  ;;  %v3275_v41 = vor.u32 %v4176_v32, %v3274_v31  ;;  %2210 = vmatpush.bf16.msra.mxu2 %v3547_v30  ;;  %v3340_v30 = vld [vmem:[%s4943_s30 + $0xb0] sm:$0xf0] }
 0x112   : > { %v3530_v36 = vld [vmem:[%s4943_s30 + $0x220] sm:$0xf]  ;;  %v4240_v37 = vld [vmem:[%s4943_s30 + $0x22c] sm:$0xf0]  ;;  %v3403_v45 = vor.u32 %v4208_v35, %v3402_v33  ;;  %2239 = vmatpush.bf16.msra.mxu3 %v3675_v34  ;;  %v867_v31 = vld [vmem:[%s6108_s2 + $0x8] sm:$0xff] }
 0x113   : > { %v3658_v38 = vld [vmem:[%s4943_s30 + $0x320] sm:$0xf]  ;;  %v4272_v39 = vld [vmem:[%s4943_s30 + $0x32c] sm:$0xf0]  ;;  %v3531_v46 = vor.u32 %v4240_v37, %v3530_v36  ;;  %2153 = vmatpush.bf16.msra.mxu0 %v3275_v41  ;;  %v4182_v61 = vld [vmem:[%s4943_s30 + $0x64] sm:$0xf] }
 0x114   : > { %v3258_v40 = vld [vmem:[%s4943_s30] sm:$0xf]  ;;  %v4172_v42 = vld [vmem:[%s4943_s30 + $0xc] sm:$0xf0]  ;;  %v3659_v50 = vor.u32 %v4272_v39, %v3658_v38  ;;  %2182 = vmatpush.bf16.msra.mxu1 %v3403_v45  ;;  %v3343_v39 = vor.u32 %v4190_v28, %v3340_v30  ;;  %v3308_v62 = vld [vmem:[%s4943_s30 + $0x70] sm:$0xf0] }
 0x115   : > { %v3386_v43 = vld [vmem:[%s4943_s30 + $0x100] sm:$0xf]  ;;  %v4204_v44 = vld [vmem:[%s4943_s30 + $0x10c] sm:$0xf0]  ;;  %v3259_v59 = vor.u32 %v4172_v42, %v3258_v40  ;;  %2211 = vmatpush.bf16.msra.mxu2 %v3531_v46  ;;  %v4186_v42 = vld [vmem:[%s4943_s30 + $0x84] sm:$0xf] }
 0x116   : > { %v3514_v47 = vld [vmem:[%s4943_s30 + $0x200] sm:$0xf]  ;;  %v4236_v48 = vld [vmem:[%s4943_s30 + $0x20c] sm:$0xf0]  ;;  %v3387_v0 = vor.u32 %v4204_v44, %v3386_v43  ;;  %2240 = vmatpush.bf16.msra.mxu3 %v3659_v50  ;;  %v3324_v43 = vld [vmem:[%s4943_s30 + $0x90] sm:$0xf0] }
 0x117   : > { %v3642_v49 = vld [vmem:[%s4943_s30 + $0x300] sm:$0xf]  ;;  %v4268_v51 = vld [vmem:[%s4943_s30 + $0x30c] sm:$0xf0]  ;;  %v3515_v1 = vor.u32 %v4236_v48, %v3514_v47  ;;  %2154 = vmatpush.bf16.msra.mxu0 %v3259_v59  ;;  %v3174_v47 = vld [vmem:[%s6107_s1 + $0x38] sm:$0xf] }
 0x118   : > { %v3146_v52 = vld [vmem:[%s6107_s1] sm:$0xf]  ;;  %v4384_v57 = vld [vmem:[%s4943_s30 + $0x6ac] sm:$0xf0]  ;;  %v3643_v5 = vor.u32 %v4268_v51, %v3642_v49  ;;  %2183 = vmatpush.bf16.msra.mxu1 %v3387_v0  ;;  %v4152_v48 = vld [vmem:[%s6107_s1 + $0x50] sm:$0xf0] }
 0x119   : > { %v3148_v55 = vld [vmem:[%s6107_s1 + $0x1c] sm:$0xf0]  ;;  %v4328_v8 = vld [vmem:[%s4943_s30 + $0x4ec] sm:$0xf0]  ;;  %v5043_v10 = vor.u32 %v4145_v53, %v3146_v52  ;;  %2212 = vmatpush.bf16.msra.mxu2 %v3515_v1  ;;  %v4149_v53 = vld [vmem:[%s6107_s1 + $0x3c] sm:$0xf] }
 0x11a   : > { %v4106_v56 = vld [vmem:[%s4943_s30 + $0x6a0] sm:$0xf]  ;;  %v4360_v12 = vld [vmem:[%s4943_s30 + $0x5ec] sm:$0xf0]  ;;  %v5048_v15 = vor.u32 %v4142_v54, %v3148_v55  ;;  %2241 = vmatpush.bf16.msra.mxu3 %v3643_v5  ;;  %v3176_v54 = vld [vmem:[%s6107_s1 + $0x54] sm:$0xf0] }
 0x11b   : > { %v866_v58 = vld [vmem:[%s6108_s2] sm:$0xff]  ;;  %v4107_v6 = vor.u32 %v4384_v57, %v4106_v56  ;;  %v4380_v14 = vld [vmem:[%s4943_s30 + $0x68c] sm:$0xf0]  ;;  %2155 = vmatmul.bf16.vlgmr.msra.gmra.mxu0 %v5043_v10  ;;  %v4153_v56 = vld [vmem:[%s6107_s1 + $0x58] sm:$0xf0]  ;;  %v3327_v57 = vor.u32 %v4186_v42, %v3324_v43 }
 0x11c   : > { %v3882_v7 = vld [vmem:[%s4943_s30 + $0x4e0] sm:$0xf]  ;;  %876 = vperm.xlu0 %4414, %v866_v58   ;;  %v4324_v23 = vld [vmem:[%s4943_s30 + $0x4cc] sm:$0xf0]  ;;  %2184 = vmatmul.bf16.vlgmr.msra.gmra.mxu1 %v5048_v15  ;;  %v869_v1 = vld [vmem:[%s6108_s2 + $0x18] sm:$0xff] }
 0x11d   : > { %v4010_v9 = vld [vmem:[%s4943_s30 + $0x5e0] sm:$0xf]  ;;  %v3883_v20 = vor.u32 %v4328_v8, %v3882_v7  ;;  %2323 = vmatpush.bf16.msrb.mxu2 %v4107_v6  ;;  %v4356_v27 = vld [vmem:[%s4943_s30 + $0x5cc] sm:$0xf0]  ;;  %2242 = vmatmul.bf16.vlgmr.msra.gmra.mxu3 %v5054_v19  ;;  %v5119_v7 = vor.u32 %v4152_v48, %v3174_v47  ;;  %v3311_v8 = vor.u32 %v4182_v61, %v3308_v62  ;;  %v4178_v17 = vld [vmem:[%s4943_s30 + $0x44] sm:$0xf] }
 0x11e   : > { %v4090_v13 = vld [vmem:[%s4943_s30 + $0x680] sm:$0xf]  ;;  %v4011_v21 = vor.u32 %v4360_v12, %v4010_v9  ;;  %2350 = vmatpush.bf16.msrb.mxu3 %v3375_v11  ;;  %2213 = vmatmul.bf16.vlgmr.msra.gmra.mxu2 %v5050_v16  ;;  %v4376_v32 = vld [vmem:[%s4943_s30 + $0x66c] sm:$0xf0]  ;;  %v3292_v18 = vld [vmem:[%s4943_s30 + $0x50] sm:$0xf0] }
 0x11f   : > { %v3866_v22 = vld [vmem:[%s4943_s30 + $0x4c0] sm:$0xf]  ;;  %v4091_v24 = vor.u32 %v4380_v14, %v4090_v13  ;;  %2263 = vmatpush.bf16.msrb.mxu0 %v3883_v20  ;;  %v868_v34 = vld [vmem:[%s6108_s2 + $0x10] sm:$0xff]  ;;  %v5123_v13 = vor.u32 %v4149_v53, %v3176_v54  ;;  %v4174_v30 = vld [vmem:[%s4943_s30 + $0x24] sm:$0xf] }
 0x120   : > { %v3994_v25 = vld [vmem:[%s4943_s30 + $0x5c0] sm:$0xf]  ;;  %v3867_v33 = vor.u32 %v4324_v23, %v3866_v22  ;;  %2292 = vmatpush.bf16.msrb.mxu1 %v4011_v21  ;;  %v4320_v37 = vld [vmem:[%s4943_s30 + $0x4ac] sm:$0xf0]  ;;  %886 = vperm.xlu1 %4415, %v868_v34   ;;  %v3210_v54 = vld [vmem:[%s6107_s1 + $0x78] sm:$0xf] }
 0x121   : > { %v4074_v29 = vld [vmem:[%s4943_s30 + $0x660] sm:$0xf]  ;;  %2324 = vmatpush.bf16.msrb.mxu2 %v4091_v24  ;;  %v3995_v35 = vor.u32 %v4356_v27, %v3994_v25  ;;  %v4352_v41 = vld [vmem:[%s4943_s30 + $0x5ac] sm:$0xf0]  ;;  %v3295_v25 = vor.u32 %v4178_v17, %v3292_v18  ;;  %v4262_v17 = vld [vmem:[%s4943_s30 + $0x2e4] sm:$0xf] }
 0x122   : > { %v3850_v36 = vld [vmem:[%s4943_s30 + $0x4a0] sm:$0xf]  ;;  %v4075_v38 = vor.u32 %v4376_v32, %v4074_v29  ;;  %2351 = vmatpush.bf16.msrb.mxu3 %v3359_v26  ;;  %v4372_v46 = vld [vmem:[%s4943_s30 + $0x64c] sm:$0xf0]  ;;  %v3628_v18 = vld [vmem:[%s4943_s30 + $0x2f0] sm:$0xf0] }
 0x123   : > { %v3978_v40 = vld [vmem:[%s4943_s30 + $0x5a0] sm:$0xf]  ;;  %2264 = vmatpush.bf16.msrb.mxu0 %v3867_v33  ;;  %v3851_v44 = vor.u32 %v4320_v37, %v3850_v36  ;;  %v4316_v51 = vld [vmem:[%s4943_s30 + $0x48c] sm:$0xf0]  ;;  %v3276_v33 = vld [vmem:[%s4943_s30 + $0x30] sm:$0xf0] }
 0x124   : > { %881 = vperm.xlu0 %4414, %v867_v31   ;;  %v4058_v45 = vld [vmem:[%s4943_s30 + $0x640] sm:$0xf]  ;;  %2293 = vmatpush.bf16.msrb.mxu1 %v3995_v35  ;;  %v3979_v49 = vor.u32 %v4352_v41, %v3978_v40  ;;  %v4348_v59 = vld [vmem:[%s4943_s30 + $0x58c] sm:$0xf0]  ;;  %v3279_v35 = vor.u32 %v4174_v30, %v3276_v33  ;;  %v4170_v40 = vld [vmem:[%s4943_s30 + $0x4] sm:$0xf] }
 0x125   : > { %2325 = vmatpush.bf16.msrb.mxu2 %v4075_v38  ;;  %v3834_v50 = vld [vmem:[%s4943_s30 + $0x480] sm:$0xf]  ;;  %v4059_v52 = vor.u32 %v4372_v46, %v4058_v45  ;;  %v4312_v5 = vld [vmem:[%s4943_s30 + $0x46c] sm:$0xf0]  ;;  %v3260_v41 = vld [vmem:[%s4943_s30 + $0x10] sm:$0xf0] }
 0x126   : > { %v3182_v55 = vld [vmem:[%s6107_s1 + $0x40] sm:$0xf]  ;;  %2352 = vmatpush.bf16.msrb.mxu3 %v3343_v39  ;;  %v3835_v0 = vor.u32 %v4316_v51, %v3834_v50  ;;  %v4368_v6 = vld [vmem:[%s4943_s30 + $0x62c] sm:$0xf0]  ;;  %v3263_v47 = vor.u32 %v4170_v40, %v3260_v41  ;;  %v4159_v51 = vld [vmem:[%s6107_s1 + $0x88] sm:$0xf0] }
 0x127   : > { %v3962_v58 = vld [vmem:[%s4943_s30 + $0x580] sm:$0xf]  ;;  %2265 = vmatpush.bf16.msrb.mxu0 %v3851_v44  ;;  %v4344_v11 = vld [vmem:[%s4943_s30 + $0x56c] sm:$0xf0]  ;;  %v5125_v14 = vor.u32 %v4153_v56, %v3182_v55  ;;  %v4160_v55 = vld [vmem:[%s6107_s1 + $0x90] sm:$0xf0] }
 0x128   : > { %v3184_v63 = vld [vmem:[%s6107_s1 + $0x5c] sm:$0xf0]  ;;  %2294 = vmatpush.bf16.msrb.mxu1 %v3979_v49  ;;  %v3963_v3 = vor.u32 %v4348_v59, %v3962_v58  ;;  %891 = vperm.xlu1 %4415, %v869_v1   ;;  %v4308_v24 = vld [vmem:[%s4943_s30 + $0x44c] sm:$0xf0]  ;;  %v3212_v58 = vld [vmem:[%s6107_s1 + $0x94] sm:$0xf0]  ;;  %v5184_v62 = vor.u32 %v4160_v55, %v3210_v54 }
 0x129   : > { %v4042_v2 = vld [vmem:[%s4943_s30 + $0x620] sm:$0xf]  ;;  %2326 = vmatpush.bf16.msrb.mxu2 %v4059_v52  ;;  %v5129_v20 = vor.u32 %v4150_v60, %v3184_v63  ;;  %v4340_v27 = vld [vmem:[%s4943_s30 + $0x54c] sm:$0xf0]  ;;  %v4156_v52 = vld [vmem:[%s6107_s1 + $0x74] sm:$0xf] }
 0x12a   : > { %v3818_v4 = vld [vmem:[%s4943_s30 + $0x460] sm:$0xf]  ;;  %2353 = vmatpush.bf16.msrb.mxu3 %v3327_v57  ;;  %v4043_v12 = vor.u32 %v4368_v6, %v4042_v2  ;;  %v4304_v32 = vld [vmem:[%s4943_s30 + $0x42c] sm:$0xf0]  ;;  %v4157_v57 = vld [vmem:[%s6107_s1 + $0x7c] sm:$0xf] }
 0x12b   : > { %v3946_v9 = vld [vmem:[%s4943_s30 + $0x560] sm:$0xf]  ;;  %6138 = vst [vmem:[#allocation5_spill] sm:$0xff] %v5129_v20  ;;  %2266 = vmatpush.bf16.msrb.mxu0 %v3835_v0  ;;  %v3819_v21 = vor.u32 %v4312_v5, %v3818_v4  ;;  %v4336_v36 = vld [vmem:[%s4943_s30 + $0x52c] sm:$0xf0]  ;;  %v5186_v63 = vor.u32 %v4157_v57, %v3212_v58  ;;  %v871_v40 = vld [vmem:[%s6108_s2 + $0x28] sm:$0xff] }
 0x12c   : > { %2295 = vmatpush.bf16.msrb.mxu1 %v3963_v3  ;;  %v3947_v22 = vor.u32 %v4344_v11, %v3946_v9  ;;  %v3802_v23 = vld [vmem:[%s4943_s30 + $0x440] sm:$0xf]  ;;  %2160 = vmatmul.bf16.gmra.mxu0 %v5119_v7  ;;  %v4364_v38 = vld [vmem:[%s4943_s30 + $0x60c] sm:$0xf0]  ;;  %6141 = vst [vmem:[#allocation8_spill] sm:$0xff] %v5184_v62 }
 0x12d   : > { %2327 = vmatpush.bf16.msrb.mxu2 %v4043_v12  ;;  %v3930_v26 = vld [vmem:[%s4943_s30 + $0x540] sm:$0xf]  ;;  %2189 = vmatmul.bf16.gmra.mxu1 %v5123_v13  ;;  %v3803_v28 = vor.u32 %v4308_v24, %v3802_v23  ;;  %v872_v43 = vld [vmem:[%s6108_s2 + $0x30] sm:$0xff]  ;;  %6142 = vst [vmem:[#allocation9_spill] sm:$0xff] %v5186_v63  ;;  %v4294_v0 = vld [vmem:[%s4943_s30 + $0x3e4] sm:$0xf]  ;;  %v3631_v23 = vor.u32 %v4262_v17, %v3628_v18 }
 0x12e   : > { %2354 = vmatpush.bf16.msrb.mxu3 %v3311_v8  ;;  %2218 = vmatmul.bf16.gmra.mxu2 %v5125_v14  ;;  %v3786_v29 = vld [vmem:[%s4943_s30 + $0x420] sm:$0xf]  ;;  %v3931_v31 = vor.u32 %v4340_v27, %v3930_v26  ;;  %v4300_v46 = vld [vmem:[%s4943_s30 + $0x40c] sm:$0xf0]  ;;  %v3756_v1 = vld [vmem:[%s4943_s30 + $0x3f0] sm:$0xf0] }
 0x12f   : > { %2247 = vmatmul.bf16.gmra.mxu3 %v5129_v20  ;;  %2267 = vmatpush.bf16.msrb.mxu0 %v3819_v21  ;;  %v3914_v34 = vld [vmem:[%s4943_s30 + $0x520] sm:$0xf]  ;;  %v3787_v42 = vor.u32 %v4304_v32, %v3786_v29  ;;  %v4332_v49 = vld [vmem:[%s4943_s30 + $0x50c] sm:$0xf0]  ;;  %v4230_v2 = vld [vmem:[%s4943_s30 + $0x1e4] sm:$0xf]  ;;  %v3759_v3 = vor.u32 %v4294_v0, %v3756_v1 }
 0x130   : > { %2296 = vmatpush.bf16.msrb.mxu1 %v3947_v22  ;;  %v4026_v37 = vld [vmem:[%s4943_s30 + $0x600] sm:$0xf]  ;;  %v3915_v44 = vor.u32 %v4336_v36, %v3914_v34  ;;  %906 = vperm.xlu0 %4414, %v872_v43   ;;  %v3202_v50 = vld [vmem:[%s6107_s1 + $0x70] sm:$0xf]  ;;  %v3500_v4 = vld [vmem:[%s4943_s30 + $0x1f0] sm:$0xf0] }
 0x131   : > { %v4027_v39 = vor.u32 %v4364_v38, %v4026_v37  ;;  %v3770_v45 = vld [vmem:[%s4943_s30 + $0x400] sm:$0xf]  ;;  %v3204_v53 = vld [vmem:[%s6107_s1 + $0x8c] sm:$0xf0]  ;;  %v5180_v60 = vor.u32 %v4159_v51, %v3202_v50  ;;  %v4326_v5 = vld [vmem:[%s4943_s30 + $0x4e4] sm:$0xf]  ;;  %v3503_v8 = vor.u32 %v4230_v2, %v3500_v4 }
 0x132   : > { %2355 = vmatpush.bf16.msrb.mxu3 %v3295_v25  ;;  %v3898_v48 = vld [vmem:[%s4943_s30 + $0x500] sm:$0xf]  ;;  %v3771_v56 = vor.u32 %v4300_v46, %v3770_v45  ;;  %v5182_v61 = vor.u32 %v4156_v52, %v3204_v53  ;;  %v3884_v6 = vld [vmem:[%s4943_s30 + $0x4f0] sm:$0xf0]  ;;  %v873_v12 = vld [vmem:[%s6108_s2 + $0x38] sm:$0xff] }
 0x133   : > { %2268 = vmatpush.bf16.msrb.mxu0 %v3803_v28  ;;  %2328 = vmatpush.bf16.msrb.mxu2 %v4027_v39  ;;  %v3899_v59 = vor.u32 %v4332_v49, %v3898_v48  ;;  %6139 = vst [vmem:[#allocation6_spill] sm:$0xff] %v5180_v60  ;;  %v3887_v9 = vor.u32 %v4326_v5, %v3884_v6  ;;  %v870_v11 = vld [vmem:[%s6108_s2 + $0x20] sm:$0xff]  ;;  %v3740_v22 = vld [vmem:[%s4943_s30 + $0x3d0] sm:$0xf0]  ;;  %v3232_v36 = vld [vmem:[%s6107_s1 + $0xc4] sm:$0xf0] }
 0x134   : > { %2297 = vmatpush.bf16.msrb.mxu1 %v3931_v31  ;;  %6140 = vst [vmem:[#allocation7_spill] sm:$0xff] %v5182_v61  ;;  %896 = vperm.xlu2 %4416, %v870_v11   ;;  %v4290_v21 = vld [vmem:[%s4943_s30 + $0x3c4] sm:$0xf]  ;;  %v3484_v26 = vld [vmem:[%s4943_s30 + $0x1d0] sm:$0xf0] }
 0x135   : > { %v3743_v24 = vor.u32 %v4290_v21, %v3740_v22  ;;  %v4226_v25 = vld [vmem:[%s4943_s30 + $0x1c4] sm:$0xf]  ;;  %911 = vperm.xlu1 %4415, %v873_v12   ;;  %v3868_v29 = vld [vmem:[%s4943_s30 + $0x4d0] sm:$0xf0]  ;;  %v3230_v31 = vld [vmem:[%s6107_s1 + $0xa8] sm:$0xf] }
 0x136   : > { %2356 = vmatpush.bf16.msrb.mxu3 %v3279_v35  ;;  %v4322_v27 = vld [vmem:[%s4943_s30 + $0x4c4] sm:$0xf]  ;;  %v3487_v28 = vor.u32 %v4226_v25, %v3484_v26  ;;  %v3612_v33 = vld [vmem:[%s4943_s30 + $0x2d0] sm:$0xf0]  ;;  %v4163_v35 = vld [vmem:[%s6107_s1 + $0xac] sm:$0xf] }
 0x137   : > { %2269 = vmatpush.bf16.msrb.mxu0 %v3787_v42  ;;  %2437 = vmatpush.bf16.msra.mxu2 %v3759_v3  ;;  %v4258_v30 = vld [vmem:[%s4943_s30 + $0x2c4] sm:$0xf]  ;;  %v3871_v32 = vor.u32 %v4322_v27, %v3868_v29  ;;  %v3238_v38 = vld [vmem:[%s6107_s1 + $0xb0] sm:$0xf]  ;;  %v4167_v39 = vld [vmem:[%s6107_s1 + $0xc8] sm:$0xf0] }
 0x138   : > { %2298 = vmatpush.bf16.msrb.mxu1 %v3915_v44  ;;  %v4166_v34 = vld [vmem:[%s6107_s1 + $0xc0] sm:$0xf0]  ;;  %v3615_v37 = vor.u32 %v4258_v30, %v3612_v33  ;;  %v4164_v41 = vld [vmem:[%s6107_s1 + $0xb4] sm:$0xf]  ;;  %v3240_v42 = vld [vmem:[%s6107_s1 + $0xcc] sm:$0xf0]  ;;  %v5243_v44 = vor.u32 %v4163_v35, %v3232_v36  ;;  %v5245_v45 = vor.u32 %v4167_v39, %v3238_v38 }
 0x139   : > { %v5241_v43 = vor.u32 %v4166_v34, %v3230_v31  ;;  %v5247_v46 = vor.u32 %v4164_v41, %v3240_v42  ;;  %v3724_v48 = vld [vmem:[%s4943_s30 + $0x3b0] sm:$0xf0]  ;;  %v4222_v49 = vld [vmem:[%s4943_s30 + $0x1a4] sm:$0xf]  ;;  %v3162_v17 = vld [vmem:[%s6107_s1 + $0x10] sm:$0xf] }
 0x13a   : > { %2357 = vmatpush.bf16.msrb.mxu3 %v3263_v47  ;;  %6144 = vst [vmem:[#allocation11_spill] sm:$0xff] %v5243_v44  ;;  %v4286_v47 = vld [vmem:[%s4943_s30 + $0x3a4] sm:$0xf]  ;;  %v3468_v51 = vld [vmem:[%s4943_s30 + $0x1b0] sm:$0xf0] }
 0x13b   : > { %2270 = vmatpush.bf16.msrb.mxu0 %v3771_v56  ;;  %2438 = vmatpush.bf16.msra.mxu2 %v3743_v24  ;;  %6143 = vst [vmem:[#allocation10_spill] sm:$0xff] %v5241_v43  ;;  %v3727_v50 = vor.u32 %v4286_v47, %v3724_v48  ;;  %v4318_v52 = vld [vmem:[%s4943_s30 + $0x4a4] sm:$0xf]  ;;  %v3852_v53 = vld [vmem:[%s4943_s30 + $0x4b0] sm:$0xf0]  ;;  %v3471_v54 = vor.u32 %v4222_v49, %v3468_v51 }
 0x13c   : > { %2299 = vmatpush.bf16.msrb.mxu1 %v3899_v59  ;;  %2165 = vmatmul.bf16.gmra.mxu0 %v5180_v60  ;;  %6145 = vst [vmem:[#allocation12_spill] sm:$0xff] %v5245_v45  ;;  %v3855_v55 = vor.u32 %v4318_v52, %v3852_v53  ;;  %v4254_v56 = vld [vmem:[%s4943_s30 + $0x2a4] sm:$0xf]  ;;  %v3596_v57 = vld [vmem:[%s4943_s30 + $0x2b0] sm:$0xf0] }
 0x13d   : > { %2194 = vmatmul.bf16.gmra.mxu1 %v5182_v61  ;;  %901 = vperm.xlu2 %4416, %v871_v40   ;;  %6146 = vst [vmem:[#allocation13_spill] sm:$0xff] %v5247_v46  ;;  %v4282_v58 = vld [vmem:[%s4943_s30 + $0x384] sm:$0xf]  ;;  %v3599_v59 = vor.u32 %v4254_v56, %v3596_v57  ;;  %v3708_v0 = vld [vmem:[%s4943_s30 + $0x390] sm:$0xf0] }
 0x13e   : > { %2223 = vmatmul.bf16.gmra.mxu2 %v5184_v62  ;;  %2466 = vmatpush.bf16.msra.mxu3 %v3887_v9  ;;  %v4218_v1 = vld [vmem:[%s4943_s30 + $0x184] sm:$0xf]  ;;  %v3452_v2 = vld [vmem:[%s4943_s30 + $0x190] sm:$0xf0]  ;;  %v3711_v3 = vor.u32 %v4282_v58, %v3708_v0  ;;  %v4147_v18 = vld [vmem:[%s6107_s1 + $0x28] sm:$0xf0] }
 0x13f   : > { %2252 = vmatmul.bf16.gmra.mxu3 %v5186_v63  ;;  %2379 = vmatpush.bf16.msra.mxu0 %v3503_v8  ;;  %v3455_v4 = vor.u32 %v4218_v1, %v3452_v2  ;;  %v4314_v5 = vld [vmem:[%s4943_s30 + $0x484] sm:$0xf]  ;;  %v3836_v6 = vld [vmem:[%s4943_s30 + $0x490] sm:$0xf0]  ;;  %v3164_v22 = vld [vmem:[%s6107_s1 + $0x2c] sm:$0xf0]  ;;  %v5287_v25 = vor.u32 %v4147_v18, %v3162_v17 }
 0x140   : > { %2408 = vmatpush.bf16.msra.mxu1 %v3631_v23  ;;  %2439 = vmatpush.bf16.msra.mxu2 %v3727_v50  ;;  %v4250_v8 = vld [vmem:[%s4943_s30 + $0x284] sm:$0xf]  ;;  %v3839_v9 = vor.u32 %v4314_v5, %v3836_v6  ;;  %v3580_v11 = vld [vmem:[%s4943_s30 + $0x290] sm:$0xf0]  ;;  %v3170_v23 = vld [vmem:[%s6107_s1 + $0x18] sm:$0xf] }
 0x141   : > { %v3583_v12 = vor.u32 %v4250_v8, %v3580_v11  ;;  %v4144_v21 = vld [vmem:[%s6107_s1 + $0x14] sm:$0xf]  ;;  %6147 = vst [vmem:[#allocation14_spill] sm:$0xff] %v5287_v25  ;;  %v4214_v30 = vld [vmem:[%s4943_s30 + $0x164] sm:$0xf] }
 0x142   : > { %2467 = vmatpush.bf16.msra.mxu3 %v3871_v32  ;;  %v4148_v24 = vld [vmem:[%s6107_s1 + $0x30] sm:$0xf0]  ;;  %v5289_v26 = vor.u32 %v4144_v21, %v3164_v22  ;;  %v4310_v33 = vld [vmem:[%s4943_s30 + $0x464] sm:$0xf]  ;;  %v3190_v56 = vld [vmem:[%s6107_s1 + $0x48] sm:$0xf] }
 0x143   : > { %2380 = vmatpush.bf16.msra.mxu0 %v3487_v28  ;;  %v5291_v27 = vor.u32 %v4148_v24, %v3170_v23  ;;  %v4278_v28 = vld [vmem:[%s4943_s30 + $0x364] sm:$0xf]  ;;  %v3692_v29 = vld [vmem:[%s4943_s30 + $0x370] sm:$0xf0]  ;;  %v4151_v58 = vld [vmem:[%s6107_s1 + $0x4c] sm:$0xf] }
 0x144   : > { %2409 = vmatpush.bf16.msra.mxu1 %v3615_v37  ;;  %2440 = vmatpush.bf16.msra.mxu2 %v3711_v3  ;;  %6148 = vst [vmem:[#allocation15_spill] sm:$0xff] %v5289_v26  ;;  %v3695_v31 = vor.u32 %v4278_v28, %v3692_v29  ;;  %v3436_v32 = vld [vmem:[%s4943_s30 + $0x170] sm:$0xf0]  ;;  %v4246_v37 = vld [vmem:[%s4943_s30 + $0x264] sm:$0xf] }
 0x145   : > { %v3820_v34 = vld [vmem:[%s4943_s30 + $0x470] sm:$0xf0]  ;;  %v3439_v35 = vor.u32 %v4214_v30, %v3436_v32  ;;  %v4274_v39 = vld [vmem:[%s4943_s30 + $0x344] sm:$0xf]  ;;  %v3198_v0 = vld [vmem:[%s6107_s1 + $0x50] sm:$0xf] }
 0x146   : > { %2468 = vmatpush.bf16.msra.mxu3 %v3855_v55  ;;  %v3823_v36 = vor.u32 %v4310_v33, %v3820_v34  ;;  %v3564_v38 = vld [vmem:[%s4943_s30 + $0x270] sm:$0xf0]  ;;  %v4210_v42 = vld [vmem:[%s4943_s30 + $0x144] sm:$0xf]  ;;  %v4155_v1 = vld [vmem:[%s6107_s1 + $0x68] sm:$0xf0] }
 0x147   : > { %2381 = vmatpush.bf16.msra.mxu0 %v3471_v54  ;;  %v3567_v40 = vor.u32 %v4246_v37, %v3564_v38  ;;  %v3676_v41 = vld [vmem:[%s4943_s30 + $0x350] sm:$0xf0]  ;;  %v4306_v50 = vld [vmem:[%s4943_s30 + $0x444] sm:$0xf] }
 0x148   : > { %2410 = vmatpush.bf16.msra.mxu1 %v3599_v59  ;;  %2441 = vmatpush.bf16.msra.mxu2 %v3695_v31  ;;  %v3420_v47 = vld [vmem:[%s4943_s30 + $0x150] sm:$0xf0]  ;;  %v3679_v48 = vor.u32 %v4274_v39, %v3676_v41  ;;  %v4242_v52 = vld [vmem:[%s4943_s30 + $0x244] sm:$0xf]  ;;  %v3192_v59 = vld [vmem:[%s6107_s1 + $0x64] sm:$0xf0] }
 0x149   : > { %v3423_v49 = vor.u32 %v4210_v42, %v3420_v47  ;;  %v3804_v51 = vld [vmem:[%s4943_s30 + $0x450] sm:$0xf0]  ;;  %v4154_v57 = vld [vmem:[%s6107_s1 + $0x60] sm:$0xf0]  ;;  %v5334_v3 = vor.u32 %v4151_v58, %v3192_v59  ;;  %v4161_v41 = vld [vmem:[%s6107_s1 + $0x98] sm:$0xf0] }
 0x14a   : > { %2469 = vmatpush.bf16.msra.mxu3 %v3839_v9  ;;  %v3807_v53 = vor.u32 %v4306_v50, %v3804_v51  ;;  %v3548_v54 = vld [vmem:[%s4943_s30 + $0x250] sm:$0xf0]  ;;  %v5332_v2 = vor.u32 %v4154_v57, %v3190_v56  ;;  %v4270_v5 = vld [vmem:[%s4943_s30 + $0x324] sm:$0xf]  ;;  %v3220_v47 = vld [vmem:[%s6107_s1 + $0x9c] sm:$0xf0] }
 0x14b   : > { %2382 = vmatpush.bf16.msra.mxu0 %v3455_v4  ;;  %v3551_v55 = vor.u32 %v4242_v52, %v3548_v54  ;;  %6150 = vst [vmem:[#allocation17_spill] sm:$0xff] %v5334_v3  ;;  %v5336_v4 = vor.u32 %v4155_v1, %v3198_v0  ;;  %v3660_v6 = vld [vmem:[%s4943_s30 + $0x330] sm:$0xf0]  ;;  %v4206_v8 = vld [vmem:[%s4943_s30 + $0x124] sm:$0xf] }
 0x14c   : > { %2170 = vmatmul.bf16.gmra.mxu0 %v5241_v43  ;;  %2411 = vmatpush.bf16.msra.mxu1 %v3583_v12  ;;  %6149 = vst [vmem:[#allocation16_spill] sm:$0xff] %v5332_v2  ;;  %v3663_v9 = vor.u32 %v4270_v5, %v3660_v6  ;;  %v3404_v11 = vld [vmem:[%s4943_s30 + $0x130] sm:$0xf0]  ;;  %v4302_v12 = vld [vmem:[%s4943_s30 + $0x424] sm:$0xf] }
 0x14d   : > { %2199 = vmatmul.bf16.gmra.mxu1 %v5243_v44  ;;  %2442 = vmatpush.bf16.msra.mxu2 %v3679_v48  ;;  %v3788_v17 = vld [vmem:[%s4943_s30 + $0x430] sm:$0xf0]  ;;  %v3407_v18 = vor.u32 %v4206_v8, %v3404_v11  ;;  %v4238_v22 = vld [vmem:[%s4943_s30 + $0x224] sm:$0xf]  ;;  %v3226_v48 = vld [vmem:[%s6107_s1 + $0x88] sm:$0xf] }
 0x14e   : > { %2228 = vmatmul.bf16.gmra.mxu2 %v5245_v45  ;;  %2470 = vmatpush.bf16.msra.mxu3 %v3823_v36  ;;  %v3791_v21 = vor.u32 %v4302_v12, %v3788_v17  ;;  %v3532_v23 = vld [vmem:[%s4943_s30 + $0x230] sm:$0xf0]  ;;  %v4266_v24 = vld [vmem:[%s4943_s30 + $0x304] sm:$0xf]  ;;  %v4201_v54 = vld [vmem:[%s4943_s30 + $0xf4] sm:$0xf0] }
 0x14f   : > { %2257 = vmatmul.bf16.gmra.mxu3 %v5247_v46  ;;  %2383 = vmatpush.bf16.msra.mxu0 %v3439_v35  ;;  %v3535_v28 = vor.u32 %v4238_v22, %v3532_v23  ;;  %v3644_v29 = vld [vmem:[%s4943_s30 + $0x310] sm:$0xf0]  ;;  %v4202_v30 = vld [vmem:[%s4943_s30 + $0x104] sm:$0xf]  ;;  %v3506_v58 = vld [vmem:[%s4943_s30 + $0x1e8] sm:$0xf] }
 0x150   : > { %2412 = vmatpush.bf16.msra.mxu1 %v3567_v40  ;;  %v3388_v31 = vld [vmem:[%s4943_s30 + $0x110] sm:$0xf0]  ;;  %v3647_v32 = vor.u32 %v4266_v24, %v3644_v29  ;;  %v4298_v34 = vld [vmem:[%s4943_s30 + $0x404] sm:$0xf]  ;;  %v3218_v40 = vld [vmem:[%s6107_s1 + $0x80] sm:$0xf] }
 0x151   : > { %2443 = vmatpush.bf16.msra.mxu2 %v3663_v9  ;;  %v3391_v33 = vor.u32 %v4202_v30, %v3388_v31  ;;  %v3772_v35 = vld [vmem:[%s4943_s30 + $0x410] sm:$0xf0]  ;;  %v4234_v36 = vld [vmem:[%s4943_s30 + $0x204] sm:$0xf]  ;;  %v5377_v50 = vor.u32 %v4161_v41, %v3218_v40  ;;  %v4233_v59 = vld [vmem:[%s4943_s30 + $0x1f4] sm:$0xf0] }
 0x152   : > { %2471 = vmatpush.bf16.msra.mxu3 %v3807_v53  ;;  %v3775_v37 = vor.u32 %v4298_v34, %v3772_v35  ;;  %v3516_v38 = vld [vmem:[%s4943_s30 + $0x210] sm:$0xf0]  ;;  %v4158_v42 = vld [vmem:[%s6107_s1 + $0x84] sm:$0xf]  ;;  %v3378_v53 = vld [vmem:[%s4943_s30 + $0xe8] sm:$0xf]  ;;  %v3507_v1 = vor.u32 %v4233_v59, %v3506_v58 }
 0x153   : > { %2384 = vmatpush.bf16.msra.mxu0 %v3423_v49  ;;  %v3519_v39 = vor.u32 %v4234_v36, %v3516_v38  ;;  %v4162_v49 = vld [vmem:[%s6107_s1 + $0xa0] sm:$0xf0]  ;;  %6151 = vst [vmem:[#allocation18_spill] sm:$0xff] %v5377_v50  ;;  %v5379_v51 = vor.u32 %v4158_v42, %v3220_v47  ;;  %v3379_v56 = vor.u32 %v4201_v54, %v3378_v53  ;;  %v4012_v57 = vld [vmem:[%s4943_s30 + $0x5f0] sm:$0xf0] }
 0x154   : > { %2413 = vmatpush.bf16.msra.mxu1 %v3551_v55  ;;  %v5381_v52 = vor.u32 %v4162_v49, %v3226_v48  ;;  %v4358_v55 = vld [vmem:[%s4943_s30 + $0x5e4] sm:$0xf]  ;;  %v3246_v5 = vld [vmem:[%s6107_s1 + $0xb8] sm:$0xf]  ;;  %v4168_v6 = vld [vmem:[%s6107_s1 + $0xd0] sm:$0xf0] }
 0x155   : > { %2444 = vmatpush.bf16.msra.mxu2 %v3647_v32  ;;  %6152 = vst [vmem:[#allocation19_spill] sm:$0xff] %v5379_v51  ;;  %v4015_v0 = vor.u32 %v4358_v55, %v4012_v57  ;;  %v4382_v8 = vld [vmem:[%s4943_s30 + $0x6a4] sm:$0xf]  ;;  %v4108_v9 = vld [vmem:[%s4943_s30 + $0x6b0] sm:$0xf0]  ;;  %v5420_v34 = vor.u32 %v4168_v6, %v3246_v5 }
 0x156   : > { %2472 = vmatpush.bf16.msra.mxu3 %v3791_v21  ;;  %6153 = vst [vmem:[#allocation20_spill] sm:$0xff] %v5381_v52  ;;  %v4165_v11 = vld [vmem:[%s6107_s1 + $0xbc] sm:$0xf]  ;;  %v4111_v12 = vor.u32 %v4382_v8, %v4108_v9  ;;  %v3362_v17 = vld [vmem:[%s4943_s30 + $0xc8] sm:$0xf] }
 0x157   : > { %2385 = vmatpush.bf16.msra.mxu0 %v3407_v18  ;;  %v4197_v18 = vld [vmem:[%s4943_s30 + $0xd4] sm:$0xf0]  ;;  %v4354_v21 = vld [vmem:[%s4943_s30 + $0x5c4] sm:$0xf]  ;;  %v3996_v23 = vld [vmem:[%s4943_s30 + $0x5d0] sm:$0xf0] }
 0x158   : > { %2414 = vmatpush.bf16.msra.mxu1 %v3535_v28  ;;  %v3363_v22 = vor.u32 %v4197_v18, %v3362_v17  ;;  %v3490_v24 = vld [vmem:[%s4943_s30 + $0x1c8] sm:$0xf]  ;;  %v4229_v28 = vld [vmem:[%s4943_s30 + $0x1d4] sm:$0xf0]  ;;  %v3254_v30 = vld [vmem:[%s6107_s1 + $0xc0] sm:$0xf]  ;;  %v3999_v32 = vor.u32 %v4354_v21, %v3996_v23 }
 0x159   : > { %v3248_v29 = vld [vmem:[%s6107_s1 + $0xd4] sm:$0xf0]  ;;  %v4169_v31 = vld [vmem:[%s6107_s1 + $0xd8] sm:$0xf0]  ;;  %6154 = vst [vmem:[#allocation21_spill] sm:$0xff] %v5420_v34 }
 0x15a   : > { %2473 = vmatpush.bf16.msra.mxu3 %v3775_v37  ;;  %v5422_v35 = vor.u32 %v4165_v11, %v3248_v29  ;;  %v5424_v36 = vor.u32 %v4169_v31, %v3254_v30  ;;  %v4378_v37 = vld [vmem:[%s4943_s30 + $0x684] sm:$0xf]  ;;  %v4092_v38 = vld [vmem:[%s4943_s30 + $0x690] sm:$0xf0]  ;;  %v3346_v40 = vld [vmem:[%s4943_s30 + $0xa8] sm:$0xf] }
 0x15b   : > { %2386 = vmatpush.bf16.msra.mxu0 %v3391_v33  ;;  %v3491_v33 = vor.u32 %v4229_v28, %v3490_v24  ;;  %v4193_v41 = vld [vmem:[%s4943_s30 + $0xb4] sm:$0xf0]  ;;  %v4350_v42 = vld [vmem:[%s4943_s30 + $0x5a4] sm:$0xf]  ;;  %v3980_v48 = vld [vmem:[%s4943_s30 + $0x5b0] sm:$0xf0] }
 0x15c   : > { %2271 = vmatmul.bf16.vlgmr.msrb.gmra.mxu0 %v5287_v25  ;;  %2415 = vmatpush.bf16.msra.mxu1 %v3519_v39  ;;  %6155 = vst [vmem:[#allocation22_spill] sm:$0xff] %v5422_v35  ;;  %v4095_v39 = vor.u32 %v4378_v37, %v4092_v38  ;;  %v3347_v47 = vor.u32 %v4193_v41, %v3346_v40  ;;  %v3474_v49 = vld [vmem:[%s4943_s30 + $0x1a8] sm:$0xf]  ;;  %v4225_v53 = vld [vmem:[%s4943_s30 + $0x1b4] sm:$0xf0] }
 0x15d   : > { %2300 = vmatmul.bf16.vlgmr.msrb.gmra.mxu1 %v5289_v26  ;;  %6156 = vst [vmem:[#allocation23_spill] sm:$0xff] %v5424_v36  ;;  %v3983_v54 = vor.u32 %v4350_v42, %v3980_v48  ;;  %v3475_v55 = vor.u32 %v4225_v53, %v3474_v49  ;;  %v4189_v57 = vld [vmem:[%s4943_s30 + $0x94] sm:$0xf0]  ;;  %v4346_v58 = vld [vmem:[%s4943_s30 + $0x584] sm:$0xf] }
 0x15e   : > { %4120 = vmatmul.msk.bf16.vlgmr.msrb.gmra.mxu2 %vm2134_vm0, %v5291_v27  ;;  %v4374_v5 = vld [vmem:[%s4943_s30 + $0x664] sm:$0xf]  ;;  %v4076_v6 = vld [vmem:[%s4943_s30 + $0x670] sm:$0xf0]  ;;  %v3458_v11 = vld [vmem:[%s4943_s30 + $0x188] sm:$0xf] }
 0x15f   : > { %2358 = vmatmul.bf16.vlgmr.msrb.gmra.mxu3 %v5043_v10  ;;  %2553 = vmatpush.bf16.msrb.mxu2 %v3379_v56  ;;  %v3330_v56 = vld [vmem:[%s4943_s30 + $0x88] sm:$0xf]  ;;  %v4079_v9 = vor.u32 %v4374_v5, %v4076_v6  ;;  %v4185_v28 = vld [vmem:[%s4943_s30 + $0x74] sm:$0xf0]  ;;  %v4342_v29 = vld [vmem:[%s4943_s30 + $0x564] sm:$0xf] }
 0x160   : > { %2495 = vmatpush.bf16.msrb.mxu0 %v4015_v0  ;;  %2582 = vmatpush.bf16.msrb.mxu3 %v3507_v1  ;;  %v3331_v0 = vor.u32 %v4189_v57, %v3330_v56  ;;  %v3964_v1 = vld [vmem:[%s4943_s30 + $0x590] sm:$0xf0]  ;;  %v3314_v24 = vld [vmem:[%s4943_s30 + $0x68] sm:$0xf]  ;;  %v4217_v37 = vld [vmem:[%s4943_s30 + $0x174] sm:$0xf0] }
 0x161   : > { %2526 = vmatpush.bf16.msrb.mxu1 %v4111_v12  ;;  %v3967_v8 = vor.u32 %v4346_v58, %v3964_v1  ;;  %v4221_v12 = vld [vmem:[%s4943_s30 + $0x194] sm:$0xf0]  ;;  %v3315_v31 = vor.u32 %v4185_v28, %v3314_v24  ;;  %v3298_v58 = vld [vmem:[%s4943_s30 + $0x48] sm:$0xf]  ;;  %v4338_v1 = vld [vmem:[%s4943_s30 + $0x544] sm:$0xf] }
 0x162   : > { %v3459_v17 = vor.u32 %v4221_v12, %v3458_v11  ;;  %v4213_v11 = vld [vmem:[%s4943_s30 + $0x154] sm:$0xf0] }
 0x163   : > { %2554 = vmatpush.bf16.msrb.mxu2 %v3363_v22 }
 0x164   : > { %2496 = vmatpush.bf16.msrb.mxu0 %v3999_v32  ;;  %2583 = vmatpush.bf16.msrb.mxu3 %v3491_v33  ;;  %v3948_v32 = vld [vmem:[%s4943_s30 + $0x570] sm:$0xf0]  ;;  %v3442_v33 = vld [vmem:[%s4943_s30 + $0x168] sm:$0xf] }
 0x165   : > { %2527 = vmatpush.bf16.msrb.mxu1 %v4095_v39  ;;  %v3951_v39 = vor.u32 %v4342_v29, %v3948_v32  ;;  %v3443_v40 = vor.u32 %v4217_v37, %v3442_v33  ;;  %v4044_v32 = vld [vmem:[%s4943_s30 + $0x630] sm:$0xf0] }
 0x167   : > { %2555 = vmatpush.bf16.msrb.mxu2 %v3347_v47 }
 0x168   : > { %2497 = vmatpush.bf16.msrb.mxu0 %v3983_v54  ;;  %2584 = vmatpush.bf16.msrb.mxu3 %v3475_v55  ;;  %v4370_v54 = vld [vmem:[%s4943_s30 + $0x644] sm:$0xf]  ;;  %v4060_v55 = vld [vmem:[%s4943_s30 + $0x650] sm:$0xf0] }
 0x169   : > { %2528 = vmatpush.bf16.msrb.mxu1 %v4079_v9  ;;  %v4063_v57 = vor.u32 %v4370_v54, %v4060_v55  ;;  %v3426_v9 = vld [vmem:[%s4943_s30 + $0x148] sm:$0xf] }
 0x16b   : > { %2556 = vmatpush.bf16.msrb.mxu2 %v3331_v0  ;;  %v4181_v0 = vld [vmem:[%s4943_s30 + $0x54] sm:$0xf0] }
 0x16c   : > { %2276 = vmatmul.bf16.gmra.mxu0 %v5332_v2  ;;  %2585 = vmatpush.bf16.msrb.mxu3 %v3459_v17  ;;  %v3299_v6 = vor.u32 %v4181_v0, %v3298_v58  ;;  %v3427_v17 = vor.u32 %v4213_v11, %v3426_v9  ;;  %v3266_v11 = vld [vmem:[%s4943_s30 + $0x8] sm:$0xf] }
 0x16d   : > { %2305 = vmatmul.bf16.gmra.mxu1 %v5334_v3  ;;  %2498 = vmatpush.bf16.msrb.mxu0 %v3967_v8  ;;  %v3932_v8 = vld [vmem:[%s4943_s30 + $0x550] sm:$0xf0] }
 0x16e   : > { %4121 = vmatmul.msk.bf16.gmra.mxu2 %vm2134_vm0, %v5336_v4  ;;  %2529 = vmatpush.bf16.msrb.mxu1 %v4063_v57  ;;  %v3935_v12 = vor.u32 %v4338_v1, %v3932_v8 }
 0x16f   : > { %2363 = vmatmul.bf16.gmra.mxu3 %v5119_v7  ;;  %2557 = vmatpush.bf16.msrb.mxu2 %v3315_v31  ;;  %v4366_v31 = vld [vmem:[%s4943_s30 + $0x624] sm:$0xf] }
 0x170   : > { %2586 = vmatpush.bf16.msrb.mxu3 %v3443_v40  ;;  %v4047_v37 = vor.u32 %v4366_v31, %v4044_v32  ;;  %v4334_v40 = vld [vmem:[%s4943_s30 + $0x524] sm:$0xf]  ;;  %v3394_v32 = vld [vmem:[%s4943_s30 + $0x108] sm:$0xf] }
 0x171   : > { %2499 = vmatpush.bf16.msrb.mxu0 %v3951_v39  ;;  %v4177_v39 = vld [vmem:[%s4943_s30 + $0x34] sm:$0xf0] }
 0x172   : > { %2530 = vmatpush.bf16.msrb.mxu1 %v4047_v37 }
 0x173   : > { %2558 = vmatpush.bf16.msrb.mxu2 %v3299_v6 }
 0x174   : > { %2587 = vmatpush.bf16.msrb.mxu3 %v3427_v17  ;;  %v4330_v17 = vld [vmem:[%s4943_s30 + $0x504] sm:$0xf] }
 0x175   : > { %2500 = vmatpush.bf16.msrb.mxu0 %v3935_v12  ;;  %v4173_v12 = vld [vmem:[%s4943_s30 + $0x14] sm:$0xf0] }
 0x17c   : > { %2281 = vmatmul.bf16.gmra.mxu0 %v5377_v50 }
 0x17d   : > { %2310 = vmatmul.bf16.gmra.mxu1 %v5379_v51 }
 0x17e   : > { %4122 = vmatmul.msk.bf16.gmra.mxu2 %vm2134_vm0, %v5381_v52 }
 0x17f   : > { %2368 = vmatmul.bf16.gmra.mxu3 %v5180_v60 }
 0x18c   : > { %2286 = vmatmul.bf16.gmra.mxu0 %v5420_v34 }
 0x18d   : > { %2315 = vmatmul.bf16.gmra.mxu1 %v5422_v35 }
 0x18e   : > { %4123 = vmatmul.msk.bf16.gmra.mxu2 %vm2134_vm0, %v5424_v36  ;;  %v5442_v59 = vpop.permute.xlu0 %876 }
 0x18f   : > { %2373 = vmatmul.bf16.gmra.mxu3 %v5241_v43 }
 0x192   : > { %v5470_v5 = vpop.permute.xlu1 %886 }
 0x196   : > { %v5457_v30 = vpop.permute.xlu0 %881 }
 0x198   : > { %v2156_v18 = vpop.f32.mrf.mxu0 }
 0x199   : > { %v2157_v21 = vadd.f32 %v2156_v18, %v5442_v59  ;;  %v2185_v22 = vpop.f32.mrf.mxu1 }
 0x19b   : > { %v2186_v23 = vadd.f32 %v2185_v22, %v2157_v21 }
 0x19c   : > { %2387 = vmatmul.bf16.vlgmr.msra.gmra.mxu0 %v5048_v15 }
 0x19d   : > { %2416 = vmatmul.bf16.vlgmr.msra.gmra.mxu1 %v5050_v16 }
 0x19e   : > { %2445 = vmatmul.bf16.vlgmr.msra.gmra.mxu2 %v5054_v19 }
 0x19f   : > { %2474 = vmatmul.bf16.vlgmr.msra.gmra.mxu3 %v5287_v25 }
 0x1a0   : > { %v2243_v42 = vpop.f32.mrf.mxu3  ;;  %v2158_v47 = vpop.f32.mrf.mxu0 }
 0x1a1   : > { %v2214_v38 = vpop.f32.mrf.mxu2  ;;  %v2159_v48 = vadd.f32 %v2158_v47, %v5457_v30  ;;  %v2187_v49 = vpop.f32.mrf.mxu1  ;;  %v3916_v47 = vld [vmem:[%s4943_s30 + $0x530] sm:$0xf0] }
 0x1a2   : > { %v2215_v41 = vadd.f32 %v2214_v38, %v2186_v23  ;;  %v3282_v38 = vld [vmem:[%s4943_s30 + $0x28] sm:$0xf]  ;;  %v3919_v55 = vor.u32 %v4334_v40, %v3916_v47 }
 0x1a3   : > { %v2188_v56 = vadd.f32 %v2187_v49, %v2159_v48  ;;  %v3410_v48 = vld [vmem:[%s4943_s30 + $0x128] sm:$0xf]  ;;  %v4209_v49 = vld [vmem:[%s4943_s30 + $0x134] sm:$0xf0] }
 0x1a4   : > { %v5463_v53 = vadd.f32 %v2243_v42, %v2215_v41  ;;  %v5487_v41 = vpop.permute.xlu1 %891  ;;  %v3283_v42 = vor.u32 %v4177_v39, %v3282_v38  ;;  %2501 = vmatpush.bf16.msrb.mxu0 %v3919_v55  ;;  %v3890_v55 = vld [vmem:[%s4943_s30 + $0x4e8] sm:$0xf] }
 0x1a6   : > { %2559 = vmatpush.bf16.msrb.mxu2 %v3283_v42 }
 0x1a8   : > { %v2245_v22 = vpop.f32.mrf.mxu3 }
 0x1a9   : > { %v2216_v18 = vpop.f32.mrf.mxu2  ;;  %v2161_v23 = vpop.f32.mrf.mxu0 }
 0x1aa   : > { %v2217_v21 = vadd.f32 %v2216_v18, %v2188_v56  ;;  %v2162_v24 = vadd.f32 %v2161_v23, %v5470_v5  ;;  %v2190_v28 = vpop.f32.mrf.mxu1  ;;  %v3411_v56 = vor.u32 %v4209_v49, %v3410_v48  ;;  %v5498_v18 = vpop.permute.xlu2 %896  ;;  %v4362_v23 = vld [vmem:[%s4943_s30 + $0x604] sm:$0xf] }
 0x1ac   : > { %v5476_v29 = vadd.f32 %v2245_v22, %v2217_v21  ;;  %v2191_v33 = vadd.f32 %v2190_v28, %v2162_v24  ;;  %2392 = vmatmul.bf16.gmra.mxu0 %v5123_v13  ;;  %2588 = vmatpush.bf16.msrb.mxu3 %v3411_v56  ;;  %v3267_v21 = vor.u32 %v4173_v12, %v3266_v11  ;;  %v3900_v22 = vld [vmem:[%s4943_s30 + $0x510] sm:$0xf0]  ;;  %v4329_v56 = vld [vmem:[%s4943_s30 + $0x4f4] sm:$0xf0] }
 0x1ad   : > { %2421 = vmatmul.bf16.gmra.mxu1 %v5125_v14  ;;  %v4028_v24 = vld [vmem:[%s4943_s30 + $0x610] sm:$0xf0]  ;;  %v3903_v28 = vor.u32 %v4330_v17, %v3900_v22 }
 0x1ae   : > { %2450 = vmatmul.bf16.gmra.mxu2 %v5129_v20  ;;  %v4031_v31 = vor.u32 %v4362_v23, %v4028_v24 }
 0x1af   : > { %2479 = vmatmul.bf16.gmra.mxu3 %v5332_v2  ;;  %2560 = vmatpush.bf16.msrb.mxu2 %v3267_v21 }
 0x1b0   : > { %2502 = vmatpush.bf16.msrb.mxu0 %v3903_v28  ;;  %2531 = vmatpush.bf16.msrb.mxu1 %v4031_v31 }
 0x1b1   : > { %v2219_v54 = vpop.f32.mrf.mxu2  ;;  %v2163_v0 = vpop.f32.mrf.mxu0 }
 0x1b2   : > { %v2220_v57 = vadd.f32 %v2219_v54, %v2191_v33  ;;  %v2248_v58 = vpop.f32.mrf.mxu3  ;;  %v2164_v1 = vadd.f32 %v2163_v0, %v5487_v41  ;;  %v2192_v6 = vpop.f32.mrf.mxu1  ;;  %v4205_v33 = vld [vmem:[%s4943_s30 + $0x114] sm:$0xf0]  ;;  %v3891_v0 = vor.u32 %v4329_v56, %v3890_v55 }
 0x1b3   : > { %v3395_v37 = vor.u32 %v4205_v33, %v3394_v32  ;;  %v3762_v32 = vld [vmem:[%s4943_s30 + $0x3e8] sm:$0xf]  ;;  %v4297_v33 = vld [vmem:[%s4943_s30 + $0x3f4] sm:$0xf0] }
 0x1b4   : > { %v5493_v8 = vadd.f32 %v2248_v58, %v2220_v57  ;;  %v2193_v9 = vadd.f32 %v2192_v6, %v2164_v1  ;;  %v3634_v57 = vld [vmem:[%s4943_s30 + $0x2e8] sm:$0xf]  ;;  %v5515_v58 = vpop.permute.xlu2 %901  ;;  %v4265_v1 = vld [vmem:[%s4943_s30 + $0x2f4] sm:$0xf0]  ;;  %2669 = vmatpush.bf16.msra.mxu2 %v3891_v0  ;;  %v5531_v0 = vpop.permute.xlu0 %906 }
 0x1b5   : > { %2589 = vmatpush.bf16.msrb.mxu3 %v3395_v37  ;;  %v4018_v6 = vld [vmem:[%s4943_s30 + $0x5e8] sm:$0xf]  ;;  %v3635_v12 = vor.u32 %v4265_v1, %v3634_v57  ;;  %v4357_v55 = vld [vmem:[%s4943_s30 + $0x5d4] sm:$0xf0]  ;;  %6157 = vst [vmem:[#allocation24_spill] sm:$0xff] %v5531_v0 }
 0x1b7   : > { %2611 = vmatpush.bf16.msra.mxu0 %v3635_v12 }
 0x1b9   : > { %v2221_v38 = vpop.f32.mrf.mxu2  ;;  %v2166_v42 = vpop.f32.mrf.mxu0 }
 0x1ba   : > { %v2222_v39 = vadd.f32 %v2221_v38, %v2193_v9  ;;  %v2250_v40 = vpop.f32.mrf.mxu3  ;;  %v2167_v47 = vadd.f32 %v2166_v42, %v5498_v18  ;;  %v2195_v48 = vpop.f32.mrf.mxu1  ;;  %v4361_v9 = vld [vmem:[%s4943_s30 + $0x5f4] sm:$0xf0]  ;;  %v3763_v38 = vor.u32 %v4297_v33, %v3762_v32  ;;  %v3618_v42 = vld [vmem:[%s4943_s30 + $0x2c8] sm:$0xf] }
 0x1bb   : > { %v4019_v17 = vor.u32 %v4361_v9, %v4018_v6  ;;  %v3858_v32 = vld [vmem:[%s4943_s30 + $0x4a8] sm:$0xf]  ;;  %v4321_v33 = vld [vmem:[%s4943_s30 + $0x4b4] sm:$0xf0] }
 0x1bc   : > { %v5506_v49 = vadd.f32 %v2250_v40, %v2222_v39  ;;  %v2196_v54 = vadd.f32 %v2195_v48, %v2167_v47  ;;  %2397 = vmatmul.bf16.gmra.mxu0 %v5182_v61  ;;  %v3874_v39 = vld [vmem:[%s4943_s30 + $0x4c8] sm:$0xf]  ;;  %v4325_v40 = vld [vmem:[%s4943_s30 + $0x4d4] sm:$0xf0]  ;;  %2640 = vmatpush.bf16.msra.mxu1 %v3763_v38  ;;  %v5545_v38 = vpop.permute.xlu1 %911 }
 0x1bd   : > { %2426 = vmatmul.bf16.gmra.mxu1 %v5184_v62  ;;  %2698 = vmatpush.bf16.msra.mxu3 %v4019_v17  ;;  %v3875_v47 = vor.u32 %v4325_v40, %v3874_v39  ;;  %v4261_v48 = vld [vmem:[%s4943_s30 + $0x2d4] sm:$0xf0]  ;;  %6158 = vst [vmem:[#allocation25_spill] sm:$0xff] %v5545_v38  ;;  %v3859_v39 = vor.u32 %v4321_v33, %v3858_v32 }
 0x1be   : > { %2455 = vmatmul.bf16.gmra.mxu2 %v5186_v63  ;;  %v3619_v56 = vor.u32 %v4261_v48, %v3618_v42  ;;  %v4257_v40 = vld [vmem:[%s4943_s30 + $0x2b4] sm:$0xf0]  ;;  %v3986_v42 = vld [vmem:[%s4943_s30 + $0x5a8] sm:$0xf] }
 0x1bf   : > { %2484 = vmatmul.bf16.gmra.mxu3 %v5377_v50  ;;  %2670 = vmatpush.bf16.msra.mxu2 %v3875_v47  ;;  %v4353_v47 = vld [vmem:[%s4943_s30 + $0x5b4] sm:$0xf0] }
 0x1c0   : > { %2612 = vmatpush.bf16.msra.mxu0 %v3619_v56  ;;  %v4317_v32 = vld [vmem:[%s4943_s30 + $0x494] sm:$0xf0] }
 0x1c1   : > { %v2224_v11 = vpop.f32.mrf.mxu2  ;;  %v2168_v23 = vpop.f32.mrf.mxu0 }
 0x1c2   : > { %v2225_v21 = vadd.f32 %v2224_v11, %v2196_v54  ;;  %v2253_v22 = vpop.f32.mrf.mxu3  ;;  %v2169_v24 = vadd.f32 %v2168_v23, %v5515_v58  ;;  %v2197_v28 = vpop.f32.mrf.mxu1  ;;  %v4002_v54 = vld [vmem:[%s4943_s30 + $0x5c8] sm:$0xf]  ;;  %v4293_v23 = vld [vmem:[%s4943_s30 + $0x3d4] sm:$0xf0] }
 0x1c3   : > { %v4003_v57 = vor.u32 %v4357_v55, %v4002_v54  ;;  %v3987_v55 = vor.u32 %v4353_v47, %v3986_v42  ;;  %2671 = vmatpush.bf16.msra.mxu2 %v3859_v39  ;;  %v4349_v39 = vld [vmem:[%s4943_s30 + $0x594] sm:$0xf0] }
 0x1c4   : > { %v5521_v31 = vadd.f32 %v2253_v22, %v2225_v21  ;;  %v2198_v37 = vadd.f32 %v2197_v28, %v2169_v24  ;;  %v3746_v22 = vld [vmem:[%s4943_s30 + $0x3c8] sm:$0xf] }
 0x1c5   : > { %2699 = vmatpush.bf16.msra.mxu3 %v4003_v57  ;;  %v3747_v28 = vor.u32 %v4293_v23, %v3746_v22 }
 0x1c7   : > { %2641 = vmatpush.bf16.msra.mxu1 %v3747_v28  ;;  %v3842_v28 = vld [vmem:[%s4943_s30 + $0x488] sm:$0xf] }
 0x1c8   : > { %v3843_v33 = vor.u32 %v4317_v32, %v3842_v28  ;;  %v3570_v28 = vld [vmem:[%s4943_s30 + $0x268] sm:$0xf] }
 0x1c9   : > { %v2226_v1 = vpop.f32.mrf.mxu2  ;;  %v2171_v11 = vpop.f32.mrf.mxu0  ;;  %2700 = vmatpush.bf16.msra.mxu3 %v3987_v55 }
 0x1ca   : > { %v2227_v6 = vadd.f32 %v2226_v1, %v2198_v37  ;;  %v2255_v9 = vpop.f32.mrf.mxu3  ;;  %v2200_v12 = vpop.f32.mrf.mxu1  ;;  %v2172_v17 = vadd.f32 %v2171_v11, %v5531_v0  ;;  %v3602_v37 = vld [vmem:[%s4943_s30 + $0x2a8] sm:$0xf]  ;;  %2672 = vmatpush.bf16.msra.mxu2 %v3843_v33 }
 0x1cb   : > { %v3603_v54 = vor.u32 %v4257_v40, %v3602_v37  ;;  %v4253_v37 = vld [vmem:[%s4943_s30 + $0x294] sm:$0xf0]  ;;  %v3970_v40 = vld [vmem:[%s4943_s30 + $0x588] sm:$0xf] }
 0x1cc   : > { %v5534_v21 = vadd.f32 %v2255_v9, %v2227_v6  ;;  %2402 = vmatmul.bf16.gmra.mxu0 %v5243_v44  ;;  %v2201_v24 = vadd.f32 %v2200_v12, %v2172_v17  ;;  %v3730_v12 = vld [vmem:[%s4943_s30 + $0x3a8] sm:$0xf]  ;;  %v4289_v17 = vld [vmem:[%s4943_s30 + $0x3b4] sm:$0xf0]  ;;  %v3971_v47 = vor.u32 %v4349_v39, %v3970_v40 }
 0x1cd   : > { %2431 = vmatmul.bf16.gmra.mxu1 %v5245_v45  ;;  %2613 = vmatpush.bf16.msra.mxu0 %v3603_v54  ;;  %v3731_v23 = vor.u32 %v4289_v17, %v3730_v12  ;;  %v4285_v12 = vld [vmem:[%s4943_s30 + $0x394] sm:$0xf0]  ;;  %v3954_v33 = vld [vmem:[%s4943_s30 + $0x568] sm:$0xf] }
 0x1ce   : > { %2460 = vmatmul.bf16.gmra.mxu2 %v5247_v46  ;;  %2701 = vmatpush.bf16.msra.mxu3 %v3971_v47 }
 0x1cf   : > { %2489 = vmatmul.bf16.gmra.mxu3 %v5420_v34  ;;  %2642 = vmatpush.bf16.msra.mxu1 %v3731_v23 }
 0x1d1   : > { %v2229_v48 = vpop.f32.mrf.mxu2  ;;  %v2173_v1 = vpop.f32.mrf.mxu0 }
 0x1d2   : > { %v2230_v56 = vadd.f32 %v2229_v48, %v2201_v24  ;;  %v2258_v57 = vpop.f32.mrf.mxu3  ;;  %v2174_v6 = vadd.f32 %v2173_v1, %v5545_v38  ;;  %v2202_v9 = vpop.f32.mrf.mxu1  ;;  %v3586_v24 = vld [vmem:[%s4943_s30 + $0x288] sm:$0xf] }
 0x1d3   : > { %v3587_v42 = vor.u32 %v4253_v37, %v3586_v24  ;;  %v4249_v24 = vld [vmem:[%s4943_s30 + $0x274] sm:$0xf0] }
 0x1d4   : > { %v5551_v11 = vadd.f32 %v2258_v57, %v2230_v56  ;;  %v2203_v22 = vadd.f32 %v2202_v9, %v2174_v6  ;;  %v3714_v9 = vld [vmem:[%s4943_s30 + $0x388] sm:$0xf]  ;;  %v4345_v37 = vld [vmem:[%s4943_s30 + $0x574] sm:$0xf0]  ;;  %v3571_v39 = vor.u32 %v4249_v24, %v3570_v28 }
 0x1d5   : > { %2614 = vmatpush.bf16.msra.mxu0 %v3587_v42  ;;  %v3715_v23 = vor.u32 %v4285_v12, %v3714_v9  ;;  %v3955_v42 = vor.u32 %v4345_v37, %v3954_v33  ;;  %v4245_v28 = vld [vmem:[%s4943_s30 + $0x254] sm:$0xf0]  ;;  %v3938_v24 = vld [vmem:[%s4943_s30 + $0x548] sm:$0xf] }
 0x1d6   : > { %v4341_v33 = vld [vmem:[%s4943_s30 + $0x554] sm:$0xf0] }
 0x1d7   : > { %2643 = vmatpush.bf16.msra.mxu1 %v3715_v23  ;;  %2702 = vmatpush.bf16.msra.mxu3 %v3955_v42  ;;  %v3810_v23 = vld [vmem:[%s4943_s30 + $0x448] sm:$0xf]  ;;  %v3939_v37 = vor.u32 %v4341_v33, %v3938_v24 }
 0x1d9   : > { %v2231_v48 = vpop.f32.mrf.mxu2  ;;  %v2272_v56 = vpop.f32.mrf.mxu0  ;;  %2615 = vmatpush.bf16.msra.mxu0 %v3571_v39 }
 0x1da   : > { %v2232_v54 = vadd.f32 %v2231_v48, %v2203_v22  ;;  %v2260_v55 = vpop.f32.mrf.mxu3  ;;  %v2273_v57 = vadd.f32 %v2272_v56, %v5463_v53  ;;  %v2301_v1 = vpop.f32.mrf.mxu1  ;;  %v3826_v53 = vld [vmem:[%s4943_s30 + $0x468] sm:$0xf]  ;;  %v4313_v22 = vld [vmem:[%s4943_s30 + $0x474] sm:$0xf0] }
 0x1db   : > { %v3827_v32 = vor.u32 %v4313_v22, %v3826_v53  ;;  %v4309_v53 = vld [vmem:[%s4943_s30 + $0x454] sm:$0xf0]  ;;  %2703 = vmatpush.bf16.msra.mxu3 %v3939_v37 }
 0x1dc   : > { %v5562_v6 = vadd.f32 %v2260_v55, %v2232_v54  ;;  %v2302_v17 = vadd.f32 %v2301_v1, %v2273_v57  ;;  %2503 = vmatmul.bf16.vlgmr.msrb.gmra.mxu0 %v5289_v26  ;;  %v3698_v57 = vld [vmem:[%s4943_s30 + $0x368] sm:$0xf]  ;;  %v4281_v1 = vld [vmem:[%s4943_s30 + $0x374] sm:$0xf0]  ;;  %v3811_v22 = vor.u32 %v4309_v53, %v3810_v23 }
 0x1dd   : > { %4124 = vmatmul.msk.bf16.vlgmr.msrb.gmra.mxu1 %vm2134_vm0, %v5291_v27  ;;  %2673 = vmatpush.bf16.msra.mxu2 %v3827_v32  ;;  %v3699_v12 = vor.u32 %v4281_v1, %v3698_v57  ;;  %v4277_v57 = vld [vmem:[%s4943_s30 + $0x354] sm:$0xf0] }
 0x1de   : > { %2561 = vmatmul.bf16.vlgmr.msrb.gmra.mxu2 %v5043_v10  ;;  %v4305_v23 = vld [vmem:[%s4943_s30 + $0x434] sm:$0xf0] }
 0x1df   : > { %2590 = vmatmul.bf16.vlgmr.msrb.gmra.mxu3 %v5048_v15  ;;  %2644 = vmatpush.bf16.msra.mxu1 %v3699_v12 }
 0x1e1   : > { %v2330_v40 = vpop.f32.mrf.mxu2  ;;  %v2274_v54 = vpop.f32.mrf.mxu0  ;;  %2674 = vmatpush.bf16.msra.mxu2 %v3811_v22  ;;  %v3922_v22 = vld [vmem:[%s4943_s30 + $0x528] sm:$0xf] }
 0x1e2   : > { %v5577_v47 = vadd.f32 %v2330_v40, %v2302_v17  ;;  %v5579_v48 = vpop.f32.mrf.mxu3  ;;  %v2275_v55 = vadd.f32 %v2274_v54, %v5476_v29  ;;  %v2303_v56 = vpop.f32.mrf.mxu1  ;;  %v3554_v17 = vld [vmem:[%s4943_s30 + $0x248] sm:$0xf] }
 0x1e3   : > { %v3555_v32 = vor.u32 %v4245_v28, %v3554_v17  ;;  %v4241_v17 = vld [vmem:[%s4943_s30 + $0x234] sm:$0xf0] }
 0x1e4   : > { %v2304_v9 = vadd.f32 %v2303_v56, %v2275_v55  ;;  %v3682_v56 = vld [vmem:[%s4943_s30 + $0x348] sm:$0xf]  ;;  %v4337_v28 = vld [vmem:[%s4943_s30 + $0x534] sm:$0xf0] }
 0x1e5   : > { %2616 = vmatpush.bf16.msra.mxu0 %v3555_v32  ;;  %v3683_v12 = vor.u32 %v4277_v57, %v3682_v56  ;;  %v3923_v32 = vor.u32 %v4337_v28, %v3922_v22  ;;  %v3666_v56 = vld [vmem:[%s4943_s30 + $0x328] sm:$0xf]  ;;  %v4273_v57 = vld [vmem:[%s4943_s30 + $0x334] sm:$0xf0] }
 0x1e6   : > { %v4237_v22 = vld [vmem:[%s4943_s30 + $0x214] sm:$0xf0]  ;;  %v3906_v28 = vld [vmem:[%s4943_s30 + $0x508] sm:$0xf] }
 0x1e7   : > { %2645 = vmatpush.bf16.msra.mxu1 %v3683_v12  ;;  %2704 = vmatpush.bf16.msra.mxu3 %v3923_v32  ;;  %v4269_v32 = vld [vmem:[%s4943_s30 + $0x314] sm:$0xf0] }
 0x1e9   : > { %v2332_v29 = vpop.f32.mrf.mxu2  ;;  %v2277_v42 = vpop.f32.mrf.mxu0 }
 0x1ea   : > { %v5590_v40 = vadd.f32 %v2332_v29, %v2304_v9  ;;  %v5592_v39 = vpop.f32.mrf.mxu3  ;;  %v2278_v54 = vadd.f32 %v2277_v42, %v5493_v8  ;;  %v2306_v55 = vpop.f32.mrf.mxu1  ;;  %v3794_v9 = vld [vmem:[%s4943_s30 + $0x428] sm:$0xf] }
 0x1eb   : > { %v3538_v8 = vld [vmem:[%s4943_s30 + $0x228] sm:$0xf]  ;;  %v3795_v53 = vor.u32 %v4305_v23, %v3794_v9  ;;  %v3667_v9 = vor.u32 %v4273_v57, %v3666_v56  ;;  %v4301_v23 = vld [vmem:[%s4943_s30 + $0x414] sm:$0xf0] }
 0x1ec   : > { %v2307_v1 = vadd.f32 %v2306_v55, %v2278_v54  ;;  %2508 = vmatmul.bf16.gmra.mxu0 %v5334_v3  ;;  %v3539_v33 = vor.u32 %v4241_v17, %v3538_v8  ;;  %v3522_v8 = vld [vmem:[%s4943_s30 + $0x208] sm:$0xf] }
 0x1ed   : > { %4125 = vmatmul.msk.bf16.gmra.mxu1 %vm2134_vm0, %v5336_v4  ;;  %2675 = vmatpush.bf16.msra.mxu2 %v3795_v53  ;;  %v3523_v53 = vor.u32 %v4237_v22, %v3522_v8  ;;  %v3636_v22 = vld [vmem:[%s4943_s30 + $0x2f8] sm:$0xf0] }
 0x1ee   : > { %2566 = vmatmul.bf16.gmra.mxu2 %v5119_v7  ;;  %2617 = vmatpush.bf16.msra.mxu0 %v3539_v33  ;;  %v3650_v33 = vld [vmem:[%s4943_s30 + $0x308] sm:$0xf] }
 0x1ef   : > { %2595 = vmatmul.bf16.gmra.mxu3 %v5123_v13  ;;  %2646 = vmatpush.bf16.msra.mxu1 %v3667_v9  ;;  %v3651_v56 = vor.u32 %v4269_v32, %v3650_v33 }
 0x1f1   : > { %v2335_v24 = vpop.f32.mrf.mxu2  ;;  %v2279_v42 = vpop.f32.mrf.mxu0 }
 0x1f2   : > { %v5608_v37 = vadd.f32 %v2335_v24, %v2307_v1  ;;  %v5610_v29 = vpop.f32.mrf.mxu3  ;;  %v2280_v54 = vadd.f32 %v2279_v42, %v5506_v49  ;;  %v2308_v55 = vpop.f32.mrf.mxu1  ;;  %v3778_v1 = vld [vmem:[%s4943_s30 + $0x408] sm:$0xf]  ;;  %v4333_v24 = vld [vmem:[%s4943_s30 + $0x514] sm:$0xf0]  ;;  %2618 = vmatpush.bf16.msra.mxu0 %v3523_v53 }
 0x1f3   : > { %v3779_v17 = vor.u32 %v4301_v23, %v3778_v1  ;;  %v3907_v38 = vor.u32 %v4333_v24, %v3906_v28  ;;  %2647 = vmatpush.bf16.msra.mxu1 %v3651_v56  ;;  %v4114_v23 = vld [vmem:[%s4943_s30 + $0x6a8] sm:$0xf] }
 0x1f4   : > { %v2309_v12 = vadd.f32 %v2308_v55, %v2280_v54 }
 0x1f5   : > { %2676 = vmatpush.bf16.msra.mxu2 %v3779_v17  ;;  %2705 = vmatpush.bf16.msra.mxu3 %v3907_v38  ;;  %v4231_v38 = vld [vmem:[%s4943_s30 + $0x1ec] sm:$0xf]  ;;  %v4385_v17 = vld [vmem:[%s4943_s30 + $0x6b4] sm:$0xf0] }
 0x1f6   : > { %v4115_v24 = vor.u32 %v4385_v17, %v4114_v23  ;;  %v4227_v23 = vld [vmem:[%s4943_s30 + $0x1cc] sm:$0xf]  ;;  %v3492_v17 = vld [vmem:[%s4943_s30 + $0x1d8] sm:$0xf0] }
 0x1f8   : > { %2729 = vmatpush.bf16.msrb.mxu0 %v4115_v24 }
 0x1f9   : > { %v2337_v49 = vpop.f32.mrf.mxu2  ;;  %v2282_v55 = vpop.f32.mrf.mxu0 }
 0x1fa   : > { %v5623_v42 = vadd.f32 %v2337_v49, %v2309_v12  ;;  %v5625_v54 = vpop.f32.mrf.mxu3  ;;  %v2283_v57 = vadd.f32 %v2282_v55, %v5521_v31  ;;  %v2311_v9 = vpop.f32.mrf.mxu1  ;;  %v3508_v12 = vld [vmem:[%s4943_s30 + $0x1f8] sm:$0xf0]  ;;  %v4263_v31 = vld [vmem:[%s4943_s30 + $0x2ec] sm:$0xf] }
 0x1fb   : > { %v3511_v8 = vor.u32 %v4231_v38, %v3508_v12  ;;  %v3639_v53 = vor.u32 %v4263_v31, %v3636_v22  ;;  %v3495_v31 = vor.u32 %v4227_v23, %v3492_v17  ;;  %v3620_v22 = vld [vmem:[%s4943_s30 + $0x2d8] sm:$0xf0]  ;;  %v4098_v23 = vld [vmem:[%s4943_s30 + $0x688] sm:$0xf]  ;;  %v4381_v17 = vld [vmem:[%s4943_s30 + $0x694] sm:$0xf0] }
 0x1fc   : > { %v2312_v1 = vadd.f32 %v2311_v9, %v2283_v57  ;;  %2513 = vmatmul.bf16.gmra.mxu0 %v5379_v51  ;;  %v4199_v57 = vld [vmem:[%s4943_s30 + $0xec] sm:$0xf]  ;;  %v3380_v9 = vld [vmem:[%s4943_s30 + $0xf8] sm:$0xf0] }
 0x1fd   : > { %4126 = vmatmul.msk.bf16.gmra.mxu1 %vm2134_vm0, %v5381_v52  ;;  %2785 = vmatpush.bf16.msrb.mxu2 %v3511_v8  ;;  %v3383_v12 = vor.u32 %v4199_v57, %v3380_v9  ;;  %v3364_v57 = vld [vmem:[%s4943_s30 + $0xd8] sm:$0xf0] }
 0x1fe   : > { %2571 = vmatmul.bf16.gmra.mxu2 %v5180_v60  ;;  %2814 = vmatpush.bf16.msrb.mxu3 %v3639_v53 }
 0x1ff   : > { %2600 = vmatmul.bf16.gmra.mxu3 %v5182_v61  ;;  %2756 = vmatpush.bf16.msrb.mxu1 %v3383_v12 }
 0x201   : > { %v2340_v28 = vpop.f32.mrf.mxu2  ;;  %v2284_v32 = vpop.f32.mrf.mxu0  ;;  %2786 = vmatpush.bf16.msrb.mxu2 %v3495_v31  ;;  %v4255_v31 = vld [vmem:[%s4943_s30 + $0x2ac] sm:$0xf] }
 0x202   : > { %v5639_v49 = vadd.f32 %v2340_v28, %v2312_v1  ;;  %v5641_v33 = vpop.f32.mrf.mxu3  ;;  %v2285_v55 = vadd.f32 %v2284_v32, %v5534_v21  ;;  %v2313_v56 = vpop.f32.mrf.mxu1  ;;  %v4259_v1 = vld [vmem:[%s4943_s30 + $0x2cc] sm:$0xf] }
 0x203   : > { %v3623_v8 = vor.u32 %v4259_v1, %v3620_v22  ;;  %v3476_v1 = vld [vmem:[%s4943_s30 + $0x1b8] sm:$0xf0] }
 0x204   : > { %6159 = vst [vmem:[#allocation26_spill] sm:$0xff] %v5639_v49  ;;  %v2314_v38 = vadd.f32 %v2313_v56, %v2285_v55  ;;  %v4195_v56 = vld [vmem:[%s4943_s30 + $0xcc] sm:$0xf] }
 0x205   : > { %2815 = vmatpush.bf16.msrb.mxu3 %v3623_v8  ;;  %v3367_v12 = vor.u32 %v4195_v56, %v3364_v57  ;;  %v3604_v8 = vld [vmem:[%s4943_s30 + $0x2b8] sm:$0xf0]  ;;  %v4235_v49 = vld [vmem:[%s4943_s30 + $0x20c] sm:$0xf] }
 0x207   : > { %2757 = vmatpush.bf16.msrb.mxu1 %v3367_v12 }
 0x209   : > { %v2342_v21 = vpop.f32.mrf.mxu2  ;;  %v2287_v53 = vpop.f32.mrf.mxu0 }
 0x20a   : > { %v5650_v28 = vadd.f32 %v2342_v21, %v2314_v38  ;;  %v5652_v24 = vpop.f32.mrf.mxu3  ;;  %v2288_v32 = vadd.f32 %v2287_v53, %v5551_v11  ;;  %v2316_v55 = vpop.f32.mrf.mxu1  ;;  %v4099_v38 = vor.u32 %v4381_v17, %v4098_v23  ;;  %v4223_v11 = vld [vmem:[%s4943_s30 + $0x1ac] sm:$0xf]  ;;  %v3607_v53 = vor.u32 %v4255_v31, %v3604_v8  ;;  %v3348_v17 = vld [vmem:[%s4943_s30 + $0xb8] sm:$0xf0] }
 0x20b   : > { %v3479_v22 = vor.u32 %v4223_v11, %v3476_v1  ;;  %v4191_v23 = vld [vmem:[%s4943_s30 + $0xac] sm:$0xf]  ;;  %v4082_v1 = vld [vmem:[%s4943_s30 + $0x668] sm:$0xf]  ;;  %v3460_v8 = vld [vmem:[%s4943_s30 + $0x198] sm:$0xf0] }
 0x20c   : > { %6160 = vst [vmem:[#allocation27_spill] sm:$0xff] %v5650_v28  ;;  %v2317_v9 = vadd.f32 %v2316_v55, %v2288_v32  ;;  %2518 = vmatmul.bf16.gmra.mxu0 %v5422_v35  ;;  %2816 = vmatpush.bf16.msrb.mxu3 %v3607_v53  ;;  %v3351_v11 = vor.u32 %v4191_v23, %v3348_v17  ;;  %v4219_v31 = vld [vmem:[%s4943_s30 + $0x18c] sm:$0xf]  ;;  %v3444_v17 = vld [vmem:[%s4943_s30 + $0x178] sm:$0xf0] }
 0x20d   : > { %4127 = vmatmul.msk.bf16.gmra.mxu1 %vm2134_vm0, %v5424_v36  ;;  %2730 = vmatpush.bf16.msrb.mxu0 %v4099_v38  ;;  %v4203_v36 = vld [vmem:[%s4943_s30 + $0x10c] sm:$0xf] }
 0x20e   : > { %2576 = vmatmul.bf16.gmra.mxu2 %v5241_v43  ;;  %2758 = vmatpush.bf16.msrb.mxu1 %v3351_v11  ;;  %v3463_v43 = vor.u32 %v4219_v31, %v3460_v8  ;;  %v4247_v31 = vld [vmem:[%s4943_s30 + $0x26c] sm:$0xf] }
 0x20f   : > { %2605 = vmatmul.bf16.gmra.mxu3 %v5243_v44  ;;  %2787 = vmatpush.bf16.msrb.mxu2 %v3479_v22  ;;  %v4377_v44 = vld [vmem:[%s4943_s30 + $0x674] sm:$0xf0] }
 0x211   : > { %v2345_v21 = vpop.f32.mrf.mxu2  ;;  %v2289_v56 = vpop.f32.mrf.mxu0 }
 0x212   : > { %v5668_v32 = vadd.f32 %v2345_v21, %v2317_v9  ;;  %v5670_v55 = vpop.f32.mrf.mxu3  ;;  %v2290_v57 = vadd.f32 %v2289_v56, %v5562_v6  ;;  %v2318_v12 = vpop.f32.mrf.mxu1  ;;  %v4083_v9 = vor.u32 %v4377_v44, %v4082_v1  ;;  %v4251_v21 = vld [vmem:[%s4943_s30 + $0x28c] sm:$0xf]  ;;  %v4373_v1 = vld [vmem:[%s4943_s30 + $0x654] sm:$0xf0] }
 0x213   : > { %6162 = vst [vmem:[#allocation29_spill] sm:$0xff] %v5670_v55  ;;  %2788 = vmatpush.bf16.msrb.mxu2 %v3463_v43  ;;  %v4215_v43 = vld [vmem:[%s4943_s30 + $0x16c] sm:$0xf] }
 0x214   : > { %6161 = vst [vmem:[#allocation28_spill] sm:$0xff] %v5668_v32  ;;  %v2319_v38 = vadd.f32 %v2318_v12, %v2290_v57  ;;  %v3588_v32 = vld [vmem:[%s4943_s30 + $0x298] sm:$0xf0]  ;;  %2731 = vmatpush.bf16.msrb.mxu0 %v4083_v9  ;;  %v4187_v12 = vld [vmem:[%s4943_s30 + $0x8c] sm:$0xf]  ;;  %v3447_v11 = vor.u32 %v4215_v43, %v3444_v17 }
 0x215   : > { %v3591_v22 = vor.u32 %v4251_v21, %v3588_v32  ;;  %v3332_v32 = vld [vmem:[%s4943_s30 + $0x98] sm:$0xf0] }
 0x216   : > { %v3335_v23 = vor.u32 %v4187_v12, %v3332_v32  ;;  %v3572_v9 = vld [vmem:[%s4943_s30 + $0x278] sm:$0xf0] }
 0x217   : > { %2817 = vmatpush.bf16.msrb.mxu3 %v3591_v22  ;;  %v3575_v22 = vor.u32 %v4247_v31, %v3572_v9  ;;  %2789 = vmatpush.bf16.msrb.mxu2 %v3447_v11  ;;  %v3316_v43 = vld [vmem:[%s4943_s30 + $0x78] sm:$0xf0] }
 0x218   : > { %2759 = vmatpush.bf16.msrb.mxu1 %v3335_v23  ;;  %v4183_v23 = vld [vmem:[%s4943_s30 + $0x6c] sm:$0xf] }
 0x219   : > { %v2347_v6 = vpop.f32.mrf.mxu2  ;;  %v5685_v44 = vpop.f32.mrf.mxu0  ;;  %v3319_v17 = vor.u32 %v4183_v23, %v3316_v43  ;;  %v4179_v23 = vld [vmem:[%s4943_s30 + $0x4c] sm:$0xf]  ;;  %v3300_v43 = vld [vmem:[%s4943_s30 + $0x58] sm:$0xf0] }
 0x21a   : > { %v5681_v53 = vadd.f32 %v2347_v6, %v2319_v38  ;;  %v5683_v56 = vpop.f32.mrf.mxu3  ;;  %v5687_v57 = vpop.f32.mrf.mxu1  ;;  %v4066_v38 = vld [vmem:[%s4943_s30 + $0x648] sm:$0xf] }
 0x21b   : > { %6164 = vst [vmem:[#allocation31_spill] sm:$0xff] %v5683_v56  ;;  %v4067_v21 = vor.u32 %v4373_v1, %v4066_v38  ;;  %2818 = vmatpush.bf16.msrb.mxu3 %v3575_v22  ;;  %v3556_v1 = vld [vmem:[%s4943_s30 + $0x258] sm:$0xf0] }
 0x21c   : > { %6163 = vst [vmem:[#allocation30_spill] sm:$0xff] %v5681_v53  ;;  %2619 = vmatmul.bf16.vlgmr.msra.gmra.mxu0 %v5050_v16  ;;  %2760 = vmatpush.bf16.msrb.mxu1 %v3319_v17  ;;  %v3284_v53 = vld [vmem:[%s4943_s30 + $0x38] sm:$0xf0] }
 0x21d   : > { %2648 = vmatmul.bf16.vlgmr.msra.gmra.mxu1 %v5054_v19  ;;  %2732 = vmatpush.bf16.msrb.mxu0 %v4067_v21  ;;  %v4243_v19 = vld [vmem:[%s4943_s30 + $0x24c] sm:$0xf]  ;;  %v3396_v56 = vld [vmem:[%s4943_s30 + $0x118] sm:$0xf0] }
 0x21e   : > { %2677 = vmatmul.bf16.vlgmr.msra.gmra.mxu2 %v5287_v25  ;;  %v3428_v25 = vld [vmem:[%s4943_s30 + $0x158] sm:$0xf0]  ;;  %v3559_v31 = vor.u32 %v4243_v19, %v3556_v1  ;;  %v4050_v19 = vld [vmem:[%s4943_s30 + $0x628] sm:$0xf] }
 0x21f   : > { %2706 = vmatmul.bf16.vlgmr.msra.gmra.mxu3 %v5289_v26  ;;  %v4211_v26 = vld [vmem:[%s4943_s30 + $0x14c] sm:$0xf]  ;;  %v3412_v1 = vld [vmem:[%s4943_s30 + $0x138] sm:$0xf0] }
 0x220   : > { %v3431_v38 = vor.u32 %v4211_v26, %v3428_v25  ;;  %2819 = vmatpush.bf16.msrb.mxu3 %v3559_v31  ;;  %v3303_v25 = vor.u32 %v4179_v23, %v3300_v43  ;;  %v4369_v26 = vld [vmem:[%s4943_s30 + $0x634] sm:$0xf0]  ;;  %v4239_v31 = vld [vmem:[%s4943_s30 + $0x22c] sm:$0xf]  ;;  %v3540_v43 = vld [vmem:[%s4943_s30 + $0x238] sm:$0xf0] }
 0x221   : > { %v5701_v8 = vpop.f32.mrf.mxu2  ;;  %v5705_v12 = vpop.f32.mrf.mxu0  ;;  %v4051_v17 = vor.u32 %v4369_v26, %v4050_v19  ;;  %v3543_v19 = vor.u32 %v4239_v31, %v3540_v43  ;;  %v3524_v31 = vld [vmem:[%s4943_s30 + $0x218] sm:$0xf0]  ;;  %v3399_v43 = vor.u32 %v4203_v36, %v3396_v56  ;;  %v4359_v56 = vld [vmem:[%s4943_s30 + $0x5ec] sm:$0xf] }
 0x222   : > { %v5703_v6 = vpop.f32.mrf.mxu3  ;;  %v5707_v32 = vpop.f32.mrf.mxu1  ;;  %2790 = vmatpush.bf16.msrb.mxu2 %v3431_v38  ;;  %2761 = vmatpush.bf16.msrb.mxu1 %v3303_v25  ;;  %v4207_v38 = vld [vmem:[%s4943_s30 + $0x12c] sm:$0xf]  ;;  %v3527_v61 = vor.u32 %v4235_v49, %v3524_v31 }
 0x223   : > { %2733 = vmatpush.bf16.msrb.mxu0 %v4051_v17  ;;  %v3415_v23 = vor.u32 %v4207_v38, %v3412_v1  ;;  %v4034_v38 = vld [vmem:[%s4943_s30 + $0x608] sm:$0xf]  ;;  %v4365_v1 = vld [vmem:[%s4943_s30 + $0x614] sm:$0xf0]  ;;  %v4295_v31 = vld [vmem:[%s4943_s30 + $0x3ec] sm:$0xf] }
 0x224   : > { %2820 = vmatpush.bf16.msrb.mxu3 %v3543_v19  ;;  %v4035_v28 = vor.u32 %v4365_v1, %v4034_v38  ;;  %v4171_v19 = vld [vmem:[%s4943_s30 + $0xc] sm:$0xf]  ;;  %v4020_v1 = vld [vmem:[%s4943_s30 + $0x5f8] sm:$0xf0] }
 0x226   : > { %2791 = vmatpush.bf16.msrb.mxu2 %v3415_v23 }
 0x227   : > { %2734 = vmatpush.bf16.msrb.mxu0 %v4035_v28 }
 0x228   : > { %2821 = vmatpush.bf16.msrb.mxu3 %v3527_v61 }
 0x229   : > { %v5715_v11 = vpop.f32.mrf.mxu2  ;;  %v5719_v21 = vpop.f32.mrf.mxu0 }
 0x22a   : > { %v5717_v9 = vpop.f32.mrf.mxu3  ;;  %v5721_v22 = vpop.f32.mrf.mxu1  ;;  %2792 = vmatpush.bf16.msrb.mxu2 %v3399_v43  ;;  %v4023_v43 = vor.u32 %v4359_v56, %v4020_v1 }
 0x22c   : > { %2624 = vmatmul.bf16.gmra.mxu0 %v5125_v14 }
 0x22d   : > { %2653 = vmatmul.bf16.gmra.mxu1 %v5129_v20 }
 0x22e   : > { %2682 = vmatmul.bf16.gmra.mxu2 %v5332_v2  ;;  %v4175_v2 = vld [vmem:[%s4943_s30 + $0x2c] sm:$0xf] }
 0x22f   : > { %2711 = vmatmul.bf16.gmra.mxu3 %v5334_v3  ;;  %v3287_v17 = vor.u32 %v4175_v2, %v3284_v53  ;;  %v3268_v2 = vld [vmem:[%s4943_s30 + $0x18] sm:$0xf0]  ;;  %2901 = vmatpush.bf16.msra.mxu2 %v4023_v43  ;;  %v4379_v43 = vld [vmem:[%s4943_s30 + $0x68c] sm:$0xf] }
 0x230   : > { %v3271_v38 = vor.u32 %v4171_v19, %v3268_v2  ;;  %v3764_v19 = vld [vmem:[%s4943_s30 + $0x3f8] sm:$0xf0]  ;;  %v4383_v2 = vld [vmem:[%s4943_s30 + $0x6ac] sm:$0xf] }
 0x231   : > { %v5735_v20 = vpop.f32.mrf.mxu2  ;;  %v5739_v3 = vpop.f32.mrf.mxu0  ;;  %2762 = vmatpush.bf16.msrb.mxu1 %v3287_v17 }
 0x232   : > { %v5737_v26 = vpop.f32.mrf.mxu3  ;;  %v5741_v25 = vpop.f32.mrf.mxu1 }
 0x235   : > { %2763 = vmatpush.bf16.msrb.mxu1 %v3271_v38  ;;  %v4116_v38 = vld [vmem:[%s4943_s30 + $0x6b8] sm:$0xf0] }
 0x239   : > { %v5751_v23 = vpop.f32.mrf.mxu2  ;;  %v5757_v60 = vpop.f32.mrf.mxu0 }
 0x23a   : > { %v5755_v53 = vpop.f32.mrf.mxu3  ;;  %v5759_v17 = vpop.f32.mrf.mxu1 }
 0x23c   : > { %2629 = vmatmul.bf16.gmra.mxu0 %v5184_v62  ;;  %v3892_v62 = vld [vmem:[%s4943_s30 + $0x4f8] sm:$0xf0] }
 0x23d   : > { %2658 = vmatmul.bf16.gmra.mxu1 %v5186_v63  ;;  %v4327_v63 = vld [vmem:[%s4943_s30 + $0x4ec] sm:$0xf] }
 0x23e   : > { %2687 = vmatmul.bf16.gmra.mxu2 %v5377_v50  ;;  %v3767_v50 = vor.u32 %v4295_v31, %v3764_v19  ;;  %v3895_v52 = vor.u32 %v4327_v63, %v3892_v62  ;;  %v4355_v31 = vld [vmem:[%s4943_s30 + $0x5cc] sm:$0xf]  ;;  %v4004_v19 = vld [vmem:[%s4943_s30 + $0x5d8] sm:$0xf0]  ;;  %v2360_v62 = vadd.f32 %v5579_v48, %v5442_v59 }
 0x23f   : > { %2716 = vmatmul.bf16.gmra.mxu3 %v5379_v51  ;;  %v4119_v51 = vor.u32 %v4383_v2, %v4116_v38  ;;  %v4291_v2 = vld [vmem:[%s4943_s30 + $0x3cc] sm:$0xf]  ;;  %v4007_v38 = vor.u32 %v4355_v31, %v4004_v19 }
 0x240   : > { %2843 = vmatpush.bf16.msra.mxu0 %v3767_v50  ;;  %2872 = vmatpush.bf16.msra.mxu1 %v3895_v52  ;;  %v4351_v31 = vld [vmem:[%s4943_s30 + $0x5ac] sm:$0xf] }
 0x241   : > { %v5765_v61 = vpop.f32.mrf.mxu2  ;;  %v5769_v49 = vpop.f32.mrf.mxu0  ;;  %2932 = vmatpush.bf16.msra.mxu3 %v4119_v51  ;;  %v2389_v51 = vadd.f32 %v5685_v44, %v2360_v62  ;;  %2902 = vmatpush.bf16.msra.mxu2 %v4007_v38  ;;  %v4100_v44 = vld [vmem:[%s4943_s30 + $0x698] sm:$0xf0]  ;;  %v4287_v38 = vld [vmem:[%s4943_s30 + $0x3ac] sm:$0xf] }
 0x242   : > { %v5767_v36 = vpop.f32.mrf.mxu3  ;;  %6166 = vst [vmem:[#allocation33_spill] sm:$0xff] %v5769_v49  ;;  %v5771_v28 = vpop.f32.mrf.mxu1  ;;  %v3876_v49 = vld [vmem:[%s4943_s30 + $0x4d8] sm:$0xf0]  ;;  %v4103_v19 = vor.u32 %v4379_v43, %v4100_v44 }
 0x243   : > { %6165 = vst [vmem:[#allocation32_spill] sm:$0xff] %v5767_v36  ;;  %v4323_v36 = vld [vmem:[%s4943_s30 + $0x4cc] sm:$0xf]  ;;  %v3732_v62 = vld [vmem:[%s4943_s30 + $0x3b8] sm:$0xf0] }
 0x244   : > { %6167 = vst [vmem:[#allocation34_spill] sm:$0xff] %v5771_v28  ;;  %v3748_v28 = vld [vmem:[%s4943_s30 + $0x3d8] sm:$0xf0]  ;;  %v3879_v50 = vor.u32 %v4323_v36, %v3876_v49  ;;  %v2418_v49 = vadd.f32 %v5687_v57, %v2389_v51 }
 0x245   : > { %v3751_v63 = vor.u32 %v4291_v2, %v3748_v28  ;;  %v3988_v2 = vld [vmem:[%s4943_s30 + $0x5b8] sm:$0xf0]  ;;  %2933 = vmatpush.bf16.msra.mxu3 %v4103_v19  ;;  %v4375_v19 = vld [vmem:[%s4943_s30 + $0x66c] sm:$0xf] }
 0x246   : > { %2873 = vmatpush.bf16.msra.mxu1 %v3879_v50  ;;  %v2447_v50 = vadd.f32 %v5701_v8, %v2418_v49  ;;  %v3860_v57 = vld [vmem:[%s4943_s30 + $0x4b8] sm:$0xf0] }
 0x247   : > { %2844 = vmatpush.bf16.msra.mxu0 %v3751_v63  ;;  %v2362_v63 = vadd.f32 %v5592_v39, %v5457_v30 }
 0x248   : > { %v2476_v39 = vadd.f32 %v5703_v6, %v2447_v50  ;;  %v4084_v6 = vld [vmem:[%s4943_s30 + $0x678] sm:$0xf0] }
 0x249   : > { %v5781_v55 = vpop.f32.mrf.mxu2  ;;  %v5785_v1 = vpop.f32.mrf.mxu0 }
 0x24a   : > { %v5783_v56 = vpop.f32.mrf.mxu3  ;;  %v5787_v0 = vpop.f32.mrf.mxu1 }
 0x24c   : > { %2634 = vmatmul.bf16.gmra.mxu0 %v5245_v45  ;;  %v2391_v45 = vadd.f32 %v5705_v12, %v2362_v63  ;;  %v4347_v12 = vld [vmem:[%s4943_s30 + $0x58c] sm:$0xf] }
 0x24d   : > { %2663 = vmatmul.bf16.gmra.mxu1 %v5247_v46  ;;  %v4319_v46 = vld [vmem:[%s4943_s30 + $0x4ac] sm:$0xf] }
 0x24e   : > { %2692 = vmatmul.bf16.gmra.mxu2 %v5420_v34  ;;  %v3735_v34 = vor.u32 %v4287_v38, %v3732_v62  ;;  %v3863_v51 = vor.u32 %v4319_v46, %v3860_v57  ;;  %v2420_v44 = vadd.f32 %v5707_v32, %v2391_v45  ;;  %v4283_v38 = vld [vmem:[%s4943_s30 + $0x38c] sm:$0xf]  ;;  %v3716_v62 = vld [vmem:[%s4943_s30 + $0x398] sm:$0xf0]  ;;  %v4087_v45 = vor.u32 %v4375_v19, %v4084_v6 }
 0x24f   : > { %2721 = vmatmul.bf16.gmra.mxu3 %v5422_v35  ;;  %v3991_v35 = vor.u32 %v4351_v31, %v3988_v2  ;;  %v3719_v32 = vor.u32 %v4283_v38, %v3716_v62  ;;  %v4315_v57 = vld [vmem:[%s4943_s30 + $0x48c] sm:$0xf]  ;;  %v3700_v38 = vld [vmem:[%s4943_s30 + $0x378] sm:$0xf0] }
 0x250   : > { %2845 = vmatpush.bf16.msra.mxu0 %v3735_v34  ;;  %2874 = vmatpush.bf16.msra.mxu1 %v3863_v51  ;;  %v2365_v34 = vadd.f32 %v5610_v29, %v5470_v5  ;;  %v2449_v63 = vadd.f32 %v5715_v11, %v2420_v44  ;;  %v3844_v51 = vld [vmem:[%s4943_s30 + $0x498] sm:$0xf0]  ;;  %v4279_v19 = vld [vmem:[%s4943_s30 + $0x36c] sm:$0xf] }
 0x251   : > { %v5802_v52 = vpop.f32.mrf.mxu2  ;;  %v5806_v36 = vpop.f32.mrf.mxu0  ;;  %2903 = vmatpush.bf16.msra.mxu2 %v3991_v35  ;;  %v3972_v35 = vld [vmem:[%s4943_s30 + $0x598] sm:$0xf0]  ;;  %v3847_v29 = vor.u32 %v4315_v57, %v3844_v51  ;;  %2934 = vmatpush.bf16.msra.mxu3 %v4087_v45  ;;  %v4371_v62 = vld [vmem:[%s4943_s30 + $0x64c] sm:$0xf]  ;;  %v3703_v45 = vor.u32 %v4279_v19, %v3700_v38  ;;  %v2370_v19 = vadd.f32 %v5641_v33, %v5498_v18 }
 0x252   : > { %v5804_v48 = vpop.f32.mrf.mxu3  ;;  %v5809_v28 = vpop.f32.mrf.mxu1  ;;  %v3975_v2 = vor.u32 %v4347_v12, %v3972_v35  ;;  %v2478_v44 = vadd.f32 %v5717_v9, %v2449_v63  ;;  %v4343_v12 = vld [vmem:[%s4943_s30 + $0x56c] sm:$0xf]  ;;  %v3956_v35 = vld [vmem:[%s4943_s30 + $0x578] sm:$0xf0] }
 0x253   : > { %v3959_v6 = vor.u32 %v4343_v12, %v3956_v35  ;;  %v4311_v57 = vld [vmem:[%s4943_s30 + $0x46c] sm:$0xf]  ;;  %v3828_v51 = vld [vmem:[%s4943_s30 + $0x478] sm:$0xf0] }
 0x254   : > { %2846 = vmatpush.bf16.msra.mxu0 %v3719_v32  ;;  %2875 = vmatpush.bf16.msra.mxu1 %v3847_v29  ;;  %v3831_v29 = vor.u32 %v4311_v57, %v3828_v51  ;;  %v4275_v12 = vld [vmem:[%s4943_s30 + $0x34c] sm:$0xf]  ;;  %v3812_v38 = vld [vmem:[%s4943_s30 + $0x458] sm:$0xf0] }
 0x255   : > { %2904 = vmatpush.bf16.msra.mxu2 %v3975_v2  ;;  %v4307_v35 = vld [vmem:[%s4943_s30 + $0x44c] sm:$0xf]  ;;  %v4052_v51 = vld [vmem:[%s4943_s30 + $0x638] sm:$0xf0] }
 0x256   : > { %v4367_v57 = vld [vmem:[%s4943_s30 + $0x62c] sm:$0xf] }
 0x258   : > { %2847 = vmatpush.bf16.msra.mxu0 %v3703_v45  ;;  %2876 = vmatpush.bf16.msra.mxu1 %v3831_v29 }
 0x259   : > { %v5824_v8 = vpop.f32.mrf.mxu2  ;;  %v2504_v43 = vpop.f32.mrf.mxu0  ;;  %2905 = vmatpush.bf16.msra.mxu2 %v3959_v6 }
 0x25a   : > { %v5826_v49 = vpop.f32.mrf.mxu3  ;;  %v2505_v31 = vadd.f32 %v2504_v43, %v2476_v39  ;;  %v2533_v46 = vpop.f32.mrf.mxu1  ;;  %v2959_v39 = vmax.f32 %v5577_v47, 0.0  ;;  %v2394_v43 = vadd.f32 %v5719_v21, %v2365_v34  ;;  %v2367_v34 = vadd.f32 %v5625_v54, %v5487_v41 }
 0x25c   : > { %v2534_v50 = vadd.f32 %v2533_v46, %v2505_v31  ;;  %4128 = vmatmul.msk.bf16.vlgmr.msrb.gmra.mxu0 %vm2134_vm0, %v5291_v27  ;;  %v2396_v54 = vadd.f32 %v5739_v3, %v2367_v34 }
 0x25d   : > { %2764 = vmatmul.bf16.vlgmr.msrb.gmra.mxu1 %v5043_v10 }
 0x25e   : > { %2793 = vmatmul.bf16.vlgmr.msrb.gmra.mxu2 %v5048_v15  ;;  %v2960_v11 = vmax.f32 %v2534_v50, 0.0 }
 0x25f   : > { %2822 = vmatmul.bf16.vlgmr.msrb.gmra.mxu3 %v5050_v16  ;;  %v2423_v16 = vadd.f32 %v5721_v22, %v2394_v43  ;;  %v4068_v22 = vld [vmem:[%s4943_s30 + $0x658] sm:$0xf0] }
 0x260   : > { %v2991_v31 = vpack.c.bf16 %v2960_v11, %v2959_v39  ;;  %v4071_v32 = vor.u32 %v4371_v62, %v4068_v22  ;;  %v2963_v39 = vmax.f32 %v5590_v40, 0.0  ;;  %v2425_v40 = vadd.f32 %v5741_v25, %v2396_v54  ;;  %v3924_v54 = vld [vmem:[%s4943_s30 + $0x538] sm:$0xf0] }
 0x261   : > { %v2562_v10 = vpop.f32.mrf.mxu2  ;;  %v2506_v21 = vpop.f32.mrf.mxu0  ;;  %v2452_v63 = vadd.f32 %v5735_v20, %v2423_v16  ;;  %v3940_v16 = vld [vmem:[%s4943_s30 + $0x558] sm:$0xf0]  ;;  %v3815_v62 = vor.u32 %v4307_v35, %v3812_v38  ;;  %v2967_v22 = vmax.f32 %v5608_v37, 0.0  ;;  %v4331_v35 = vld [vmem:[%s4943_s30 + $0x50c] sm:$0xf] }
 0x262   : > { %v2563_v15 = vadd.f32 %v2562_v10, %v5442_v59  ;;  %v2591_v47 = vpop.f32.mrf.mxu3  ;;  %3007 = vst [vmem:[%s5852_s12] sm:$0xff] %v2991_v31  ;;  %v2507_v46 = vadd.f32 %v2506_v21, %v2478_v44  ;;  %v2535_v9 = vpop.f32.mrf.mxu1  ;;  %2935 = vmatpush.bf16.msra.mxu3 %v4071_v32  ;;  %v4339_v21 = vld [vmem:[%s4943_s30 + $0x54c] sm:$0xf]  ;;  %v2454_v34 = vadd.f32 %v5751_v23, %v2425_v40 }
 0x263   : > { %v2481_v20 = vadd.f32 %v5737_v26, %v2452_v63  ;;  %v3684_v26 = vld [vmem:[%s4943_s30 + $0x358] sm:$0xf0]  ;;  %v2399_v63 = vadd.f32 %v5757_v60, %v2370_v19  ;;  %2877 = vmatpush.bf16.msra.mxu1 %v3815_v62 }
 0x264   : > { %v5860_v2 = vadd.f32 %v2591_v47, %v2563_v15  ;;  %v2536_v50 = vadd.f32 %v2535_v9, %v2507_v46  ;;  %v3943_v9 = vor.u32 %v4339_v21, %v3940_v16  ;;  %v3687_v25 = vor.u32 %v4275_v12, %v3684_v26  ;;  %v6168_v21 = vld [vmem:[#allocation33_spill] sm:$0xff]  ;;  %v3908_v19 = vld [vmem:[%s4943_s30 + $0x518] sm:$0xf0] }
 0x265   : > { %v2428_v60 = vadd.f32 %v5759_v17, %v2399_v63  ;;  %v3911_v38 = vor.u32 %v4331_v35, %v3908_v19  ;;  %v4036_v62 = vld [vmem:[%s4943_s30 + $0x618] sm:$0xf0] }
 0x266   : > { %v2964_v43 = vmax.f32 %v2536_v50, 0.0  ;;  %2906 = vmatpush.bf16.msra.mxu2 %v3943_v9  ;;  %2848 = vmatpush.bf16.msra.mxu0 %v3687_v25  ;;  %v3652_v63 = vld [vmem:[%s4943_s30 + $0x318] sm:$0xf0] }
 0x268   : > { %v2993_v11 = vpack.c.bf16 %v2964_v43, %v2963_v39  ;;  %v4335_v39 = vld [vmem:[%s4943_s30 + $0x52c] sm:$0xf] }
 0x269   : > { %v2564_v44 = vpop.f32.mrf.mxu2  ;;  %v2509_v15 = vpop.f32.mrf.mxu0  ;;  %v4271_v43 = vld [vmem:[%s4943_s30 + $0x32c] sm:$0xf]  ;;  %v3927_v17 = vor.u32 %v4335_v39, %v3924_v54 }
 0x26a   : > { %v2565_v31 = vadd.f32 %v2564_v44, %v5457_v30  ;;  %v2593_v10 = vpop.f32.mrf.mxu3  ;;  %3009 = vst [vmem:[%s5852_s12 + $0x10] sm:$0xff] %v2993_v11  ;;  %v2510_v3 = vadd.f32 %v2509_v15, %v2481_v20  ;;  %v2538_v47 = vpop.f32.mrf.mxu1  ;;  %v2372_v20 = vadd.f32 %v5652_v24, %v5515_v58  ;;  %v2457_v11 = vadd.f32 %v5765_v61, %v2428_v60  ;;  %v3796_v15 = vld [vmem:[%s4943_s30 + $0x438] sm:$0xf0]  ;;  %v6169_v61 = vld [vmem:[#allocation32_spill] sm:$0xff] }
 0x26b   : > { %2907 = vmatpush.bf16.msra.mxu2 %v3927_v17  ;;  %v3780_v60 = vld [vmem:[%s4943_s30 + $0x418] sm:$0xf0] }
 0x26c   : > { %v5876_v46 = vadd.f32 %v2593_v10, %v2565_v31  ;;  %v2539_v6 = vadd.f32 %v2538_v47, %v2510_v3  ;;  %4129 = vmatmul.msk.bf16.gmra.mxu0 %vm2134_vm0, %v5336_v4  ;;  %v3668_v31 = vld [vmem:[%s4943_s30 + $0x338] sm:$0xf0]  ;;  %v4303_v10 = vld [vmem:[%s4943_s30 + $0x42c] sm:$0xf]  ;;  %v2971_v47 = vmax.f32 %v5623_v42, 0.0  ;;  %v2401_v16 = vadd.f32 %v6168_v21, %v2372_v20  ;;  %v6174_v20 = vld [vmem:[#allocation6_spill] sm:$0xff] }
 0x26d   : > { %2769 = vmatmul.bf16.gmra.mxu1 %v5119_v7  ;;  %v2483_v7 = vadd.f32 %v5755_v53, %v2454_v34  ;;  %v4055_v53 = vor.u32 %v4367_v57, %v4052_v51  ;;  %v3671_v40 = vor.u32 %v4271_v43, %v3668_v31  ;;  %v3799_v3 = vor.u32 %v4303_v10, %v3796_v15  ;;  %v4363_v34 = vld [vmem:[%s4943_s30 + $0x60c] sm:$0xf]  ;;  %v6171_v57 = vld [vmem:[#allocation24_spill] sm:$0xff] }
 0x26e   : > { %2798 = vmatmul.bf16.gmra.mxu2 %v5123_v13  ;;  %v2968_v33 = vmax.f32 %v2539_v6, 0.0  ;;  %v2486_v9 = vadd.f32 %v6169_v61, %v2457_v11  ;;  %v6172_v51 = vld [vmem:[#allocation29_spill] sm:$0xff]  ;;  %v6173_v43 = vld [vmem:[#allocation20_spill] sm:$0xff]  ;;  %v6175_v11 = vld [vmem:[#allocation7_spill] sm:$0xff] }
 0x26f   : > { %2827 = vmatmul.bf16.gmra.mxu3 %v5125_v14  ;;  %2849 = vmatpush.bf16.msra.mxu0 %v3671_v40  ;;  %v6177_v15 = vld [vmem:[#allocation8_spill] sm:$0xff] }
 0x270   : > { %v2995_v13 = vpack.c.bf16 %v2968_v33, %v2967_v22  ;;  %2936 = vmatpush.bf16.msra.mxu3 %v4055_v53  ;;  %2878 = vmatpush.bf16.msra.mxu1 %v3799_v3  ;;  %v4267_v22 = vld [vmem:[%s4943_s30 + $0x30c] sm:$0xf]  ;;  %v6170_v33 = vld [vmem:[#allocation34_spill] sm:$0xff]  ;;  %v2375_v53 = vadd.f32 %v6172_v51, %v6171_v57 }
 0x271   : > { %v2567_v23 = vpop.f32.mrf.mxu2  ;;  %v2511_v45 = vpop.f32.mrf.mxu0  ;;  %2908 = vmatpush.bf16.msra.mxu2 %v3911_v38 }
 0x272   : > { %v2568_v50 = vadd.f32 %v2567_v23, %v5470_v5  ;;  %v2596_v37 = vpop.f32.mrf.mxu3  ;;  %3011 = vst [vmem:[%s5852_s12 + $0x20] sm:$0xff] %v2995_v13  ;;  %v2512_v14 = vadd.f32 %v2511_v45, %v2483_v7  ;;  %v2540_v32 = vpop.f32.mrf.mxu1  ;;  %v2430_v7 = vadd.f32 %v6170_v33, %v2401_v16  ;;  %v4299_v45 = vld [vmem:[%s4943_s30 + $0x40c] sm:$0xf]  ;;  %v2404_v31 = vadd.f32 %v5785_v1, %v2375_v53 }
 0x274   : > { %v5898_v29 = vadd.f32 %v2596_v37, %v2568_v50  ;;  %v2541_v44 = vadd.f32 %v2540_v32, %v2512_v14  ;;  %v4039_v50 = vor.u32 %v4363_v34, %v4036_v62  ;;  %v3655_v37 = vor.u32 %v4267_v22, %v3652_v63  ;;  %v6180_v34 = vld [vmem:[#allocation27_spill] sm:$0xff] }
 0x275   : > { %v3783_v32 = vor.u32 %v4299_v45, %v3780_v60  ;;  %v2459_v39 = vadd.f32 %v5781_v55, %v2430_v7  ;;  %v6183_v45 = vld [vmem:[#allocation11_spill] sm:$0xff]  ;;  %v6184_v60 = vld [vmem:[#allocation28_spill] sm:$0xff] }
 0x276   : > { %v2972_v24 = vmax.f32 %v2541_v44, 0.0  ;;  %2937 = vmatpush.bf16.msra.mxu3 %v4039_v50  ;;  %v6176_v44 = vld [vmem:[#allocation26_spill] sm:$0xff]  ;;  %2850 = vmatpush.bf16.msra.mxu0 %v3655_v37  ;;  %v6181_v37 = vld [vmem:[#allocation23_spill] sm:$0xff] }
 0x277   : > { %v2975_v17 = vmax.f32 %v6176_v44, 0.0  ;;  %2879 = vmatpush.bf16.msra.mxu1 %v3783_v32  ;;  %v2488_v55 = vadd.f32 %v5783_v56, %v2459_v39  ;;  %v2983_v32 = vmax.f32 %v6184_v60, 0.0 }
 0x278   : > { %v2997_v12 = vpack.c.bf16 %v2972_v24, %v2971_v47  ;;  %v2433_v24 = vadd.f32 %v5787_v0, %v2404_v31 }
 0x279   : > { %v2569_v26 = vpop.f32.mrf.mxu2  ;;  %v2514_v25 = vpop.f32.mrf.mxu0 }
 0x27a   : > { %v2570_v42 = vadd.f32 %v2569_v26, %v5487_v41  ;;  %v2598_v6 = vpop.f32.mrf.mxu3  ;;  %3013 = vst [vmem:[%s5852_s12 + $0x30] sm:$0xff] %v2997_v12  ;;  %v2515_v13 = vadd.f32 %v2514_v25, %v2486_v9  ;;  %v2543_v23 = vpop.f32.mrf.mxu1  ;;  %v6178_v12 = vld [vmem:[#allocation25_spill] sm:$0xff]  ;;  %v6179_v26 = vld [vmem:[#allocation31_spill] sm:$0xff]  ;;  %v2462_v19 = vadd.f32 %v5802_v52, %v2433_v24 }
 0x27b   : > { %v2377_v35 = vadd.f32 %v6179_v26, %v6178_v12 }
 0x27c   : > { %v5923_v14 = vadd.f32 %v2598_v6, %v2570_v42  ;;  %v2544_v54 = vadd.f32 %v2543_v23, %v2515_v13  ;;  %4130 = vmatmul.msk.bf16.gmra.mxu0 %vm2134_vm0, %v6173_v43  ;;  %v2979_v42 = vmax.f32 %v6180_v34, 0.0  ;;  %v2491_v38 = vadd.f32 %v5804_v48, %v2462_v19  ;;  %v6182_v48 = vld [vmem:[#allocation10_spill] sm:$0xff] }
 0x27d   : > { %2774 = vmatmul.bf16.gmra.mxu1 %v6174_v20  ;;  %v2406_v6 = vadd.f32 %v5806_v36, %v2377_v35  ;;  %v6187_v35 = vld [vmem:[#allocation4_spill] sm:$0xff]  ;;  %v6188_v19 = vld [vmem:[#allocation14_spill] sm:$0xff] }
 0x27e   : > { %2803 = vmatmul.bf16.gmra.mxu2 %v6175_v11  ;;  %v2976_v10 = vmax.f32 %v2544_v54, 0.0 }
 0x27f   : > { %2832 = vmatmul.bf16.gmra.mxu3 %v6177_v15  ;;  %v2435_v7 = vadd.f32 %v5809_v28, %v2406_v6  ;;  %v6185_v28 = vld [vmem:[#allocation12_spill] sm:$0xff]  ;;  %v6186_v15 = vld [vmem:[#allocation30_spill] sm:$0xff] }
 0x280   : > { %v2999_v40 = vpack.c.bf16 %v2976_v10, %v2975_v17 }
 0x281   : > { %v2572_v3 = vpop.f32.mrf.mxu2  ;;  %v2516_v16 = vpop.f32.mrf.mxu0  ;;  %v2464_v50 = vadd.f32 %v5824_v8, %v2435_v7 }
 0x282   : > { %v2573_v47 = vadd.f32 %v2572_v3, %v5498_v18  ;;  %v2601_v21 = vpop.f32.mrf.mxu3  ;;  %3015 = vst [vmem:[%s5852_s12 + $0x40] sm:$0xff] %v2999_v40  ;;  %v2517_v61 = vadd.f32 %v2516_v16, %v2488_v55  ;;  %v2545_v9 = vpop.f32.mrf.mxu1  ;;  %v2987_v55 = vmax.f32 %v6186_v15, 0.0 }
 0x283   : > { %v2493_v53 = vadd.f32 %v5826_v49, %v2464_v50 }
 0x284   : > { %v5939_v1 = vadd.f32 %v2601_v21, %v2573_v47  ;;  %v2546_v56 = vadd.f32 %v2545_v9, %v2517_v61 }
 0x286   : > { %v2980_v25 = vmax.f32 %v2546_v56, 0.0  ;;  %v6189_v56 = vld [vmem:[#allocation15_spill] sm:$0xff] }
 0x288   : > { %v3001_v0 = vpack.c.bf16 %v2980_v25, %v2979_v42 }
 0x289   : > { %v2574_v62 = vpop.f32.mrf.mxu2  ;;  %v2519_v33 = vpop.f32.mrf.mxu0 }
 0x28a   : > { %v2575_v22 = vadd.f32 %v2574_v62, %v5515_v58  ;;  %v2603_v63 = vpop.f32.mrf.mxu3  ;;  %3017 = vst [vmem:[%s5852_s12 + $0x50] sm:$0xff] %v3001_v0  ;;  %v2520_v13 = vadd.f32 %v2519_v33, %v2491_v38  ;;  %v2548_v23 = vpop.f32.mrf.mxu1 }
 0x28c   : > { %v5950_v52 = vadd.f32 %v2603_v63, %v2575_v22  ;;  %v2549_v36 = vadd.f32 %v2548_v23, %v2520_v13  ;;  %4131 = vmatmul.msk.bf16.gmra.mxu0 %vm2134_vm0, %v6181_v37 }
 0x28d   : > { %2779 = vmatmul.bf16.gmra.mxu1 %v6182_v48  ;;  %v6191_v48 = vld [vmem:[#allocation16_spill] sm:$0xff] }
 0x28e   : > { %2808 = vmatmul.bf16.gmra.mxu2 %v6183_v45  ;;  %v2984_v51 = vmax.f32 %v2549_v36, 0.0  ;;  %v6190_v36 = vld [vmem:[#allocation5_spill] sm:$0xff] }
 0x28f   : > { %2837 = vmatmul.bf16.gmra.mxu3 %v6185_v28  ;;  %v6192_v45 = vld [vmem:[#allocation17_spill] sm:$0xff] }
 0x290   : > { %v3003_v39 = vpack.c.bf16 %v2984_v51, %v2983_v32 }
 0x291   : > { %v2577_v54 = vpop.f32.mrf.mxu2  ;;  %v2521_v11 = vpop.f32.mrf.mxu0 }
 0x292   : > { %v2578_v8 = vadd.f32 %v2577_v54, %v6171_v57  ;;  %v2606_v20 = vpop.f32.mrf.mxu3  ;;  %3019 = vst [vmem:[%s5852_s12 + $0x60] sm:$0xff] %v3003_v39  ;;  %v2522_v44 = vadd.f32 %v2521_v11, %v2493_v53  ;;  %v2550_v17 = vpop.f32.mrf.mxu1 }
 0x294   : > { %v5962_v31 = vadd.f32 %v2606_v20, %v2578_v8  ;;  %v2551_v10 = vadd.f32 %v2550_v17, %v2522_v44 }
 0x296   : > { %v2988_v40 = vmax.f32 %v2551_v10, 0.0 }
 0x298   : > { %v3005_v3 = vpack.c.bf16 %v2988_v40, %v2987_v55  ;;  %v6193_v55 = vld [vmem:[#allocation9_spill] sm:$0xff]  ;;  %v6195_v40 = vld [vmem:[#allocation19_spill] sm:$0xff] }
 0x299   : > { %v2579_v47 = vpop.f32.mrf.mxu2  ;;  %v2620_v16 = vpop.f32.mrf.mxu0 }
 0x29a   : > { %v2580_v49 = vadd.f32 %v2579_v47, %v6178_v12  ;;  %v2608_v21 = vpop.f32.mrf.mxu3  ;;  %3021 = vst [vmem:[%s5852_s12 + $0x70] sm:$0xff] %v3005_v3  ;;  %v2621_v24 = vadd.f32 %v2620_v16, %v5860_v2  ;;  %v2649_v61 = vpop.f32.mrf.mxu1 }
 0x29c   : > { %v5968_v9 = vadd.f32 %v2608_v21, %v2580_v49  ;;  %v2650_v26 = vadd.f32 %v2649_v61, %v2621_v24  ;;  %2851 = vmatmul.bf16.vlgmr.msra.gmra.mxu0 %v6187_v35 }
 0x29d   : > { %2880 = vmatmul.bf16.vlgmr.msra.gmra.mxu1 %v6188_v19 }
 0x29e   : > { %2909 = vmatmul.bf16.vlgmr.msra.gmra.mxu2 %v6189_v56 }
 0x29f   : > { %4132 = vmatmul.msk.bf16.vlgmr.msra.gmra.mxu3 %vm2134_vm0, %v5291_v27 }
 0x2a1   : > { %v2678_v34 = vpop.f32.mrf.mxu2  ;;  %v2622_v25 = vpop.f32.mrf.mxu0 }
 0x2a2   : > { %v2679_v42 = vadd.f32 %v2678_v34, %v2650_v26  ;;  %v2707_v6 = vpop.f32.mrf.mxu3  ;;  %v2623_v38 = vadd.f32 %v2622_v25, %v5876_v46  ;;  %v2651_v2 = vpop.f32.mrf.mxu1  ;;  %v6196_v25 = vld [vmem:[#allocation13_spill] sm:$0xff] }
 0x2a4   : > { %v5976_v0 = vadd.f32 %v2707_v6, %v2679_v42  ;;  %v2652_v62 = vadd.f32 %v2651_v2, %v2623_v38  ;;  %v6198_v38 = vld [vmem:[#allocation22_spill] sm:$0xff] }
 0x2a9   : > { %v2680_v22 = vpop.f32.mrf.mxu2  ;;  %v2625_v7 = vpop.f32.mrf.mxu0 }
 0x2aa   : > { %v2681_v63 = vadd.f32 %v2680_v22, %v2652_v62  ;;  %v2709_v33 = vpop.f32.mrf.mxu3  ;;  %v2626_v13 = vadd.f32 %v2625_v7, %v5898_v29  ;;  %v2654_v23 = vpop.f32.mrf.mxu1 }
 0x2ac   : > { %v5979_v50 = vadd.f32 %v2709_v33, %v2681_v63  ;;  %v2655_v27 = vadd.f32 %v2654_v23, %v2626_v13  ;;  %2856 = vmatmul.bf16.gmra.mxu0 %v6190_v36 }
 0x2ad   : > { %2885 = vmatmul.bf16.gmra.mxu1 %v6191_v48 }
 0x2ae   : > { %2914 = vmatmul.bf16.gmra.mxu2 %v6192_v45 }
 0x2af   : > { %4133 = vmatmul.msk.bf16.gmra.mxu3 %vm2134_vm0, %v5336_v4  ;;  %v6194_v4 = vld [vmem:[#allocation18_spill] sm:$0xff] }
 0x2b1   : > { %v2683_v46 = vpop.f32.mrf.mxu2  ;;  %v2627_v51 = vpop.f32.mrf.mxu0 }
 0x2b2   : > { %v2684_v60 = vadd.f32 %v2683_v46, %v2655_v27  ;;  %v2712_v32 = vpop.f32.mrf.mxu3  ;;  %v2628_v28 = vadd.f32 %v2627_v51, %v5923_v14  ;;  %v2656_v29 = vpop.f32.mrf.mxu1 }
 0x2b4   : > { %v2713_v53 = vadd.f32 %v2712_v32, %v2684_v60  ;;  %v2657_v39 = vadd.f32 %v2656_v29, %v2628_v28 }
 0x2b9   : > { %v2685_v54 = vpop.f32.mrf.mxu2  ;;  %v2630_v11 = vpop.f32.mrf.mxu0 }
 0x2ba   : > { %v2686_v8 = vadd.f32 %v2685_v54, %v2657_v39  ;;  %v2714_v20 = vpop.f32.mrf.mxu3  ;;  %v2631_v44 = vadd.f32 %v2630_v11, %v5939_v1  ;;  %v2659_v17 = vpop.f32.mrf.mxu1 }
 0x2bc   : > { %v2715_v10 = vadd.f32 %v2714_v20, %v2686_v8  ;;  %v2660_v15 = vadd.f32 %v2659_v17, %v2631_v44  ;;  %2861 = vmatmul.bf16.gmra.mxu0 %v6193_v55 }
 0x2bd   : > { %2890 = vmatmul.bf16.gmra.mxu1 %v6194_v4 }
 0x2be   : > { %2919 = vmatmul.bf16.gmra.mxu2 %v6195_v40 }
 0x2bf   : > { %4134 = vmatmul.msk.bf16.gmra.mxu3 %vm2134_vm0, %v6173_v43  ;;  %v6197_v43 = vld [vmem:[#allocation21_spill] sm:$0xff] }
 0x2c1   : > { %v2688_v14 = vpop.f32.mrf.mxu2  ;;  %v2632_v49 = vpop.f32.mrf.mxu0 }
 0x2c2   : > { %v2689_v3 = vadd.f32 %v2688_v14, %v2660_v15  ;;  %v2717_v47 = vpop.f32.mrf.mxu3  ;;  %v2633_v21 = vadd.f32 %v2632_v49, %v5950_v52  ;;  %v2661_v16 = vpop.f32.mrf.mxu1 }
 0x2c4   : > { %v2718_v1 = vadd.f32 %v2717_v47, %v2689_v3  ;;  %v2662_v24 = vadd.f32 %v2661_v16, %v2633_v21 }
 0x2c9   : > { %v2690_v61 = vpop.f32.mrf.mxu2  ;;  %v2635_v19 = vpop.f32.mrf.mxu0 }
 0x2ca   : > { %v2691_v26 = vadd.f32 %v2690_v61, %v2662_v24  ;;  %v2719_v35 = vpop.f32.mrf.mxu3  ;;  %v2636_v56 = vadd.f32 %v2635_v19, %v5962_v31  ;;  %v2664_v34 = vpop.f32.mrf.mxu1 }
 0x2cc   : > { %v2720_v42 = vadd.f32 %v2719_v35, %v2691_v26  ;;  %v2665_v6 = vadd.f32 %v2664_v34, %v2636_v56  ;;  %2866 = vmatmul.bf16.gmra.mxu0 %v6196_v25 }
 0x2cd   : > { %2895 = vmatmul.bf16.gmra.mxu1 %v6197_v43 }
 0x2ce   : > { %2924 = vmatmul.bf16.gmra.mxu2 %v6198_v38 }
 0x2cf   : > { %4135 = vmatmul.msk.bf16.gmra.mxu3 %vm2134_vm0, %v6181_v37 }
 0x2d1   : > { %v2693_v52 = vpop.f32.mrf.mxu2  ;;  %v2637_v22 = vpop.f32.mrf.mxu0 }
 0x2d2   : > { %v2694_v2 = vadd.f32 %v2693_v52, %v2665_v6  ;;  %v2722_v62 = vpop.f32.mrf.mxu3  ;;  %v2638_v63 = vadd.f32 %v2637_v22, %v5968_v9  ;;  %v2666_v33 = vpop.f32.mrf.mxu1 }
 0x2d4   : > { %v2723_v31 = vadd.f32 %v2722_v62, %v2694_v2  ;;  %v2667_v7 = vadd.f32 %v2666_v33, %v2638_v63 }
 0x2d9   : > { %v2695_v13 = vpop.f32.mrf.mxu2  ;;  %v2736_v36 = vpop.f32.mrf.mxu0 }
 0x2da   : > { %v2696_v23 = vadd.f32 %v2695_v13, %v2667_v7  ;;  %v2724_v27 = vpop.f32.mrf.mxu3  ;;  %v2737_v48 = vadd.f32 %v2736_v36, %v5976_v0  ;;  %v2765_v45 = vpop.f32.mrf.mxu1 }
 0x2db   : > { %v2766_v26 = vadd.f32 %v2765_v45, %v5442_v59 }
 0x2dc   : > { %v2725_v46 = vadd.f32 %v2724_v27, %v2696_v23 }
 0x2e1   : > { %v2794_v60 = vpop.f32.mrf.mxu2  ;;  %v2738_v37 = vpop.f32.mrf.mxu0 }
 0x2e2   : > { %v2823_v32 = vpop.f32.mrf.mxu3  ;;  %v6003_v51 = vadd.f32 %v2738_v37, %v5979_v50  ;;  %v2767_v28 = vpop.f32.mrf.mxu1 }
 0x2e3   : > { %v2768_v2 = vadd.f32 %v2767_v28, %v5457_v30 }
 0x2e9   : > { %v2796_v29 = vpop.f32.mrf.mxu2  ;;  %v2741_v39 = vpop.f32.mrf.mxu0 }
 0x2ea   : > { %v2825_v9 = vpop.f32.mrf.mxu3  ;;  %v6005_v54 = vadd.f32 %v2741_v39, %v2713_v53  ;;  %v2770_v8 = vpop.f32.mrf.mxu1  ;;  %v2797_v22 = vadd.f32 %v2796_v29, %v2768_v2 }
 0x2ec   : > { %v2826_v33 = vadd.f32 %v2825_v9, %v2797_v22 }
 0x2f1   : > { %v2799_v20 = vpop.f32.mrf.mxu2  ;;  %v2743_v44 = vpop.f32.mrf.mxu0 }
 0x2f2   : > { %v2828_v11 = vpop.f32.mrf.mxu3  ;;  %v6007_v17 = vadd.f32 %v2743_v44, %v2715_v10  ;;  %v2772_v0 = vpop.f32.mrf.mxu1 }
 0x2f9   : > { %v2801_v15 = vpop.f32.mrf.mxu2  ;;  %v2746_v4 = vpop.f32.mrf.mxu0 }
 0x2fa   : > { %v2830_v55 = vpop.f32.mrf.mxu3  ;;  %v6009_v40 = vadd.f32 %v2746_v4, %v2718_v1  ;;  %v2775_v50 = vpop.f32.mrf.mxu1 }
 0x301   : > { %v6011_v14 = vpop.f32.mrf.mxu2  ;;  %v2748_v47 = vpop.f32.mrf.mxu0 }
 0x302   : > { %v6013_v3 = vpop.f32.mrf.mxu3  ;;  %v6015_v53 = vadd.f32 %v2748_v47, %v2720_v42  ;;  %v6017_v49 = vpop.f32.mrf.mxu1  ;;  %v2795_v42 = vadd.f32 %v2794_v60, %v2766_v26 }
 0x304   : > { %v2824_v25 = vadd.f32 %v2823_v32, %v2795_v42 }
 0x309   : > { %v6019_v21 = vpop.f32.mrf.mxu2  ;;  %v2751_v16 = vpop.f32.mrf.mxu0 }
 0x30a   : > { %v6021_v10 = vpop.f32.mrf.mxu3  ;;  %v6023_v24 = vadd.f32 %v2751_v16, %v2723_v31  ;;  %v6025_v61 = vpop.f32.mrf.mxu1  ;;  %v2771_v31 = vadd.f32 %v2770_v8, %v5470_v5  ;;  %v2773_v5 = vadd.f32 %v2772_v0, %v5487_v41  ;;  %v2965_v16 = vmax.f32 %v6003_v51, 0.0 }
 0x30b   : > { %v2969_v0 = vmax.f32 %v6005_v54, 0.0  ;;  %v2973_v54 = vmax.f32 %v6007_v17, 0.0  ;;  %v2977_v17 = vmax.f32 %v6009_v40, 0.0  ;;  %v2981_v40 = vmax.f32 %v6015_v53, 0.0 }
 0x30c   : > { %v2800_v60 = vadd.f32 %v2799_v20, %v2771_v31  ;;  %v2802_v26 = vadd.f32 %v2801_v15, %v2773_v5 }
 0x30e   : > { %v2829_v28 = vadd.f32 %v2828_v11, %v2800_v60  ;;  %v2776_v11 = vadd.f32 %v2775_v50, %v5498_v18 }
 0x310   : > { %v2805_v51 = vadd.f32 %v6011_v14, %v2776_v11 }
 0x311   : > { %v6027_v1 = vpop.f32.mrf.mxu2  ;;  %v2753_v19 = vpop.f32.mrf.mxu0 }
 0x312   : > { %v6030_v35 = vpop.f32.mrf.mxu3  ;;  %v6032_v56 = vadd.f32 %v2753_v19, %v2725_v46  ;;  %v6034_v34 = vpop.f32.mrf.mxu1  ;;  %v2961_v46 = vmax.f32 %v2737_v48, 0.0 }
 0x319   : > { %v6036_v6 = vpop.f32.mrf.mxu2  ;;  %v2852_v38 = vpop.f32.mrf.mxu0 }
 0x31a   : > { %v6038_v43 = vpop.f32.mrf.mxu3  ;;  %v2881_v52 = vpop.f32.mrf.mxu1  ;;  %v2853_v62 = vadd.f32 %v2852_v38, %v2824_v25  ;;  %v2831_v25 = vadd.f32 %v2830_v55, %v2802_v26  ;;  %v2834_v55 = vadd.f32 %v6013_v3, %v2805_v51 }
 0x31c   : > { %v2882_v59 = vadd.f32 %v2881_v52, %v2853_v62 }
 0x321   : > { %v2910_v63 = vpop.f32.mrf.mxu2  ;;  %v2854_v23 = vpop.f32.mrf.mxu0 }
 0x322   : > { %v2911_v7 = vadd.f32 %v2910_v63, %v2882_v59  ;;  %v2939_v13 = vpop.f32.mrf.mxu3  ;;  %v2883_v27 = vpop.f32.mrf.mxu1  ;;  %v2855_v45 = vadd.f32 %v2854_v23, %v2826_v33 }
 0x324   : > { %v2940_v36 = vadd.f32 %v2939_v13, %v2911_v7  ;;  %v2884_v39 = vadd.f32 %v2883_v27, %v2855_v45  ;;  %v2778_v13 = vadd.f32 %v6017_v49, %v5515_v58 }
 0x326   : > { %v2962_v32 = vmax.f32 %v2940_v36, 0.0  ;;  %v2807_v14 = vadd.f32 %v6019_v21, %v2778_v13 }
 0x328   : > { %v2992_v37 = vpack.c.bf16 %v2962_v32, %v2961_v46  ;;  %v2836_v3 = vadd.f32 %v6021_v10, %v2807_v14  ;;  %v2781_v32 = vadd.f32 %v6025_v61, %v6171_v57 }
 0x329   : > { %v2912_v30 = vpop.f32.mrf.mxu2  ;;  %v2857_v9 = vpop.f32.mrf.mxu0 }
 0x32a   : > { %3008 = vst [vmem:[%s5852_s12 + $0x8] sm:$0xff] %v2992_v37  ;;  %v2913_v29 = vadd.f32 %v2912_v30, %v2884_v39  ;;  %v2941_v44 = vpop.f32.mrf.mxu3  ;;  %v2886_v4 = vpop.f32.mrf.mxu1  ;;  %v2858_v47 = vadd.f32 %v2857_v9, %v2829_v28  ;;  %v2810_v21 = vadd.f32 %v6027_v1, %v2781_v32 }
 0x32c   : > { %v2942_v8 = vadd.f32 %v2941_v44, %v2913_v29  ;;  %v2887_v19 = vadd.f32 %v2886_v4, %v2858_v47  ;;  %v2839_v10 = vadd.f32 %v6030_v35, %v2810_v21 }
 0x32e   : > { %v2966_v48 = vmax.f32 %v2942_v8, 0.0  ;;  %v2783_v8 = vadd.f32 %v6034_v34, %v6178_v12 }
 0x330   : > { %v2994_v20 = vpack.c.bf16 %v2966_v48, %v2965_v16  ;;  %v2812_v1 = vadd.f32 %v6036_v6, %v2783_v8 }
 0x331   : > { %v2915_v42 = vpop.f32.mrf.mxu2  ;;  %v2859_v2 = vpop.f32.mrf.mxu0 }
 0x332   : > { %3010 = vst [vmem:[%s5852_s12 + $0x18] sm:$0xff] %v2994_v20  ;;  %v2916_v38 = vadd.f32 %v2915_v42, %v2887_v19  ;;  %v2944_v52 = vpop.f32.mrf.mxu3  ;;  %v2888_v62 = vpop.f32.mrf.mxu1  ;;  %v2860_v41 = vadd.f32 %v2859_v2, %v2831_v25  ;;  %v2841_v42 = vadd.f32 %v6038_v43, %v2812_v1  ;;  %v2989_v43 = vmax.f32 %v6032_v56, 0.0  ;;  %v3047_v56 = vld [vmem:[%s5852_s12 + $0x8] sm:$0xff] (%p4492_p5) }
 0x333   : > { %3048 = vst [vmem:[%s3032_s20 + $0x8] sm:$0xff] (%p4492_p5), %v3047_v56 }
 0x334   : > { %v2945_v22 = vadd.f32 %v2944_v52, %v2916_v38  ;;  %v2889_v63 = vadd.f32 %v2888_v62, %v2860_v41  ;;  %v2985_v52 = vmax.f32 %v6023_v24, 0.0  ;;  %v3045_v24 = vld [vmem:[%s5852_s12] sm:$0xff] (%p4492_p5) }
 0x335   : > { %3046 = vst [vmem:[%s3032_s20] sm:$0xff] (%p4492_p5), %v3045_v24 }
 0x336   : > { %v2970_v15 = vmax.f32 %v2945_v22, 0.0 }
 0x338   : > { %v2996_v59 = vpack.c.bf16 %v2970_v15, %v2969_v0 }
 0x339   : > { %v2917_v33 = vpop.f32.mrf.mxu2  ;;  %v2862_v31 = vpop.f32.mrf.mxu0 }
 0x33a   : > { %3012 = vst [vmem:[%s5852_s12 + $0x28] sm:$0xff] %v2996_v59  ;;  %v2918_v18 = vadd.f32 %v2917_v33, %v2889_v63  ;;  %v2946_v50 = vpop.f32.mrf.mxu3  ;;  %v2891_v7 = vpop.f32.mrf.mxu1  ;;  %v2863_v27 = vadd.f32 %v2862_v31, %v2834_v55  ;;  %v3049_v63 = vld [vmem:[%s5852_s12 + $0x10] sm:$0xff] (%p4492_p5)  ;;  %v3051_v33 = vld [vmem:[%s5852_s12 + $0x18] sm:$0xff] (%p4492_p5)  ;;  %v3053_v55 = vld [vmem:[%s5852_s12 + $0x20] sm:$0xff] (%p4492_p5) }
 0x33b   : > { %3050 = vst [vmem:[%s3032_s20 + $0x20] sm:$0xff] (%p4492_p5), %v3049_v63 }
 0x33c   : > { %v2947_v23 = vadd.f32 %v2946_v50, %v2918_v18  ;;  %v2892_v46 = vadd.f32 %v2891_v7, %v2863_v27  ;;  %3052 = vst [vmem:[%s3032_s20 + $0x28] sm:$0xff] (%p4492_p5), %v3051_v33  ;;  %v3057_v50 = vld [vmem:[%s5852_s12 + $0x30] sm:$0xff] (%p4492_p5)  ;;  %v3061_v7 = vld [vmem:[%s5852_s12 + $0x40] sm:$0xff] (%p4492_p5) }
 0x33d   : > { %3054 = vst [vmem:[%s3032_s20 + $0x40] sm:$0xff] (%p4492_p5), %v3053_v55 }
 0x33e   : > { %v2974_v36 = vmax.f32 %v2947_v23, 0.0  ;;  %3058 = vst [vmem:[%s3032_s20 + $0x60] sm:$0xff] (%p4492_p5), %v3057_v50  ;;  %v3065_v23 = vld [vmem:[%s5852_s12 + $0x50] sm:$0xff] (%p4492_p5) }
 0x33f   : > { %3062 = vst [vmem:[%s3032_s20 + $0x80] sm:$0xff] (%p4492_p5), %v3061_v7 }
 0x340   : > { %v2998_v45 = vpack.c.bf16 %v2974_v36, %v2973_v54  ;;  %v3069_v54 = vld [vmem:[%s5852_s12 + $0x60] sm:$0xff] (%p4492_p5)  ;;  %3066 = vst [vmem:[%s3032_s20 + $0xa0] sm:$0xff] (%p4492_p5), %v3065_v23  ;;  %v3073_v36 = vld [vmem:[%s5852_s12 + $0x70] sm:$0xff] (%p4492_p5) }
 0x341   : > { %v2920_v60 = vpop.f32.mrf.mxu2  ;;  %v2864_v58 = vpop.f32.mrf.mxu0  ;;  %v3055_v18 = vld [vmem:[%s5852_s12 + $0x28] sm:$0xff] (%p4492_p5)  ;;  %3070 = vst [vmem:[%s3032_s20 + $0xc0] sm:$0xff] (%p4492_p5), %v3069_v54 }
 0x342   : > { %3014 = vst [vmem:[%s5852_s12 + $0x38] sm:$0xff] %v2998_v45  ;;  %v2921_v37 = vadd.f32 %v2920_v60, %v2892_v46  ;;  %v2949_v39 = vpop.f32.mrf.mxu3  ;;  %v2893_v49 = vpop.f32.mrf.mxu1  ;;  %v2865_v28 = vadd.f32 %v2864_v58, %v2836_v3 }
 0x343   : > { %3056 = vst [vmem:[%s3032_s20 + $0x48] sm:$0xff] (%p4492_p5), %v3055_v18 }
 0x344   : > { %v2950_v30 = vadd.f32 %v2949_v39, %v2921_v37  ;;  %v2894_v9 = vadd.f32 %v2893_v49, %v2865_v28  ;;  %3074 = vst [vmem:[%s3032_s20 + $0xe0] sm:$0xff] (%p4492_p5), %v3073_v36 }
 0x346   : > { %v2978_v29 = vmax.f32 %v2950_v30, 0.0 }
 0x348   : > { %v3000_v44 = vpack.c.bf16 %v2978_v29, %v2977_v17 }
 0x349   : > { %v2922_v4 = vpop.f32.mrf.mxu2  ;;  %v2867_v5 = vpop.f32.mrf.mxu0  ;;  %v3059_v31 = vld [vmem:[%s5852_s12 + $0x38] sm:$0xff] (%p4492_p5) }
 0x34a   : > { %3016 = vst [vmem:[%s5852_s12 + $0x48] sm:$0xff] %v3000_v44  ;;  %v2923_v57 = vadd.f32 %v2922_v4, %v2894_v9  ;;  %v2951_v61 = vpop.f32.mrf.mxu3  ;;  %v2868_v16 = vadd.f32 %v2867_v5, %v2839_v10  ;;  %v2896_v26 = vpop.f32.mrf.mxu1 }
 0x34b   : > { %3060 = vst [vmem:[%s3032_s20 + $0x68] sm:$0xff] (%p4492_p5), %v3059_v31 }
 0x34c   : > { %v2952_v47 = vadd.f32 %v2951_v61, %v2923_v57  ;;  %v2897_v19 = vadd.f32 %v2896_v26, %v2868_v16 }
 0x34e   : > { %v2982_v48 = vmax.f32 %v2952_v47, 0.0 }
 0x350   : > { %v3002_v20 = vpack.c.bf16 %v2982_v48, %v2981_v40 }
 0x351   : > { %v2925_v35 = vpop.f32.mrf.mxu2  ;;  %v2869_v38 = vpop.f32.mrf.mxu0  ;;  %v3063_v13 = vld [vmem:[%s5852_s12 + $0x48] sm:$0xff] (%p4492_p5) }
 0x352   : > { %3018 = vst [vmem:[%s5852_s12 + $0x58] sm:$0xff] %v3002_v20  ;;  %v2926_v25 = vadd.f32 %v2925_v35, %v2897_v19  ;;  %v2954_v11 = vpop.f32.mrf.mxu3  ;;  %v2870_v34 = vadd.f32 %v2869_v38, %v2841_v42  ;;  %v2898_v53 = vpop.f32.mrf.mxu1 }
 0x353   : > { %3064 = vst [vmem:[%s3032_s20 + $0x88] sm:$0xff] (%p4492_p5), %v3063_v13 }
 0x354   : > { %v2955_v12 = vadd.f32 %v2954_v11, %v2926_v25  ;;  %v2899_v6 = vadd.f32 %v2898_v53, %v2870_v34 }
 0x356   : > { %v2986_v2 = vmax.f32 %v2955_v12, 0.0 }
 0x358   : > { %v3004_v62 = vpack.c.bf16 %v2986_v2, %v2985_v52 }
 0x359   : > { %v2927_v22 = vpop.f32.mrf.mxu2  ;;  %v3067_v27 = vld [vmem:[%s5852_s12 + $0x58] sm:$0xff] (%p4492_p5) }
 0x35a   : > { %3020 = vst [vmem:[%s5852_s12 + $0x68] sm:$0xff] %v3004_v62  ;;  %v2928_v41 = vadd.f32 %v2927_v22, %v2899_v6  ;;  %v2956_v0 = vpop.f32.mrf.mxu3 }
 0x35b   : > { %3068 = vst [vmem:[%s3032_s20 + $0xa8] sm:$0xff] (%p4492_p5), %v3067_v27 }
 0x35c   : > { %v2957_v51 = vadd.f32 %v2956_v0, %v2928_v41 }
 0x35e   : > { %v2990_v15 = vmax.f32 %v2957_v51, 0.0  ;;  %3029 = sbr.rel (!%p4492_p5) target bundleno = 875 (0x36b), region = 59 }
 0x360   : > { %v3006_v59 = vpack.c.bf16 %v2990_v15, %v2989_v43 }
 0x361   : > { %v3071_v14 = vld [vmem:[%s5852_s12 + $0x68] sm:$0xff] (%p4492_p5) }
 0x362   : > { %3022 = vst [vmem:[%s5852_s12 + $0x78] sm:$0xff] %v3006_v59 }
 0x363   : > { %3072 = vst [vmem:[%s3032_s20 + $0xc8] sm:$0xff] %v3071_v14 }
 0x369   : > { %v3075_v45 = vld [vmem:[%s5852_s12 + $0x78] sm:$0xff] }
 0x36a   : > { %3076 = vst [vmem:[%s3032_s20 + $0xe8] sm:$0xff] %v3075_v45 }
 0x36b PF: > { %p10_p10 = scmp.ge.s32.totalorder %s4479_s16, 4   ;;  %s6199_s12 = smov %s4435_s13 }
 0x36c   : > { %s6200_s13 = smov %s4490_s19  ;;  %s6201_s14 = smov %s4479_s16 }
 0x36d   :  { %12 = sbr.rel (!%p10_p10) target bundleno = 2 (0x2), region = 113 }

// kernel: hybrid_cfd_forward.5
= control target key start
LH: loop header
LB: loop body
LE: loop exit
PB: predicated region body
PF: predicated region fallthrough
CT: control target
= control target key end

     0   :  { %s7558_s18 = smov 0   ;;  %s7560_s19 = smov 0   ;;  %s9899_s0 = inlined_call_operand.vmem [shape: bf16[1728,1024], index: 0, kind: input, shape index: {}]   ;;  %s9900_s1 = inlined_call_operand.vmem [shape: bf16[32,1728], index: 1, kind: input, shape index: {}]   ;;  %s9901_s2 = inlined_call_operand.vmem [shape: f32[32,1], index: 2, kind: input, shape index: {}]   ;;  %s9902_s3 = inlined_call_operand.vmem [shape: f32[3,32], index: 3, kind: input, shape index: {}]   ;;  %s9903_s4 = inlined_call_operand.vmem [shape: f32[3,1], index: 4, kind: input, shape index: {}]   ;;  %s9904_s5 = inlined_call_operand.vmem [shape: f32[3,1024], index: 5, kind: output, shape index: {}]  }
   0x1   :  { %s7562_s20 = smov 0  }
   0x2 LB: > { %s5149_s21 = sadd.s32 4294967295, %s7525_s20   ;;  %s7575_s22 = sadd.s32 1, %s7525_s20   ;;  %s7525_s20 = sphi %s7562_s20, %s9946_s20   ;;  %s7521_s19 = sphi %s7560_s19, %s9945_s19   ;;  %s7517_s18 = sphi %s7558_s18, %s9944_s18  }
   0x3   : > { %s19_s23 = ssub.s32 %s7525_s20, %s7575_s22  ;;  %s22_s24 = sadd.s32 1, %s7521_s19 }
   0x4   : > { %p20_p0 = scmp.eq.s32.totalorder %s19_s23, 0  ;;  %p29_p1 = scmp.ne.s32.totalorder %s7521_s19, %s7517_s18 }
   0x5   : > { %p30_p2 = scmp.eq.s32.totalorder %s7525_s20, 0  ;;  %p5152_p4 = scmp.ge.s32.totalorder %s7525_s20, 2 }
   0x6   : > { %s7584_s25 = scalar_select %p20_p0, %s7521_s19, %s22_s24  }
   0x7   : > { %p31_p3 = por %p30_p2, %p29_p1  ;;  %177 = sbr.rel (%p5152_p4) target bundleno = 448 (0x1c0), region = 32 }
   0xc   : > { %180 = sbr.rel (!%p31_p3) target bundleno = 448 (0x1c0), region = 36  ;;  %s182_s26 = sand.u32 (%p31_p3), 1, %s7521_s19  }
   0xd   : > { %s7012_s27 = sshll.u32 (%p31_p3), %s7525_s20, 4  ;;  %s7473_s28 = smul.u32 (%p31_p3), 3456, %s182_s26 }
   0xe   : > { %s7592_s6 = scalar_lea.vmem (%p31_p3), %s9899_s0, %s7012_s27 }
   0xf   : > { %v200_v0 = vld [vmem:[%s7592_s6] sm:$0xff] (%p31_p3)  ;;  %v202_v1 = vld [vmem:[%s7592_s6 + $0x8] sm:$0xff] (%p31_p3)  ;;  %s7597_s7 = scalar_lea.vmem (%p31_p3), [#allocation2], %s7473_s28 }
  0x10   : > { %v204_v2 = vld [vmem:[%s7592_s6 + $0x20] sm:$0xff] (%p31_p3)  ;;  %201 = vst [vmem:[%s7597_s7] sm:$0xff] (%p31_p3), %v200_v0  ;;  %v206_v3 = vld [vmem:[%s7592_s6 + $0x28] sm:$0xff] (%p31_p3) }
  0x11   : > { %203 = vst [vmem:[%s7597_s7 + $0x8] sm:$0xff] %v202_v1  ;;  %v208_v4 = vld [vmem:[%s7592_s6 + $0x40] sm:$0xff]  ;;  %v210_v5 = vld [vmem:[%s7592_s6 + $0x48] sm:$0xff] }
  0x12   : > { %205 = vst [vmem:[%s7597_s7 + $0x10] sm:$0xff] %v204_v2  ;;  %v212_v6 = vld [vmem:[%s7592_s6 + $0x60] sm:$0xff]  ;;  %v214_v7 = vld [vmem:[%s7592_s6 + $0x68] sm:$0xff] }
  0x13   : > { %207 = vst [vmem:[%s7597_s7 + $0x18] sm:$0xff] %v206_v3  ;;  %v216_v8 = vld [vmem:[%s7592_s6 + $0x80] sm:$0xff]  ;;  %v218_v9 = vld [vmem:[%s7592_s6 + $0x88] sm:$0xff] }
  0x14   : > { %209 = vst [vmem:[%s7597_s7 + $0x20] sm:$0xff] %v208_v4  ;;  %v220_v10 = vld [vmem:[%s7592_s6 + $0xa0] sm:$0xff]  ;;  %v222_v11 = vld [vmem:[%s7592_s6 + $0xa8] sm:$0xff] }
  0x15   : > { %211 = vst [vmem:[%s7597_s7 + $0x28] sm:$0xff] %v210_v5  ;;  %v224_v12 = vld [vmem:[%s7592_s6 + $0xc0] sm:$0xff]  ;;  %v226_v13 = vld [vmem:[%s7592_s6 + $0xc8] sm:$0xff] }
  0x16   : > { %213 = vst [vmem:[%s7597_s7 + $0x30] sm:$0xff] %v212_v6  ;;  %v228_v14 = vld [vmem:[%s7592_s6 + $0xe0] sm:$0xff]  ;;  %v230_v15 = vld [vmem:[%s7592_s6 + $0xe8] sm:$0xff] }
  0x17   : > { %215 = vst [vmem:[%s7597_s7 + $0x38] sm:$0xff] %v214_v7  ;;  %v232_v16 = vld [vmem:[%s7592_s6 + $0x100] sm:$0xff]  ;;  %v234_v17 = vld [vmem:[%s7592_s6 + $0x108] sm:$0xff] }
  0x18   : > { %217 = vst [vmem:[%s7597_s7 + $0x40] sm:$0xff] %v216_v8  ;;  %v236_v18 = vld [vmem:[%s7592_s6 + $0x120] sm:$0xff]  ;;  %v238_v19 = vld [vmem:[%s7592_s6 + $0x128] sm:$0xff] }
  0x19   : > { %219 = vst [vmem:[%s7597_s7 + $0x48] sm:$0xff] %v218_v9  ;;  %v240_v20 = vld [vmem:[%s7592_s6 + $0x140] sm:$0xff]  ;;  %v242_v21 = vld [vmem:[%s7592_s6 + $0x148] sm:$0xff] }
  0x1a   : > { %221 = vst [vmem:[%s7597_s7 + $0x50] sm:$0xff] %v220_v10  ;;  %v244_v22 = vld [vmem:[%s7592_s6 + $0x160] sm:$0xff]  ;;  %v246_v23 = vld [vmem:[%s7592_s6 + $0x168] sm:$0xff] }
  0x1b   : > { %223 = vst [vmem:[%s7597_s7 + $0x58] sm:$0xff] %v222_v11  ;;  %v248_v24 = vld [vmem:[%s7592_s6 + $0x180] sm:$0xff]  ;;  %v250_v25 = vld [vmem:[%s7592_s6 + $0x188] sm:$0xff] }
  0x1c   : > { %225 = vst [vmem:[%s7597_s7 + $0x60] sm:$0xff] %v224_v12  ;;  %v252_v26 = vld [vmem:[%s7592_s6 + $0x1a0] sm:$0xff]  ;;  %v254_v27 = vld [vmem:[%s7592_s6 + $0x1a8] sm:$0xff] }
  0x1d   : > { %227 = vst [vmem:[%s7597_s7 + $0x68] sm:$0xff] %v226_v13  ;;  %v256_v28 = vld [vmem:[%s7592_s6 + $0x1c0] sm:$0xff]  ;;  %v258_v29 = vld [vmem:[%s7592_s6 + $0x1c8] sm:$0xff] }
  0x1e   : > { %229 = vst [vmem:[%s7597_s7 + $0x70] sm:$0xff] %v228_v14  ;;  %v260_v30 = vld [vmem:[%s7592_s6 + $0x1e0] sm:$0xff]  ;;  %v262_v31 = vld [vmem:[%s7592_s6 + $0x1e8] sm:$0xff] }
  0x1f   : > { %231 = vst [vmem:[%s7597_s7 + $0x78] sm:$0xff] %v230_v15  ;;  %v264_v32 = vld [vmem:[%s7592_s6 + $0x200] sm:$0xff]  ;;  %v266_v33 = vld [vmem:[%s7592_s6 + $0x208] sm:$0xff] }
  0x20   : > { %233 = vst [vmem:[%s7597_s7 + $0x80] sm:$0xff] %v232_v16  ;;  %v268_v34 = vld [vmem:[%s7592_s6 + $0x220] sm:$0xff]  ;;  %v270_v35 = vld [vmem:[%s7592_s6 + $0x228] sm:$0xff] }
  0x21   : > { %235 = vst [vmem:[%s7597_s7 + $0x88] sm:$0xff] %v234_v17  ;;  %v272_v36 = vld [vmem:[%s7592_s6 + $0x240] sm:$0xff]  ;;  %v274_v37 = vld [vmem:[%s7592_s6 + $0x248] sm:$0xff] }
  0x22   : > { %237 = vst [vmem:[%s7597_s7 + $0x90] sm:$0xff] %v236_v18  ;;  %v276_v38 = vld [vmem:[%s7592_s6 + $0x260] sm:$0xff]  ;;  %v278_v39 = vld [vmem:[%s7592_s6 + $0x268] sm:$0xff] }
  0x23   : > { %239 = vst [vmem:[%s7597_s7 + $0x98] sm:$0xff] %v238_v19  ;;  %v280_v40 = vld [vmem:[%s7592_s6 + $0x280] sm:$0xff]  ;;  %v282_v41 = vld [vmem:[%s7592_s6 + $0x288] sm:$0xff] }
  0x24   : > { %241 = vst [vmem:[%s7597_s7 + $0xa0] sm:$0xff] %v240_v20  ;;  %v284_v42 = vld [vmem:[%s7592_s6 + $0x2a0] sm:$0xff]  ;;  %v286_v43 = vld [vmem:[%s7592_s6 + $0x2a8] sm:$0xff] }
  0x25   : > { %243 = vst [vmem:[%s7597_s7 + $0xa8] sm:$0xff] %v242_v21  ;;  %v288_v44 = vld [vmem:[%s7592_s6 + $0x2c0] sm:$0xff]  ;;  %v290_v45 = vld [vmem:[%s7592_s6 + $0x2c8] sm:$0xff] }
  0x26   : > { %245 = vst [vmem:[%s7597_s7 + $0xb0] sm:$0xff] %v244_v22  ;;  %v292_v46 = vld [vmem:[%s7592_s6 + $0x2e0] sm:$0xff]  ;;  %v294_v47 = vld [vmem:[%s7592_s6 + $0x2e8] sm:$0xff] }
  0x27   : > { %247 = vst [vmem:[%s7597_s7 + $0xb8] sm:$0xff] %v246_v23  ;;  %v296_v48 = vld [vmem:[%s7592_s6 + $0x300] sm:$0xff]  ;;  %v298_v49 = vld [vmem:[%s7592_s6 + $0x308] sm:$0xff] }
  0x28   : > { %249 = vst [vmem:[%s7597_s7 + $0xc0] sm:$0xff] %v248_v24  ;;  %v300_v50 = vld [vmem:[%s7592_s6 + $0x320] sm:$0xff]  ;;  %v302_v51 = vld [vmem:[%s7592_s6 + $0x328] sm:$0xff] }
  0x29   : > { %251 = vst [vmem:[%s7597_s7 + $0xc8] sm:$0xff] %v250_v25  ;;  %v304_v52 = vld [vmem:[%s7592_s6 + $0x340] sm:$0xff]  ;;  %v306_v53 = vld [vmem:[%s7592_s6 + $0x348] sm:$0xff] }
  0x2a   : > { %253 = vst [vmem:[%s7597_s7 + $0xd0] sm:$0xff] %v252_v26  ;;  %v308_v54 = vld [vmem:[%s7592_s6 + $0x360] sm:$0xff]  ;;  %v310_v55 = vld [vmem:[%s7592_s6 + $0x368] sm:$0xff] }
  0x2b   : > { %255 = vst [vmem:[%s7597_s7 + $0xd8] sm:$0xff] %v254_v27  ;;  %v312_v56 = vld [vmem:[%s7592_s6 + $0x380] sm:$0xff]  ;;  %v314_v57 = vld [vmem:[%s7592_s6 + $0x388] sm:$0xff] }
  0x2c   : > { %257 = vst [vmem:[%s7597_s7 + $0xe0] sm:$0xff] %v256_v28  ;;  %v316_v58 = vld [vmem:[%s7592_s6 + $0x3a0] sm:$0xff]  ;;  %v318_v59 = vld [vmem:[%s7592_s6 + $0x3a8] sm:$0xff] }
  0x2d   : > { %259 = vst [vmem:[%s7597_s7 + $0xe8] sm:$0xff] %v258_v29  ;;  %v320_v60 = vld [vmem:[%s7592_s6 + $0x3c0] sm:$0xff]  ;;  %v322_v61 = vld [vmem:[%s7592_s6 + $0x3c8] sm:$0xff] }
  0x2e   : > { %261 = vst [vmem:[%s7597_s7 + $0xf0] sm:$0xff] %v260_v30  ;;  %v324_v62 = vld [vmem:[%s7592_s6 + $0x3e0] sm:$0xff]  ;;  %v326_v63 = vld [vmem:[%s7592_s6 + $0x3e8] sm:$0xff] }
  0x2f   : > { %263 = vst [vmem:[%s7597_s7 + $0xf8] sm:$0xff] %v262_v31  ;;  %v328_v0 = vld [vmem:[%s7592_s6 + $0x400] sm:$0xff]  ;;  %v330_v1 = vld [vmem:[%s7592_s6 + $0x408] sm:$0xff] }
  0x30   : > { %265 = vst [vmem:[%s7597_s7 + $0x100] sm:$0xff] %v264_v32  ;;  %v332_v2 = vld [vmem:[%s7592_s6 + $0x420] sm:$0xff]  ;;  %v334_v3 = vld [vmem:[%s7592_s6 + $0x428] sm:$0xff] }
  0x31   : > { %267 = vst [vmem:[%s7597_s7 + $0x108] sm:$0xff] %v266_v33  ;;  %v336_v4 = vld [vmem:[%s7592_s6 + $0x440] sm:$0xff]  ;;  %v338_v5 = vld [vmem:[%s7592_s6 + $0x448] sm:$0xff] }
  0x32   : > { %269 = vst [vmem:[%s7597_s7 + $0x110] sm:$0xff] %v268_v34  ;;  %v340_v6 = vld [vmem:[%s7592_s6 + $0x460] sm:$0xff]  ;;  %v342_v7 = vld [vmem:[%s7592_s6 + $0x468] sm:$0xff] }
  0x33   : > { %271 = vst [vmem:[%s7597_s7 + $0x118] sm:$0xff] %v270_v35  ;;  %v344_v8 = vld [vmem:[%s7592_s6 + $0x480] sm:$0xff]  ;;  %v346_v9 = vld [vmem:[%s7592_s6 + $0x488] sm:$0xff] }
  0x34   : > { %273 = vst [vmem:[%s7597_s7 + $0x120] sm:$0xff] %v272_v36  ;;  %v348_v10 = vld [vmem:[%s7592_s6 + $0x4a0] sm:$0xff]  ;;  %v350_v11 = vld [vmem:[%s7592_s6 + $0x4a8] sm:$0xff] }
  0x35   : > { %275 = vst [vmem:[%s7597_s7 + $0x128] sm:$0xff] %v274_v37  ;;  %v352_v12 = vld [vmem:[%s7592_s6 + $0x4c0] sm:$0xff]  ;;  %v354_v13 = vld [vmem:[%s7592_s6 + $0x4c8] sm:$0xff] }
  0x36   : > { %277 = vst [vmem:[%s7597_s7 + $0x130] sm:$0xff] %v276_v38  ;;  %v356_v14 = vld [vmem:[%s7592_s6 + $0x4e0] sm:$0xff]  ;;  %v358_v15 = vld [vmem:[%s7592_s6 + $0x4e8] sm:$0xff] }
  0x37   : > { %279 = vst [vmem:[%s7597_s7 + $0x138] sm:$0xff] %v278_v39  ;;  %v360_v16 = vld [vmem:[%s7592_s6 + $0x500] sm:$0xff]  ;;  %v362_v17 = vld [vmem:[%s7592_s6 + $0x508] sm:$0xff] }
  0x38   : > { %281 = vst [vmem:[%s7597_s7 + $0x140] sm:$0xff] %v280_v40  ;;  %v364_v18 = vld [vmem:[%s7592_s6 + $0x520] sm:$0xff]  ;;  %v366_v19 = vld [vmem:[%s7592_s6 + $0x528] sm:$0xff] }
  0x39   : > { %283 = vst [vmem:[%s7597_s7 + $0x148] sm:$0xff] %v282_v41  ;;  %v368_v20 = vld [vmem:[%s7592_s6 + $0x540] sm:$0xff]  ;;  %v370_v21 = vld [vmem:[%s7592_s6 + $0x548] sm:$0xff] }
  0x3a   : > { %285 = vst [vmem:[%s7597_s7 + $0x150] sm:$0xff] %v284_v42  ;;  %v372_v22 = vld [vmem:[%s7592_s6 + $0x560] sm:$0xff]  ;;  %v374_v23 = vld [vmem:[%s7592_s6 + $0x568] sm:$0xff] }
  0x3b   : > { %287 = vst [vmem:[%s7597_s7 + $0x158] sm:$0xff] %v286_v43  ;;  %v376_v24 = vld [vmem:[%s7592_s6 + $0x580] sm:$0xff]  ;;  %v378_v25 = vld [vmem:[%s7592_s6 + $0x588] sm:$0xff] }
  0x3c   : > { %289 = vst [vmem:[%s7597_s7 + $0x160] sm:$0xff] %v288_v44  ;;  %v380_v26 = vld [vmem:[%s7592_s6 + $0x5a0] sm:$0xff]  ;;  %v382_v27 = vld [vmem:[%s7592_s6 + $0x5a8] sm:$0xff] }
  0x3d   : > { %291 = vst [vmem:[%s7597_s7 + $0x168] sm:$0xff] %v290_v45  ;;  %v384_v28 = vld [vmem:[%s7592_s6 + $0x5c0] sm:$0xff]  ;;  %v386_v29 = vld [vmem:[%s7592_s6 + $0x5c8] sm:$0xff] }
  0x3e   : > { %293 = vst [vmem:[%s7597_s7 + $0x170] sm:$0xff] %v292_v46  ;;  %v388_v30 = vld [vmem:[%s7592_s6 + $0x5e0] sm:$0xff]  ;;  %v390_v31 = vld [vmem:[%s7592_s6 + $0x5e8] sm:$0xff] }
  0x3f   : > { %295 = vst [vmem:[%s7597_s7 + $0x178] sm:$0xff] %v294_v47  ;;  %v392_v32 = vld [vmem:[%s7592_s6 + $0x600] sm:$0xff]  ;;  %v394_v33 = vld [vmem:[%s7592_s6 + $0x608] sm:$0xff] }
  0x40   : > { %297 = vst [vmem:[%s7597_s7 + $0x180] sm:$0xff] %v296_v48  ;;  %v396_v34 = vld [vmem:[%s7592_s6 + $0x620] sm:$0xff]  ;;  %v398_v35 = vld [vmem:[%s7592_s6 + $0x628] sm:$0xff] }
  0x41   : > { %299 = vst [vmem:[%s7597_s7 + $0x188] sm:$0xff] %v298_v49  ;;  %v400_v36 = vld [vmem:[%s7592_s6 + $0x640] sm:$0xff]  ;;  %v402_v37 = vld [vmem:[%s7592_s6 + $0x648] sm:$0xff] }
  0x42   : > { %301 = vst [vmem:[%s7597_s7 + $0x190] sm:$0xff] %v300_v50  ;;  %v404_v38 = vld [vmem:[%s7592_s6 + $0x660] sm:$0xff]  ;;  %v406_v39 = vld [vmem:[%s7592_s6 + $0x668] sm:$0xff] }
  0x43   : > { %303 = vst [vmem:[%s7597_s7 + $0x198] sm:$0xff] %v302_v51  ;;  %v408_v40 = vld [vmem:[%s7592_s6 + $0x680] sm:$0xff]  ;;  %v410_v41 = vld [vmem:[%s7592_s6 + $0x688] sm:$0xff] }
  0x44   : > { %305 = vst [vmem:[%s7597_s7 + $0x1a0] sm:$0xff] %v304_v52  ;;  %v412_v42 = vld [vmem:[%s7592_s6 + $0x6a0] sm:$0xff]  ;;  %v414_v43 = vld [vmem:[%s7592_s6 + $0x6a8] sm:$0xff] }
  0x45   : > { %307 = vst [vmem:[%s7597_s7 + $0x1a8] sm:$0xff] %v306_v53  ;;  %v416_v44 = vld [vmem:[%s7592_s6 + $0x6c0] sm:$0xff]  ;;  %v418_v45 = vld [vmem:[%s7592_s6 + $0x6c8] sm:$0xff] }
  0x46   : > { %309 = vst [vmem:[%s7597_s7 + $0x1b0] sm:$0xff] %v308_v54  ;;  %v420_v46 = vld [vmem:[%s7592_s6 + $0x6e0] sm:$0xff]  ;;  %v422_v47 = vld [vmem:[%s7592_s6 + $0x6e8] sm:$0xff] }
  0x47   : > { %311 = vst [vmem:[%s7597_s7 + $0x1b8] sm:$0xff] %v310_v55  ;;  %v424_v48 = vld [vmem:[%s7592_s6 + $0x700] sm:$0xff]  ;;  %v426_v49 = vld [vmem:[%s7592_s6 + $0x708] sm:$0xff] }
  0x48   : > { %313 = vst [vmem:[%s7597_s7 + $0x1c0] sm:$0xff] %v312_v56  ;;  %v428_v50 = vld [vmem:[%s7592_s6 + $0x720] sm:$0xff]  ;;  %v430_v51 = vld [vmem:[%s7592_s6 + $0x728] sm:$0xff] }
  0x49   : > { %315 = vst [vmem:[%s7597_s7 + $0x1c8] sm:$0xff] %v314_v57  ;;  %v432_v52 = vld [vmem:[%s7592_s6 + $0x740] sm:$0xff]  ;;  %v434_v53 = vld [vmem:[%s7592_s6 + $0x748] sm:$0xff] }
  0x4a   : > { %317 = vst [vmem:[%s7597_s7 + $0x1d0] sm:$0xff] %v316_v58  ;;  %v436_v54 = vld [vmem:[%s7592_s6 + $0x760] sm:$0xff]  ;;  %v438_v55 = vld [vmem:[%s7592_s6 + $0x768] sm:$0xff] }
  0x4b   : > { %319 = vst [vmem:[%s7597_s7 + $0x1d8] sm:$0xff] %v318_v59  ;;  %v440_v56 = vld [vmem:[%s7592_s6 + $0x780] sm:$0xff]  ;;  %v442_v57 = vld [vmem:[%s7592_s6 + $0x788] sm:$0xff] }
  0x4c   : > { %321 = vst [vmem:[%s7597_s7 + $0x1e0] sm:$0xff] %v320_v60  ;;  %v444_v58 = vld [vmem:[%s7592_s6 + $0x7a0] sm:$0xff]  ;;  %v446_v59 = vld [vmem:[%s7592_s6 + $0x7a8] sm:$0xff] }
  0x4d   : > { %323 = vst [vmem:[%s7597_s7 + $0x1e8] sm:$0xff] %v322_v61  ;;  %v448_v60 = vld [vmem:[%s7592_s6 + $0x7c0] sm:$0xff]  ;;  %v450_v61 = vld [vmem:[%s7592_s6 + $0x7c8] sm:$0xff] }
  0x4e   : > { %325 = vst [vmem:[%s7597_s7 + $0x1f0] sm:$0xff] %v324_v62  ;;  %v452_v62 = vld [vmem:[%s7592_s6 + $0x7e0] sm:$0xff] }
  0x4f   : > { %327 = vst [vmem:[%s7597_s7 + $0x1f8] sm:$0xff] %v326_v63  ;;  %v454_v63 = vld [vmem:[%s7592_s6 + $0x7e8] sm:$0xff] }
  0x50   : > { %329 = vst [vmem:[%s7597_s7 + $0x200] sm:$0xff] %v328_v0  ;;  %v456_v0 = vld [vmem:[%s7592_s6 + $0x800] sm:$0xff] }
  0x51   : > { %331 = vst [vmem:[%s7597_s7 + $0x208] sm:$0xff] %v330_v1  ;;  %v458_v1 = vld [vmem:[%s7592_s6 + $0x808] sm:$0xff] }
  0x52   : > { %333 = vst [vmem:[%s7597_s7 + $0x210] sm:$0xff] %v332_v2  ;;  %v460_v2 = vld [vmem:[%s7592_s6 + $0x820] sm:$0xff] }
  0x53   : > { %335 = vst [vmem:[%s7597_s7 + $0x218] sm:$0xff] %v334_v3  ;;  %v462_v3 = vld [vmem:[%s7592_s6 + $0x828] sm:$0xff] }
  0x54   : > { %337 = vst [vmem:[%s7597_s7 + $0x220] sm:$0xff] %v336_v4  ;;  %v464_v4 = vld [vmem:[%s7592_s6 + $0x840] sm:$0xff] }
  0x55   : > { %339 = vst [vmem:[%s7597_s7 + $0x228] sm:$0xff] %v338_v5  ;;  %v466_v5 = vld [vmem:[%s7592_s6 + $0x848] sm:$0xff] }
  0x56   : > { %341 = vst [vmem:[%s7597_s7 + $0x230] sm:$0xff] %v340_v6  ;;  %v468_v6 = vld [vmem:[%s7592_s6 + $0x860] sm:$0xff] }
  0x57   : > { %343 = vst [vmem:[%s7597_s7 + $0x238] sm:$0xff] %v342_v7  ;;  %v470_v7 = vld [vmem:[%s7592_s6 + $0x868] sm:$0xff] }
  0x58   : > { %345 = vst [vmem:[%s7597_s7 + $0x240] sm:$0xff] %v344_v8  ;;  %v472_v8 = vld [vmem:[%s7592_s6 + $0x880] sm:$0xff] }
  0x59   : > { %347 = vst [vmem:[%s7597_s7 + $0x248] sm:$0xff] %v346_v9  ;;  %v474_v9 = vld [vmem:[%s7592_s6 + $0x888] sm:$0xff] }
  0x5a   : > { %349 = vst [vmem:[%s7597_s7 + $0x250] sm:$0xff] %v348_v10  ;;  %v476_v10 = vld [vmem:[%s7592_s6 + $0x8a0] sm:$0xff] }
  0x5b   : > { %351 = vst [vmem:[%s7597_s7 + $0x258] sm:$0xff] %v350_v11  ;;  %v478_v11 = vld [vmem:[%s7592_s6 + $0x8a8] sm:$0xff] }
  0x5c   : > { %353 = vst [vmem:[%s7597_s7 + $0x260] sm:$0xff] %v352_v12  ;;  %v480_v12 = vld [vmem:[%s7592_s6 + $0x8c0] sm:$0xff] }
  0x5d   : > { %355 = vst [vmem:[%s7597_s7 + $0x268] sm:$0xff] %v354_v13  ;;  %v482_v13 = vld [vmem:[%s7592_s6 + $0x8c8] sm:$0xff] }
  0x5e   : > { %357 = vst [vmem:[%s7597_s7 + $0x270] sm:$0xff] %v356_v14  ;;  %v484_v14 = vld [vmem:[%s7592_s6 + $0x8e0] sm:$0xff] }
  0x5f   : > { %359 = vst [vmem:[%s7597_s7 + $0x278] sm:$0xff] %v358_v15  ;;  %v486_v15 = vld [vmem:[%s7592_s6 + $0x8e8] sm:$0xff] }
  0x60   : > { %361 = vst [vmem:[%s7597_s7 + $0x280] sm:$0xff] %v360_v16  ;;  %v488_v16 = vld [vmem:[%s7592_s6 + $0x900] sm:$0xff] }
  0x61   : > { %363 = vst [vmem:[%s7597_s7 + $0x288] sm:$0xff] %v362_v17  ;;  %v490_v17 = vld [vmem:[%s7592_s6 + $0x908] sm:$0xff] }
  0x62   : > { %365 = vst [vmem:[%s7597_s7 + $0x290] sm:$0xff] %v364_v18  ;;  %v492_v18 = vld [vmem:[%s7592_s6 + $0x920] sm:$0xff] }
  0x63   : > { %367 = vst [vmem:[%s7597_s7 + $0x298] sm:$0xff] %v366_v19  ;;  %v494_v19 = vld [vmem:[%s7592_s6 + $0x928] sm:$0xff] }
  0x64   : > { %369 = vst [vmem:[%s7597_s7 + $0x2a0] sm:$0xff] %v368_v20  ;;  %v496_v20 = vld [vmem:[%s7592_s6 + $0x940] sm:$0xff] }
  0x65   : > { %371 = vst [vmem:[%s7597_s7 + $0x2a8] sm:$0xff] %v370_v21  ;;  %v498_v21 = vld [vmem:[%s7592_s6 + $0x948] sm:$0xff] }
  0x66   : > { %373 = vst [vmem:[%s7597_s7 + $0x2b0] sm:$0xff] %v372_v22  ;;  %v500_v22 = vld [vmem:[%s7592_s6 + $0x960] sm:$0xff] }
  0x67   : > { %375 = vst [vmem:[%s7597_s7 + $0x2b8] sm:$0xff] %v374_v23  ;;  %v502_v23 = vld [vmem:[%s7592_s6 + $0x968] sm:$0xff] }
  0x68   : > { %377 = vst [vmem:[%s7597_s7 + $0x2c0] sm:$0xff] %v376_v24  ;;  %v504_v24 = vld [vmem:[%s7592_s6 + $0x980] sm:$0xff] }
  0x69   : > { %379 = vst [vmem:[%s7597_s7 + $0x2c8] sm:$0xff] %v378_v25  ;;  %v506_v25 = vld [vmem:[%s7592_s6 + $0x988] sm:$0xff] }
  0x6a   : > { %381 = vst [vmem:[%s7597_s7 + $0x2d0] sm:$0xff] %v380_v26  ;;  %v508_v26 = vld [vmem:[%s7592_s6 + $0x9a0] sm:$0xff] }
  0x6b   : > { %383 = vst [vmem:[%s7597_s7 + $0x2d8] sm:$0xff] %v382_v27  ;;  %v510_v27 = vld [vmem:[%s7592_s6 + $0x9a8] sm:$0xff] }
  0x6c   : > { %385 = vst [vmem:[%s7597_s7 + $0x2e0] sm:$0xff] %v384_v28  ;;  %v512_v28 = vld [vmem:[%s7592_s6 + $0x9c0] sm:$0xff] }
  0x6d   : > { %387 = vst [vmem:[%s7597_s7 + $0x2e8] sm:$0xff] %v386_v29  ;;  %v514_v29 = vld [vmem:[%s7592_s6 + $0x9c8] sm:$0xff] }
  0x6e   : > { %389 = vst [vmem:[%s7597_s7 + $0x2f0] sm:$0xff] %v388_v30  ;;  %v516_v30 = vld [vmem:[%s7592_s6 + $0x9e0] sm:$0xff] }
  0x6f   : > { %391 = vst [vmem:[%s7597_s7 + $0x2f8] sm:$0xff] %v390_v31  ;;  %v518_v31 = vld [vmem:[%s7592_s6 + $0x9e8] sm:$0xff] }
  0x70   : > { %393 = vst [vmem:[%s7597_s7 + $0x300] sm:$0xff] %v392_v32  ;;  %v520_v32 = vld [vmem:[%s7592_s6 + $0xa00] sm:$0xff] }
  0x71   : > { %395 = vst [vmem:[%s7597_s7 + $0x308] sm:$0xff] %v394_v33  ;;  %v522_v33 = vld [vmem:[%s7592_s6 + $0xa08] sm:$0xff] }
  0x72   : > { %397 = vst [vmem:[%s7597_s7 + $0x310] sm:$0xff] %v396_v34  ;;  %v524_v34 = vld [vmem:[%s7592_s6 + $0xa20] sm:$0xff] }
  0x73   : > { %399 = vst [vmem:[%s7597_s7 + $0x318] sm:$0xff] %v398_v35  ;;  %v526_v35 = vld [vmem:[%s7592_s6 + $0xa28] sm:$0xff] }
  0x74   : > { %401 = vst [vmem:[%s7597_s7 + $0x320] sm:$0xff] %v400_v36  ;;  %v528_v36 = vld [vmem:[%s7592_s6 + $0xa40] sm:$0xff] }
  0x75   : > { %403 = vst [vmem:[%s7597_s7 + $0x328] sm:$0xff] %v402_v37  ;;  %v530_v37 = vld [vmem:[%s7592_s6 + $0xa48] sm:$0xff] }
  0x76   : > { %405 = vst [vmem:[%s7597_s7 + $0x330] sm:$0xff] %v404_v38  ;;  %v532_v38 = vld [vmem:[%s7592_s6 + $0xa60] sm:$0xff] }
  0x77   : > { %407 = vst [vmem:[%s7597_s7 + $0x338] sm:$0xff] %v406_v39  ;;  %v534_v39 = vld [vmem:[%s7592_s6 + $0xa68] sm:$0xff] }
  0x78   : > { %409 = vst [vmem:[%s7597_s7 + $0x340] sm:$0xff] %v408_v40  ;;  %v536_v40 = vld [vmem:[%s7592_s6 + $0xa80] sm:$0xff] }
  0x79   : > { %411 = vst [vmem:[%s7597_s7 + $0x348] sm:$0xff] %v410_v41  ;;  %v538_v41 = vld [vmem:[%s7592_s6 + $0xa88] sm:$0xff] }
  0x7a   : > { %413 = vst [vmem:[%s7597_s7 + $0x350] sm:$0xff] %v412_v42  ;;  %v540_v42 = vld [vmem:[%s7592_s6 + $0xaa0] sm:$0xff] }
  0x7b   : > { %415 = vst [vmem:[%s7597_s7 + $0x358] sm:$0xff] %v414_v43  ;;  %v542_v43 = vld [vmem:[%s7592_s6 + $0xaa8] sm:$0xff] }
  0x7c   : > { %417 = vst [vmem:[%s7597_s7 + $0x360] sm:$0xff] %v416_v44  ;;  %v544_v44 = vld [vmem:[%s7592_s6 + $0xac0] sm:$0xff] }
  0x7d   : > { %419 = vst [vmem:[%s7597_s7 + $0x368] sm:$0xff] %v418_v45  ;;  %v546_v45 = vld [vmem:[%s7592_s6 + $0xac8] sm:$0xff] }
  0x7e   : > { %421 = vst [vmem:[%s7597_s7 + $0x370] sm:$0xff] %v420_v46  ;;  %v548_v46 = vld [vmem:[%s7592_s6 + $0xae0] sm:$0xff] }
  0x7f   : > { %423 = vst [vmem:[%s7597_s7 + $0x378] sm:$0xff] %v422_v47  ;;  %v550_v47 = vld [vmem:[%s7592_s6 + $0xae8] sm:$0xff] }
  0x80   : > { %425 = vst [vmem:[%s7597_s7 + $0x380] sm:$0xff] %v424_v48  ;;  %v552_v48 = vld [vmem:[%s7592_s6 + $0xb00] sm:$0xff] }
  0x81   : > { %427 = vst [vmem:[%s7597_s7 + $0x388] sm:$0xff] %v426_v49  ;;  %v554_v49 = vld [vmem:[%s7592_s6 + $0xb08] sm:$0xff] }
  0x82   : > { %429 = vst [vmem:[%s7597_s7 + $0x390] sm:$0xff] %v428_v50  ;;  %v556_v50 = vld [vmem:[%s7592_s6 + $0xb20] sm:$0xff] }
  0x83   : > { %431 = vst [vmem:[%s7597_s7 + $0x398] sm:$0xff] %v430_v51  ;;  %v558_v51 = vld [vmem:[%s7592_s6 + $0xb28] sm:$0xff] }
  0x84   : > { %433 = vst [vmem:[%s7597_s7 + $0x3a0] sm:$0xff] %v432_v52  ;;  %v560_v52 = vld [vmem:[%s7592_s6 + $0xb40] sm:$0xff] }
  0x85   : > { %435 = vst [vmem:[%s7597_s7 + $0x3a8] sm:$0xff] %v434_v53  ;;  %v562_v53 = vld [vmem:[%s7592_s6 + $0xb48] sm:$0xff] }
  0x86   : > { %437 = vst [vmem:[%s7597_s7 + $0x3b0] sm:$0xff] %v436_v54  ;;  %v564_v54 = vld [vmem:[%s7592_s6 + $0xb60] sm:$0xff] }
  0x87   : > { %439 = vst [vmem:[%s7597_s7 + $0x3b8] sm:$0xff] %v438_v55  ;;  %v566_v55 = vld [vmem:[%s7592_s6 + $0xb68] sm:$0xff] }
  0x88   : > { %441 = vst [vmem:[%s7597_s7 + $0x3c0] sm:$0xff] %v440_v56  ;;  %v568_v56 = vld [vmem:[%s7592_s6 + $0xb80] sm:$0xff] }
  0x89   : > { %443 = vst [vmem:[%s7597_s7 + $0x3c8] sm:$0xff] %v442_v57  ;;  %v570_v57 = vld [vmem:[%s7592_s6 + $0xb88] sm:$0xff] }
  0x8a   : > { %445 = vst [vmem:[%s7597_s7 + $0x3d0] sm:$0xff] %v444_v58  ;;  %v572_v58 = vld [vmem:[%s7592_s6 + $0xba0] sm:$0xff] }
  0x8b   : > { %447 = vst [vmem:[%s7597_s7 + $0x3d8] sm:$0xff] %v446_v59  ;;  %v574_v59 = vld [vmem:[%s7592_s6 + $0xba8] sm:$0xff] }
  0x8c   : > { %449 = vst [vmem:[%s7597_s7 + $0x3e0] sm:$0xff] %v448_v60  ;;  %v576_v60 = vld [vmem:[%s7592_s6 + $0xbc0] sm:$0xff] }
  0x8d   : > { %451 = vst [vmem:[%s7597_s7 + $0x3e8] sm:$0xff] %v450_v61  ;;  %v578_v61 = vld [vmem:[%s7592_s6 + $0xbc8] sm:$0xff] }
  0x8e   : > { %453 = vst [vmem:[%s7597_s7 + $0x3f0] sm:$0xff] %v452_v62  ;;  %v580_v62 = vld [vmem:[%s7592_s6 + $0xbe0] sm:$0xff] }
  0x8f   : > { %455 = vst [vmem:[%s7597_s7 + $0x3f8] sm:$0xff] %v454_v63  ;;  %v582_v63 = vld [vmem:[%s7592_s6 + $0xbe8] sm:$0xff] }
  0x90   : > { %457 = vst [vmem:[%s7597_s7 + $0x400] sm:$0xff] %v456_v0  ;;  %v584_v0 = vld [vmem:[%s7592_s6 + $0xc00] sm:$0xff] }
  0x91   : > { %459 = vst [vmem:[%s7597_s7 + $0x408] sm:$0xff] %v458_v1  ;;  %v586_v1 = vld [vmem:[%s7592_s6 + $0xc08] sm:$0xff] }
  0x92   : > { %461 = vst [vmem:[%s7597_s7 + $0x410] sm:$0xff] %v460_v2  ;;  %v588_v2 = vld [vmem:[%s7592_s6 + $0xc20] sm:$0xff] }
  0x93   : > { %463 = vst [vmem:[%s7597_s7 + $0x418] sm:$0xff] %v462_v3  ;;  %v590_v3 = vld [vmem:[%s7592_s6 + $0xc28] sm:$0xff] }
  0x94   : > { %465 = vst [vmem:[%s7597_s7 + $0x420] sm:$0xff] %v464_v4  ;;  %v592_v4 = vld [vmem:[%s7592_s6 + $0xc40] sm:$0xff] }
  0x95   : > { %467 = vst [vmem:[%s7597_s7 + $0x428] sm:$0xff] %v466_v5  ;;  %v594_v5 = vld [vmem:[%s7592_s6 + $0xc48] sm:$0xff] }
  0x96   : > { %469 = vst [vmem:[%s7597_s7 + $0x430] sm:$0xff] %v468_v6  ;;  %v596_v6 = vld [vmem:[%s7592_s6 + $0xc60] sm:$0xff] }
  0x97   : > { %471 = vst [vmem:[%s7597_s7 + $0x438] sm:$0xff] %v470_v7  ;;  %v598_v7 = vld [vmem:[%s7592_s6 + $0xc68] sm:$0xff] }
  0x98   : > { %473 = vst [vmem:[%s7597_s7 + $0x440] sm:$0xff] %v472_v8  ;;  %v600_v8 = vld [vmem:[%s7592_s6 + $0xc80] sm:$0xff] }
  0x99   : > { %475 = vst [vmem:[%s7597_s7 + $0x448] sm:$0xff] %v474_v9  ;;  %v602_v9 = vld [vmem:[%s7592_s6 + $0xc88] sm:$0xff] }
  0x9a   : > { %477 = vst [vmem:[%s7597_s7 + $0x450] sm:$0xff] %v476_v10  ;;  %v604_v10 = vld [vmem:[%s7592_s6 + $0xca0] sm:$0xff] }
  0x9b   : > { %479 = vst [vmem:[%s7597_s7 + $0x458] sm:$0xff] %v478_v11  ;;  %v606_v11 = vld [vmem:[%s7592_s6 + $0xca8] sm:$0xff] }
  0x9c   : > { %481 = vst [vmem:[%s7597_s7 + $0x460] sm:$0xff] %v480_v12  ;;  %v608_v12 = vld [vmem:[%s7592_s6 + $0xcc0] sm:$0xff] }
  0x9d   : > { %483 = vst [vmem:[%s7597_s7 + $0x468] sm:$0xff] %v482_v13  ;;  %v610_v13 = vld [vmem:[%s7592_s6 + $0xcc8] sm:$0xff] }
  0x9e   : > { %485 = vst [vmem:[%s7597_s7 + $0x470] sm:$0xff] %v484_v14  ;;  %v612_v14 = vld [vmem:[%s7592_s6 + $0xce0] sm:$0xff] }
  0x9f   : > { %487 = vst [vmem:[%s7597_s7 + $0x478] sm:$0xff] %v486_v15  ;;  %v614_v15 = vld [vmem:[%s7592_s6 + $0xce8] sm:$0xff] }
  0xa0   : > { %489 = vst [vmem:[%s7597_s7 + $0x480] sm:$0xff] %v488_v16  ;;  %v616_v16 = vld [vmem:[%s7592_s6 + $0xd00] sm:$0xff] }
  0xa1   : > { %491 = vst [vmem:[%s7597_s7 + $0x488] sm:$0xff] %v490_v17  ;;  %v618_v17 = vld [vmem:[%s7592_s6 + $0xd08] sm:$0xff] }
  0xa2   : > { %493 = vst [vmem:[%s7597_s7 + $0x490] sm:$0xff] %v492_v18  ;;  %v620_v18 = vld [vmem:[%s7592_s6 + $0xd20] sm:$0xff] }
  0xa3   : > { %495 = vst [vmem:[%s7597_s7 + $0x498] sm:$0xff] %v494_v19  ;;  %v622_v19 = vld [vmem:[%s7592_s6 + $0xd28] sm:$0xff] }
  0xa4   : > { %497 = vst [vmem:[%s7597_s7 + $0x4a0] sm:$0xff] %v496_v20  ;;  %v624_v20 = vld [vmem:[%s7592_s6 + $0xd40] sm:$0xff] }
  0xa5   : > { %499 = vst [vmem:[%s7597_s7 + $0x4a8] sm:$0xff] %v498_v21  ;;  %v626_v21 = vld [vmem:[%s7592_s6 + $0xd48] sm:$0xff] }
  0xa6   : > { %501 = vst [vmem:[%s7597_s7 + $0x4b0] sm:$0xff] %v500_v22  ;;  %v628_v22 = vld [vmem:[%s7592_s6 + $0xd60] sm:$0xff] }
  0xa7   : > { %503 = vst [vmem:[%s7597_s7 + $0x4b8] sm:$0xff] %v502_v23  ;;  %v630_v23 = vld [vmem:[%s7592_s6 + $0xd68] sm:$0xff] }
  0xa8   : > { %505 = vst [vmem:[%s7597_s7 + $0x4c0] sm:$0xff] %v504_v24  ;;  %v632_v24 = vld [vmem:[%s7592_s6 + $0xd80] sm:$0xff] }
  0xa9   : > { %507 = vst [vmem:[%s7597_s7 + $0x4c8] sm:$0xff] %v506_v25  ;;  %v634_v25 = vld [vmem:[%s7592_s6 + $0xd88] sm:$0xff] }
  0xaa   : > { %509 = vst [vmem:[%s7597_s7 + $0x4d0] sm:$0xff] %v508_v26  ;;  %v636_v26 = vld [vmem:[%s7592_s6 + $0xda0] sm:$0xff] }
  0xab   : > { %511 = vst [vmem:[%s7597_s7 + $0x4d8] sm:$0xff] %v510_v27  ;;  %v638_v27 = vld [vmem:[%s7592_s6 + $0xda8] sm:$0xff] }
  0xac   : > { %513 = vst [vmem:[%s7597_s7 + $0x4e0] sm:$0xff] %v512_v28  ;;  %v640_v28 = vld [vmem:[%s7592_s6 + $0xdc0] sm:$0xff] }
  0xad   : > { %515 = vst [vmem:[%s7597_s7 + $0x4e8] sm:$0xff] %v514_v29  ;;  %v642_v29 = vld [vmem:[%s7592_s6 + $0xdc8] sm:$0xff] }
  0xae   : > { %517 = vst [vmem:[%s7597_s7 + $0x4f0] sm:$0xff] %v516_v30  ;;  %v644_v30 = vld [vmem:[%s7592_s6 + $0xde0] sm:$0xff] }
  0xaf   : > { %519 = vst [vmem:[%s7597_s7 + $0x4f8] sm:$0xff] %v518_v31  ;;  %v646_v31 = vld [vmem:[%s7592_s6 + $0xde8] sm:$0xff] }
  0xb0   : > { %521 = vst [vmem:[%s7597_s7 + $0x500] sm:$0xff] %v520_v32  ;;  %v648_v32 = vld [vmem:[%s7592_s6 + $0xe00] sm:$0xff] }
  0xb1   : > { %523 = vst [vmem:[%s7597_s7 + $0x508] sm:$0xff] %v522_v33  ;;  %v650_v33 = vld [vmem:[%s7592_s6 + $0xe08] sm:$0xff] }
  0xb2   : > { %525 = vst [vmem:[%s7597_s7 + $0x510] sm:$0xff] %v524_v34  ;;  %v652_v34 = vld [vmem:[%s7592_s6 + $0xe20] sm:$0xff] }
  0xb3   : > { %527 = vst [vmem:[%s7597_s7 + $0x518] sm:$0xff] %v526_v35  ;;  %v654_v35 = vld [vmem:[%s7592_s6 + $0xe28] sm:$0xff] }
  0xb4   : > { %529 = vst [vmem:[%s7597_s7 + $0x520] sm:$0xff] %v528_v36  ;;  %v656_v36 = vld [vmem:[%s7592_s6 + $0xe40] sm:$0xff] }
  0xb5   : > { %531 = vst [vmem:[%s7597_s7 + $0x528] sm:$0xff] %v530_v37  ;;  %v658_v37 = vld [vmem:[%s7592_s6 + $0xe48] sm:$0xff] }
  0xb6   : > { %533 = vst [vmem:[%s7597_s7 + $0x530] sm:$0xff] %v532_v38  ;;  %v660_v38 = vld [vmem:[%s7592_s6 + $0xe60] sm:$0xff] }
  0xb7   : > { %535 = vst [vmem:[%s7597_s7 + $0x538] sm:$0xff] %v534_v39  ;;  %v662_v39 = vld [vmem:[%s7592_s6 + $0xe68] sm:$0xff] }
  0xb8   : > { %537 = vst [vmem:[%s7597_s7 + $0x540] sm:$0xff] %v536_v40  ;;  %v664_v40 = vld [vmem:[%s7592_s6 + $0xe80] sm:$0xff] }
  0xb9   : > { %539 = vst [vmem:[%s7597_s7 + $0x548] sm:$0xff] %v538_v41  ;;  %v666_v41 = vld [vmem:[%s7592_s6 + $0xe88] sm:$0xff] }
  0xba   : > { %541 = vst [vmem:[%s7597_s7 + $0x550] sm:$0xff] %v540_v42  ;;  %v668_v42 = vld [vmem:[%s7592_s6 + $0xea0] sm:$0xff] }
  0xbb   : > { %543 = vst [vmem:[%s7597_s7 + $0x558] sm:$0xff] %v542_v43  ;;  %v670_v43 = vld [vmem:[%s7592_s6 + $0xea8] sm:$0xff] }
  0xbc   : > { %545 = vst [vmem:[%s7597_s7 + $0x560] sm:$0xff] %v544_v44  ;;  %v672_v44 = vld [vmem:[%s7592_s6 + $0xec0] sm:$0xff] }
  0xbd   : > { %547 = vst [vmem:[%s7597_s7 + $0x568] sm:$0xff] %v546_v45  ;;  %v674_v45 = vld [vmem:[%s7592_s6 + $0xec8] sm:$0xff] }
  0xbe   : > { %549 = vst [vmem:[%s7597_s7 + $0x570] sm:$0xff] %v548_v46  ;;  %v676_v46 = vld [vmem:[%s7592_s6 + $0xee0] sm:$0xff] }
  0xbf   : > { %551 = vst [vmem:[%s7597_s7 + $0x578] sm:$0xff] %v550_v47  ;;  %v678_v47 = vld [vmem:[%s7592_s6 + $0xee8] sm:$0xff] }
  0xc0   : > { %553 = vst [vmem:[%s7597_s7 + $0x580] sm:$0xff] %v552_v48  ;;  %v680_v48 = vld [vmem:[%s7592_s6 + $0xf00] sm:$0xff] }
  0xc1   : > { %555 = vst [vmem:[%s7597_s7 + $0x588] sm:$0xff] %v554_v49  ;;  %v682_v49 = vld [vmem:[%s7592_s6 + $0xf08] sm:$0xff] }
  0xc2   : > { %557 = vst [vmem:[%s7597_s7 + $0x590] sm:$0xff] %v556_v50  ;;  %v684_v50 = vld [vmem:[%s7592_s6 + $0xf20] sm:$0xff] }
  0xc3   : > { %559 = vst [vmem:[%s7597_s7 + $0x598] sm:$0xff] %v558_v51  ;;  %v686_v51 = vld [vmem:[%s7592_s6 + $0xf28] sm:$0xff] }
  0xc4   : > { %561 = vst [vmem:[%s7597_s7 + $0x5a0] sm:$0xff] %v560_v52  ;;  %v688_v52 = vld [vmem:[%s7592_s6 + $0xf40] sm:$0xff] }
  0xc5   : > { %563 = vst [vmem:[%s7597_s7 + $0x5a8] sm:$0xff] %v562_v53  ;;  %v690_v53 = vld [vmem:[%s7592_s6 + $0xf48] sm:$0xff] }
  0xc6   : > { %565 = vst [vmem:[%s7597_s7 + $0x5b0] sm:$0xff] %v564_v54  ;;  %v692_v54 = vld [vmem:[%s7592_s6 + $0xf60] sm:$0xff] }
  0xc7   : > { %567 = vst [vmem:[%s7597_s7 + $0x5b8] sm:$0xff] %v566_v55  ;;  %v694_v55 = vld [vmem:[%s7592_s6 + $0xf68] sm:$0xff] }
  0xc8   : > { %569 = vst [vmem:[%s7597_s7 + $0x5c0] sm:$0xff] %v568_v56  ;;  %v696_v56 = vld [vmem:[%s7592_s6 + $0xf80] sm:$0xff] }
  0xc9   : > { %571 = vst [vmem:[%s7597_s7 + $0x5c8] sm:$0xff] %v570_v57  ;;  %v698_v57 = vld [vmem:[%s7592_s6 + $0xf88] sm:$0xff] }
  0xca   : > { %573 = vst [vmem:[%s7597_s7 + $0x5d0] sm:$0xff] %v572_v58  ;;  %v700_v58 = vld [vmem:[%s7592_s6 + $0xfa0] sm:$0xff] }
  0xcb   : > { %575 = vst [vmem:[%s7597_s7 + $0x5d8] sm:$0xff] %v574_v59  ;;  %v702_v59 = vld [vmem:[%s7592_s6 + $0xfa8] sm:$0xff] }
  0xcc   : > { %577 = vst [vmem:[%s7597_s7 + $0x5e0] sm:$0xff] %v576_v60  ;;  %v704_v60 = vld [vmem:[%s7592_s6 + $0xfc0] sm:$0xff] }
  0xcd   : > { %579 = vst [vmem:[%s7597_s7 + $0x5e8] sm:$0xff] %v578_v61  ;;  %v706_v61 = vld [vmem:[%s7592_s6 + $0xfc8] sm:$0xff] }
  0xce   : > { %581 = vst [vmem:[%s7597_s7 + $0x5f0] sm:$0xff] %v580_v62  ;;  %v708_v62 = vld [vmem:[%s7592_s6 + $0xfe0] sm:$0xff] }
  0xcf   : > { %583 = vst [vmem:[%s7597_s7 + $0x5f8] sm:$0xff] %v582_v63  ;;  %v710_v63 = vld [vmem:[%s7592_s6 + $0xfe8] sm:$0xff] }
  0xd0   : > { %585 = vst [vmem:[%s7597_s7 + $0x600] sm:$0xff] %v584_v0  ;;  %v712_v0 = vld [vmem:[%s7592_s6 + $0x1000] sm:$0xff] }
  0xd1   : > { %587 = vst [vmem:[%s7597_s7 + $0x608] sm:$0xff] %v586_v1  ;;  %v714_v1 = vld [vmem:[%s7592_s6 + $0x1008] sm:$0xff] }
  0xd2   : > { %589 = vst [vmem:[%s7597_s7 + $0x610] sm:$0xff] %v588_v2  ;;  %v716_v2 = vld [vmem:[%s7592_s6 + $0x1020] sm:$0xff] }
  0xd3   : > { %591 = vst [vmem:[%s7597_s7 + $0x618] sm:$0xff] %v590_v3  ;;  %v718_v3 = vld [vmem:[%s7592_s6 + $0x1028] sm:$0xff] }
  0xd4   : > { %593 = vst [vmem:[%s7597_s7 + $0x620] sm:$0xff] %v592_v4  ;;  %v720_v4 = vld [vmem:[%s7592_s6 + $0x1040] sm:$0xff] }
  0xd5   : > { %595 = vst [vmem:[%s7597_s7 + $0x628] sm:$0xff] %v594_v5  ;;  %v722_v5 = vld [vmem:[%s7592_s6 + $0x1048] sm:$0xff] }
  0xd6   : > { %597 = vst [vmem:[%s7597_s7 + $0x630] sm:$0xff] %v596_v6  ;;  %v724_v6 = vld [vmem:[%s7592_s6 + $0x1060] sm:$0xff] }
  0xd7   : > { %599 = vst [vmem:[%s7597_s7 + $0x638] sm:$0xff] %v598_v7  ;;  %v726_v7 = vld [vmem:[%s7592_s6 + $0x1068] sm:$0xff] }
  0xd8   : > { %601 = vst [vmem:[%s7597_s7 + $0x640] sm:$0xff] %v600_v8  ;;  %v728_v8 = vld [vmem:[%s7592_s6 + $0x1080] sm:$0xff] }
  0xd9   : > { %603 = vst [vmem:[%s7597_s7 + $0x648] sm:$0xff] %v602_v9  ;;  %v730_v9 = vld [vmem:[%s7592_s6 + $0x1088] sm:$0xff] }
  0xda   : > { %605 = vst [vmem:[%s7597_s7 + $0x650] sm:$0xff] %v604_v10  ;;  %v732_v10 = vld [vmem:[%s7592_s6 + $0x10a0] sm:$0xff] }
  0xdb   : > { %607 = vst [vmem:[%s7597_s7 + $0x658] sm:$0xff] %v606_v11  ;;  %v734_v11 = vld [vmem:[%s7592_s6 + $0x10a8] sm:$0xff] }
  0xdc   : > { %609 = vst [vmem:[%s7597_s7 + $0x660] sm:$0xff] %v608_v12  ;;  %v736_v12 = vld [vmem:[%s7592_s6 + $0x10c0] sm:$0xff] }
  0xdd   : > { %611 = vst [vmem:[%s7597_s7 + $0x668] sm:$0xff] %v610_v13  ;;  %v738_v13 = vld [vmem:[%s7592_s6 + $0x10c8] sm:$0xff] }
  0xde   : > { %613 = vst [vmem:[%s7597_s7 + $0x670] sm:$0xff] %v612_v14  ;;  %v740_v14 = vld [vmem:[%s7592_s6 + $0x10e0] sm:$0xff] }
  0xdf   : > { %615 = vst [vmem:[%s7597_s7 + $0x678] sm:$0xff] %v614_v15  ;;  %v742_v15 = vld [vmem:[%s7592_s6 + $0x10e8] sm:$0xff] }
  0xe0   : > { %617 = vst [vmem:[%s7597_s7 + $0x680] sm:$0xff] %v616_v16  ;;  %v744_v16 = vld [vmem:[%s7592_s6 + $0x1100] sm:$0xff] }
  0xe1   : > { %619 = vst [vmem:[%s7597_s7 + $0x688] sm:$0xff] %v618_v17  ;;  %v746_v17 = vld [vmem:[%s7592_s6 + $0x1108] sm:$0xff] }
  0xe2   : > { %621 = vst [vmem:[%s7597_s7 + $0x690] sm:$0xff] %v620_v18  ;;  %v748_v18 = vld [vmem:[%s7592_s6 + $0x1120] sm:$0xff] }
  0xe3   : > { %623 = vst [vmem:[%s7597_s7 + $0x698] sm:$0xff] %v622_v19  ;;  %v750_v19 = vld [vmem:[%s7592_s6 + $0x1128] sm:$0xff] }
  0xe4   : > { %625 = vst [vmem:[%s7597_s7 + $0x6a0] sm:$0xff] %v624_v20  ;;  %v752_v20 = vld [vmem:[%s7592_s6 + $0x1140] sm:$0xff] }
  0xe5   : > { %627 = vst [vmem:[%s7597_s7 + $0x6a8] sm:$0xff] %v626_v21  ;;  %v754_v21 = vld [vmem:[%s7592_s6 + $0x1148] sm:$0xff] }
  0xe6   : > { %629 = vst [vmem:[%s7597_s7 + $0x6b0] sm:$0xff] %v628_v22  ;;  %v756_v22 = vld [vmem:[%s7592_s6 + $0x1160] sm:$0xff] }
  0xe7   : > { %631 = vst [vmem:[%s7597_s7 + $0x6b8] sm:$0xff] %v630_v23  ;;  %v758_v23 = vld [vmem:[%s7592_s6 + $0x1168] sm:$0xff] }
  0xe8   : > { %633 = vst [vmem:[%s7597_s7 + $0x6c0] sm:$0xff] %v632_v24  ;;  %v760_v24 = vld [vmem:[%s7592_s6 + $0x1180] sm:$0xff] }
  0xe9   : > { %635 = vst [vmem:[%s7597_s7 + $0x6c8] sm:$0xff] %v634_v25  ;;  %v762_v25 = vld [vmem:[%s7592_s6 + $0x1188] sm:$0xff] }
  0xea   : > { %637 = vst [vmem:[%s7597_s7 + $0x6d0] sm:$0xff] %v636_v26  ;;  %v764_v26 = vld [vmem:[%s7592_s6 + $0x11a0] sm:$0xff] }
  0xeb   : > { %639 = vst [vmem:[%s7597_s7 + $0x6d8] sm:$0xff] %v638_v27  ;;  %v766_v27 = vld [vmem:[%s7592_s6 + $0x11a8] sm:$0xff] }
  0xec   : > { %641 = vst [vmem:[%s7597_s7 + $0x6e0] sm:$0xff] %v640_v28  ;;  %v768_v28 = vld [vmem:[%s7592_s6 + $0x11c0] sm:$0xff] }
  0xed   : > { %643 = vst [vmem:[%s7597_s7 + $0x6e8] sm:$0xff] %v642_v29  ;;  %v770_v29 = vld [vmem:[%s7592_s6 + $0x11c8] sm:$0xff] }
  0xee   : > { %645 = vst [vmem:[%s7597_s7 + $0x6f0] sm:$0xff] %v644_v30  ;;  %v772_v30 = vld [vmem:[%s7592_s6 + $0x11e0] sm:$0xff] }
  0xef   : > { %647 = vst [vmem:[%s7597_s7 + $0x6f8] sm:$0xff] %v646_v31  ;;  %v774_v31 = vld [vmem:[%s7592_s6 + $0x11e8] sm:$0xff] }
  0xf0   : > { %649 = vst [vmem:[%s7597_s7 + $0x700] sm:$0xff] %v648_v32  ;;  %v776_v32 = vld [vmem:[%s7592_s6 + $0x1200] sm:$0xff] }
  0xf1   : > { %651 = vst [vmem:[%s7597_s7 + $0x708] sm:$0xff] %v650_v33  ;;  %v778_v33 = vld [vmem:[%s7592_s6 + $0x1208] sm:$0xff] }
  0xf2   : > { %653 = vst [vmem:[%s7597_s7 + $0x710] sm:$0xff] %v652_v34  ;;  %v780_v34 = vld [vmem:[%s7592_s6 + $0x1220] sm:$0xff] }
  0xf3   : > { %655 = vst [vmem:[%s7597_s7 + $0x718] sm:$0xff] %v654_v35  ;;  %v782_v35 = vld [vmem:[%s7592_s6 + $0x1228] sm:$0xff] }
  0xf4   : > { %657 = vst [vmem:[%s7597_s7 + $0x720] sm:$0xff] %v656_v36  ;;  %v784_v36 = vld [vmem:[%s7592_s6 + $0x1240] sm:$0xff] }
  0xf5   : > { %659 = vst [vmem:[%s7597_s7 + $0x728] sm:$0xff] %v658_v37  ;;  %v786_v37 = vld [vmem:[%s7592_s6 + $0x1248] sm:$0xff] }
  0xf6   : > { %661 = vst [vmem:[%s7597_s7 + $0x730] sm:$0xff] %v660_v38  ;;  %v788_v38 = vld [vmem:[%s7592_s6 + $0x1260] sm:$0xff] }
  0xf7   : > { %663 = vst [vmem:[%s7597_s7 + $0x738] sm:$0xff] %v662_v39  ;;  %v790_v39 = vld [vmem:[%s7592_s6 + $0x1268] sm:$0xff] }
  0xf8   : > { %665 = vst [vmem:[%s7597_s7 + $0x740] sm:$0xff] %v664_v40  ;;  %v792_v40 = vld [vmem:[%s7592_s6 + $0x1280] sm:$0xff] }
  0xf9   : > { %667 = vst [vmem:[%s7597_s7 + $0x748] sm:$0xff] %v666_v41  ;;  %v794_v41 = vld [vmem:[%s7592_s6 + $0x1288] sm:$0xff] }
  0xfa   : > { %669 = vst [vmem:[%s7597_s7 + $0x750] sm:$0xff] %v668_v42  ;;  %v796_v42 = vld [vmem:[%s7592_s6 + $0x12a0] sm:$0xff] }
  0xfb   : > { %671 = vst [vmem:[%s7597_s7 + $0x758] sm:$0xff] %v670_v43  ;;  %v798_v43 = vld [vmem:[%s7592_s6 + $0x12a8] sm:$0xff] }
  0xfc   : > { %673 = vst [vmem:[%s7597_s7 + $0x760] sm:$0xff] %v672_v44  ;;  %v800_v44 = vld [vmem:[%s7592_s6 + $0x12c0] sm:$0xff] }
  0xfd   : > { %675 = vst [vmem:[%s7597_s7 + $0x768] sm:$0xff] %v674_v45  ;;  %v802_v45 = vld [vmem:[%s7592_s6 + $0x12c8] sm:$0xff] }
  0xfe   : > { %677 = vst [vmem:[%s7597_s7 + $0x770] sm:$0xff] %v676_v46  ;;  %v804_v46 = vld [vmem:[%s7592_s6 + $0x12e0] sm:$0xff] }
  0xff   : > { %679 = vst [vmem:[%s7597_s7 + $0x778] sm:$0xff] %v678_v47  ;;  %v806_v47 = vld [vmem:[%s7592_s6 + $0x12e8] sm:$0xff] }
 0x100   : > { %681 = vst [vmem:[%s7597_s7 + $0x780] sm:$0xff] %v680_v48  ;;  %v808_v48 = vld [vmem:[%s7592_s6 + $0x1300] sm:$0xff] }
 0x101   : > { %683 = vst [vmem:[%s7597_s7 + $0x788] sm:$0xff] %v682_v49  ;;  %v810_v49 = vld [vmem:[%s7592_s6 + $0x1308] sm:$0xff] }
 0x102   : > { %685 = vst [vmem:[%s7597_s7 + $0x790] sm:$0xff] %v684_v50  ;;  %v812_v50 = vld [vmem:[%s7592_s6 + $0x1320] sm:$0xff] }
 0x103   : > { %687 = vst [vmem:[%s7597_s7 + $0x798] sm:$0xff] %v686_v51  ;;  %v814_v51 = vld [vmem:[%s7592_s6 + $0x1328] sm:$0xff] }
 0x104   : > { %689 = vst [vmem:[%s7597_s7 + $0x7a0] sm:$0xff] %v688_v52  ;;  %v816_v52 = vld [vmem:[%s7592_s6 + $0x1340] sm:$0xff] }
 0x105   : > { %691 = vst [vmem:[%s7597_s7 + $0x7a8] sm:$0xff] %v690_v53  ;;  %v818_v53 = vld [vmem:[%s7592_s6 + $0x1348] sm:$0xff] }
 0x106   : > { %693 = vst [vmem:[%s7597_s7 + $0x7b0] sm:$0xff] %v692_v54  ;;  %v820_v54 = vld [vmem:[%s7592_s6 + $0x1360] sm:$0xff] }
 0x107   : > { %695 = vst [vmem:[%s7597_s7 + $0x7b8] sm:$0xff] %v694_v55  ;;  %v822_v55 = vld [vmem:[%s7592_s6 + $0x1368] sm:$0xff] }
 0x108   : > { %697 = vst [vmem:[%s7597_s7 + $0x7c0] sm:$0xff] %v696_v56  ;;  %v824_v56 = vld [vmem:[%s7592_s6 + $0x1380] sm:$0xff] }
 0x109   : > { %699 = vst [vmem:[%s7597_s7 + $0x7c8] sm:$0xff] %v698_v57  ;;  %v826_v57 = vld [vmem:[%s7592_s6 + $0x1388] sm:$0xff] }
 0x10a   : > { %701 = vst [vmem:[%s7597_s7 + $0x7d0] sm:$0xff] %v700_v58  ;;  %v828_v58 = vld [vmem:[%s7592_s6 + $0x13a0] sm:$0xff] }
 0x10b   : > { %703 = vst [vmem:[%s7597_s7 + $0x7d8] sm:$0xff] %v702_v59  ;;  %v830_v59 = vld [vmem:[%s7592_s6 + $0x13a8] sm:$0xff] }
 0x10c   : > { %705 = vst [vmem:[%s7597_s7 + $0x7e0] sm:$0xff] %v704_v60  ;;  %v832_v60 = vld [vmem:[%s7592_s6 + $0x13c0] sm:$0xff] }
 0x10d   : > { %707 = vst [vmem:[%s7597_s7 + $0x7e8] sm:$0xff] %v706_v61  ;;  %v834_v61 = vld [vmem:[%s7592_s6 + $0x13c8] sm:$0xff] }
 0x10e   : > { %709 = vst [vmem:[%s7597_s7 + $0x7f0] sm:$0xff] %v708_v62  ;;  %v836_v62 = vld [vmem:[%s7592_s6 + $0x13e0] sm:$0xff] }
 0x10f   : > { %711 = vst [vmem:[%s7597_s7 + $0x7f8] sm:$0xff] %v710_v63  ;;  %v838_v63 = vld [vmem:[%s7592_s6 + $0x13e8] sm:$0xff] }
 0x110   : > { %713 = vst [vmem:[%s7597_s7 + $0x800] sm:$0xff] %v712_v0  ;;  %v840_v0 = vld [vmem:[%s7592_s6 + $0x1400] sm:$0xff] }
 0x111   : > { %715 = vst [vmem:[%s7597_s7 + $0x808] sm:$0xff] %v714_v1  ;;  %v842_v1 = vld [vmem:[%s7592_s6 + $0x1408] sm:$0xff] }
 0x112   : > { %717 = vst [vmem:[%s7597_s7 + $0x810] sm:$0xff] %v716_v2  ;;  %v844_v2 = vld [vmem:[%s7592_s6 + $0x1420] sm:$0xff] }
 0x113   : > { %719 = vst [vmem:[%s7597_s7 + $0x818] sm:$0xff] %v718_v3  ;;  %v846_v3 = vld [vmem:[%s7592_s6 + $0x1428] sm:$0xff] }
 0x114   : > { %721 = vst [vmem:[%s7597_s7 + $0x820] sm:$0xff] %v720_v4  ;;  %v848_v4 = vld [vmem:[%s7592_s6 + $0x1440] sm:$0xff] }
 0x115   : > { %723 = vst [vmem:[%s7597_s7 + $0x828] sm:$0xff] %v722_v5  ;;  %v850_v5 = vld [vmem:[%s7592_s6 + $0x1448] sm:$0xff] }
 0x116   : > { %725 = vst [vmem:[%s7597_s7 + $0x830] sm:$0xff] %v724_v6  ;;  %v852_v6 = vld [vmem:[%s7592_s6 + $0x1460] sm:$0xff] }
 0x117   : > { %727 = vst [vmem:[%s7597_s7 + $0x838] sm:$0xff] %v726_v7  ;;  %v854_v7 = vld [vmem:[%s7592_s6 + $0x1468] sm:$0xff] }
 0x118   : > { %729 = vst [vmem:[%s7597_s7 + $0x840] sm:$0xff] %v728_v8  ;;  %v856_v8 = vld [vmem:[%s7592_s6 + $0x1480] sm:$0xff] }
 0x119   : > { %731 = vst [vmem:[%s7597_s7 + $0x848] sm:$0xff] %v730_v9  ;;  %v858_v9 = vld [vmem:[%s7592_s6 + $0x1488] sm:$0xff] }
 0x11a   : > { %733 = vst [vmem:[%s7597_s7 + $0x850] sm:$0xff] %v732_v10  ;;  %v860_v10 = vld [vmem:[%s7592_s6 + $0x14a0] sm:$0xff] }
 0x11b   : > { %735 = vst [vmem:[%s7597_s7 + $0x858] sm:$0xff] %v734_v11  ;;  %v862_v11 = vld [vmem:[%s7592_s6 + $0x14a8] sm:$0xff] }
 0x11c   : > { %737 = vst [vmem:[%s7597_s7 + $0x860] sm:$0xff] %v736_v12  ;;  %v864_v12 = vld [vmem:[%s7592_s6 + $0x14c0] sm:$0xff] }
 0x11d   : > { %739 = vst [vmem:[%s7597_s7 + $0x868] sm:$0xff] %v738_v13  ;;  %v866_v13 = vld [vmem:[%s7592_s6 + $0x14c8] sm:$0xff] }
 0x11e   : > { %741 = vst [vmem:[%s7597_s7 + $0x870] sm:$0xff] %v740_v14  ;;  %v868_v14 = vld [vmem:[%s7592_s6 + $0x14e0] sm:$0xff] }
 0x11f   : > { %743 = vst [vmem:[%s7597_s7 + $0x878] sm:$0xff] %v742_v15  ;;  %v870_v15 = vld [vmem:[%s7592_s6 + $0x14e8] sm:$0xff] }
 0x120   : > { %745 = vst [vmem:[%s7597_s7 + $0x880] sm:$0xff] %v744_v16  ;;  %v872_v16 = vld [vmem:[%s7592_s6 + $0x1500] sm:$0xff] }
 0x121   : > { %747 = vst [vmem:[%s7597_s7 + $0x888] sm:$0xff] %v746_v17  ;;  %v874_v17 = vld [vmem:[%s7592_s6 + $0x1508] sm:$0xff] }
 0x122   : > { %749 = vst [vmem:[%s7597_s7 + $0x890] sm:$0xff] %v748_v18  ;;  %v876_v18 = vld [vmem:[%s7592_s6 + $0x1520] sm:$0xff] }
 0x123   : > { %751 = vst [vmem:[%s7597_s7 + $0x898] sm:$0xff] %v750_v19  ;;  %v878_v19 = vld [vmem:[%s7592_s6 + $0x1528] sm:$0xff] }
 0x124   : > { %753 = vst [vmem:[%s7597_s7 + $0x8a0] sm:$0xff] %v752_v20  ;;  %v880_v20 = vld [vmem:[%s7592_s6 + $0x1540] sm:$0xff] }
 0x125   : > { %755 = vst [vmem:[%s7597_s7 + $0x8a8] sm:$0xff] %v754_v21  ;;  %v882_v21 = vld [vmem:[%s7592_s6 + $0x1548] sm:$0xff] }
 0x126   : > { %757 = vst [vmem:[%s7597_s7 + $0x8b0] sm:$0xff] %v756_v22  ;;  %v884_v22 = vld [vmem:[%s7592_s6 + $0x1560] sm:$0xff] }
 0x127   : > { %759 = vst [vmem:[%s7597_s7 + $0x8b8] sm:$0xff] %v758_v23  ;;  %v886_v23 = vld [vmem:[%s7592_s6 + $0x1568] sm:$0xff] }
 0x128   : > { %761 = vst [vmem:[%s7597_s7 + $0x8c0] sm:$0xff] %v760_v24  ;;  %v888_v24 = vld [vmem:[%s7592_s6 + $0x1580] sm:$0xff] }
 0x129   : > { %763 = vst [vmem:[%s7597_s7 + $0x8c8] sm:$0xff] %v762_v25  ;;  %v890_v25 = vld [vmem:[%s7592_s6 + $0x1588] sm:$0xff] }
 0x12a   : > { %765 = vst [vmem:[%s7597_s7 + $0x8d0] sm:$0xff] %v764_v26  ;;  %v892_v26 = vld [vmem:[%s7592_s6 + $0x15a0] sm:$0xff] }
 0x12b   : > { %767 = vst [vmem:[%s7597_s7 + $0x8d8] sm:$0xff] %v766_v27  ;;  %v894_v27 = vld [vmem:[%s7592_s6 + $0x15a8] sm:$0xff] }
 0x12c   : > { %769 = vst [vmem:[%s7597_s7 + $0x8e0] sm:$0xff] %v768_v28  ;;  %v896_v28 = vld [vmem:[%s7592_s6 + $0x15c0] sm:$0xff] }
 0x12d   : > { %771 = vst [vmem:[%s7597_s7 + $0x8e8] sm:$0xff] %v770_v29  ;;  %v898_v29 = vld [vmem:[%s7592_s6 + $0x15c8] sm:$0xff] }
 0x12e   : > { %773 = vst [vmem:[%s7597_s7 + $0x8f0] sm:$0xff] %v772_v30  ;;  %v900_v30 = vld [vmem:[%s7592_s6 + $0x15e0] sm:$0xff] }
 0x12f   : > { %775 = vst [vmem:[%s7597_s7 + $0x8f8] sm:$0xff] %v774_v31  ;;  %v902_v31 = vld [vmem:[%s7592_s6 + $0x15e8] sm:$0xff] }
 0x130   : > { %777 = vst [vmem:[%s7597_s7 + $0x900] sm:$0xff] %v776_v32  ;;  %v904_v32 = vld [vmem:[%s7592_s6 + $0x1600] sm:$0xff] }
 0x131   : > { %779 = vst [vmem:[%s7597_s7 + $0x908] sm:$0xff] %v778_v33  ;;  %v906_v33 = vld [vmem:[%s7592_s6 + $0x1608] sm:$0xff] }
 0x132   : > { %781 = vst [vmem:[%s7597_s7 + $0x910] sm:$0xff] %v780_v34  ;;  %v908_v34 = vld [vmem:[%s7592_s6 + $0x1620] sm:$0xff] }
 0x133   : > { %783 = vst [vmem:[%s7597_s7 + $0x918] sm:$0xff] %v782_v35  ;;  %v910_v35 = vld [vmem:[%s7592_s6 + $0x1628] sm:$0xff] }
 0x134   : > { %785 = vst [vmem:[%s7597_s7 + $0x920] sm:$0xff] %v784_v36  ;;  %v912_v36 = vld [vmem:[%s7592_s6 + $0x1640] sm:$0xff] }
 0x135   : > { %787 = vst [vmem:[%s7597_s7 + $0x928] sm:$0xff] %v786_v37  ;;  %v914_v37 = vld [vmem:[%s7592_s6 + $0x1648] sm:$0xff] }
 0x136   : > { %789 = vst [vmem:[%s7597_s7 + $0x930] sm:$0xff] %v788_v38  ;;  %v916_v38 = vld [vmem:[%s7592_s6 + $0x1660] sm:$0xff] }
 0x137   : > { %791 = vst [vmem:[%s7597_s7 + $0x938] sm:$0xff] %v790_v39  ;;  %v918_v39 = vld [vmem:[%s7592_s6 + $0x1668] sm:$0xff] }
 0x138   : > { %793 = vst [vmem:[%s7597_s7 + $0x940] sm:$0xff] %v792_v40  ;;  %v920_v40 = vld [vmem:[%s7592_s6 + $0x1680] sm:$0xff] }
 0x139   : > { %795 = vst [vmem:[%s7597_s7 + $0x948] sm:$0xff] %v794_v41  ;;  %v922_v41 = vld [vmem:[%s7592_s6 + $0x1688] sm:$0xff] }
 0x13a   : > { %797 = vst [vmem:[%s7597_s7 + $0x950] sm:$0xff] %v796_v42  ;;  %v924_v42 = vld [vmem:[%s7592_s6 + $0x16a0] sm:$0xff] }
 0x13b   : > { %799 = vst [vmem:[%s7597_s7 + $0x958] sm:$0xff] %v798_v43  ;;  %v926_v43 = vld [vmem:[%s7592_s6 + $0x16a8] sm:$0xff] }
 0x13c   : > { %801 = vst [vmem:[%s7597_s7 + $0x960] sm:$0xff] %v800_v44  ;;  %v928_v44 = vld [vmem:[%s7592_s6 + $0x16c0] sm:$0xff] }
 0x13d   : > { %803 = vst [vmem:[%s7597_s7 + $0x968] sm:$0xff] %v802_v45  ;;  %v930_v45 = vld [vmem:[%s7592_s6 + $0x16c8] sm:$0xff] }
 0x13e   : > { %805 = vst [vmem:[%s7597_s7 + $0x970] sm:$0xff] %v804_v46  ;;  %v932_v46 = vld [vmem:[%s7592_s6 + $0x16e0] sm:$0xff] }
 0x13f   : > { %807 = vst [vmem:[%s7597_s7 + $0x978] sm:$0xff] %v806_v47  ;;  %v934_v47 = vld [vmem:[%s7592_s6 + $0x16e8] sm:$0xff] }
 0x140   : > { %809 = vst [vmem:[%s7597_s7 + $0x980] sm:$0xff] %v808_v48  ;;  %v936_v48 = vld [vmem:[%s7592_s6 + $0x1700] sm:$0xff] }
 0x141   : > { %811 = vst [vmem:[%s7597_s7 + $0x988] sm:$0xff] %v810_v49  ;;  %v938_v49 = vld [vmem:[%s7592_s6 + $0x1708] sm:$0xff] }
 0x142   : > { %813 = vst [vmem:[%s7597_s7 + $0x990] sm:$0xff] %v812_v50  ;;  %v940_v50 = vld [vmem:[%s7592_s6 + $0x1720] sm:$0xff] }
 0x143   : > { %815 = vst [vmem:[%s7597_s7 + $0x998] sm:$0xff] %v814_v51  ;;  %v942_v51 = vld [vmem:[%s7592_s6 + $0x1728] sm:$0xff] }
 0x144   : > { %817 = vst [vmem:[%s7597_s7 + $0x9a0] sm:$0xff] %v816_v52  ;;  %v944_v52 = vld [vmem:[%s7592_s6 + $0x1740] sm:$0xff] }
 0x145   : > { %819 = vst [vmem:[%s7597_s7 + $0x9a8] sm:$0xff] %v818_v53  ;;  %v946_v53 = vld [vmem:[%s7592_s6 + $0x1748] sm:$0xff] }
 0x146   : > { %821 = vst [vmem:[%s7597_s7 + $0x9b0] sm:$0xff] %v820_v54  ;;  %v948_v54 = vld [vmem:[%s7592_s6 + $0x1760] sm:$0xff] }
 0x147   : > { %823 = vst [vmem:[%s7597_s7 + $0x9b8] sm:$0xff] %v822_v55  ;;  %v950_v55 = vld [vmem:[%s7592_s6 + $0x1768] sm:$0xff] }
 0x148   : > { %825 = vst [vmem:[%s7597_s7 + $0x9c0] sm:$0xff] %v824_v56  ;;  %v952_v56 = vld [vmem:[%s7592_s6 + $0x1780] sm:$0xff] }
 0x149   : > { %827 = vst [vmem:[%s7597_s7 + $0x9c8] sm:$0xff] %v826_v57  ;;  %v954_v57 = vld [vmem:[%s7592_s6 + $0x1788] sm:$0xff] }
 0x14a   : > { %829 = vst [vmem:[%s7597_s7 + $0x9d0] sm:$0xff] %v828_v58  ;;  %v956_v58 = vld [vmem:[%s7592_s6 + $0x17a0] sm:$0xff] }
 0x14b   : > { %831 = vst [vmem:[%s7597_s7 + $0x9d8] sm:$0xff] %v830_v59  ;;  %v958_v59 = vld [vmem:[%s7592_s6 + $0x17a8] sm:$0xff] }
 0x14c   : > { %833 = vst [vmem:[%s7597_s7 + $0x9e0] sm:$0xff] %v832_v60  ;;  %v960_v60 = vld [vmem:[%s7592_s6 + $0x17c0] sm:$0xff] }
 0x14d   : > { %835 = vst [vmem:[%s7597_s7 + $0x9e8] sm:$0xff] %v834_v61  ;;  %v962_v61 = vld [vmem:[%s7592_s6 + $0x17c8] sm:$0xff] }
 0x14e   : > { %837 = vst [vmem:[%s7597_s7 + $0x9f0] sm:$0xff] %v836_v62  ;;  %v964_v62 = vld [vmem:[%s7592_s6 + $0x17e0] sm:$0xff] }
 0x14f   : > { %839 = vst [vmem:[%s7597_s7 + $0x9f8] sm:$0xff] %v838_v63  ;;  %v966_v63 = vld [vmem:[%s7592_s6 + $0x17e8] sm:$0xff] }
 0x150   : > { %841 = vst [vmem:[%s7597_s7 + $0xa00] sm:$0xff] %v840_v0  ;;  %v968_v0 = vld [vmem:[%s7592_s6 + $0x1800] sm:$0xff] }
 0x151   : > { %843 = vst [vmem:[%s7597_s7 + $0xa08] sm:$0xff] %v842_v1  ;;  %v970_v1 = vld [vmem:[%s7592_s6 + $0x1808] sm:$0xff] }
 0x152   : > { %845 = vst [vmem:[%s7597_s7 + $0xa10] sm:$0xff] %v844_v2  ;;  %v972_v2 = vld [vmem:[%s7592_s6 + $0x1820] sm:$0xff] }
 0x153   : > { %847 = vst [vmem:[%s7597_s7 + $0xa18] sm:$0xff] %v846_v3  ;;  %v974_v3 = vld [vmem:[%s7592_s6 + $0x1828] sm:$0xff] }
 0x154   : > { %849 = vst [vmem:[%s7597_s7 + $0xa20] sm:$0xff] %v848_v4  ;;  %v976_v4 = vld [vmem:[%s7592_s6 + $0x1840] sm:$0xff] }
 0x155   : > { %851 = vst [vmem:[%s7597_s7 + $0xa28] sm:$0xff] %v850_v5  ;;  %v978_v5 = vld [vmem:[%s7592_s6 + $0x1848] sm:$0xff] }
 0x156   : > { %853 = vst [vmem:[%s7597_s7 + $0xa30] sm:$0xff] %v852_v6  ;;  %v980_v6 = vld [vmem:[%s7592_s6 + $0x1860] sm:$0xff] }
 0x157   : > { %855 = vst [vmem:[%s7597_s7 + $0xa38] sm:$0xff] %v854_v7  ;;  %v982_v7 = vld [vmem:[%s7592_s6 + $0x1868] sm:$0xff] }
 0x158   : > { %857 = vst [vmem:[%s7597_s7 + $0xa40] sm:$0xff] %v856_v8  ;;  %v984_v8 = vld [vmem:[%s7592_s6 + $0x1880] sm:$0xff] }
 0x159   : > { %859 = vst [vmem:[%s7597_s7 + $0xa48] sm:$0xff] %v858_v9  ;;  %v986_v9 = vld [vmem:[%s7592_s6 + $0x1888] sm:$0xff] }
 0x15a   : > { %861 = vst [vmem:[%s7597_s7 + $0xa50] sm:$0xff] %v860_v10  ;;  %v988_v10 = vld [vmem:[%s7592_s6 + $0x18a0] sm:$0xff] }
 0x15b   : > { %863 = vst [vmem:[%s7597_s7 + $0xa58] sm:$0xff] %v862_v11  ;;  %v990_v11 = vld [vmem:[%s7592_s6 + $0x18a8] sm:$0xff] }
 0x15c   : > { %865 = vst [vmem:[%s7597_s7 + $0xa60] sm:$0xff] %v864_v12  ;;  %v992_v12 = vld [vmem:[%s7592_s6 + $0x18c0] sm:$0xff] }
 0x15d   : > { %867 = vst [vmem:[%s7597_s7 + $0xa68] sm:$0xff] %v866_v13  ;;  %v994_v13 = vld [vmem:[%s7592_s6 + $0x18c8] sm:$0xff] }
 0x15e   : > { %869 = vst [vmem:[%s7597_s7 + $0xa70] sm:$0xff] %v868_v14  ;;  %v996_v14 = vld [vmem:[%s7592_s6 + $0x18e0] sm:$0xff] }
 0x15f   : > { %871 = vst [vmem:[%s7597_s7 + $0xa78] sm:$0xff] %v870_v15  ;;  %v998_v15 = vld [vmem:[%s7592_s6 + $0x18e8] sm:$0xff] }
 0x160   : > { %873 = vst [vmem:[%s7597_s7 + $0xa80] sm:$0xff] %v872_v16  ;;  %v1000_v16 = vld [vmem:[%s7592_s6 + $0x1900] sm:$0xff] }
 0x161   : > { %875 = vst [vmem:[%s7597_s7 + $0xa88] sm:$0xff] %v874_v17  ;;  %v1002_v17 = vld [vmem:[%s7592_s6 + $0x1908] sm:$0xff] }
 0x162   : > { %877 = vst [vmem:[%s7597_s7 + $0xa90] sm:$0xff] %v876_v18  ;;  %v1004_v18 = vld [vmem:[%s7592_s6 + $0x1920] sm:$0xff] }
 0x163   : > { %879 = vst [vmem:[%s7597_s7 + $0xa98] sm:$0xff] %v878_v19  ;;  %v1006_v19 = vld [vmem:[%s7592_s6 + $0x1928] sm:$0xff] }
 0x164   : > { %881 = vst [vmem:[%s7597_s7 + $0xaa0] sm:$0xff] %v880_v20  ;;  %v1008_v20 = vld [vmem:[%s7592_s6 + $0x1940] sm:$0xff] }
 0x165   : > { %883 = vst [vmem:[%s7597_s7 + $0xaa8] sm:$0xff] %v882_v21  ;;  %v1010_v21 = vld [vmem:[%s7592_s6 + $0x1948] sm:$0xff] }
 0x166   : > { %885 = vst [vmem:[%s7597_s7 + $0xab0] sm:$0xff] %v884_v22  ;;  %v1012_v22 = vld [vmem:[%s7592_s6 + $0x1960] sm:$0xff] }
 0x167   : > { %887 = vst [vmem:[%s7597_s7 + $0xab8] sm:$0xff] %v886_v23  ;;  %v1014_v23 = vld [vmem:[%s7592_s6 + $0x1968] sm:$0xff] }
 0x168   : > { %889 = vst [vmem:[%s7597_s7 + $0xac0] sm:$0xff] %v888_v24  ;;  %v1016_v24 = vld [vmem:[%s7592_s6 + $0x1980] sm:$0xff] }
 0x169   : > { %891 = vst [vmem:[%s7597_s7 + $0xac8] sm:$0xff] %v890_v25  ;;  %v1018_v25 = vld [vmem:[%s7592_s6 + $0x1988] sm:$0xff] }
 0x16a   : > { %893 = vst [vmem:[%s7597_s7 + $0xad0] sm:$0xff] %v892_v26  ;;  %v1020_v26 = vld [vmem:[%s7592_s6 + $0x19a0] sm:$0xff] }
 0x16b   : > { %895 = vst [vmem:[%s7597_s7 + $0xad8] sm:$0xff] %v894_v27  ;;  %v1022_v27 = vld [vmem:[%s7592_s6 + $0x19a8] sm:$0xff] }
 0x16c   : > { %897 = vst [vmem:[%s7597_s7 + $0xae0] sm:$0xff] %v896_v28  ;;  %v1024_v28 = vld [vmem:[%s7592_s6 + $0x19c0] sm:$0xff] }
 0x16d   : > { %899 = vst [vmem:[%s7597_s7 + $0xae8] sm:$0xff] %v898_v29  ;;  %v1026_v29 = vld [vmem:[%s7592_s6 + $0x19c8] sm:$0xff] }
 0x16e   : > { %901 = vst [vmem:[%s7597_s7 + $0xaf0] sm:$0xff] %v900_v30  ;;  %v1028_v30 = vld [vmem:[%s7592_s6 + $0x19e0] sm:$0xff] }
 0x16f   : > { %903 = vst [vmem:[%s7597_s7 + $0xaf8] sm:$0xff] %v902_v31  ;;  %v1030_v31 = vld [vmem:[%s7592_s6 + $0x19e8] sm:$0xff] }
 0x170   : > { %905 = vst [vmem:[%s7597_s7 + $0xb00] sm:$0xff] %v904_v32  ;;  %v1032_v32 = vld [vmem:[%s7592_s6 + $0x1a00] sm:$0xff] }
 0x171   : > { %907 = vst [vmem:[%s7597_s7 + $0xb08] sm:$0xff] %v906_v33  ;;  %v1034_v33 = vld [vmem:[%s7592_s6 + $0x1a08] sm:$0xff] }
 0x172   : > { %909 = vst [vmem:[%s7597_s7 + $0xb10] sm:$0xff] %v908_v34  ;;  %v1036_v34 = vld [vmem:[%s7592_s6 + $0x1a20] sm:$0xff] }
 0x173   : > { %911 = vst [vmem:[%s7597_s7 + $0xb18] sm:$0xff] %v910_v35  ;;  %v1038_v35 = vld [vmem:[%s7592_s6 + $0x1a28] sm:$0xff] }
 0x174   : > { %913 = vst [vmem:[%s7597_s7 + $0xb20] sm:$0xff] %v912_v36  ;;  %v1040_v36 = vld [vmem:[%s7592_s6 + $0x1a40] sm:$0xff] }
 0x175   : > { %915 = vst [vmem:[%s7597_s7 + $0xb28] sm:$0xff] %v914_v37  ;;  %v1042_v37 = vld [vmem:[%s7592_s6 + $0x1a48] sm:$0xff] }
 0x176   : > { %917 = vst [vmem:[%s7597_s7 + $0xb30] sm:$0xff] %v916_v38  ;;  %v1044_v38 = vld [vmem:[%s7592_s6 + $0x1a60] sm:$0xff] }
 0x177   : > { %919 = vst [vmem:[%s7597_s7 + $0xb38] sm:$0xff] %v918_v39  ;;  %v1046_v39 = vld [vmem:[%s7592_s6 + $0x1a68] sm:$0xff] }
 0x178   : > { %921 = vst [vmem:[%s7597_s7 + $0xb40] sm:$0xff] %v920_v40  ;;  %v1048_v40 = vld [vmem:[%s7592_s6 + $0x1a80] sm:$0xff] }
 0x179   : > { %923 = vst [vmem:[%s7597_s7 + $0xb48] sm:$0xff] %v922_v41  ;;  %v1050_v41 = vld [vmem:[%s7592_s6 + $0x1a88] sm:$0xff] }
 0x17a   : > { %925 = vst [vmem:[%s7597_s7 + $0xb50] sm:$0xff] %v924_v42  ;;  %v1052_v42 = vld [vmem:[%s7592_s6 + $0x1aa0] sm:$0xff] }
 0x17b   : > { %927 = vst [vmem:[%s7597_s7 + $0xb58] sm:$0xff] %v926_v43  ;;  %v1054_v43 = vld [vmem:[%s7592_s6 + $0x1aa8] sm:$0xff] }
 0x17c   : > { %929 = vst [vmem:[%s7597_s7 + $0xb60] sm:$0xff] %v928_v44  ;;  %v1056_v44 = vld [vmem:[%s7592_s6 + $0x1ac0] sm:$0xff] }
 0x17d   : > { %931 = vst [vmem:[%s7597_s7 + $0xb68] sm:$0xff] %v930_v45  ;;  %v1058_v45 = vld [vmem:[%s7592_s6 + $0x1ac8] sm:$0xff] }
 0x17e   : > { %933 = vst [vmem:[%s7597_s7 + $0xb70] sm:$0xff] %v932_v46  ;;  %v1060_v46 = vld [vmem:[%s7592_s6 + $0x1ae0] sm:$0xff] }
 0x17f   : > { %935 = vst [vmem:[%s7597_s7 + $0xb78] sm:$0xff] %v934_v47  ;;  %v1062_v47 = vld [vmem:[%s7592_s6 + $0x1ae8] sm:$0xff] }
 0x180   : > { %937 = vst [vmem:[%s7597_s7 + $0xb80] sm:$0xff] %v936_v48 }
 0x181   : > { %939 = vst [vmem:[%s7597_s7 + $0xb88] sm:$0xff] %v938_v49 }
 0x182   : > { %941 = vst [vmem:[%s7597_s7 + $0xb90] sm:$0xff] %v940_v50 }
 0x183   : > { %943 = vst [vmem:[%s7597_s7 + $0xb98] sm:$0xff] %v942_v51 }
 0x184   : > { %945 = vst [vmem:[%s7597_s7 + $0xba0] sm:$0xff] %v944_v52 }
 0x185   : > { %947 = vst [vmem:[%s7597_s7 + $0xba8] sm:$0xff] %v946_v53 }
 0x186   : > { %949 = vst [vmem:[%s7597_s7 + $0xbb0] sm:$0xff] %v948_v54 }
 0x187   : > { %951 = vst [vmem:[%s7597_s7 + $0xbb8] sm:$0xff] %v950_v55 }
 0x188   : > { %953 = vst [vmem:[%s7597_s7 + $0xbc0] sm:$0xff] %v952_v56 }
 0x189   : > { %955 = vst [vmem:[%s7597_s7 + $0xbc8] sm:$0xff] %v954_v57 }
 0x18a   : > { %957 = vst [vmem:[%s7597_s7 + $0xbd0] sm:$0xff] %v956_v58 }
 0x18b   : > { %959 = vst [vmem:[%s7597_s7 + $0xbd8] sm:$0xff] %v958_v59 }
 0x18c   : > { %961 = vst [vmem:[%s7597_s7 + $0xbe0] sm:$0xff] %v960_v60 }
 0x18d   : > { %963 = vst [vmem:[%s7597_s7 + $0xbe8] sm:$0xff] %v962_v61 }
 0x18e   : > { %965 = vst [vmem:[%s7597_s7 + $0xbf0] sm:$0xff] %v964_v62 }
 0x18f   : > { %967 = vst [vmem:[%s7597_s7 + $0xbf8] sm:$0xff] %v966_v63 }
 0x190   : > { %969 = vst [vmem:[%s7597_s7 + $0xc00] sm:$0xff] %v968_v0 }
 0x191   : > { %971 = vst [vmem:[%s7597_s7 + $0xc08] sm:$0xff] %v970_v1 }
 0x192   : > { %973 = vst [vmem:[%s7597_s7 + $0xc10] sm:$0xff] %v972_v2 }
 0x193   : > { %975 = vst [vmem:[%s7597_s7 + $0xc18] sm:$0xff] %v974_v3 }
 0x194   : > { %977 = vst [vmem:[%s7597_s7 + $0xc20] sm:$0xff] %v976_v4 }
 0x195   : > { %979 = vst [vmem:[%s7597_s7 + $0xc28] sm:$0xff] %v978_v5 }
 0x196   : > { %981 = vst [vmem:[%s7597_s7 + $0xc30] sm:$0xff] %v980_v6 }
 0x197   : > { %983 = vst [vmem:[%s7597_s7 + $0xc38] sm:$0xff] %v982_v7 }
 0x198   : > { %985 = vst [vmem:[%s7597_s7 + $0xc40] sm:$0xff] %v984_v8 }
 0x199   : > { %987 = vst [vmem:[%s7597_s7 + $0xc48] sm:$0xff] %v986_v9 }
 0x19a   : > { %989 = vst [vmem:[%s7597_s7 + $0xc50] sm:$0xff] %v988_v10 }
 0x19b   : > { %991 = vst [vmem:[%s7597_s7 + $0xc58] sm:$0xff] %v990_v11 }
 0x19c   : > { %993 = vst [vmem:[%s7597_s7 + $0xc60] sm:$0xff] %v992_v12 }
 0x19d   : > { %995 = vst [vmem:[%s7597_s7 + $0xc68] sm:$0xff] %v994_v13 }
 0x19e   : > { %997 = vst [vmem:[%s7597_s7 + $0xc70] sm:$0xff] %v996_v14 }
 0x19f   : > { %999 = vst [vmem:[%s7597_s7 + $0xc78] sm:$0xff] %v998_v15 }
 0x1a0   : > { %1001 = vst [vmem:[%s7597_s7 + $0xc80] sm:$0xff] %v1000_v16 }
 0x1a1   : > { %1003 = vst [vmem:[%s7597_s7 + $0xc88] sm:$0xff] %v1002_v17 }
 0x1a2   : > { %1005 = vst [vmem:[%s7597_s7 + $0xc90] sm:$0xff] %v1004_v18 }
 0x1a3   : > { %1007 = vst [vmem:[%s7597_s7 + $0xc98] sm:$0xff] %v1006_v19 }
 0x1a4   : > { %1009 = vst [vmem:[%s7597_s7 + $0xca0] sm:$0xff] %v1008_v20 }
 0x1a5   : > { %1011 = vst [vmem:[%s7597_s7 + $0xca8] sm:$0xff] %v1010_v21 }
 0x1a6   : > { %1013 = vst [vmem:[%s7597_s7 + $0xcb0] sm:$0xff] %v1012_v22 }
 0x1a7   : > { %1015 = vst [vmem:[%s7597_s7 + $0xcb8] sm:$0xff] %v1014_v23 }
 0x1a8   : > { %1017 = vst [vmem:[%s7597_s7 + $0xcc0] sm:$0xff] %v1016_v24 }
 0x1a9   : > { %1019 = vst [vmem:[%s7597_s7 + $0xcc8] sm:$0xff] %v1018_v25 }
 0x1aa   : > { %1021 = vst [vmem:[%s7597_s7 + $0xcd0] sm:$0xff] %v1020_v26 }
 0x1ab   : > { %1023 = vst [vmem:[%s7597_s7 + $0xcd8] sm:$0xff] %v1022_v27 }
 0x1ac   : > { %1025 = vst [vmem:[%s7597_s7 + $0xce0] sm:$0xff] %v1024_v28 }
 0x1ad   : > { %1027 = vst [vmem:[%s7597_s7 + $0xce8] sm:$0xff] %v1026_v29 }
 0x1ae   : > { %1029 = vst [vmem:[%s7597_s7 + $0xcf0] sm:$0xff] %v1028_v30 }
 0x1af   : > { %1031 = vst [vmem:[%s7597_s7 + $0xcf8] sm:$0xff] %v1030_v31 }
 0x1b0   : > { %1033 = vst [vmem:[%s7597_s7 + $0xd00] sm:$0xff] %v1032_v32 }
 0x1b1   : > { %1035 = vst [vmem:[%s7597_s7 + $0xd08] sm:$0xff] %v1034_v33 }
 0x1b2   : > { %1037 = vst [vmem:[%s7597_s7 + $0xd10] sm:$0xff] %v1036_v34 }
 0x1b3   : > { %1039 = vst [vmem:[%s7597_s7 + $0xd18] sm:$0xff] %v1038_v35 }
 0x1b4   : > { %1041 = vst [vmem:[%s7597_s7 + $0xd20] sm:$0xff] %v1040_v36 }
 0x1b5   : > { %1043 = vst [vmem:[%s7597_s7 + $0xd28] sm:$0xff] %v1042_v37 }
 0x1b6   : > { %1045 = vst [vmem:[%s7597_s7 + $0xd30] sm:$0xff] %v1044_v38 }
 0x1b7   : > { %1047 = vst [vmem:[%s7597_s7 + $0xd38] sm:$0xff] %v1046_v39 }
 0x1b8   : > { %1049 = vst [vmem:[%s7597_s7 + $0xd40] sm:$0xff] %v1048_v40 }
 0x1b9   : > { %1051 = vst [vmem:[%s7597_s7 + $0xd48] sm:$0xff] %v1050_v41 }
 0x1ba   : > { %1053 = vst [vmem:[%s7597_s7 + $0xd50] sm:$0xff] %v1052_v42 }
 0x1bb   : > { %1055 = vst [vmem:[%s7597_s7 + $0xd58] sm:$0xff] %v1054_v43 }
 0x1bc   : > { %1057 = vst [vmem:[%s7597_s7 + $0xd60] sm:$0xff] %v1056_v44 }
 0x1bd   : > { %1059 = vst [vmem:[%s7597_s7 + $0xd68] sm:$0xff] %v1058_v45 }
 0x1be   : > { %1061 = vst [vmem:[%s7597_s7 + $0xd70] sm:$0xff] %v1060_v46 }
 0x1bf   : > { %1063 = vst [vmem:[%s7597_s7 + $0xd78] sm:$0xff] %v1062_v47 }
 0x1c0 PF: > { %p5155_p5 = scmp.ge.s32.totalorder %s7525_s20, 1  ;;  %p1068_p6 = scmp.lt.s32.totalorder %s7525_s20, 3 }
 0x1c2   : > { %p1069_p7 = pnand %p5155_p5, %p1068_p6 }
 0x1c4   : > { %1072 = sbr.rel (%p1069_p7) target bundleno = 1245 (0x4dd), region = 59 }
 0x1c9   : > { %s1075_s8 = sand.u32 1, %s7517_s18   ;;  %vm3892_vm0 = vcmask 523264   ;;  %vm4986_vm1 = vcmask 261120   ;;  %s5156_s24 = sshll.u32 %s5149_s21, 2  ;;  %vm5080_vm2 = vcmask 1043456  }
 0x1ca   : > { %s7474_s9 = smul.u32 3456, %s1075_s8  ;;  %p1104_p8 = scmp.lt.s32.totalorder %s5156_s24, 7 }
 0x1cc   : > { %s8463_s10 = scalar_lea.vmem [#allocation2], %s7474_s9  ;;  %s9948_s24 = smov (!%p1104_p8, %s5156_s24), 7 }
 0x1cd   : > { %v5384_v48 = vld [vmem:[%s8463_s10 + $0xe0] sm:$0xf]  ;;  %v7071_v49 = vld [vmem:[%s8463_s10 + $0xec] sm:$0xf0]  ;;  %s5157_s26 = sshll.u32 %s9948_s24, 2 }
 0x1ce   : > { %v5512_v50 = vld [vmem:[%s8463_s10 + $0x1e0] sm:$0xf]  ;;  %v5385_v51 = vor.u32 %v7071_v49, %v5384_v48  ;;  %v7103_v52 = vld [vmem:[%s8463_s10 + $0x1ec] sm:$0xf0]  ;;  %s1107_s29 = scalar_lea.vmem %s9904_s5, %s5157_s26 }
 0x1cf   : > { %v5640_v53 = vld [vmem:[%s8463_s10 + $0x2e0] sm:$0xf]  ;;  %v7135_v54 = vld [vmem:[%s8463_s10 + $0x2ec] sm:$0xf0]  ;;  %v5513_v55 = vor.u32 %v7103_v52, %v5512_v50 }
 0x1d0   : > { %v5641_v56 = vor.u32 %v7135_v54, %v5640_v53  ;;  %v5768_v57 = vld [vmem:[%s8463_s10 + $0x3e0] sm:$0xf]  ;;  %v7167_v58 = vld [vmem:[%s8463_s10 + $0x3ec] sm:$0xf0]  ;;  %3899 = vmatpush.bf16.msra.mxu0 %v5385_v51 }
 0x1d1   : > { %v5368_v59 = vld [vmem:[%s8463_s10 + $0xc0] sm:$0xf]  ;;  %v5769_v60 = vor.u32 %v7167_v58, %v5768_v57  ;;  %v7067_v61 = vld [vmem:[%s8463_s10 + $0xcc] sm:$0xf0]  ;;  %3918 = vmatpush.bf16.msra.mxu1 %v5513_v55 }
 0x1d2   : > { %v5496_v62 = vld [vmem:[%s8463_s10 + $0x1c0] sm:$0xf]  ;;  %v7099_v63 = vld [vmem:[%s8463_s10 + $0x1cc] sm:$0xf0]  ;;  %3937 = vmatpush.bf16.msra.mxu2 %v5641_v56  ;;  %v5369_v0 = vor.u32 %v7067_v61, %v5368_v59 }
 0x1d3   : > { %v5497_v1 = vor.u32 %v7099_v63, %v5496_v62  ;;  %v5624_v2 = vld [vmem:[%s8463_s10 + $0x2c0] sm:$0xf]  ;;  %v7131_v3 = vld [vmem:[%s8463_s10 + $0x2cc] sm:$0xf0]  ;;  %3956 = vmatpush.bf16.msra.mxu3 %v5769_v60 }
 0x1d4   : > { %v5752_v4 = vld [vmem:[%s8463_s10 + $0x3c0] sm:$0xf]  ;;  %v5625_v5 = vor.u32 %v7131_v3, %v5624_v2  ;;  %v7163_v6 = vld [vmem:[%s8463_s10 + $0x3cc] sm:$0xf0]  ;;  %3900 = vmatpush.bf16.msra.mxu0 %v5369_v0 }
 0x1d5   : > { %v5352_v7 = vld [vmem:[%s8463_s10 + $0xa0] sm:$0xf]  ;;  %v7063_v8 = vld [vmem:[%s8463_s10 + $0xac] sm:$0xf0]  ;;  %v5753_v9 = vor.u32 %v7163_v6, %v5752_v4  ;;  %3919 = vmatpush.bf16.msra.mxu1 %v5497_v1 }
 0x1d6   : > { %v5480_v10 = vld [vmem:[%s8463_s10 + $0x1a0] sm:$0xf]  ;;  %v7095_v11 = vld [vmem:[%s8463_s10 + $0x1ac] sm:$0xf0]  ;;  %v5353_v13 = vor.u32 %v7063_v8, %v5352_v7  ;;  %3938 = vmatpush.bf16.msra.mxu2 %v5625_v5 }
 0x1d7   : > { %v5608_v12 = vld [vmem:[%s8463_s10 + $0x2a0] sm:$0xf]  ;;  %v7127_v14 = vld [vmem:[%s8463_s10 + $0x2ac] sm:$0xf0]  ;;  %v5481_v17 = vor.u32 %v7095_v11, %v5480_v10  ;;  %3957 = vmatpush.bf16.msra.mxu3 %v5753_v9 }
 0x1d8   : > { %v5736_v15 = vld [vmem:[%s8463_s10 + $0x3a0] sm:$0xf]  ;;  %v7159_v16 = vld [vmem:[%s8463_s10 + $0x3ac] sm:$0xf0]  ;;  %v5609_v18 = vor.u32 %v7127_v14, %v5608_v12  ;;  %3901 = vmatpush.bf16.msra.mxu0 %v5353_v13  ;;  %v7020_v13 = vld [vmem:[%s9900_s1 + $0x34] sm:$0xf0] }
 0x1d9   : > { %v5336_v19 = vld [vmem:[%s8463_s10 + $0x80] sm:$0xf]  ;;  %v7059_v20 = vld [vmem:[%s8463_s10 + $0x8c] sm:$0xf0]  ;;  %v5737_v22 = vor.u32 %v7159_v16, %v5736_v15  ;;  %3920 = vmatpush.bf16.msra.mxu1 %v5481_v17  ;;  %v7013_v14 = vld [vmem:[%s9900_s1 + $0x4] sm:$0xf] }
 0x1da   : > { %v5464_v21 = vld [vmem:[%s8463_s10 + $0x180] sm:$0xf]  ;;  %v7091_v23 = vld [vmem:[%s8463_s10 + $0x18c] sm:$0xf0]  ;;  %v5337_v28 = vor.u32 %v7059_v20, %v5336_v19  ;;  %3939 = vmatpush.bf16.msra.mxu2 %v5609_v18  ;;  %v5162_v15 = vld [vmem:[%s9900_s1 + $0x38] sm:$0xf0] }
 0x1db   : > { %v5592_v24 = vld [vmem:[%s8463_s10 + $0x280] sm:$0xf]  ;;  %v7123_v25 = vld [vmem:[%s8463_s10 + $0x28c] sm:$0xf0]  ;;  %v5465_v29 = vor.u32 %v7091_v23, %v5464_v21  ;;  %3958 = vmatpush.bf16.msra.mxu3 %v5737_v22  ;;  %v1571_v18 = vld [vmem:[%s9901_s2 + $0x8] sm:$0xff]  ;;  %v7527_v23 = vmov 0  }
 0x1dc   : > { %v5720_v26 = vld [vmem:[%s8463_s10 + $0x380] sm:$0xf]  ;;  %v7155_v27 = vld [vmem:[%s8463_s10 + $0x38c] sm:$0xf0]  ;;  %v5593_v30 = vor.u32 %v7123_v25, %v5592_v24  ;;  %3902 = vmatpush.bf16.msra.mxu0 %v5337_v28  ;;  %v5168_v20 = vld [vmem:[%s9900_s1 + $0x8] sm:$0xf]  ;;  %7501 = vset.pattern.permute.xlu1 %v7527_v23 }
 0x1dd   : > { %v5320_v31 = vld [vmem:[%s8463_s10 + $0x60] sm:$0xf]  ;;  %v7055_v32 = vld [vmem:[%s8463_s10 + $0x6c] sm:$0xf0]  ;;  %v5721_v34 = vor.u32 %v7155_v27, %v5720_v26  ;;  %3921 = vmatpush.bf16.msra.mxu1 %v5465_v29  ;;  %v7014_v27 = vld [vmem:[%s9900_s1 + $0xc] sm:$0xf]  ;;  %1581 = vperm.xlu1 %7501, %v1571_v18  }
 0x1de   : > { %v5448_v33 = vld [vmem:[%s8463_s10 + $0x160] sm:$0xf]  ;;  %v7087_v35 = vld [vmem:[%s8463_s10 + $0x16c] sm:$0xf0]  ;;  %v5321_v40 = vor.u32 %v7055_v32, %v5320_v31  ;;  %3940 = vmatpush.bf16.msra.mxu2 %v5593_v30  ;;  %v5170_v28 = vld [vmem:[%s9900_s1 + $0x40] sm:$0xf0]  ;;  %7500 = vset.pattern.permute.xlu0 %v7527_v23 }
 0x1df   : > { %v5576_v36 = vld [vmem:[%s8463_s10 + $0x260] sm:$0xf]  ;;  %v7119_v37 = vld [vmem:[%s8463_s10 + $0x26c] sm:$0xf0]  ;;  %v5449_v41 = vor.u32 %v7087_v35, %v5448_v33  ;;  %3959 = vmatpush.bf16.msra.mxu3 %v5721_v34  ;;  %7502 = vset.pattern.permute.xlu2 %v7527_v23 }
 0x1e0   : > { %v5704_v38 = vld [vmem:[%s8463_s10 + $0x360] sm:$0xf]  ;;  %v7151_v39 = vld [vmem:[%s8463_s10 + $0x36c] sm:$0xf0]  ;;  %v5577_v42 = vor.u32 %v7119_v37, %v5576_v36  ;;  %3903 = vmatpush.bf16.msra.mxu0 %v5321_v40 }
 0x1e1   : > { %v5304_v43 = vld [vmem:[%s8463_s10 + $0x40] sm:$0xf]  ;;  %v7051_v44 = vld [vmem:[%s8463_s10 + $0x4c] sm:$0xf0]  ;;  %v5705_v46 = vor.u32 %v7151_v39, %v5704_v38  ;;  %3922 = vmatpush.bf16.msra.mxu1 %v5449_v41  ;;  %v8568_v39 = vor.u32 %v7013_v14, %v5162_v15  ;;  %v7034_v14 = vld [vmem:[%s9900_s1 + $0xa4] sm:$0xf0] }
 0x1e2   : > { %v5432_v45 = vld [vmem:[%s8463_s10 + $0x140] sm:$0xf]  ;;  %v7083_v47 = vld [vmem:[%s8463_s10 + $0x14c] sm:$0xf0]  ;;  %v5305_v52 = vor.u32 %v7051_v44, %v5304_v43  ;;  %3941 = vmatpush.bf16.msra.mxu2 %v5577_v42  ;;  %v8574_v43 = vor.u32 %v7014_v27, %v5170_v28 }
 0x1e3   : > { %v5560_v48 = vld [vmem:[%s8463_s10 + $0x240] sm:$0xf]  ;;  %v7115_v49 = vld [vmem:[%s8463_s10 + $0x24c] sm:$0xf0]  ;;  %v5433_v53 = vor.u32 %v7083_v47, %v5432_v45  ;;  %3960 = vmatpush.bf16.msra.mxu3 %v5705_v46 }
 0x1e4   : > { %v5688_v50 = vld [vmem:[%s8463_s10 + $0x340] sm:$0xf]  ;;  %v7147_v51 = vld [vmem:[%s8463_s10 + $0x34c] sm:$0xf0]  ;;  %v5561_v54 = vor.u32 %v7115_v49, %v5560_v48  ;;  %3904 = vmatpush.bf16.msra.mxu0 %v5305_v52 }
 0x1e5   : > { %v5288_v55 = vld [vmem:[%s8463_s10 + $0x20] sm:$0xf]  ;;  %v7047_v56 = vld [vmem:[%s8463_s10 + $0x2c] sm:$0xf0]  ;;  %v5689_v58 = vor.u32 %v7147_v51, %v5688_v50  ;;  %3923 = vmatpush.bf16.msra.mxu1 %v5433_v53 }
 0x1e6   : > { %v5416_v57 = vld [vmem:[%s8463_s10 + $0x120] sm:$0xf]  ;;  %v7079_v59 = vld [vmem:[%s8463_s10 + $0x12c] sm:$0xf0]  ;;  %v5289_v1 = vor.u32 %v7047_v56, %v5288_v55  ;;  %3942 = vmatpush.bf16.msra.mxu2 %v5561_v54 }
 0x1e7   : > { %v5544_v60 = vld [vmem:[%s8463_s10 + $0x220] sm:$0xf]  ;;  %v7111_v61 = vld [vmem:[%s8463_s10 + $0x22c] sm:$0xf0]  ;;  %v5417_v5 = vor.u32 %v7079_v59, %v5416_v57  ;;  %3961 = vmatpush.bf16.msra.mxu3 %v5689_v58 }
 0x1e8   : > { %v5672_v62 = vld [vmem:[%s8463_s10 + $0x320] sm:$0xf]  ;;  %v7143_v63 = vld [vmem:[%s8463_s10 + $0x32c] sm:$0xf0]  ;;  %v5545_v6 = vor.u32 %v7111_v61, %v5544_v60  ;;  %3905 = vmatpush.bf16.msra.mxu0 %v5289_v1 }
 0x1e9   : > { %v5272_v0 = vld [vmem:[%s8463_s10] sm:$0xf]  ;;  %v7043_v2 = vld [vmem:[%s8463_s10 + $0xc] sm:$0xf0]  ;;  %v5673_v10 = vor.u32 %v7143_v63, %v5672_v62  ;;  %3924 = vmatpush.bf16.msra.mxu1 %v5417_v5 }
 0x1ea   : > { %v5400_v3 = vld [vmem:[%s8463_s10 + $0x100] sm:$0xf]  ;;  %v7075_v4 = vld [vmem:[%s8463_s10 + $0x10c] sm:$0xf0]  ;;  %v5273_v19 = vor.u32 %v7043_v2, %v5272_v0  ;;  %3943 = vmatpush.bf16.msra.mxu2 %v5545_v6 }
 0x1eb   : > { %v5528_v7 = vld [vmem:[%s8463_s10 + $0x200] sm:$0xf]  ;;  %v7107_v8 = vld [vmem:[%s8463_s10 + $0x20c] sm:$0xf0]  ;;  %v5401_v24 = vor.u32 %v7075_v4, %v5400_v3  ;;  %3962 = vmatpush.bf16.msra.mxu3 %v5673_v10 }
 0x1ec   : > { %v5656_v9 = vld [vmem:[%s8463_s10 + $0x300] sm:$0xf]  ;;  %v7139_v11 = vld [vmem:[%s8463_s10 + $0x30c] sm:$0xf0]  ;;  %v5529_v25 = vor.u32 %v7107_v8, %v5528_v7  ;;  %3906 = vmatpush.bf16.msra.mxu0 %v5273_v19 }
 0x1ed   : > { %v5160_v12 = vld [vmem:[%s9900_s1] sm:$0xf]  ;;  %v7199_v17 = vld [vmem:[%s8463_s10 + $0x4ec] sm:$0xf0]  ;;  %v5657_v29 = vor.u32 %v7139_v11, %v5656_v9  ;;  %3925 = vmatpush.bf16.msra.mxu1 %v5401_v24  ;;  %v1573_v9 = vld [vmem:[%s9901_s2 + $0x18] sm:$0xff] }
 0x1ee   : > { %v5896_v16 = vld [vmem:[%s8463_s10 + $0x4e0] sm:$0xf]  ;;  %v7231_v22 = vld [vmem:[%s8463_s10 + $0x5ec] sm:$0xf0]  ;;  %v8563_v34 = vor.u32 %v7020_v13, %v5160_v12  ;;  %3944 = vmatpush.bf16.msra.mxu2 %v5529_v25  ;;  %1591 = vperm.xlu0 %7500, %v1573_v9   ;;  %v7028_v25 = vld [vmem:[%s9900_s1 + $0x7c] sm:$0xf] }
 0x1ef   : > { %v6024_v21 = vld [vmem:[%s8463_s10 + $0x5e0] sm:$0xf]  ;;  %v5897_v30 = vor.u32 %v7199_v17, %v5896_v16  ;;  %v7263_v32 = vld [vmem:[%s8463_s10 + $0x6ec] sm:$0xf0]  ;;  %3963 = vmatpush.bf16.msra.mxu3 %v5657_v29  ;;  %v7027_v16 = vld [vmem:[%s9900_s1 + $0x74] sm:$0xf] }
 0x1f0   : > { %v7021_v26 = vld [vmem:[%s9900_s1 + $0x3c] sm:$0xf0]  ;;  %v6025_v35 = vor.u32 %v7231_v22, %v6024_v21  ;;  %v7295_v36 = vld [vmem:[%s8463_s10 + $0x7ec] sm:$0xf0]  ;;  %3907 = vmatmul.bf16.vlgmr.msra.gmra.mxu0 %v8563_v34  ;;  %3926 = vmatmul.bf16.vlgmr.msra.gmra.mxu1 %v8568_v39  ;;  %v5218_v17 = vld [vmem:[%s9900_s1 + $0xa8] sm:$0xf0] }
 0x1f1   : > { %v6152_v31 = vld [vmem:[%s8463_s10 + $0x6e0] sm:$0xf]  ;;  %v7195_v38 = vld [vmem:[%s8463_s10 + $0x4cc] sm:$0xf0]  ;;  %v8570_v40 = vor.u32 %v7021_v26, %v5168_v20  ;;  %3975 = vmatpush.bf16.msrb.mxu0 %v5897_v30  ;;  %v5224_v20 = vld [vmem:[%s9900_s1 + $0x78] sm:$0xf] }
 0x1f2   : > { %v6280_v33 = vld [vmem:[%s8463_s10 + $0x7e0] sm:$0xf]  ;;  %v7227_v42 = vld [vmem:[%s8463_s10 + $0x5cc] sm:$0xf0]  ;;  %v6153_v44 = vor.u32 %v7263_v32, %v6152_v31  ;;  %3994 = vmatpush.bf16.msrb.mxu1 %v6025_v35  ;;  %3964 = vmatmul.bf16.vlgmr.msra.gmra.mxu3 %v8574_v43  ;;  %v5226_v26 = vld [vmem:[%s9900_s1 + $0xb0] sm:$0xf0] }
 0x1f3   : > { %v5880_v37 = vld [vmem:[%s8463_s10 + $0x4c0] sm:$0xf]  ;;  %v6281_v45 = vor.u32 %v7295_v36, %v6280_v33  ;;  %v7259_v48 = vld [vmem:[%s8463_s10 + $0x6cc] sm:$0xf0]  ;;  %3945 = vmatmul.bf16.vlgmr.msra.gmra.mxu2 %v8570_v40 }
 0x1f4   : > { %v6008_v41 = vld [vmem:[%s8463_s10 + $0x5c0] sm:$0xf]  ;;  %v5881_v46 = vor.u32 %v7195_v38, %v5880_v37  ;;  %v7291_v51 = vld [vmem:[%s8463_s10 + $0x7cc] sm:$0xf0]  ;;  %4013 = vmatpush.bf16.msrb.mxu2 %v6153_v44  ;;  %v8642_v38 = vor.u32 %v7027_v16, %v5218_v17 }
 0x1f5   : > { %v6136_v47 = vld [vmem:[%s8463_s10 + $0x6c0] sm:$0xf]  ;;  %v6009_v50 = vor.u32 %v7227_v42, %v6008_v41  ;;  %v7191_v53 = vld [vmem:[%s8463_s10 + $0x4ac] sm:$0xf0]  ;;  %4032 = vmatpush.bf16.msrb.mxu3 %v6281_v45  ;;  %v8648_v45 = vor.u32 %v7028_v25, %v5226_v26  ;;  %v5184_v26 = vld [vmem:[%s9900_s1 + $0x18] sm:$0xf] }
 0x1f6   : > { %v6264_v49 = vld [vmem:[%s8463_s10 + $0x7c0] sm:$0xf]  ;;  %v7223_v55 = vld [vmem:[%s8463_s10 + $0x5ac] sm:$0xf0]  ;;  %v6137_v57 = vor.u32 %v7259_v48, %v6136_v47  ;;  %3976 = vmatpush.bf16.msrb.mxu0 %v5881_v46 }
 0x1f7   : > { %v5864_v52 = vld [vmem:[%s8463_s10 + $0x4a0] sm:$0xf]  ;;  %v6265_v58 = vor.u32 %v7291_v51, %v6264_v49  ;;  %v7255_v61 = vld [vmem:[%s8463_s10 + $0x6ac] sm:$0xf0]  ;;  %3995 = vmatpush.bf16.msrb.mxu1 %v6009_v50 }
 0x1f8   : > { %v5992_v54 = vld [vmem:[%s8463_s10 + $0x5a0] sm:$0xf]  ;;  %v5865_v59 = vor.u32 %v7191_v53, %v5864_v52  ;;  %v7287_v0 = vld [vmem:[%s8463_s10 + $0x7ac] sm:$0xf0]  ;;  %4014 = vmatpush.bf16.msrb.mxu2 %v6137_v57 }
 0x1f9   : > { %v1570_v56 = vld [vmem:[%s9901_s2] sm:$0xff]  ;;  %v5993_v63 = vor.u32 %v7223_v55, %v5992_v54  ;;  %v7187_v2 = vld [vmem:[%s8463_s10 + $0x48c] sm:$0xf0]  ;;  %4033 = vmatpush.bf16.msrb.mxu3 %v6265_v58 }
 0x1fa   : > { %v6120_v60 = vld [vmem:[%s8463_s10 + $0x6a0] sm:$0xf]  ;;  %1576 = vperm.xlu1 %7501, %v1570_v56   ;;  %v7219_v4 = vld [vmem:[%s8463_s10 + $0x58c] sm:$0xf0]  ;;  %3977 = vmatpush.bf16.msrb.mxu0 %v5865_v59 }
 0x1fb   : > { %v6248_v62 = vld [vmem:[%s8463_s10 + $0x7a0] sm:$0xf]  ;;  %v6121_v6 = vor.u32 %v7255_v61, %v6120_v60  ;;  %v7251_v7 = vld [vmem:[%s8463_s10 + $0x68c] sm:$0xf0]  ;;  %3996 = vmatpush.bf16.msrb.mxu1 %v5993_v63 }
 0x1fc   : > { %v5848_v1 = vld [vmem:[%s8463_s10 + $0x480] sm:$0xf]  ;;  %v6249_v10 = vor.u32 %v7287_v0, %v6248_v62  ;;  %v7283_v12 = vld [vmem:[%s8463_s10 + $0x78c] sm:$0xf0] }
 0x1fd   : > { %v5976_v3 = vld [vmem:[%s8463_s10 + $0x580] sm:$0xf]  ;;  %v5849_v11 = vor.u32 %v7187_v2, %v5848_v1  ;;  %v5216_v13 = vld [vmem:[%s9900_s1 + $0x70] sm:$0xf]  ;;  %4015 = vmatpush.bf16.msrb.mxu2 %v6121_v6 }
 0x1fe   : > { %v6104_v5 = vld [vmem:[%s8463_s10 + $0x680] sm:$0xf]  ;;  %v5977_v15 = vor.u32 %v7219_v4, %v5976_v3  ;;  %v7183_v19 = vld [vmem:[%s8463_s10 + $0x46c] sm:$0xf0]  ;;  %4034 = vmatpush.bf16.msrb.mxu3 %v6249_v10  ;;  %v8637_v32 = vor.u32 %v7034_v14, %v5216_v13 }
 0x1ff   : > { %v6232_v8 = vld [vmem:[%s8463_s10 + $0x780] sm:$0xf]  ;;  %v7215_v22 = vld [vmem:[%s8463_s10 + $0x56c] sm:$0xf0]  ;;  %v6105_v23 = vor.u32 %v7251_v7, %v6104_v5  ;;  %3978 = vmatpush.bf16.msrb.mxu0 %v5849_v11 }
 0x200   : > { %v5832_v18 = vld [vmem:[%s8463_s10 + $0x460] sm:$0xf]  ;;  %v7035_v24 = vld [vmem:[%s9900_s1 + $0xac] sm:$0xf0]  ;;  %v6233_v27 = vor.u32 %v7283_v12, %v6232_v8  ;;  %3997 = vmatpush.bf16.msrb.mxu1 %v5977_v15  ;;  %3912 = vmatmul.bf16.gmra.mxu0 %v8637_v32 }
 0x201   : > { %v5960_v21 = vld [vmem:[%s8463_s10 + $0x560] sm:$0xf]  ;;  %v5833_v28 = vor.u32 %v7183_v19, %v5832_v18  ;;  %v7247_v30 = vld [vmem:[%s8463_s10 + $0x66c] sm:$0xf0]  ;;  %v8644_v41 = vor.u32 %v7035_v24, %v5224_v20  ;;  %4016 = vmatpush.bf16.msrb.mxu2 %v6105_v23  ;;  %3931 = vmatmul.bf16.gmra.mxu1 %v8642_v38  ;;  %v7022_v19 = vld [vmem:[%s9900_s1 + $0x44] sm:$0xf0] }
 0x202   : > { %v6088_v29 = vld [vmem:[%s8463_s10 + $0x660] sm:$0xf]  ;;  %v5961_v33 = vor.u32 %v7215_v22, %v5960_v21  ;;  %v7279_v35 = vld [vmem:[%s8463_s10 + $0x76c] sm:$0xf0]  ;;  %4035 = vmatpush.bf16.msrb.mxu3 %v6233_v27  ;;  %v7015_v21 = vld [vmem:[%s9900_s1 + $0x14] sm:$0xf] }
 0x203   : > { %v6216_v31 = vld [vmem:[%s8463_s10 + $0x760] sm:$0xf]  ;;  %v7179_v37 = vld [vmem:[%s8463_s10 + $0x44c] sm:$0xf0]  ;;  %v6089_v46 = vor.u32 %v7247_v30, %v6088_v29  ;;  %3979 = vmatpush.bf16.msrb.mxu0 %v5833_v28  ;;  %3950 = vmatmul.bf16.gmra.mxu2 %v8644_v41  ;;  %v5178_v22 = vld [vmem:[%s9900_s1 + $0x48] sm:$0xf0] }
 0x204   : > { %v5816_v36 = vld [vmem:[%s8463_s10 + $0x440] sm:$0xf]  ;;  %v7211_v44 = vld [vmem:[%s8463_s10 + $0x54c] sm:$0xf0]  ;;  %v6217_v47 = vor.u32 %v7279_v35, %v6216_v31  ;;  %3998 = vmatpush.bf16.msrb.mxu1 %v5961_v33  ;;  %3969 = vmatmul.bf16.gmra.mxu3 %v8648_v45  ;;  %v7016_v33 = vld [vmem:[%s9900_s1 + $0x1c] sm:$0xf] }
 0x205   : > { %v5944_v42 = vld [vmem:[%s8463_s10 + $0x540] sm:$0xf]  ;;  %v5817_v48 = vor.u32 %v7179_v37, %v5816_v36  ;;  %v7243_v50 = vld [vmem:[%s8463_s10 + $0x64c] sm:$0xf0]  ;;  %4017 = vmatpush.bf16.msrb.mxu2 %v6089_v46  ;;  %v5186_v35 = vld [vmem:[%s9900_s1 + $0x50] sm:$0xf0] }
 0x206   : > { %v6072_v49 = vld [vmem:[%s8463_s10 + $0x640] sm:$0xf]  ;;  %v5945_v52 = vor.u32 %v7211_v44, %v5944_v42  ;;  %v7275_v53 = vld [vmem:[%s8463_s10 + $0x74c] sm:$0xf0]  ;;  %4036 = vmatpush.bf16.msrb.mxu3 %v6217_v47 }
 0x207   : > { %v6200_v51 = vld [vmem:[%s8463_s10 + $0x740] sm:$0xf]  ;;  %v7175_v55 = vld [vmem:[%s8463_s10 + $0x42c] sm:$0xf0]  ;;  %v6073_v59 = vor.u32 %v7243_v50, %v6072_v49  ;;  %3980 = vmatpush.bf16.msrb.mxu0 %v5817_v48 }
 0x208   : > { %v5800_v54 = vld [vmem:[%s8463_s10 + $0x420] sm:$0xf]  ;;  %v7207_v57 = vld [vmem:[%s8463_s10 + $0x52c] sm:$0xf0]  ;;  %v6201_v62 = vor.u32 %v7275_v53, %v6200_v51  ;;  %3999 = vmatpush.bf16.msrb.mxu1 %v5945_v52  ;;  %v8717_v52 = vor.u32 %v7015_v21, %v5178_v22  ;;  %v7036_v21 = vld [vmem:[%s9900_s1 + $0xb4] sm:$0xf0] }
 0x209   : > { %v5928_v56 = vld [vmem:[%s8463_s10 + $0x520] sm:$0xf]  ;;  %v1572_v58 = vld [vmem:[%s9901_s2 + $0x10] sm:$0xff]  ;;  %v5801_v63 = vor.u32 %v7175_v55, %v5800_v54  ;;  %4018 = vmatpush.bf16.msrb.mxu2 %v6073_v59 }
 0x20a   : > { %v6056_v60 = vld [vmem:[%s8463_s10 + $0x620] sm:$0xf]  ;;  %v7239_v61 = vld [vmem:[%s8463_s10 + $0x62c] sm:$0xf0]  ;;  %v5929_v3 = vor.u32 %v7207_v57, %v5928_v56  ;;  %1586 = vperm.xlu0 %7500, %v1572_v58   ;;  %4037 = vmatpush.bf16.msrb.mxu3 %v6201_v62  ;;  %v8723_v56 = vor.u32 %v7016_v33, %v5186_v35 }
 0x20b   : > { %v6184_v0 = vld [vmem:[%s8463_s10 + $0x720] sm:$0xf]  ;;  %v7271_v1 = vld [vmem:[%s8463_s10 + $0x72c] sm:$0xf0]  ;;  %v6057_v11 = vor.u32 %v7239_v61, %v6056_v60  ;;  %3981 = vmatpush.bf16.msrb.mxu0 %v5801_v63 }
 0x20c   : > { %v5784_v2 = vld [vmem:[%s8463_s10 + $0x400] sm:$0xf]  ;;  %v7171_v4 = vld [vmem:[%s8463_s10 + $0x40c] sm:$0xf0]  ;;  %v6185_v15 = vor.u32 %v7271_v1, %v6184_v0  ;;  %4000 = vmatpush.bf16.msrb.mxu1 %v5929_v3 }
 0x20d   : > { %v5912_v5 = vld [vmem:[%s8463_s10 + $0x500] sm:$0xf]  ;;  %v7203_v6 = vld [vmem:[%s8463_s10 + $0x50c] sm:$0xf0]  ;;  %v5785_v16 = vor.u32 %v7171_v4, %v5784_v2  ;;  %4019 = vmatpush.bf16.msrb.mxu2 %v6057_v11 }
 0x20e   : > { %v6040_v7 = vld [vmem:[%s8463_s10 + $0x600] sm:$0xf]  ;;  %v7235_v8 = vld [vmem:[%s8463_s10 + $0x60c] sm:$0xf0]  ;;  %v5913_v20 = vor.u32 %v7203_v6, %v5912_v5  ;;  %4038 = vmatpush.bf16.msrb.mxu3 %v6185_v15 }
 0x20f   : > { %v6408_v9 = vld [vmem:[%s8463_s10 + $0x8e0] sm:$0xf]  ;;  %v7327_v10 = vld [vmem:[%s8463_s10 + $0x8ec] sm:$0xf0]  ;;  %v6041_v30 = vor.u32 %v7235_v8, %v6040_v7  ;;  %3982 = vmatpush.bf16.msrb.mxu0 %v5785_v16 }
 0x210   : > { %v6168_v12 = vld [vmem:[%s8463_s10 + $0x700] sm:$0xf]  ;;  %v7359_v14 = vld [vmem:[%s8463_s10 + $0x9ec] sm:$0xf0]  ;;  %v6409_v23 = vor.u32 %v7327_v10, %v6408_v9  ;;  %4001 = vmatpush.bf16.msrb.mxu1 %v5913_v20 }
 0x211   : > { %v6536_v13 = vld [vmem:[%s8463_s10 + $0x9e0] sm:$0xf]  ;;  %v7267_v17 = vld [vmem:[%s8463_s10 + $0x70c] sm:$0xf0]  ;;  %4020 = vmatpush.bf16.msrb.mxu2 %v6041_v30 }
 0x212   : > { %v5176_v18 = vld [vmem:[%s9900_s1 + $0x10] sm:$0xf]  ;;  %v6664_v24 = vld [vmem:[%s8463_s10 + $0xae0] sm:$0xf]  ;;  %v6537_v27 = vor.u32 %v7359_v14, %v6536_v13  ;;  %v6169_v36 = vor.u32 %v7267_v17, %v6168_v12 }
 0x213   : > { %v7391_v25 = vld [vmem:[%s8463_s10 + $0xaec] sm:$0xf0]  ;;  %v6792_v28 = vld [vmem:[%s8463_s10 + $0xbe0] sm:$0xf]  ;;  %v8712_v47 = vor.u32 %v7022_v19, %v5176_v18  ;;  %4051 = vmatpush.bf16.msra.mxu0 %v6409_v23  ;;  %4002 = vmatmul.bf16.vlgmr.msrb.gmra.mxu1 %v8717_v52 }
 0x214   : > { %v7423_v29 = vld [vmem:[%s8463_s10 + $0xbec] sm:$0xf0]  ;;  %v6665_v37 = vor.u32 %v7391_v25, %v6664_v24  ;;  %v6392_v42 = vld [vmem:[%s8463_s10 + $0x8c0] sm:$0xf]  ;;  %4070 = vmatpush.bf16.msra.mxu1 %v6537_v27  ;;  %4039 = vmatpush.bf16.msrb.mxu3 %v6169_v36  ;;  %v5234_v27 = vld [vmem:[%s9900_s1 + $0xb8] sm:$0xf0] }
 0x215   : > { %v7023_v31 = vld [vmem:[%s9900_s1 + $0x4c] sm:$0xf0]  ;;  %v6520_v46 = vld [vmem:[%s8463_s10 + $0x9c0] sm:$0xf]  ;;  %v6793_v48 = vor.u32 %v7423_v29, %v6792_v28  ;;  %3983 = vmatmul.bf16.vlgmr.msrb.gmra.mxu0 %v8712_v47 }
 0x216   : > { %v7323_v44 = vld [vmem:[%s8463_s10 + $0x8cc] sm:$0xf0]  ;;  %v6648_v50 = vld [vmem:[%s8463_s10 + $0xac0] sm:$0xf]  ;;  %v8719_v53 = vor.u32 %v7023_v31, %v5184_v26  ;;  %4089 = vmatpush.bf16.msra.mxu2 %v6665_v37  ;;  %v7029_v26 = vld [vmem:[%s9900_s1 + $0x84] sm:$0xf] }
 0x217   : > { %v7355_v49 = vld [vmem:[%s8463_s10 + $0x9cc] sm:$0xf0]  ;;  %v6776_v54 = vld [vmem:[%s8463_s10 + $0xbc0] sm:$0xf]  ;;  %v6393_v57 = vor.u32 %v7323_v44, %v6392_v42  ;;  %4040 = vmatmul.bf16.vlgmr.msrb.gmra.mxu3 %v8723_v56  ;;  %v5240_v31 = vld [vmem:[%s9900_s1 + $0x88] sm:$0xf] }
 0x218   : > { %v7387_v51 = vld [vmem:[%s8463_s10 + $0xacc] sm:$0xf0]  ;;  %v6521_v58 = vor.u32 %v7355_v49, %v6520_v46  ;;  %v6376_v60 = vld [vmem:[%s8463_s10 + $0x8a0] sm:$0xf]  ;;  %4108 = vmatpush.bf16.msra.mxu3 %v6793_v48  ;;  %4021 = vmatmul.bf16.vlgmr.msrb.gmra.mxu2 %v8719_v53  ;;  %v7030_v37 = vld [vmem:[%s9900_s1 + $0x8c] sm:$0xf] }
 0x219   : > { %v7419_v55 = vld [vmem:[%s8463_s10 + $0xbcc] sm:$0xf0]  ;;  %v6649_v59 = vor.u32 %v7387_v51, %v6648_v50  ;;  %v6504_v62 = vld [vmem:[%s8463_s10 + $0x9a0] sm:$0xf]  ;;  %4052 = vmatpush.bf16.msra.mxu0 %v6393_v57  ;;  %v5242_v42 = vld [vmem:[%s9900_s1 + $0xc0] sm:$0xf0] }
 0x21a   : > { %v7319_v61 = vld [vmem:[%s8463_s10 + $0x8ac] sm:$0xf0]  ;;  %v6777_v63 = vor.u32 %v7419_v55, %v6776_v54  ;;  %v6632_v1 = vld [vmem:[%s8463_s10 + $0xaa0] sm:$0xf]  ;;  %4071 = vmatpush.bf16.msra.mxu1 %v6521_v58 }
 0x21b   : > { %v7351_v0 = vld [vmem:[%s8463_s10 + $0x9ac] sm:$0xf0]  ;;  %v6760_v3 = vld [vmem:[%s8463_s10 + $0xba0] sm:$0xf]  ;;  %v6377_v5 = vor.u32 %v7319_v61, %v6376_v60  ;;  %4090 = vmatpush.bf16.msra.mxu2 %v6649_v59  ;;  %v8785_v60 = vor.u32 %v7029_v26, %v5234_v27  ;;  %v7069_v27 = vld [vmem:[%s8463_s10 + $0xe4] sm:$0xf] }
 0x21c   : > { %v7383_v2 = vld [vmem:[%s8463_s10 + $0xaac] sm:$0xf0]  ;;  %v6505_v6 = vor.u32 %v7351_v0, %v6504_v62  ;;  %v6360_v8 = vld [vmem:[%s8463_s10 + $0x880] sm:$0xf]  ;;  %4109 = vmatpush.bf16.msra.mxu3 %v6777_v63  ;;  %v8791_v0 = vor.u32 %v7030_v37, %v5242_v42  ;;  %v7024_v42 = vld [vmem:[%s9900_s1 + $0x54] sm:$0xf0] }
 0x21d   : > { %v7415_v4 = vld [vmem:[%s8463_s10 + $0xbac] sm:$0xf0]  ;;  %v6633_v7 = vor.u32 %v7383_v2, %v6632_v1  ;;  %v6488_v10 = vld [vmem:[%s8463_s10 + $0x980] sm:$0xf]  ;;  %4053 = vmatpush.bf16.msra.mxu0 %v6377_v5 }
 0x21e   : > { %v7315_v9 = vld [vmem:[%s8463_s10 + $0x88c] sm:$0xf0]  ;;  %v6761_v11 = vor.u32 %v7415_v4, %v6760_v3  ;;  %v6616_v13 = vld [vmem:[%s8463_s10 + $0xa80] sm:$0xf]  ;;  %4072 = vmatpush.bf16.msra.mxu1 %v6505_v6 }
 0x21f   : > { %v7347_v12 = vld [vmem:[%s8463_s10 + $0x98c] sm:$0xf0]  ;;  %v6744_v15 = vld [vmem:[%s8463_s10 + $0xb80] sm:$0xf]  ;;  %v6361_v17 = vor.u32 %v7315_v9, %v6360_v8  ;;  %4091 = vmatpush.bf16.msra.mxu2 %v6633_v7 }
 0x220   : > { %v7379_v14 = vld [vmem:[%s8463_s10 + $0xa8c] sm:$0xf0]  ;;  %v6489_v18 = vor.u32 %v7347_v12, %v6488_v10  ;;  %v5232_v20 = vld [vmem:[%s9900_s1 + $0x80] sm:$0xf]  ;;  %4110 = vmatpush.bf16.msra.mxu3 %v6761_v11 }
 0x221   : > { %v7411_v16 = vld [vmem:[%s8463_s10 + $0xb8c] sm:$0xf0]  ;;  %v6617_v19 = vor.u32 %v7379_v14, %v6616_v13  ;;  %v6344_v22 = vld [vmem:[%s8463_s10 + $0x860] sm:$0xf]  ;;  %4054 = vmatpush.bf16.msra.mxu0 %v6361_v17  ;;  %v8780_v54 = vor.u32 %v7036_v21, %v5232_v20 }
 0x222   : > { %v7311_v23 = vld [vmem:[%s8463_s10 + $0x86c] sm:$0xf0]  ;;  %v6472_v24 = vld [vmem:[%s8463_s10 + $0x960] sm:$0xf]  ;;  %v6745_v25 = vor.u32 %v7411_v16, %v6744_v15  ;;  %4073 = vmatpush.bf16.msra.mxu1 %v6489_v18 }
 0x223   : > { %v7343_v28 = vld [vmem:[%s8463_s10 + $0x96c] sm:$0xf0]  ;;  %v6600_v29 = vld [vmem:[%s8463_s10 + $0xa60] sm:$0xf]  ;;  %v6345_v44 = vor.u32 %v7311_v23, %v6344_v22  ;;  %4092 = vmatpush.bf16.msra.mxu2 %v6617_v19  ;;  %4007 = vmatmul.bf16.gmra.mxu1 %v8785_v60 }
 0x224   : > { %v7375_v30 = vld [vmem:[%s8463_s10 + $0xa6c] sm:$0xf0]  ;;  %v6728_v33 = vld [vmem:[%s8463_s10 + $0xb60] sm:$0xf]  ;;  %v6473_v46 = vor.u32 %v7343_v28, %v6472_v24  ;;  %4111 = vmatpush.bf16.msra.mxu3 %v6745_v25 }
 0x225   : > { %v7407_v35 = vld [vmem:[%s8463_s10 + $0xb6c] sm:$0xf0]  ;;  %v7037_v36 = vld [vmem:[%s9900_s1 + $0xbc] sm:$0xf0]  ;;  %v6601_v48 = vor.u32 %v7375_v30, %v6600_v29  ;;  %4055 = vmatpush.bf16.msra.mxu0 %v6345_v44  ;;  %v5386_v29 = vld [vmem:[%s8463_s10 + $0xf0] sm:$0xf0] }
 0x226   : > { %v6328_v49 = vld [vmem:[%s8463_s10 + $0x840] sm:$0xf]  ;;  %v7307_v50 = vld [vmem:[%s8463_s10 + $0x84c] sm:$0xf0]  ;;  %v6729_v55 = vor.u32 %v7407_v35, %v6728_v33  ;;  %v8787_v61 = vor.u32 %v7037_v36, %v5240_v31  ;;  %4074 = vmatpush.bf16.msra.mxu1 %v6473_v46  ;;  %3988 = vmatmul.bf16.gmra.mxu0 %v8780_v54  ;;  %v7101_v30 = vld [vmem:[%s8463_s10 + $0x1e4] sm:$0xf] }
 0x227   : > { %v6456_v51 = vld [vmem:[%s8463_s10 + $0x940] sm:$0xf]  ;;  %v7339_v57 = vld [vmem:[%s8463_s10 + $0x94c] sm:$0xf0]  ;;  %v6329_v1 = vor.u32 %v7307_v50, %v6328_v49  ;;  %4093 = vmatpush.bf16.msra.mxu2 %v6601_v48  ;;  %4045 = vmatmul.bf16.gmra.mxu3 %v8791_v0  ;;  %v5514_v31 = vld [vmem:[%s8463_s10 + $0x1f0] sm:$0xf0] }
 0x228   : > { %v6584_v58 = vld [vmem:[%s8463_s10 + $0xa40] sm:$0xf]  ;;  %v7371_v59 = vld [vmem:[%s8463_s10 + $0xa4c] sm:$0xf0]  ;;  %9916 = vst [vmem:[#allocation3_spill] sm:$0xff] %v8787_v61  ;;  %v6457_v2 = vor.u32 %v7339_v57, %v6456_v51  ;;  %4112 = vmatpush.bf16.msra.mxu3 %v6729_v55  ;;  %4026 = vmatmul.bf16.gmra.mxu2 %v8787_v61  ;;  %v5389_v55 = vor.u32 %v7069_v27, %v5386_v29 }
 0x229   : > { %v6712_v62 = vld [vmem:[%s8463_s10 + $0xb40] sm:$0xf]  ;;  %v7403_v63 = vld [vmem:[%s8463_s10 + $0xb4c] sm:$0xf0]  ;;  %v6585_v3 = vor.u32 %v7371_v59, %v6584_v58  ;;  %4056 = vmatpush.bf16.msra.mxu0 %v6329_v1  ;;  %v7017_v49 = vld [vmem:[%s9900_s1 + $0x24] sm:$0xf]  ;;  %v5517_v57 = vor.u32 %v7101_v30, %v5514_v31 }
 0x22a   : > { %v6312_v4 = vld [vmem:[%s8463_s10 + $0x820] sm:$0xf]  ;;  %v7303_v5 = vld [vmem:[%s8463_s10 + $0x82c] sm:$0xf0]  ;;  %v6713_v7 = vor.u32 %v7403_v63, %v6712_v62  ;;  %4075 = vmatpush.bf16.msra.mxu1 %v6457_v2  ;;  %v5194_v50 = vld [vmem:[%s9900_s1 + $0x58] sm:$0xf0] }
 0x22b   : > { %v6440_v6 = vld [vmem:[%s8463_s10 + $0x920] sm:$0xf]  ;;  %v7335_v8 = vld [vmem:[%s8463_s10 + $0x92c] sm:$0xf0]  ;;  %v6313_v13 = vor.u32 %v7303_v5, %v6312_v4  ;;  %4094 = vmatpush.bf16.msra.mxu2 %v6585_v3  ;;  %v5200_v51 = vld [vmem:[%s9900_s1 + $0x28] sm:$0xf] }
 0x22c   : > { %v6568_v9 = vld [vmem:[%s8463_s10 + $0xa20] sm:$0xf]  ;;  %v7367_v10 = vld [vmem:[%s8463_s10 + $0xa2c] sm:$0xf0]  ;;  %v6441_v16 = vor.u32 %v7335_v8, %v6440_v6  ;;  %4113 = vmatpush.bf16.msra.mxu3 %v6713_v7  ;;  %v7018_v59 = vld [vmem:[%s9900_s1 + $0x2c] sm:$0xf]  ;;  %v8853_v8 = vor.u32 %v7017_v49, %v5194_v50 }
 0x22d   : > { %v6696_v11 = vld [vmem:[%s8463_s10 + $0xb20] sm:$0xf]  ;;  %v7399_v12 = vld [vmem:[%s8463_s10 + $0xb2c] sm:$0xf0]  ;;  %v6569_v17 = vor.u32 %v7367_v10, %v6568_v9  ;;  %4057 = vmatpush.bf16.msra.mxu0 %v6313_v13  ;;  %v5202_v62 = vld [vmem:[%s9900_s1 + $0x60] sm:$0xf0] }
 0x22e   : > { %v6296_v14 = vld [vmem:[%s8463_s10 + $0x800] sm:$0xf]  ;;  %v7299_v15 = vld [vmem:[%s8463_s10 + $0x80c] sm:$0xf0]  ;;  %v6697_v21 = vor.u32 %v7399_v12, %v6696_v11  ;;  %4076 = vmatpush.bf16.msra.mxu1 %v6441_v16  ;;  %v7065_v3 = vld [vmem:[%s8463_s10 + $0xc4] sm:$0xf]  ;;  %v8859_v12 = vor.u32 %v7018_v59, %v5202_v62 }
 0x22f   : > { %v6424_v18 = vld [vmem:[%s8463_s10 + $0x900] sm:$0xf]  ;;  %v7331_v19 = vld [vmem:[%s8463_s10 + $0x90c] sm:$0xf0]  ;;  %v6297_v28 = vor.u32 %v7299_v15, %v6296_v14  ;;  %4095 = vmatpush.bf16.msra.mxu2 %v6569_v17  ;;  %v5370_v5 = vld [vmem:[%s8463_s10 + $0xd0] sm:$0xf0] }
 0x230   : > { %v6552_v20 = vld [vmem:[%s8463_s10 + $0xa00] sm:$0xf]  ;;  %v7363_v22 = vld [vmem:[%s8463_s10 + $0xa0c] sm:$0xf0]  ;;  %v6425_v33 = vor.u32 %v7331_v19, %v6424_v18  ;;  %4114 = vmatpush.bf16.msra.mxu3 %v6697_v21  ;;  %v7097_v6 = vld [vmem:[%s8463_s10 + $0x1c4] sm:$0xf]  ;;  %v5373_v14 = vor.u32 %v7065_v3, %v5370_v5 }
 0x231   : > { %v6680_v23 = vld [vmem:[%s8463_s10 + $0xb00] sm:$0xf]  ;;  %v7395_v24 = vld [vmem:[%s8463_s10 + $0xb0c] sm:$0xf0]  ;;  %v6553_v35 = vor.u32 %v7363_v22, %v6552_v20  ;;  %4058 = vmatpush.bf16.msra.mxu0 %v6297_v28  ;;  %v5498_v7 = vld [vmem:[%s8463_s10 + $0x1d0] sm:$0xf0] }
 0x232   : > { %v6920_v25 = vld [vmem:[%s8463_s10 + $0xce0] sm:$0xf]  ;;  %v7455_v26 = vld [vmem:[%s8463_s10 + $0xcec] sm:$0xf0]  ;;  %v6681_v37 = vor.u32 %v7395_v24, %v6680_v23  ;;  %4077 = vmatpush.bf16.msra.mxu1 %v6425_v33  ;;  %9918 = vst [vmem:[#allocation5_spill] sm:$0xff] %v8859_v12  ;;  %v5501_v15 = vor.u32 %v7097_v6, %v5498_v7 }
 0x233   : > { %v5192_v36 = vld [vmem:[%s9900_s1 + $0x20] sm:$0xf]  ;;  %v6921_v44 = vor.u32 %v7455_v26, %v6920_v25  ;;  %v7471_v48 = vld [vmem:[%s8463_s10 + $0xd6c] sm:$0xf0]  ;;  %4096 = vmatpush.bf16.msra.mxu2 %v6553_v35  ;;  %v7061_v18 = vld [vmem:[%s8463_s10 + $0xa4] sm:$0xf] }
 0x234   : > { %v6984_v46 = vld [vmem:[%s8463_s10 + $0xd60] sm:$0xf]  ;;  %v7451_v2 = vld [vmem:[%s8463_s10 + $0xccc] sm:$0xf0]  ;;  %4115 = vmatpush.bf16.msra.mxu3 %v6681_v37  ;;  %v8848_v4 = vor.u32 %v7024_v42, %v5192_v36  ;;  %v5354_v19 = vld [vmem:[%s8463_s10 + $0xb0] sm:$0xf0] }
 0x235   : > { %v7025_v58 = vld [vmem:[%s9900_s1 + $0x5c] sm:$0xf0]  ;;  %v6985_v63 = vor.u32 %v7471_v48, %v6984_v46  ;;  %4127 = vmatpush.bf16.msrb.mxu0 %v6921_v44  ;;  %v7467_v11 = vld [vmem:[%s8463_s10 + $0xd4c] sm:$0xf0]  ;;  %v7093_v20 = vld [vmem:[%s8463_s10 + $0x1a4] sm:$0xf]  ;;  %4078 = vmatmul.bf16.vlgmr.msra.gmra.mxu1 %v8853_v8  ;;  %v5357_v26 = vor.u32 %v7061_v18, %v5354_v19 }
 0x236   : > { %v6904_v1 = vld [vmem:[%s8463_s10 + $0xcc0] sm:$0xf]  ;;  %v8855_v9 = vor.u32 %v7025_v58, %v5200_v51  ;;  %v7447_v17 = vld [vmem:[%s8463_s10 + $0xcac] sm:$0xf0]  ;;  %4059 = vmatmul.bf16.vlgmr.msra.gmra.mxu0 %v8848_v4  ;;  %v5482_v21 = vld [vmem:[%s8463_s10 + $0x1b0] sm:$0xf0] }
 0x237   : > { %4165 = vmatpush.bf16.msrb.mxu2 %v5389_v55  ;;  %v6968_v10 = vld [vmem:[%s8463_s10 + $0xd40] sm:$0xf]  ;;  %v6905_v13 = vor.u32 %v7451_v2, %v6904_v1  ;;  %4150 = vmatpush.bf16.msrb.mxu1 %v6985_v63  ;;  %v7463_v24 = vld [vmem:[%s8463_s10 + $0xd2c] sm:$0xf0]  ;;  %v5485_v27 = vor.u32 %v7093_v20, %v5482_v21  ;;  %v7057_v30 = vld [vmem:[%s8463_s10 + $0x84] sm:$0xf] }
 0x238   : > { %9917 = vst [vmem:[#allocation4_spill] sm:$0xff] %v8855_v9  ;;  %4184 = vmatpush.bf16.msrb.mxu3 %v5517_v57  ;;  %v6888_v16 = vld [vmem:[%s8463_s10 + $0xca0] sm:$0xf]  ;;  %v6969_v22 = vor.u32 %v7467_v11, %v6968_v10  ;;  %4097 = vmatmul.bf16.vlgmr.msra.gmra.mxu2 %v8855_v9  ;;  %v7443_v29 = vld [vmem:[%s8463_s10 + $0xc8c] sm:$0xf0] }
 0x239   : > { %v6952_v23 = vld [vmem:[%s8463_s10 + $0xd20] sm:$0xf]  ;;  %4116 = vmatmul.bf16.vlgmr.msra.gmra.mxu3 %v8859_v12  ;;  %4128 = vmatpush.bf16.msrb.mxu0 %v6905_v13  ;;  %v6889_v25 = vor.u32 %v7447_v17, %v6888_v16  ;;  %v5338_v31 = vld [vmem:[%s8463_s10 + $0x90] sm:$0xf0]  ;;  %v7089_v33 = vld [vmem:[%s8463_s10 + $0x184] sm:$0xf] }
 0x23a   : > { %v6872_v28 = vld [vmem:[%s8463_s10 + $0xc80] sm:$0xf]  ;;  %v5466_v35 = vld [vmem:[%s8463_s10 + $0x190] sm:$0xf0]  ;;  %v6953_v36 = vor.u32 %v7463_v24, %v6952_v23  ;;  %v7459_v42 = vld [vmem:[%s8463_s10 + $0xd0c] sm:$0xf0]  ;;  %v5341_v49 = vor.u32 %v7057_v30, %v5338_v31 }
 0x23b   : > { %4166 = vmatpush.bf16.msrb.mxu2 %v5373_v14  ;;  %4151 = vmatpush.bf16.msrb.mxu1 %v6969_v22  ;;  %v6936_v37 = vld [vmem:[%s8463_s10 + $0xd00] sm:$0xf]  ;;  %v6873_v44 = vor.u32 %v7443_v29, %v6872_v28  ;;  %v7165_v46 = vld [vmem:[%s8463_s10 + $0x3e4] sm:$0xf]  ;;  %v5770_v48 = vld [vmem:[%s8463_s10 + $0x3f0] sm:$0xf0]  ;;  %v5469_v50 = vor.u32 %v7089_v33, %v5466_v35 }
 0x23c   : > { %4185 = vmatpush.bf16.msrb.mxu3 %v5501_v15  ;;  %v5248_v51 = vld [vmem:[%s9900_s1 + $0x90] sm:$0xf]  ;;  %v7038_v55 = vld [vmem:[%s9900_s1 + $0xc4] sm:$0xf0]  ;;  %v6856_v57 = vld [vmem:[%s8463_s10 + $0xc60] sm:$0xf]  ;;  %v6937_v2 = vor.u32 %v7459_v42, %v6936_v37  ;;  %v5773_v7 = vor.u32 %v7165_v46, %v5770_v48 }
 0x23d   : > { %4129 = vmatpush.bf16.msrb.mxu0 %v6889_v25  ;;  %v7439_v58 = vld [vmem:[%s8463_s10 + $0xc6c] sm:$0xf0]  ;;  %v7053_v59 = vld [vmem:[%s8463_s10 + $0x64] sm:$0xf]  ;;  %v5322_v62 = vld [vmem:[%s8463_s10 + $0x70] sm:$0xf0]  ;;  %v8916_v20 = vor.u32 %v7038_v55, %v5248_v51 }
 0x23e   : > { %v7085_v63 = vld [vmem:[%s8463_s10 + $0x164] sm:$0xf]  ;;  %v5450_v1 = vld [vmem:[%s8463_s10 + $0x170] sm:$0xf0]  ;;  %v5250_v5 = vld [vmem:[%s9900_s1 + $0xc8] sm:$0xf0]  ;;  %v6857_v14 = vor.u32 %v7439_v58, %v6856_v57  ;;  %v5325_v15 = vor.u32 %v7053_v59, %v5322_v62 }
 0x23f   : > { %4167 = vmatpush.bf16.msrb.mxu2 %v5357_v26  ;;  %4152 = vmatpush.bf16.msrb.mxu1 %v6953_v36  ;;  %v7031_v3 = vld [vmem:[%s9900_s1 + $0x94] sm:$0xf]  ;;  %v5256_v6 = vld [vmem:[%s9900_s1 + $0x98] sm:$0xf]  ;;  %v7039_v10 = vld [vmem:[%s9900_s1 + $0xcc] sm:$0xf0]  ;;  %v5453_v16 = vor.u32 %v7085_v63, %v5450_v1 }
 0x240   : > { %4186 = vmatpush.bf16.msrb.mxu3 %v5485_v27  ;;  %v7032_v11 = vld [vmem:[%s9900_s1 + $0x9c] sm:$0xf]  ;;  %v5258_v13 = vld [vmem:[%s9900_s1 + $0xd0] sm:$0xf0]  ;;  %v6840_v17 = vld [vmem:[%s8463_s10 + $0xc40] sm:$0xf]  ;;  %v8921_v24 = vor.u32 %v7031_v3, %v5250_v5  ;;  %v8923_v25 = vor.u32 %v7039_v10, %v5256_v6 }
 0x241   : > { %4130 = vmatpush.bf16.msrb.mxu0 %v6873_v44  ;;  %v7435_v18 = vld [vmem:[%s8463_s10 + $0xc4c] sm:$0xf0]  ;;  %v7049_v19 = vld [vmem:[%s8463_s10 + $0x44] sm:$0xf]  ;;  %v5306_v21 = vld [vmem:[%s8463_s10 + $0x50] sm:$0xf0]  ;;  %v8927_v28 = vor.u32 %v7032_v11, %v5258_v13 }
 0x242   : > { %v7081_v22 = vld [vmem:[%s8463_s10 + $0x144] sm:$0xf]  ;;  %v5434_v23 = vld [vmem:[%s8463_s10 + $0x150] sm:$0xf0]  ;;  %9919 = vst [vmem:[#allocation6_spill] sm:$0xff] %v8921_v24  ;;  %v6841_v29 = vor.u32 %v7435_v18, %v6840_v17  ;;  %v5309_v30 = vor.u32 %v7049_v19, %v5306_v21 }
 0x243   : > { %4168 = vmatpush.bf16.msrb.mxu2 %v5341_v49  ;;  %4153 = vmatpush.bf16.msrb.mxu1 %v6937_v2  ;;  %9920 = vst [vmem:[#allocation7_spill] sm:$0xff] %v8923_v25  ;;  %v7161_v26 = vld [vmem:[%s8463_s10 + $0x3c4] sm:$0xf]  ;;  %v5754_v27 = vld [vmem:[%s8463_s10 + $0x3d0] sm:$0xf0]  ;;  %v5437_v31 = vor.u32 %v7081_v22, %v5434_v23 }
 0x244   : > { %4187 = vmatpush.bf16.msrb.mxu3 %v5469_v50  ;;  %9921 = vst [vmem:[#allocation8_spill] sm:$0xff] %v8927_v28  ;;  %v6824_v33 = vld [vmem:[%s8463_s10 + $0xc20] sm:$0xf]  ;;  %v7431_v35 = vld [vmem:[%s8463_s10 + $0xc2c] sm:$0xf0]  ;;  %v5757_v46 = vor.u32 %v7161_v26, %v5754_v27 }
 0x245   : > { %4131 = vmatpush.bf16.msrb.mxu0 %v6857_v14  ;;  %v7045_v36 = vld [vmem:[%s8463_s10 + $0x24] sm:$0xf]  ;;  %v5290_v37 = vld [vmem:[%s8463_s10 + $0x30] sm:$0xf0]  ;;  %4083 = vmatmul.bf16.gmra.mxu1 %v8921_v24  ;;  %v6825_v50 = vor.u32 %v7431_v35, %v6824_v33  ;;  %v6808_v51 = vld [vmem:[%s8463_s10 + $0xc00] sm:$0xf] }
 0x246   : > { %4064 = vmatmul.bf16.gmra.mxu0 %v8916_v20  ;;  %v7077_v42 = vld [vmem:[%s8463_s10 + $0x124] sm:$0xf]  ;;  %v5418_v44 = vld [vmem:[%s8463_s10 + $0x130] sm:$0xf0]  ;;  %v7427_v55 = vld [vmem:[%s8463_s10 + $0xc0c] sm:$0xf0]  ;;  %v5293_v57 = vor.u32 %v7045_v36, %v5290_v37 }
 0x247   : > { %4222 = vmatpush.bf16.msra.mxu1 %v5773_v7  ;;  %4169 = vmatpush.bf16.msrb.mxu2 %v5325_v15  ;;  %v7157_v48 = vld [vmem:[%s8463_s10 + $0x3a4] sm:$0xf]  ;;  %v5738_v49 = vld [vmem:[%s8463_s10 + $0x3b0] sm:$0xf0]  ;;  %v5421_v58 = vor.u32 %v7077_v42, %v5418_v44  ;;  %v6809_v11 = vor.u32 %v7427_v55, %v6808_v51  ;;  %v5208_v19 = vld [vmem:[%s9900_s1 + $0x30] sm:$0xf] }
 0x248   : > { %4188 = vmatpush.bf16.msrb.mxu3 %v5453_v16  ;;  %4102 = vmatmul.bf16.gmra.mxu2 %v8923_v25  ;;  %v7041_v59 = vld [vmem:[%s8463_s10 + $0x4] sm:$0xf]  ;;  %v5274_v62 = vld [vmem:[%s8463_s10 + $0x10] sm:$0xf0]  ;;  %v5741_v5 = vor.u32 %v7157_v48, %v5738_v49  ;;  %v7026_v22 = vld [vmem:[%s9900_s1 + $0x64] sm:$0xf0] }
 0x249   : > { %4121 = vmatmul.bf16.gmra.mxu3 %v8927_v28  ;;  %4132 = vmatpush.bf16.msrb.mxu0 %v6841_v29  ;;  %v7073_v63 = vld [vmem:[%s8463_s10 + $0x104] sm:$0xf]  ;;  %v5402_v1 = vld [vmem:[%s8463_s10 + $0x110] sm:$0xf0]  ;;  %v5277_v16 = vor.u32 %v7041_v59, %v5274_v62  ;;  %v8972_v37 = vor.u32 %v7026_v22, %v5208_v19 }
 0x24a   : > { %v7133_v2 = vld [vmem:[%s8463_s10 + $0x2e4] sm:$0xf]  ;;  %v5642_v3 = vld [vmem:[%s8463_s10 + $0x2f0] sm:$0xf0]  ;;  %v5405_v17 = vor.u32 %v7073_v63, %v5402_v1 }
 0x24b   : > { %4170 = vmatpush.bf16.msrb.mxu2 %v5309_v30  ;;  %4223 = vmatpush.bf16.msra.mxu1 %v5757_v46  ;;  %v7197_v6 = vld [vmem:[%s8463_s10 + $0x4e4] sm:$0xf]  ;;  %v5898_v7 = vld [vmem:[%s8463_s10 + $0x4f0] sm:$0xf0]  ;;  %v5645_v18 = vor.u32 %v7133_v2, %v5642_v3  ;;  %9922 = vst [vmem:[#allocation9_spill] sm:$0xff] %v8972_v37 }
 0x24c   : > { %4189 = vmatpush.bf16.msrb.mxu3 %v5437_v31  ;;  %v7229_v10 = vld [vmem:[%s8463_s10 + $0x5e4] sm:$0xf]  ;;  %v6026_v13 = vld [vmem:[%s8463_s10 + $0x5f0] sm:$0xf0]  ;;  %v5901_v21 = vor.u32 %v7197_v6, %v5898_v7  ;;  %v5210_v31 = vld [vmem:[%s9900_s1 + $0x68] sm:$0xf0] }
 0x24d   : > { %4133 = vmatpush.bf16.msrb.mxu0 %v6825_v50  ;;  %v7153_v14 = vld [vmem:[%s8463_s10 + $0x384] sm:$0xf]  ;;  %v5722_v15 = vld [vmem:[%s8463_s10 + $0x390] sm:$0xf0]  ;;  %v6029_v23 = vor.u32 %v7229_v10, %v6026_v13 }
 0x24e   : > { %v7193_v26 = vld [vmem:[%s8463_s10 + $0x4c4] sm:$0xf]  ;;  %v5882_v27 = vld [vmem:[%s8463_s10 + $0x4d0] sm:$0xf0]  ;;  %v5725_v29 = vor.u32 %v7153_v14, %v5722_v15 }
 0x24f   : > { %4171 = vmatpush.bf16.msrb.mxu2 %v5293_v57  ;;  %4224 = vmatpush.bf16.msra.mxu1 %v5741_v5  ;;  %v7019_v30 = vld [vmem:[%s9900_s1 + $0x34] sm:$0xf]  ;;  %v7129_v33 = vld [vmem:[%s8463_s10 + $0x2c4] sm:$0xf]  ;;  %v5885_v42 = vor.u32 %v7193_v26, %v5882_v27 }
 0x250   : > { %4190 = vmatpush.bf16.msrb.mxu3 %v5421_v58  ;;  %v5626_v35 = vld [vmem:[%s8463_s10 + $0x2d0] sm:$0xf0]  ;;  %v7225_v36 = vld [vmem:[%s8463_s10 + $0x5c4] sm:$0xf]  ;;  %v8977_v49 = vor.u32 %v7019_v30, %v5210_v31  ;;  %v5264_v31 = vld [vmem:[%s9900_s1 + $0xa0] sm:$0xf] }
 0x251   : > { %4134 = vmatpush.bf16.msrb.mxu0 %v6809_v11  ;;  %v6010_v44 = vld [vmem:[%s8463_s10 + $0x5d0] sm:$0xf0]  ;;  %v7149_v46 = vld [vmem:[%s8463_s10 + $0x364] sm:$0xf]  ;;  %v5629_v55 = vor.u32 %v7129_v33, %v5626_v35 }
 0x252   : > { %v5706_v48 = vld [vmem:[%s8463_s10 + $0x370] sm:$0xf0]  ;;  %9923 = vst [vmem:[#allocation10_spill] sm:$0xff] %v8977_v49  ;;  %v7189_v50 = vld [vmem:[%s8463_s10 + $0x4a4] sm:$0xf]  ;;  %v6013_v57 = vor.u32 %v7225_v36, %v6010_v44 }
 0x253   : > { %4172 = vmatpush.bf16.msrb.mxu2 %v5277_v16  ;;  %v5866_v51 = vld [vmem:[%s8463_s10 + $0x4b0] sm:$0xf0]  ;;  %4225 = vmatpush.bf16.msra.mxu1 %v5725_v29  ;;  %v7125_v58 = vld [vmem:[%s8463_s10 + $0x2a4] sm:$0xf]  ;;  %v5709_v63 = vor.u32 %v7149_v46, %v5706_v48  ;;  %v7040_v48 = vld [vmem:[%s9900_s1 + $0xd4] sm:$0xf0] }
 0x254   : > { %4191 = vmatpush.bf16.msrb.mxu3 %v5405_v17  ;;  %v5610_v59 = vld [vmem:[%s8463_s10 + $0x2b0] sm:$0xf0]  ;;  %v7221_v62 = vld [vmem:[%s8463_s10 + $0x5a4] sm:$0xf]  ;;  %v5869_v1 = vor.u32 %v7189_v50, %v5866_v51 }
 0x255   : > { %4203 = vmatpush.bf16.msra.mxu0 %v5645_v18  ;;  %v5994_v2 = vld [vmem:[%s8463_s10 + $0x5b0] sm:$0xf0]  ;;  %v7145_v3 = vld [vmem:[%s8463_s10 + $0x344] sm:$0xf]  ;;  %6998 = vmatmul.msk.bf16.vlgmr.msrb.gmra.mxu1 %vm3892_vm0, %v8977_v49  ;;  %v5613_v10 = vor.u32 %v7125_v58, %v5610_v59  ;;  %v5266_v58 = vld [vmem:[%s9900_s1 + $0xd8] sm:$0xf0] }
 0x256   : > { %4135 = vmatmul.bf16.vlgmr.msrb.gmra.mxu0 %v8972_v37  ;;  %v5690_v5 = vld [vmem:[%s8463_s10 + $0x350] sm:$0xf0]  ;;  %v7185_v6 = vld [vmem:[%s8463_s10 + $0x484] sm:$0xf]  ;;  %v5997_v11 = vor.u32 %v7221_v62, %v5994_v2 }
 0x257   : > { %4241 = vmatpush.bf16.msra.mxu2 %v5901_v21  ;;  %v5850_v7 = vld [vmem:[%s8463_s10 + $0x490] sm:$0xf0]  ;;  %v7121_v13 = vld [vmem:[%s8463_s10 + $0x284] sm:$0xf]  ;;  %4226 = vmatpush.bf16.msra.mxu1 %v5709_v63  ;;  %v5693_v16 = vor.u32 %v7145_v3, %v5690_v5  ;;  %v9025_v3 = vor.u32 %v7040_v48, %v5264_v31 }
 0x258   : > { %4260 = vmatpush.bf16.msra.mxu3 %v6029_v23  ;;  %4173 = vmatmul.bf16.vlgmr.msrb.gmra.mxu2 %v8563_v34  ;;  %v5594_v14 = vld [vmem:[%s8463_s10 + $0x290] sm:$0xf0]  ;;  %v7217_v15 = vld [vmem:[%s8463_s10 + $0x584] sm:$0xf]  ;;  %v5853_v17 = vor.u32 %v7185_v6, %v5850_v7 }
 0x259   : > { %4192 = vmatmul.bf16.vlgmr.msrb.gmra.mxu3 %v8568_v39  ;;  %4204 = vmatpush.bf16.msra.mxu0 %v5629_v55  ;;  %v5978_v18 = vld [vmem:[%s8463_s10 + $0x590] sm:$0xf0]  ;;  %v7141_v19 = vld [vmem:[%s8463_s10 + $0x324] sm:$0xf]  ;;  %v5597_v26 = vor.u32 %v7121_v13, %v5594_v14  ;;  %9924 = vst [vmem:[#allocation11_spill] sm:$0xff] %v9025_v3 }
 0x25a   : > { %v5674_v21 = vld [vmem:[%s8463_s10 + $0x330] sm:$0xf0]  ;;  %v7181_v22 = vld [vmem:[%s8463_s10 + $0x464] sm:$0xf]  ;;  %v5981_v29 = vor.u32 %v7217_v15, %v5978_v18 }
 0x25b   : > { %4242 = vmatpush.bf16.msra.mxu2 %v5885_v42  ;;  %v5834_v23 = vld [vmem:[%s8463_s10 + $0x470] sm:$0xf0]  ;;  %v7117_v27 = vld [vmem:[%s8463_s10 + $0x264] sm:$0xf]  ;;  %4227 = vmatpush.bf16.msra.mxu1 %v5693_v16  ;;  %v5677_v35 = vor.u32 %v7141_v19, %v5674_v21 }
 0x25c   : > { %4261 = vmatpush.bf16.msra.mxu3 %v6013_v57  ;;  %v5578_v30 = vld [vmem:[%s8463_s10 + $0x270] sm:$0xf0]  ;;  %v7213_v33 = vld [vmem:[%s8463_s10 + $0x564] sm:$0xf]  ;;  %v5837_v36 = vor.u32 %v7181_v22, %v5834_v23 }
 0x25d   : > { %4205 = vmatpush.bf16.msra.mxu0 %v5613_v10  ;;  %v5962_v42 = vld [vmem:[%s8463_s10 + $0x570] sm:$0xf0]  ;;  %v7137_v44 = vld [vmem:[%s8463_s10 + $0x304] sm:$0xf]  ;;  %v5581_v55 = vor.u32 %v7117_v27, %v5578_v30 }
 0x25e   : > { %v5658_v46 = vld [vmem:[%s8463_s10 + $0x310] sm:$0xf0]  ;;  %v7177_v50 = vld [vmem:[%s8463_s10 + $0x444] sm:$0xf]  ;;  %v5965_v59 = vor.u32 %v7213_v33, %v5962_v42 }
 0x25f   : > { %4243 = vmatpush.bf16.msra.mxu2 %v5869_v1  ;;  %v5818_v51 = vld [vmem:[%s8463_s10 + $0x450] sm:$0xf0]  ;;  %v7033_v57 = vld [vmem:[%s9900_s1 + $0xa4] sm:$0xf]  ;;  %4228 = vmatpush.bf16.msra.mxu1 %v5677_v35  ;;  %v5661_v2 = vor.u32 %v7137_v44, %v5658_v46 }
 0x260   : > { %4262 = vmatpush.bf16.msra.mxu3 %v5997_v11  ;;  %v7113_v62 = vld [vmem:[%s8463_s10 + $0x244] sm:$0xf]  ;;  %v5562_v63 = vld [vmem:[%s8463_s10 + $0x250] sm:$0xf0]  ;;  %v5821_v5 = vor.u32 %v7177_v50, %v5818_v51  ;;  %v9030_v11 = vor.u32 %v7033_v57, %v5266_v58 }
 0x261   : > { %4206 = vmatpush.bf16.msra.mxu0 %v5597_v26  ;;  %v7209_v1 = vld [vmem:[%s8463_s10 + $0x544] sm:$0xf]  ;;  %v5946_v6 = vld [vmem:[%s8463_s10 + $0x550] sm:$0xf0]  ;;  %v5565_v15 = vor.u32 %v7113_v62, %v5562_v63 }
 0x262   : > { %v7293_v7 = vld [vmem:[%s8463_s10 + $0x7e4] sm:$0xf]  ;;  %v6282_v10 = vld [vmem:[%s8463_s10 + $0x7f0] sm:$0xf0]  ;;  %9925 = vst [vmem:[#allocation12_spill] sm:$0xff] %v9030_v11  ;;  %v5949_v16 = vor.u32 %v7209_v1, %v5946_v6 }
 0x263   : > { %4244 = vmatpush.bf16.msra.mxu2 %v5853_v17  ;;  %v7173_v13 = vld [vmem:[%s8463_s10 + $0x424] sm:$0xf]  ;;  %v5802_v14 = vld [vmem:[%s8463_s10 + $0x430] sm:$0xf0]  ;;  %4229 = vmatpush.bf16.msra.mxu1 %v5661_v2  ;;  %v6285_v21 = vor.u32 %v7293_v7, %v6282_v10 }
 0x264   : > { %4263 = vmatpush.bf16.msra.mxu3 %v5981_v29  ;;  %v7109_v17 = vld [vmem:[%s8463_s10 + $0x224] sm:$0xf]  ;;  %v5546_v18 = vld [vmem:[%s8463_s10 + $0x230] sm:$0xf0]  ;;  %v5805_v22 = vor.u32 %v7173_v13, %v5802_v14  ;;  %v9044_v29 = vpop.permute.xlu1 %1581 }
 0x265   : > { %4207 = vmatpush.bf16.msra.mxu0 %v5581_v55  ;;  %v7205_v19 = vld [vmem:[%s8463_s10 + $0x524] sm:$0xf]  ;;  %v5930_v23 = vld [vmem:[%s8463_s10 + $0x530] sm:$0xf0]  ;;  %6999 = vmatmul.msk.bf16.gmra.mxu1 %vm3892_vm0, %v9030_v11  ;;  %v5549_v33 = vor.u32 %v7109_v17, %v5546_v18 }
 0x266   : > { %4140 = vmatmul.bf16.gmra.mxu0 %v9025_v3  ;;  %v7289_v26 = vld [vmem:[%s8463_s10 + $0x7c4] sm:$0xf]  ;;  %v6266_v27 = vld [vmem:[%s8463_s10 + $0x7d0] sm:$0xf0]  ;;  %v5933_v44 = vor.u32 %v7205_v19, %v5930_v23 }
 0x267   : > { %4245 = vmatpush.bf16.msra.mxu2 %v5837_v36  ;;  %v7169_v30 = vld [vmem:[%s8463_s10 + $0x404] sm:$0xf]  ;;  %v5786_v31 = vld [vmem:[%s8463_s10 + $0x410] sm:$0xf0]  ;;  %4298 = vmatpush.bf16.msrb.mxu1 %v6285_v21  ;;  %v6269_v51 = vor.u32 %v7289_v26, %v6266_v27 }
 0x268   : > { %4264 = vmatpush.bf16.msra.mxu3 %v5965_v59  ;;  %4178 = vmatmul.bf16.gmra.mxu2 %v8637_v32  ;;  %v7105_v35 = vld [vmem:[%s8463_s10 + $0x204] sm:$0xf]  ;;  %v6410_v42 = vld [vmem:[%s8463_s10 + $0x8f0] sm:$0xf0]  ;;  %v5789_v55 = vor.u32 %v7169_v30, %v5786_v31 }
 0x269   : > { %4197 = vmatmul.bf16.gmra.mxu3 %v8642_v38  ;;  %4208 = vmatpush.bf16.msra.mxu0 %v5565_v15  ;;  %v7325_v36 = vld [vmem:[%s8463_s10 + $0x8e4] sm:$0xf]  ;;  %v5530_v46 = vld [vmem:[%s8463_s10 + $0x210] sm:$0xf0] }
 0x26a   : > { %v7261_v48 = vld [vmem:[%s8463_s10 + $0x6e4] sm:$0xf]  ;;  %v6154_v50 = vld [vmem:[%s8463_s10 + $0x6f0] sm:$0xf0]  ;;  %v6413_v62 = vor.u32 %v7325_v36, %v6410_v42 }
 0x26b   : > { %4246 = vmatpush.bf16.msra.mxu2 %v5821_v5  ;;  %v7201_v57 = vld [vmem:[%s8463_s10 + $0x504] sm:$0xf]  ;;  %v5914_v58 = vld [vmem:[%s8463_s10 + $0x510] sm:$0xf0]  ;;  %v5533_v5 = vor.u32 %v7105_v35, %v5530_v46  ;;  %v6157_v10 = vor.u32 %v7261_v48, %v6154_v50  ;;  %4299 = vmatpush.bf16.msrb.mxu1 %v6269_v51 }
 0x26c   : > { %4265 = vmatpush.bf16.msra.mxu3 %v5949_v16  ;;  %v7357_v59 = vld [vmem:[%s8463_s10 + $0x9e4] sm:$0xf]  ;;  %v6538_v63 = vld [vmem:[%s8463_s10 + $0x9f0] sm:$0xf0]  ;;  %v5917_v13 = vor.u32 %v7201_v57, %v5914_v58 }
 0x26d   : > { %v7285_v1 = vld [vmem:[%s8463_s10 + $0x7a4] sm:$0xf]  ;;  %v6250_v2 = vld [vmem:[%s8463_s10 + $0x7b0] sm:$0xf0]  ;;  %4209 = vmatpush.bf16.msra.mxu0 %v5549_v33  ;;  %v6541_v16 = vor.u32 %v7357_v59, %v6538_v63  ;;  %v3908_v42 = vpop.f32.mrf.mxu0  ;;  %v3927_v48 = vpop.f32.mrf.mxu1 }
 0x26e   : > { %v7321_v6 = vld [vmem:[%s8463_s10 + $0x8c4] sm:$0xf]  ;;  %v6394_v7 = vld [vmem:[%s8463_s10 + $0x8d0] sm:$0xf0]  ;;  %v6253_v17 = vor.u32 %v7285_v1, %v6250_v2 }
 0x26f   : > { %4247 = vmatpush.bf16.msra.mxu2 %v5805_v22  ;;  %v7257_v14 = vld [vmem:[%s8463_s10 + $0x6c4] sm:$0xf]  ;;  %v6138_v15 = vld [vmem:[%s8463_s10 + $0x6d0] sm:$0xf0]  ;;  %v6397_v18 = vor.u32 %v7321_v6, %v6394_v7  ;;  %v9067_v22 = vpop.permute.xlu1 %1576  ;;  %v9087_v7 = vpop.permute.xlu0 %1591 }
 0x270   : > { %4266 = vmatpush.bf16.msra.mxu3 %v5933_v44  ;;  %v7353_v19 = vld [vmem:[%s8463_s10 + $0x9c4] sm:$0xf]  ;;  %v6522_v21 = vld [vmem:[%s8463_s10 + $0x9d0] sm:$0xf0]  ;;  %9926 = vst [vmem:[#allocation13_spill] sm:$0xff] %v9067_v22  ;;  %v6141_v23 = vor.u32 %v7257_v14, %v6138_v15  ;;  %4300 = vmatpush.bf16.msrb.mxu1 %v6253_v17  ;;  %v3909_v50 = vadd.f32 %v3908_v42, %v9067_v22 }
 0x271   : > { %4210 = vmatpush.bf16.msra.mxu0 %v5533_v5  ;;  %v7253_v26 = vld [vmem:[%s8463_s10 + $0x6a4] sm:$0xf]  ;;  %v6378_v30 = vld [vmem:[%s8463_s10 + $0x8b0] sm:$0xf0]  ;;  %v6525_v33 = vor.u32 %v7353_v19, %v6522_v21 }
 0x272   : > { %v7317_v27 = vld [vmem:[%s8463_s10 + $0x8a4] sm:$0xf]  ;;  %v6122_v31 = vld [vmem:[%s8463_s10 + $0x6b0] sm:$0xf0]  ;;  %v3928_v63 = vadd.f32 %v3927_v48, %v3909_v50 }
 0x273   : > { %4248 = vmatpush.bf16.msra.mxu2 %v5789_v55  ;;  %v7281_v35 = vld [vmem:[%s8463_s10 + $0x784] sm:$0xf]  ;;  %v6234_v36 = vld [vmem:[%s8463_s10 + $0x790] sm:$0xf0]  ;;  %v6381_v51 = vor.u32 %v7317_v27, %v6378_v30  ;;  %v6125_v55 = vor.u32 %v7253_v26, %v6122_v31 }
 0x274   : > { %4267 = vmatpush.bf16.msra.mxu3 %v5917_v13  ;;  %v7349_v44 = vld [vmem:[%s8463_s10 + $0x9a4] sm:$0xf]  ;;  %v6506_v46 = vld [vmem:[%s8463_s10 + $0x9b0] sm:$0xf0]  ;;  %v6237_v58 = vor.u32 %v7281_v35, %v6234_v36 }
 0x275   : > { %4279 = vmatpush.bf16.msrb.mxu0 %v6157_v10  ;;  %v7249_v57 = vld [vmem:[%s8463_s10 + $0x684] sm:$0xf]  ;;  %v6106_v1 = vld [vmem:[%s8463_s10 + $0x690] sm:$0xf0]  ;;  %v6509_v2 = vor.u32 %v7349_v44, %v6506_v46  ;;  %4230 = vmatmul.bf16.vlgmr.msra.gmra.mxu1 %v8574_v43  ;;  %v3910_v35 = vpop.f32.mrf.mxu0  ;;  %v3929_v46 = vpop.f32.mrf.mxu1 }
 0x276   : > { %v7313_v59 = vld [vmem:[%s8463_s10 + $0x884] sm:$0xf]  ;;  %4211 = vmatmul.bf16.vlgmr.msra.gmra.mxu0 %v8570_v40  ;;  %v6218_v6 = vld [vmem:[%s8463_s10 + $0x770] sm:$0xf0]  ;;  %v6109_v15 = vor.u32 %v7249_v57, %v6106_v1  ;;  %4301 = vmatpush.bf16.msrb.mxu1 %v6237_v58  ;;  %v3946_v21 = vpop.f32.mrf.mxu2  ;;  %v3911_v44 = vadd.f32 %v3910_v35, %v9044_v29 }
 0x277   : > { %4317 = vmatpush.bf16.msrb.mxu2 %v6413_v62  ;;  %v6362_v62 = vld [vmem:[%s8463_s10 + $0x890] sm:$0xf0]  ;;  %v7277_v5 = vld [vmem:[%s8463_s10 + $0x764] sm:$0xf]  ;;  %v3947_v31 = vadd.f32 %v3946_v21, %v3928_v63 }
 0x278   : > { %4336 = vmatpush.bf16.msrb.mxu3 %v6541_v16  ;;  %4249 = vmatmul.bf16.vlgmr.msra.gmra.mxu2 %v8712_v47  ;;  %v7345_v10 = vld [vmem:[%s8463_s10 + $0x984] sm:$0xf]  ;;  %v6490_v13 = vld [vmem:[%s8463_s10 + $0x990] sm:$0xf0]  ;;  %v6365_v14 = vor.u32 %v7313_v59, %v6362_v62  ;;  %v6221_v17 = vor.u32 %v7277_v5, %v6218_v6  ;;  %v3930_v62 = vadd.f32 %v3929_v46, %v3911_v44 }
 0x279   : > { %4280 = vmatpush.bf16.msrb.mxu0 %v6141_v23  ;;  %4268 = vmatmul.bf16.vlgmr.msra.gmra.mxu3 %v8717_v52  ;;  %v7245_v16 = vld [vmem:[%s8463_s10 + $0x664] sm:$0xf]  ;;  %v6346_v19 = vld [vmem:[%s8463_s10 + $0x870] sm:$0xf0]  ;;  %v6493_v26 = vor.u32 %v7345_v10, %v6490_v13 }
 0x27a   : > { %v6090_v23 = vld [vmem:[%s8463_s10 + $0x670] sm:$0xf0]  ;;  %v7273_v27 = vld [vmem:[%s8463_s10 + $0x744] sm:$0xf]  ;;  %4302 = vmatpush.bf16.msrb.mxu1 %v6221_v17 }
 0x27b   : > { %4318 = vmatpush.bf16.msrb.mxu2 %v6397_v18  ;;  %v7309_v18 = vld [vmem:[%s8463_s10 + $0x864] sm:$0xf]  ;;  %v6202_v30 = vld [vmem:[%s8463_s10 + $0x750] sm:$0xf0] }
 0x27c   : > { %4337 = vmatpush.bf16.msrb.mxu3 %v6525_v33  ;;  %v3965_v33 = vpop.f32.mrf.mxu3  ;;  %v7341_v36 = vld [vmem:[%s8463_s10 + $0x964] sm:$0xf]  ;;  %v6474_v42 = vld [vmem:[%s8463_s10 + $0x970] sm:$0xf0]  ;;  %v6349_v48 = vor.u32 %v7309_v18, %v6346_v19  ;;  %v6205_v57 = vor.u32 %v7273_v27, %v6202_v30 }
 0x27d   : > { %4281 = vmatpush.bf16.msrb.mxu0 %v6125_v55  ;;  %v9101_v50 = vadd.f32 %v3965_v33, %v3947_v31  ;;  %v7241_v55 = vld [vmem:[%s8463_s10 + $0x644] sm:$0xf]  ;;  %v6330_v59 = vld [vmem:[%s8463_s10 + $0x850] sm:$0xf0]  ;;  %v6477_v1 = vor.u32 %v7341_v36, %v6474_v42  ;;  %v3913_v36 = vpop.f32.mrf.mxu0 }
 0x27e   : > { %v7305_v58 = vld [vmem:[%s8463_s10 + $0x844] sm:$0xf]  ;;  %v6074_v63 = vld [vmem:[%s8463_s10 + $0x650] sm:$0xf0]  ;;  %4303 = vmatpush.bf16.msrb.mxu1 %v6205_v57 }
 0x27f   : > { %4319 = vmatpush.bf16.msrb.mxu2 %v6381_v51  ;;  %v6093_v51 = vor.u32 %v7245_v16, %v6090_v23  ;;  %v6186_v5 = vld [vmem:[%s8463_s10 + $0x730] sm:$0xf0]  ;;  %v7337_v6 = vld [vmem:[%s8463_s10 + $0x944] sm:$0xf]  ;;  %v6077_v16 = vor.u32 %v7241_v55, %v6074_v63  ;;  %v3948_v23 = vpop.f32.mrf.mxu2 }
 0x280   : > { %4338 = vmatpush.bf16.msrb.mxu3 %v6509_v2  ;;  %v7269_v2 = vld [vmem:[%s8463_s10 + $0x724] sm:$0xf]  ;;  %v6458_v10 = vld [vmem:[%s8463_s10 + $0x950] sm:$0xf0]  ;;  %v3949_v33 = vadd.f32 %v3948_v23, %v3930_v62 }
 0x281   : > { %4282 = vmatpush.bf16.msrb.mxu0 %v6109_v15  ;;  %v7237_v13 = vld [vmem:[%s8463_s10 + $0x624] sm:$0xf]  ;;  %v9112_v15 = vpop.permute.xlu0 %1586  ;;  %v6058_v17 = vld [vmem:[%s8463_s10 + $0x630] sm:$0xf0]  ;;  %v6189_v18 = vor.u32 %v7269_v2, %v6186_v5 }
 0x282   : > { %v7301_v19 = vld [vmem:[%s8463_s10 + $0x824] sm:$0xf]  ;;  %v6314_v21 = vld [vmem:[%s8463_s10 + $0x830] sm:$0xf0]  ;;  %v6061_v62 = vor.u32 %v7237_v13, %v6058_v17 }
 0x283   : > { %4320 = vmatpush.bf16.msrb.mxu2 %v6365_v14  ;;  %v6333_v14 = vor.u32 %v7305_v58, %v6330_v59  ;;  %v7333_v27 = vld [vmem:[%s8463_s10 + $0x924] sm:$0xf]  ;;  %v6170_v31 = vld [vmem:[%s8463_s10 + $0x710] sm:$0xf0]  ;;  %v6317_v58 = vor.u32 %v7301_v19, %v6314_v21  ;;  %4304 = vmatpush.bf16.msrb.mxu1 %v6189_v18 }
 0x284   : > { %4339 = vmatpush.bf16.msrb.mxu3 %v6493_v26  ;;  %v6461_v26 = vor.u32 %v7337_v6, %v6458_v10  ;;  %v7265_v30 = vld [vmem:[%s8463_s10 + $0x704] sm:$0xf]  ;;  %v3967_v35 = vpop.f32.mrf.mxu3  ;;  %v6442_v42 = vld [vmem:[%s8463_s10 + $0x930] sm:$0xf0] }
 0x285   : > { %4283 = vmatpush.bf16.msrb.mxu0 %v6093_v51  ;;  %v7421_v44 = vld [vmem:[%s8463_s10 + $0xbe4] sm:$0xf]  ;;  %v6794_v46 = vld [vmem:[%s8463_s10 + $0xbf0] sm:$0xf0]  ;;  %v3914_v51 = vadd.f32 %v3913_v36, %v9112_v15  ;;  %v9126_v59 = vadd.f32 %v3967_v35, %v3949_v33  ;;  %4235 = vmatmul.bf16.gmra.mxu1 %v8648_v45 }
 0x286   : > { %v7233_v55 = vld [vmem:[%s8463_s10 + $0x604] sm:$0xf]  ;;  %v6042_v57 = vld [vmem:[%s8463_s10 + $0x610] sm:$0xf0]  ;;  %4216 = vmatmul.bf16.gmra.mxu0 %v8644_v41  ;;  %v6797_v19 = vor.u32 %v7421_v44, %v6794_v46 }
 0x287   : > { %4321 = vmatpush.bf16.msrb.mxu2 %v6349_v48  ;;  %v3932_v48 = vpop.f32.mrf.mxu1  ;;  %v7389_v63 = vld [vmem:[%s8463_s10 + $0xae4] sm:$0xf]  ;;  %v6298_v5 = vld [vmem:[%s8463_s10 + $0x810] sm:$0xf0]  ;;  %v3951_v35 = vpop.f32.mrf.mxu2 }
 0x288   : > { %4340 = vmatpush.bf16.msrb.mxu3 %v6477_v1  ;;  %v6173_v1 = vor.u32 %v7265_v30, %v6170_v31  ;;  %v7297_v2 = vld [vmem:[%s8463_s10 + $0x804] sm:$0xf]  ;;  %v3933_v6 = vadd.f32 %v3932_v48, %v3914_v51  ;;  %v6666_v10 = vld [vmem:[%s8463_s10 + $0xaf0] sm:$0xf0]  ;;  %4254 = vmatmul.bf16.gmra.mxu2 %v8780_v54  ;;  %v6045_v31 = vor.u32 %v7233_v55, %v6042_v57 }
 0x289   : > { %4284 = vmatpush.bf16.msrb.mxu0 %v6077_v16  ;;  %v7453_v16 = vld [vmem:[%s8463_s10 + $0xce4] sm:$0xf]  ;;  %v6922_v13 = vld [vmem:[%s8463_s10 + $0xcf0] sm:$0xf0]  ;;  %4273 = vmatmul.bf16.gmra.mxu3 %v8785_v60  ;;  %v6301_v23 = vor.u32 %v7297_v2, %v6298_v5  ;;  %v6669_v36 = vor.u32 %v7389_v63, %v6666_v10 }
 0x28a   : > { %v7329_v17 = vld [vmem:[%s8463_s10 + $0x904] sm:$0xf]  ;;  %v6426_v18 = vld [vmem:[%s8463_s10 + $0x910] sm:$0xf0]  ;;  %4305 = vmatpush.bf16.msrb.mxu1 %v6173_v1  ;;  %v6925_v33 = vor.u32 %v7453_v16, %v6922_v13  ;;  %v3952_v48 = vadd.f32 %v3951_v35, %v3933_v6 }
 0x28b   : > { %4322 = vmatpush.bf16.msrb.mxu2 %v6333_v14  ;;  %v6445_v14 = vor.u32 %v7333_v27, %v6442_v42  ;;  %v7417_v21 = vld [vmem:[%s8463_s10 + $0xbc4] sm:$0xf]  ;;  %v6986_v27 = vld [vmem:[%s8463_s10 + $0xd70] sm:$0xf0]  ;;  %v6429_v42 = vor.u32 %v7329_v17, %v6426_v18 }
 0x28c   : > { %4341 = vmatpush.bf16.msrb.mxu3 %v6461_v26  ;;  %v6778_v26 = vld [vmem:[%s8463_s10 + $0xbd0] sm:$0xf0]  ;;  %v7469_v30 = vld [vmem:[%s8463_s10 + $0xd64] sm:$0xf]  ;;  %v3970_v51 = vpop.f32.mrf.mxu3 }
 0x28d   : > { %4285 = vmatpush.bf16.msrb.mxu0 %v6061_v62  ;;  %v7449_v44 = vld [vmem:[%s8463_s10 + $0xcc4] sm:$0xf]  ;;  %v6906_v46 = vld [vmem:[%s8463_s10 + $0xcd0] sm:$0xf0]  ;;  %v6781_v62 = vor.u32 %v7417_v21, %v6778_v26  ;;  %v6989_v57 = vor.u32 %v7469_v30, %v6986_v27  ;;  %v9153_v16 = vadd.f32 %v3970_v51, %v3952_v48 }
 0x28e   : > { %4374 = vmatpush.bf16.msra.mxu1 %v6797_v19  ;;  %v7385_v2 = vld [vmem:[%s8463_s10 + $0xac4] sm:$0xf]  ;;  %v6650_v5 = vld [vmem:[%s8463_s10 + $0xad0] sm:$0xf0]  ;;  %v6909_v6 = vor.u32 %v7449_v44, %v6906_v46 }
 0x28f   : > { %4323 = vmatpush.bf16.msrb.mxu2 %v6317_v58  ;;  %v3915_v58 = vpop.f32.mrf.mxu0  ;;  %v7413_v55 = vld [vmem:[%s8463_s10 + $0xba4] sm:$0xf]  ;;  %v3934_v1 = vpop.f32.mrf.mxu1  ;;  %v6762_v10 = vld [vmem:[%s8463_s10 + $0xbb0] sm:$0xf0]  ;;  %v6653_v17 = vor.u32 %v7385_v2, %v6650_v5 }
 0x290   : > { %4342 = vmatpush.bf16.msrb.mxu3 %v6445_v14  ;;  %v3916_v63 = vadd.f32 %v3915_v58, %v9087_v7  ;;  %v7465_v14 = vld [vmem:[%s8463_s10 + $0xd44] sm:$0xf]  ;;  %v6970_v19 = vld [vmem:[%s8463_s10 + $0xd50] sm:$0xf0]  ;;  %v3953_v35 = vpop.f32.mrf.mxu2 }
 0x291   : > { %4286 = vmatpush.bf16.msrb.mxu0 %v6045_v31  ;;  %v7445_v18 = vld [vmem:[%s8463_s10 + $0xca4] sm:$0xf]  ;;  %v6890_v21 = vld [vmem:[%s8463_s10 + $0xcb0] sm:$0xf0]  ;;  %v6973_v26 = vor.u32 %v7465_v14, %v6970_v19 }
 0x292   : > { %v3935_v13 = vadd.f32 %v3934_v1, %v3916_v63  ;;  %4375 = vmatpush.bf16.msra.mxu1 %v6781_v62  ;;  %v7381_v30 = vld [vmem:[%s8463_s10 + $0xaa4] sm:$0xf]  ;;  %v6634_v27 = vld [vmem:[%s8463_s10 + $0xab0] sm:$0xf0]  ;;  %v6893_v31 = vor.u32 %v7445_v18, %v6890_v21 }
 0x293   : > { %4324 = vmatpush.bf16.msrb.mxu2 %v6301_v23  ;;  %v6765_v23 = vor.u32 %v7413_v55, %v6762_v10  ;;  %v6874_v44 = vld [vmem:[%s8463_s10 + $0xc90] sm:$0xf0]  ;;  %v7461_v58 = vld [vmem:[%s8463_s10 + $0xd24] sm:$0xf]  ;;  %v6637_v55 = vor.u32 %v7381_v30, %v6634_v27  ;;  %v5776_v30 = vld [vmem:[%s8463_s10 + $0x3e8] sm:$0xf] }
 0x294   : > { %4343 = vmatpush.bf16.msrb.mxu3 %v6429_v42  ;;  %v7441_v42 = vld [vmem:[%s8463_s10 + $0xc84] sm:$0xf]  ;;  %v3954_v46 = vadd.f32 %v3953_v35, %v3935_v13  ;;  %v3972_v48 = vpop.f32.mrf.mxu3  ;;  %v6954_v2 = vld [vmem:[%s8463_s10 + $0xd30] sm:$0xf0]  ;;  %v7168_v27 = vld [vmem:[%s8463_s10 + $0x3f4] sm:$0xf0] }
 0x295   : > { %4355 = vmatpush.bf16.msra.mxu0 %v6669_v36  ;;  %v6746_v36 = vld [vmem:[%s8463_s10 + $0xb90] sm:$0xf0]  ;;  %v7377_v63 = vld [vmem:[%s8463_s10 + $0xa84] sm:$0xf]  ;;  %v6877_v14 = vor.u32 %v7441_v42, %v6874_v44  ;;  %v6957_v18 = vor.u32 %v7461_v58, %v6954_v2  ;;  %4306 = vmatmul.bf16.vlgmr.msrb.gmra.mxu1 %v8723_v56 }
 0x296   : > { %4376 = vmatpush.bf16.msra.mxu1 %v6765_v23  ;;  %v6618_v1 = vld [vmem:[%s8463_s10 + $0xa90] sm:$0xf0]  ;;  %v7405_v19 = vld [vmem:[%s8463_s10 + $0xb64] sm:$0xf]  ;;  %4287 = vmatmul.bf16.vlgmr.msrb.gmra.mxu0 %v8719_v53 }
 0x297   : > { %4393 = vmatpush.bf16.msra.mxu2 %v6925_v33  ;;  %v7409_v33 = vld [vmem:[%s8463_s10 + $0xb84] sm:$0xf]  ;;  %v3984_v51 = vpop.f32.mrf.mxu0  ;;  %v4003_v62 = vpop.f32.mrf.mxu1  ;;  %v6938_v23 = vld [vmem:[%s8463_s10 + $0xd10] sm:$0xf0] }
 0x298   : > { %4416 = vmatpush.bf16.msra.mxu3 %v6989_v57  ;;  %v3985_v5 = vadd.f32 %v3984_v51, %v9101_v50  ;;  %v9166_v57 = vadd.f32 %v3972_v48, %v3954_v46  ;;  %v6749_v10 = vor.u32 %v7409_v33, %v6746_v36  ;;  %v6730_v50 = vld [vmem:[%s8463_s10 + $0xb70] sm:$0xf0]  ;;  %v7437_v13 = vld [vmem:[%s8463_s10 + $0xc64] sm:$0xf]  ;;  %4325 = vmatmul.bf16.vlgmr.msrb.gmra.mxu2 %v8848_v4 }
 0x299   : > { %4356 = vmatpush.bf16.msra.mxu0 %v6653_v17  ;;  %v6858_v17 = vld [vmem:[%s8463_s10 + $0xc70] sm:$0xf0]  ;;  %v7457_v21 = vld [vmem:[%s8463_s10 + $0xd04] sm:$0xf]  ;;  %4344 = vmatmul.bf16.vlgmr.msrb.gmra.mxu3 %v8853_v8  ;;  %v6733_v35 = vor.u32 %v7405_v19, %v6730_v50  ;;  %v7164_v19 = vld [vmem:[%s8463_s10 + $0x3d4] sm:$0xf0] }
 0x29a   : > { %v6602_v33 = vld [vmem:[%s8463_s10 + $0xa70] sm:$0xf0]  ;;  %4377 = vmatpush.bf16.msra.mxu1 %v6749_v10  ;;  %v6861_v36 = vor.u32 %v7437_v13, %v6858_v17  ;;  %v7401_v42 = vld [vmem:[%s8463_s10 + $0xb44] sm:$0xf]  ;;  %v6941_v58 = vor.u32 %v7457_v21, %v6938_v23 }
 0x29b   : > { %4394 = vmatpush.bf16.msra.mxu2 %v6909_v6  ;;  %v4004_v6 = vadd.f32 %v4003_v62, %v3985_v5  ;;  %v4022_v44 = vpop.f32.mrf.mxu2  ;;  %v6714_v46 = vld [vmem:[%s8463_s10 + $0xb50] sm:$0xf0]  ;;  %v7433_v48 = vld [vmem:[%s8463_s10 + $0xc44] sm:$0xf] }
 0x29c   : > { %4417 = vmatpush.bf16.msra.mxu3 %v6973_v26  ;;  %v6621_v26 = vor.u32 %v7377_v63, %v6618_v1  ;;  %v6842_v51 = vld [vmem:[%s8463_s10 + $0xc50] sm:$0xf0]  ;;  %v4041_v5 = vpop.f32.mrf.mxu3  ;;  %v7369_v13 = vld [vmem:[%s8463_s10 + $0xa44] sm:$0xf] }
 0x29d   : > { %4357 = vmatpush.bf16.msra.mxu0 %v6637_v55  ;;  %v4023_v2 = vadd.f32 %v4022_v44, %v4004_v6  ;;  %v5777_v55 = vor.u32 %v7168_v27, %v5776_v30  ;;  %v6586_v17 = vld [vmem:[%s8463_s10 + $0xa50] sm:$0xf0]  ;;  %v6717_v6 = vor.u32 %v7401_v42, %v6714_v46  ;;  %v7397_v21 = vld [vmem:[%s8463_s10 + $0xb24] sm:$0xf] }
 0x29e   : > { %4378 = vmatpush.bf16.msra.mxu1 %v6733_v35  ;;  %v6826_v30 = vld [vmem:[%s8463_s10 + $0xc30] sm:$0xf0]  ;;  %v7393_v44 = vld [vmem:[%s8463_s10 + $0xb04] sm:$0xf] }
 0x29f   : > { %4395 = vmatpush.bf16.msra.mxu2 %v6893_v31  ;;  %v7373_v31 = vld [vmem:[%s8463_s10 + $0xa64] sm:$0xf]  ;;  %v3986_v62 = vpop.f32.mrf.mxu0  ;;  %v4005_v1 = vpop.f32.mrf.mxu1  ;;  %v9191_v50 = vadd.f32 %v4041_v5, %v4023_v2  ;;  %v6570_v35 = vld [vmem:[%s8463_s10 + $0xa30] sm:$0xf0]  ;;  %v5520_v2 = vld [vmem:[%s8463_s10 + $0x1e8] sm:$0xf] }
 0x2a0   : > { %4418 = vmatpush.bf16.msra.mxu3 %v6957_v18  ;;  %v3987_v63 = vadd.f32 %v3986_v62, %v9126_v59  ;;  %v6605_v10 = vor.u32 %v7373_v31, %v6602_v33  ;;  %v6845_v18 = vor.u32 %v7433_v48, %v6842_v51  ;;  %v6698_v59 = vld [vmem:[%s8463_s10 + $0xb30] sm:$0xf0]  ;;  %v6589_v31 = vor.u32 %v7369_v13, %v6586_v17  ;;  %v7365_v33 = vld [vmem:[%s8463_s10 + $0xa24] sm:$0xf]  ;;  %v5744_v17 = vld [vmem:[%s8463_s10 + $0x3a8] sm:$0xf] }
 0x2a1   : > { %4358 = vmatpush.bf16.msra.mxu0 %v6621_v26  ;;  %v7429_v26 = vld [vmem:[%s8463_s10 + $0xc24] sm:$0xf]  ;;  %v6682_v46 = vld [vmem:[%s8463_s10 + $0xb10] sm:$0xf0]  ;;  %v6573_v13 = vor.u32 %v7365_v33, %v6570_v35  ;;  %v5504_v35 = vld [vmem:[%s8463_s10 + $0x1c8] sm:$0xf] }
 0x2a2   : > { %v4006_v23 = vadd.f32 %v4005_v1, %v3987_v63  ;;  %4379 = vmatpush.bf16.msra.mxu1 %v6717_v6  ;;  %v6829_v42 = vor.u32 %v7429_v26, %v6826_v30  ;;  %v7425_v51 = vld [vmem:[%s8463_s10 + $0xc04] sm:$0xf]  ;;  %v7104_v63 = vld [vmem:[%s8463_s10 + $0x1f4] sm:$0xf0]  ;;  %v5648_v1 = vld [vmem:[%s8463_s10 + $0x2e8] sm:$0xf] }
 0x2a3   : > { %4396 = vmatpush.bf16.msra.mxu2 %v6877_v14  ;;  %v5760_v14 = vld [vmem:[%s8463_s10 + $0x3c8] sm:$0xf]  ;;  %v4024_v48 = vpop.f32.mrf.mxu2  ;;  %v7160_v6 = vld [vmem:[%s8463_s10 + $0x3b4] sm:$0xf0] }
 0x2a4   : > { %4419 = vmatpush.bf16.msra.mxu3 %v6941_v58  ;;  %v5761_v27 = vor.u32 %v7164_v19, %v5760_v14  ;;  %v6810_v58 = vld [vmem:[%s8463_s10 + $0xc10] sm:$0xf0]  ;;  %v4025_v5 = vadd.f32 %v4024_v48, %v4006_v23  ;;  %v4043_v62 = vpop.f32.mrf.mxu3 }
 0x2a5   : > { %4359 = vmatpush.bf16.msra.mxu0 %v6605_v10  ;;  %v7136_v10 = vld [vmem:[%s8463_s10 + $0x2f4] sm:$0xf0]  ;;  %v6554_v23 = vld [vmem:[%s8463_s10 + $0xa10] sm:$0xf0]  ;;  %v6813_v26 = vor.u32 %v7425_v51, %v6810_v58  ;;  %4311 = vmatmul.bf16.gmra.mxu1 %v8791_v0  ;;  %v5728_v51 = vld [vmem:[%s8463_s10 + $0x388] sm:$0xf] }
 0x2a6   : > { %4292 = vmatmul.bf16.gmra.mxu0 %v8787_v61  ;;  %v5649_v33 = vor.u32 %v7136_v10, %v5648_v1  ;;  %v7156_v58 = vld [vmem:[%s8463_s10 + $0x394] sm:$0xf0]  ;;  %v5488_v10 = vld [vmem:[%s8463_s10 + $0x1a8] sm:$0xf] }
 0x2a7   : > { %4397 = vmatpush.bf16.msra.mxu2 %v6861_v36  ;;  %v6701_v36 = vor.u32 %v7397_v21, %v6698_v59  ;;  %v4008_v19 = vpop.f32.mrf.mxu1  ;;  %v7361_v21 = vld [vmem:[%s8463_s10 + $0xa04] sm:$0xf]  ;;  %v6685_v59 = vor.u32 %v7393_v44, %v6682_v46  ;;  %v7132_v44 = vld [vmem:[%s8463_s10 + $0x2d4] sm:$0xf0]  ;;  %v5745_v46 = vor.u32 %v7160_v6, %v5744_v17  ;;  %v5616_v6 = vld [vmem:[%s8463_s10 + $0x2a8] sm:$0xf] }
 0x2a8   : > { %4488 = vmatpush.bf16.msrb.mxu3 %v5777_v55  ;;  %v3989_v55 = vpop.f32.mrf.mxu0  ;;  %4330 = vmatmul.bf16.gmra.mxu2 %v8916_v20  ;;  %v6557_v48 = vor.u32 %v7361_v21, %v6554_v23  ;;  %v7096_v17 = vld [vmem:[%s8463_s10 + $0x1b4] sm:$0xf0]  ;;  %v5729_v23 = vor.u32 %v7156_v58, %v5728_v51  ;;  %v5344_v58 = vld [vmem:[%s8463_s10 + $0x88] sm:$0xf] }
 0x2a9   : > { %4360 = vmatpush.bf16.msra.mxu0 %v6589_v31  ;;  %v3990_v14 = vadd.f32 %v3989_v55, %v9153_v16  ;;  %4380 = vmatpush.bf16.msra.mxu1 %v6701_v36  ;;  %v5392_v16 = vld [vmem:[%s8463_s10 + $0xe8] sm:$0xf]  ;;  %v5521_v31 = vor.u32 %v7104_v63, %v5520_v2  ;;  %v7100_v36 = vld [vmem:[%s8463_s10 + $0x1d4] sm:$0xf0] }
 0x2aa   : > { %4349 = vmatmul.bf16.gmra.mxu3 %v8921_v24  ;;  %v7068_v55 = vld [vmem:[%s8463_s10 + $0xd4] sm:$0xf0]  ;;  %v5505_v63 = vor.u32 %v7100_v36, %v5504_v35  ;;  %v5360_v35 = vld [vmem:[%s8463_s10 + $0xa8] sm:$0xf] }
 0x2ab   : > { %4398 = vmatpush.bf16.msra.mxu2 %v6845_v18  ;;  %v9212_v18 = vadd.f32 %v4043_v62, %v4025_v5  ;;  %v4009_v30 = vadd.f32 %v4008_v19, %v3990_v14  ;;  %v4027_v5 = vpop.f32.mrf.mxu2  ;;  %v5376_v62 = vld [vmem:[%s8463_s10 + $0xc8] sm:$0xf]  ;;  %v7128_v21 = vld [vmem:[%s8463_s10 + $0x2b4] sm:$0xf0] }
 0x2ac   : > { %4489 = vmatpush.bf16.msrb.mxu3 %v5761_v27  ;;  %v7072_v27 = vld [vmem:[%s8463_s10 + $0xf4] sm:$0xf0]  ;;  %v4046_v19 = vpop.f32.mrf.mxu3 }
 0x2ad   : > { %4361 = vmatpush.bf16.msra.mxu0 %v6573_v13  ;;  %v5393_v2 = vor.u32 %v7072_v27, %v5392_v16  ;;  %4381 = vmatpush.bf16.msra.mxu1 %v6685_v59  ;;  %v4028_v14 = vadd.f32 %v4027_v5, %v4009_v30  ;;  %v5712_v16 = vld [vmem:[%s8463_s10 + $0x368] sm:$0xf]  ;;  %v7152_v27 = vld [vmem:[%s8463_s10 + $0x374] sm:$0xf0]  ;;  %v5377_v30 = vor.u32 %v7068_v55, %v5376_v62 }
 0x2ae   : > { %v7064_v36 = vld [vmem:[%s8463_s10 + $0xb4] sm:$0xf0] }
 0x2af   : > { %4399 = vmatpush.bf16.msra.mxu2 %v6829_v42  ;;  %v5632_v42 = vld [vmem:[%s8463_s10 + $0x2c8] sm:$0xf]  ;;  %v5361_v51 = vor.u32 %v7064_v36, %v5360_v35  ;;  %v7124_v5 = vld [vmem:[%s8463_s10 + $0x294] sm:$0xf0] }
 0x2b0   : > { %v5633_v1 = vor.u32 %v7132_v44, %v5632_v42  ;;  %v3991_v13 = vpop.f32.mrf.mxu0  ;;  %4490 = vmatpush.bf16.msrb.mxu3 %v5745_v46  ;;  %v5489_v42 = vor.u32 %v7096_v17, %v5488_v10  ;;  %v5617_v44 = vor.u32 %v7128_v21, %v5616_v6  ;;  %v7092_v46 = vld [vmem:[%s8463_s10 + $0x194] sm:$0xf0]  ;;  %v5456_v17 = vld [vmem:[%s8463_s10 + $0x168] sm:$0xf] }
 0x2b1   : > { %4450 = vmatpush.bf16.msrb.mxu1 %v5521_v31  ;;  %4362 = vmatpush.bf16.msra.mxu0 %v6557_v48  ;;  %v3992_v59 = vadd.f32 %v3991_v13, %v9166_v57  ;;  %v9237_v31 = vadd.f32 %v4046_v19, %v4028_v14  ;;  %v5472_v57 = vld [vmem:[%s8463_s10 + $0x188] sm:$0xf]  ;;  %v5713_v48 = vor.u32 %v7152_v27, %v5712_v16  ;;  %v7060_v55 = vld [vmem:[%s8463_s10 + $0x94] sm:$0xf0] }
 0x2b2   : > { %v7148_v10 = vld [vmem:[%s8463_s10 + $0x354] sm:$0xf0]  ;;  %v5345_v16 = vor.u32 %v7060_v55, %v5344_v58  ;;  %v5328_v27 = vld [vmem:[%s8463_s10 + $0x68] sm:$0xf] }
 0x2b3   : > { %4400 = vmatpush.bf16.msra.mxu2 %v6813_v26  ;;  %v4010_v26 = vpop.f32.mrf.mxu1  ;;  %v4029_v62 = vpop.f32.mrf.mxu2  ;;  %v7088_v6 = vld [vmem:[%s8463_s10 + $0x174] sm:$0xf0] }
 0x2b4   : > { %4491 = vmatpush.bf16.msrb.mxu3 %v5729_v23  ;;  %v4048_v19 = vpop.f32.mrf.mxu3  ;;  %v7116_v55 = vld [vmem:[%s8463_s10 + $0x254] sm:$0xf0] }
 0x2b5   : > { %4431 = vmatpush.bf16.msrb.mxu0 %v5393_v2  ;;  %4451 = vmatpush.bf16.msrb.mxu1 %v5505_v63  ;;  %v5600_v2 = vld [vmem:[%s8463_s10 + $0x288] sm:$0xf]  ;;  %v5473_v63 = vor.u32 %v7092_v46, %v5472_v57  ;;  %v7144_v57 = vld [vmem:[%s8463_s10 + $0x334] sm:$0xf0] }
 0x2b6   : > { %4363 = vmatmul.bf16.vlgmr.msra.gmra.mxu0 %v8855_v9  ;;  %4382 = vmatmul.bf16.vlgmr.msra.gmra.mxu1 %v8859_v12  ;;  %v5440_v46 = vld [vmem:[%s8463_s10 + $0x148] sm:$0xf] }
 0x2b7   : > { %4469 = vmatpush.bf16.msrb.mxu2 %v5649_v33  ;;  %v4011_v33 = vadd.f32 %v4010_v26, %v3992_v59  ;;  %v5601_v59 = vor.u32 %v7124_v5, %v5600_v2  ;;  %v7052_v5 = vld [vmem:[%s8463_s10 + $0x54] sm:$0xf0] }
 0x2b8   : > { %v4060_v13 = vpop.f32.mrf.mxu0  ;;  %4492 = vmatpush.bf16.msrb.mxu3 %v5713_v48  ;;  %4401 = vmatmul.bf16.vlgmr.msra.gmra.mxu2 %v8972_v37  ;;  %v7084_v48 = vld [vmem:[%s8463_s10 + $0x154] sm:$0xf0] }
 0x2b9   : > { %4432 = vmatpush.bf16.msrb.mxu0 %v5377_v30  ;;  %4452 = vmatpush.bf16.msrb.mxu1 %v5489_v42  ;;  %v4030_v14 = vadd.f32 %v4029_v62, %v4011_v33  ;;  %v4061_v21 = vadd.f32 %v4060_v13, %v9191_v50  ;;  %v5584_v30 = vld [vmem:[%s8463_s10 + $0x268] sm:$0xf]  ;;  %v7120_v33 = vld [vmem:[%s8463_s10 + $0x274] sm:$0xf0]  ;;  %v5457_v50 = vor.u32 %v7088_v6, %v5456_v17 }
 0x2ba   : > { %v7056_v42 = vld [vmem:[%s8463_s10 + $0x74] sm:$0xf0]  ;;  %7000 = vmatmul.msk.bf16.vlgmr.msra.gmra.mxu3 %vm3892_vm0, %v8977_v49  ;;  %v5585_v58 = vor.u32 %v7120_v33, %v5584_v30  ;;  %v5568_v62 = vld [vmem:[%s8463_s10 + $0x248] sm:$0xf] }
 0x2bb   : > { %4470 = vmatpush.bf16.msrb.mxu2 %v5633_v1  ;;  %v5696_v1 = vld [vmem:[%s8463_s10 + $0x348] sm:$0xf]  ;;  %v4079_v23 = vpop.f32.mrf.mxu1  ;;  %v9252_v26 = vadd.f32 %v4048_v19, %v4030_v14  ;;  %v5329_v2 = vor.u32 %v7056_v42, %v5328_v27  ;;  %v7140_v13 = vld [vmem:[%s8463_s10 + $0x314] sm:$0xf0]  ;;  %v5569_v33 = vor.u32 %v7116_v55, %v5568_v62 }
 0x2bc   : > { %v5697_v35 = vor.u32 %v7148_v10, %v5696_v1  ;;  %v4080_v36 = vadd.f32 %v4079_v23, %v4061_v21  ;;  %v4098_v1 = vpop.f32.mrf.mxu2  ;;  %v5441_v10 = vor.u32 %v7084_v48, %v5440_v46  ;;  %v5424_v14 = vld [vmem:[%s8463_s10 + $0x128] sm:$0xf]  ;;  %v4117_v6 = vpop.f32.mrf.mxu3  ;;  %v7080_v23 = vld [vmem:[%s8463_s10 + $0x134] sm:$0xf0] }
 0x2bd   : > { %4433 = vmatpush.bf16.msrb.mxu0 %v5361_v51  ;;  %4453 = vmatpush.bf16.msrb.mxu1 %v5473_v63  ;;  %v5312_v51 = vld [vmem:[%s8463_s10 + $0x48] sm:$0xf]  ;;  %v5425_v48 = vor.u32 %v7080_v23, %v5424_v14  ;;  %v7076_v55 = vld [vmem:[%s8463_s10 + $0x114] sm:$0xf0] }
 0x2be   : > { %4493 = vmatpush.bf16.msrb.mxu3 %v5697_v35  ;;  %v5664_v19 = vld [vmem:[%s8463_s10 + $0x308] sm:$0xf]  ;;  %v4099_v17 = vadd.f32 %v4098_v1, %v4080_v36  ;;  %v5313_v42 = vor.u32 %v7052_v5, %v5312_v51 }
 0x2bf   : > { %4471 = vmatpush.bf16.msrb.mxu2 %v5617_v44  ;;  %v5680_v44 = vld [vmem:[%s8463_s10 + $0x328] sm:$0xf] }
 0x2c0   : > { %v5681_v63 = vor.u32 %v7144_v57, %v5680_v44  ;;  %v4062_v21 = vpop.f32.mrf.mxu0  ;;  %v9278_v35 = vadd.f32 %v4117_v6, %v4099_v17  ;;  %v5552_v36 = vld [vmem:[%s8463_s10 + $0x228] sm:$0xf]  ;;  %v5665_v44 = vor.u32 %v7140_v13, %v5664_v19  ;;  %v7108_v19 = vld [vmem:[%s8463_s10 + $0x214] sm:$0xf0] }
 0x2c1   : > { %4434 = vmatpush.bf16.msrb.mxu0 %v5345_v16  ;;  %4454 = vmatpush.bf16.msrb.mxu1 %v5457_v50  ;;  %v7296_v16 = vld [vmem:[%s8463_s10 + $0x7f4] sm:$0xf0]  ;;  %v4063_v27 = vadd.f32 %v4062_v21, %v9212_v18  ;;  %v5296_v46 = vld [vmem:[%s8463_s10 + $0x28] sm:$0xf] }
 0x2c2   : > { %v7112_v50 = vld [vmem:[%s8463_s10 + $0x234] sm:$0xf0]  ;;  %4494 = vmatpush.bf16.msrb.mxu3 %v5681_v63  ;;  %v5408_v62 = vld [vmem:[%s8463_s10 + $0x108] sm:$0xf] }
 0x2c3   : > { %4472 = vmatpush.bf16.msrb.mxu2 %v5601_v59  ;;  %v6288_v59 = vld [vmem:[%s8463_s10 + $0x7e8] sm:$0xf]  ;;  %v4081_v30 = vpop.f32.mrf.mxu1  ;;  %v7048_v18 = vld [vmem:[%s8463_s10 + $0x34] sm:$0xf0]  ;;  %v5553_v51 = vor.u32 %v7112_v50, %v5552_v36  ;;  %v5409_v14 = vor.u32 %v7076_v55, %v5408_v62 }
 0x2c4   : > { %v4082_v57 = vadd.f32 %v4081_v30, %v4063_v27  ;;  %v5297_v5 = vor.u32 %v7048_v18, %v5296_v46  ;;  %v7044_v63 = vld [vmem:[%s8463_s10 + $0x14] sm:$0xf0]  ;;  %v5536_v1 = vld [vmem:[%s8463_s10 + $0x208] sm:$0xf]  ;;  %v4100_v13 = vpop.f32.mrf.mxu2  ;;  %v4119_v23 = vpop.f32.mrf.mxu3 }
 0x2c5   : > { %4435 = vmatpush.bf16.msrb.mxu0 %v5329_v2  ;;  %4455 = vmatpush.bf16.msrb.mxu1 %v5441_v10  ;;  %v5280_v2 = vld [vmem:[%s8463_s10 + $0x8] sm:$0xf]  ;;  %v7232_v6 = vld [vmem:[%s8463_s10 + $0x5f4] sm:$0xf0]  ;;  %v5537_v36 = vor.u32 %v7108_v19, %v5536_v1 }
 0x2c6   : > { %4495 = vmatpush.bf16.msrb.mxu3 %v5665_v44  ;;  %v5904_v10 = vld [vmem:[%s8463_s10 + $0x4e8] sm:$0xf]  ;;  %v4101_v21 = vadd.f32 %v4100_v13, %v4082_v57  ;;  %v7264_v30 = vld [vmem:[%s8463_s10 + $0x6f4] sm:$0xf0]  ;;  %v5281_v57 = vor.u32 %v7044_v63, %v5280_v2  ;;  %4368 = vmatmul.bf16.gmra.mxu0 %v8923_v25 }
 0x2c7   : > { %4473 = vmatpush.bf16.msrb.mxu2 %v5585_v58  ;;  %v6289_v58 = vor.u32 %v7296_v16, %v6288_v59  ;;  %v6032_v17 = vld [vmem:[%s8463_s10 + $0x5e8] sm:$0xf]  ;;  %v7200_v16 = vld [vmem:[%s8463_s10 + $0x4f4] sm:$0xf0]  ;;  %4387 = vmatmul.bf16.gmra.mxu1 %v8927_v28 }
 0x2c8   : > { %v4065_v59 = vpop.f32.mrf.mxu0  ;;  %v6160_v27 = vld [vmem:[%s8463_s10 + $0x6e8] sm:$0xf]  ;;  %v7292_v44 = vld [vmem:[%s8463_s10 + $0x7d4] sm:$0xf0]  ;;  %v9299_v46 = vadd.f32 %v4119_v23, %v4101_v21  ;;  %v6033_v18 = vor.u32 %v7232_v6, %v6032_v17  ;;  %4406 = vmatmul.bf16.gmra.mxu2 %v9025_v3 }
 0x2c9   : > { %4436 = vmatpush.bf16.msrb.mxu0 %v5313_v42  ;;  %4456 = vmatpush.bf16.msrb.mxu1 %v5425_v48  ;;  %v6272_v50 = vld [vmem:[%s8463_s10 + $0x7c8] sm:$0xf]  ;;  %v6161_v62 = vor.u32 %v7264_v30, %v6160_v27  ;;  %v7196_v1 = vld [vmem:[%s8463_s10 + $0x4d4] sm:$0xf0] }
 0x2ca   : > { %4564 = vmatpush.bf16.msra.mxu3 %v6289_v58  ;;  %v5888_v58 = vld [vmem:[%s8463_s10 + $0x4c8] sm:$0xf]  ;;  %v7260_v2 = vld [vmem:[%s8463_s10 + $0x6d4] sm:$0xf0]  ;;  %v6273_v63 = vor.u32 %v7292_v44, %v6272_v50 }
 0x2cb   : > { %4474 = vmatpush.bf16.msrb.mxu2 %v5569_v33  ;;  %v4066_v33 = vadd.f32 %v4065_v59, %v9237_v31  ;;  %v4084_v42 = vpop.f32.mrf.mxu1  ;;  %v5905_v31 = vor.u32 %v7200_v16, %v5904_v10  ;;  %v6016_v55 = vld [vmem:[%s8463_s10 + $0x5c8] sm:$0xf]  ;;  %7001 = vmatmul.msk.bf16.gmra.mxu3 %vm3892_vm0, %v9030_v11  ;;  %v7288_v13 = vld [vmem:[%s8463_s10 + $0x7b4] sm:$0xf0]  ;;  %v5889_v17 = vor.u32 %v7196_v1, %v5888_v58 }
 0x2cc   : > { %v6256_v19 = vld [vmem:[%s8463_s10 + $0x7a8] sm:$0xf]  ;;  %v7224_v59 = vld [vmem:[%s8463_s10 + $0x5b4] sm:$0xf0]  ;;  %v4122_v27 = vpop.f32.mrf.mxu3 }
 0x2cd   : > { %4437 = vmatpush.bf16.msrb.mxu0 %v5297_v5  ;;  %v4085_v48 = vadd.f32 %v4084_v42, %v4066_v33  ;;  %4457 = vmatpush.bf16.msrb.mxu1 %v5409_v14  ;;  %v6144_v5 = vld [vmem:[%s8463_s10 + $0x6c8] sm:$0xf]  ;;  %v4103_v14 = vpop.f32.mrf.mxu2  ;;  %v7192_v33 = vld [vmem:[%s8463_s10 + $0x4b4] sm:$0xf0]  ;;  %v6257_v50 = vor.u32 %v7288_v13, %v6256_v19 }
 0x2ce   : > { %v5872_v6 = vld [vmem:[%s8463_s10 + $0x4a8] sm:$0xf]  ;;  %v6145_v21 = vor.u32 %v7260_v2, %v6144_v5  ;;  %4565 = vmatpush.bf16.msra.mxu3 %v6273_v63  ;;  %v7188_v2 = vld [vmem:[%s8463_s10 + $0x494] sm:$0xf0] }
 0x2cf   : > { %4475 = vmatpush.bf16.msrb.mxu2 %v5553_v51  ;;  %v7228_v51 = vld [vmem:[%s8463_s10 + $0x5d4] sm:$0xf0]  ;;  %v6000_v23 = vld [vmem:[%s8463_s10 + $0x5a8] sm:$0xf]  ;;  %v4104_v16 = vadd.f32 %v4103_v14, %v4085_v48 }
 0x2d0   : > { %v6017_v10 = vor.u32 %v7228_v51, %v6016_v55  ;;  %v4067_v30 = vpop.f32.mrf.mxu0  ;;  %v6128_v42 = vld [vmem:[%s8463_s10 + $0x6a8] sm:$0xf]  ;;  %v6001_v48 = vor.u32 %v7224_v59, %v6000_v23  ;;  %v5873_v55 = vor.u32 %v7192_v33, %v5872_v6  ;;  %v7252_v19 = vld [vmem:[%s8463_s10 + $0x694] sm:$0xf0] }
 0x2d1   : > { %4438 = vmatpush.bf16.msrb.mxu0 %v5281_v57  ;;  %4526 = vmatpush.bf16.msra.mxu1 %v6033_v18  ;;  %v4068_v44 = vadd.f32 %v4067_v30, %v9252_v26  ;;  %v6240_v18 = vld [vmem:[%s8463_s10 + $0x788] sm:$0xf]  ;;  %v9323_v58 = vadd.f32 %v4122_v27, %v4104_v16  ;;  %v7220_v26 = vld [vmem:[%s8463_s10 + $0x594] sm:$0xf0] }
 0x2d2   : > { %v5856_v51 = vld [vmem:[%s8463_s10 + $0x488] sm:$0xf]  ;;  %4566 = vmatpush.bf16.msra.mxu3 %v6257_v50  ;;  %v7216_v59 = vld [vmem:[%s8463_s10 + $0x574] sm:$0xf0] }
 0x2d3   : > { %4476 = vmatpush.bf16.msrb.mxu2 %v5537_v36  ;;  %v7256_v36 = vld [vmem:[%s8463_s10 + $0x6b4] sm:$0xf0]  ;;  %v4086_v57 = vpop.f32.mrf.mxu1  ;;  %v5984_v5 = vld [vmem:[%s8463_s10 + $0x588] sm:$0xf] }
 0x2d4   : > { %v6129_v1 = vor.u32 %v7256_v36, %v6128_v42  ;;  %v6112_v63 = vld [vmem:[%s8463_s10 + $0x688] sm:$0xf]  ;;  %v5985_v14 = vor.u32 %v7220_v26, %v5984_v5  ;;  %v7280_v27 = vld [vmem:[%s8463_s10 + $0x774] sm:$0xf0]  ;;  %v4124_v33 = vpop.f32.mrf.mxu3 }
 0x2d5   : > { %4507 = vmatpush.bf16.msra.mxu0 %v5905_v31  ;;  %v7284_v31 = vld [vmem:[%s8463_s10 + $0x794] sm:$0xf0]  ;;  %4527 = vmatpush.bf16.msra.mxu1 %v6017_v10  ;;  %v5840_v10 = vld [vmem:[%s8463_s10 + $0x468] sm:$0xf]  ;;  %v4105_v6 = vpop.f32.mrf.mxu2  ;;  %v6113_v23 = vor.u32 %v7252_v19, %v6112_v63 }
 0x2d6   : > { %v6241_v13 = vor.u32 %v7284_v31, %v6240_v18  ;;  %v6224_v16 = vld [vmem:[%s8463_s10 + $0x768] sm:$0xf]  ;;  %v7184_v36 = vld [vmem:[%s8463_s10 + $0x474] sm:$0xf0]  ;;  %4439 = vmatmul.bf16.vlgmr.msrb.gmra.mxu0 %v8563_v34 }
 0x2d7   : > { %4545 = vmatpush.bf16.msra.mxu2 %v6161_v62  ;;  %v4087_v62 = vadd.f32 %v4086_v57, %v4068_v44  ;;  %v6096_v50 = vld [vmem:[%s8463_s10 + $0x668] sm:$0xf]  ;;  %v7248_v44 = vld [vmem:[%s8463_s10 + $0x674] sm:$0xf0]  ;;  %v5841_v5 = vor.u32 %v7184_v36, %v5840_v10  ;;  %4458 = vmatmul.bf16.vlgmr.msrb.gmra.mxu1 %v8568_v39 }
 0x2d8   : > { %v4136_v42 = vpop.f32.mrf.mxu0  ;;  %4567 = vmatpush.bf16.msra.mxu3 %v6241_v13  ;;  %v6097_v26 = vor.u32 %v7248_v44, %v6096_v50  ;;  %v7276_v63 = vld [vmem:[%s8463_s10 + $0x754] sm:$0xf0]  ;;  %v6080_v13 = vld [vmem:[%s8463_s10 + $0x648] sm:$0xf]  ;;  %4477 = vmatmul.bf16.vlgmr.msrb.gmra.mxu2 %v8570_v40 }
 0x2d9   : > { %4508 = vmatpush.bf16.msra.mxu0 %v5889_v17  ;;  %4528 = vmatpush.bf16.msra.mxu1 %v6001_v48  ;;  %v5968_v17 = vld [vmem:[%s8463_s10 + $0x568] sm:$0xf]  ;;  %v4106_v30 = vadd.f32 %v4105_v6, %v4087_v62  ;;  %v4137_v57 = vadd.f32 %v4136_v42, %v9278_v35  ;;  %v7212_v35 = vld [vmem:[%s8463_s10 + $0x554] sm:$0xf0] }
 0x2da   : > { %v5824_v48 = vld [vmem:[%s8463_s10 + $0x448] sm:$0xf]  ;;  %v5969_v62 = vor.u32 %v7216_v59, %v5968_v17  ;;  %v7180_v19 = vld [vmem:[%s8463_s10 + $0x454] sm:$0xf0] }
 0x2db   : > { %4546 = vmatpush.bf16.msra.mxu2 %v6145_v21  ;;  %v5857_v21 = vor.u32 %v7188_v2, %v5856_v51  ;;  %v4155_v18 = vpop.f32.mrf.mxu1  ;;  %v9340_v31 = vadd.f32 %v4124_v33, %v4106_v30  ;;  %v5952_v51 = vld [vmem:[%s8463_s10 + $0x548] sm:$0xf]  ;;  %4496 = vmatmul.bf16.vlgmr.msrb.gmra.mxu3 %v8574_v43  ;;  %v5825_v59 = vor.u32 %v7180_v19, %v5824_v48  ;;  %v7272_v33 = vld [vmem:[%s8463_s10 + $0x734] sm:$0xf0] }
 0x2dc   : > { %v6208_v2 = vld [vmem:[%s8463_s10 + $0x748] sm:$0xf]  ;;  %v5953_v17 = vor.u32 %v7212_v35, %v5952_v51  ;;  %v4193_v36 = vpop.f32.mrf.mxu3  ;;  %v7176_v44 = vld [vmem:[%s8463_s10 + $0x434] sm:$0xf0] }
 0x2dd   : > { %4509 = vmatpush.bf16.msra.mxu0 %v5873_v55  ;;  %4529 = vmatpush.bf16.msra.mxu1 %v5985_v14  ;;  %v6225_v55 = vor.u32 %v7280_v27, %v6224_v16  ;;  %v7244_v14 = vld [vmem:[%s8463_s10 + $0x654] sm:$0xf0]  ;;  %v5808_v10 = vld [vmem:[%s8463_s10 + $0x428] sm:$0xf]  ;;  %v6209_v6 = vor.u32 %v7276_v63, %v6208_v2 }
 0x2de   : > { %v6081_v16 = vor.u32 %v7244_v14, %v6080_v13  ;;  %v7208_v27 = vld [vmem:[%s8463_s10 + $0x534] sm:$0xf0]  ;;  %v6192_v30 = vld [vmem:[%s8463_s10 + $0x728] sm:$0xf]  ;;  %v5809_v63 = vor.u32 %v7176_v44, %v5808_v10 }
 0x2df   : > { %4547 = vmatpush.bf16.msra.mxu2 %v6129_v1  ;;  %v9344_v1 = vadd.f32 %v4155_v18, %v4137_v57  ;;  %4568 = vmatpush.bf16.msra.mxu3 %v6225_v55  ;;  %v6064_v57 = vld [vmem:[%s8463_s10 + $0x628] sm:$0xf]  ;;  %v7240_v18 = vld [vmem:[%s8463_s10 + $0x634] sm:$0xf0] }
 0x2e0   : > { %v4138_v50 = vpop.f32.mrf.mxu0  ;;  %v5792_v51 = vld [vmem:[%s8463_s10 + $0x408] sm:$0xf]  ;;  %v7204_v19 = vld [vmem:[%s8463_s10 + $0x514] sm:$0xf0] }
 0x2e1   : > { %9927 = vst [vmem:[#allocation14_spill] sm:$0xff] %v9344_v1  ;;  %4510 = vmatpush.bf16.msra.mxu0 %v5857_v21  ;;  %4530 = vmatpush.bf16.msra.mxu1 %v5969_v62  ;;  %v5936_v21 = vld [vmem:[%s8463_s10 + $0x528] sm:$0xf]  ;;  %v4139_v62 = vadd.f32 %v4138_v50, %v9299_v46  ;;  %v6065_v46 = vor.u32 %v7240_v18, %v6064_v57  ;;  %v7268_v14 = vld [vmem:[%s8463_s10 + $0x714] sm:$0xf0] }
 0x2e2   : > { %v5920_v35 = vld [vmem:[%s8463_s10 + $0x508] sm:$0xf] }
 0x2e3   : > { %4548 = vmatpush.bf16.msra.mxu2 %v6113_v23  ;;  %v4174_v23 = vpop.f32.mrf.mxu2  ;;  %v4157_v55 = vpop.f32.mrf.mxu1  ;;  %4569 = vmatpush.bf16.msra.mxu3 %v6209_v6  ;;  %v6176_v13 = vld [vmem:[%s8463_s10 + $0x708] sm:$0xf] }
 0x2e4   : > { %v4175_v42 = vadd.f32 %v4174_v23, %v9067_v22  ;;  %v9370_v2 = vadd.f32 %v4157_v55, %v4139_v62  ;;  %v7172_v23 = vld [vmem:[%s8463_s10 + $0x414] sm:$0xf0]  ;;  %v6416_v6 = vld [vmem:[%s8463_s10 + $0x8e8] sm:$0xf]  ;;  %v6177_v10 = vor.u32 %v7268_v14, %v6176_v13  ;;  %v4195_v57 = vpop.f32.mrf.mxu3 }
 0x2e5   : > { %4511 = vmatpush.bf16.msra.mxu0 %v5841_v5  ;;  %4531 = vmatpush.bf16.msra.mxu1 %v5953_v17  ;;  %v5937_v5 = vor.u32 %v7208_v27, %v5936_v21  ;;  %v6048_v17 = vld [vmem:[%s8463_s10 + $0x608] sm:$0xf]  ;;  %v5921_v21 = vor.u32 %v7204_v19, %v5920_v35  ;;  %v7392_v55 = vld [vmem:[%s8463_s10 + $0xaf4] sm:$0xf0] }
 0x2e6   : > { %v9366_v48 = vadd.f32 %v4193_v36, %v4175_v42  ;;  %9928 = vst [vmem:[#allocation15_spill] sm:$0xff] %v9370_v2  ;;  %v7236_v42 = vld [vmem:[%s8463_s10 + $0x614] sm:$0xf0]  ;;  %v6672_v50 = vld [vmem:[%s8463_s10 + $0xae8] sm:$0xf]  ;;  %4444 = vmatmul.bf16.gmra.mxu0 %v8637_v32 }
 0x2e7   : > { %4549 = vmatpush.bf16.msra.mxu2 %v6097_v26  ;;  %v6193_v26 = vor.u32 %v7272_v33, %v6192_v30  ;;  %v7328_v36 = vld [vmem:[%s8463_s10 + $0x8f4] sm:$0xf0]  ;;  %v6049_v27 = vor.u32 %v7236_v42, %v6048_v17  ;;  %v6544_v30 = vld [vmem:[%s8463_s10 + $0x9e8] sm:$0xf]  ;;  %4463 = vmatmul.bf16.gmra.mxu1 %v8642_v38 }
 0x2e8   : > { %v7360_v33 = vld [vmem:[%s8463_s10 + $0x9f4] sm:$0xf0]  ;;  %v4141_v18 = vpop.f32.mrf.mxu0  ;;  %v6417_v62 = vor.u32 %v7328_v36, %v6416_v6  ;;  %v6656_v6 = vld [vmem:[%s8463_s10 + $0xac8] sm:$0xf]  ;;  %4482 = vmatmul.bf16.gmra.mxu2 %v8644_v41 }
 0x2e9   : > { %4512 = vmatpush.bf16.msra.mxu0 %v5825_v59  ;;  %4532 = vmatpush.bf16.msra.mxu1 %v5937_v5  ;;  %v6800_v5 = vld [vmem:[%s8463_s10 + $0xbe8] sm:$0xf]  ;;  %v4142_v35 = vadd.f32 %v4141_v18, %v9323_v58  ;;  %v6545_v13 = vor.u32 %v7360_v33, %v6544_v30  ;;  %v7356_v42 = vld [vmem:[%s8463_s10 + $0x9d4] sm:$0xf0] }
 0x2ea   : > { %4570 = vmatpush.bf16.msra.mxu3 %v6193_v26  ;;  %v7424_v26 = vld [vmem:[%s8463_s10 + $0xbf4] sm:$0xf0]  ;;  %v6528_v58 = vld [vmem:[%s8463_s10 + $0x9c8] sm:$0xf] }
 0x2eb   : > { %4550 = vmatpush.bf16.msra.mxu2 %v6081_v16  ;;  %v4176_v59 = vpop.f32.mrf.mxu2  ;;  %v5793_v16 = vor.u32 %v7172_v23, %v5792_v51  ;;  %v4160_v51 = vpop.f32.mrf.mxu1  ;;  %v6673_v23 = vor.u32 %v7392_v55, %v6672_v50  ;;  %v6801_v17 = vor.u32 %v7424_v26, %v6800_v5  ;;  %4501 = vmatmul.bf16.gmra.mxu3 %v8648_v45  ;;  %v7352_v18 = vld [vmem:[%s8463_s10 + $0x9b4] sm:$0xf0]  ;;  %v6560_v1 = vld [vmem:[%s8463_s10 + $0xa08] sm:$0xf] }
 0x2ec   : > { %v4177_v44 = vadd.f32 %v4176_v59, %v9044_v29  ;;  %v9392_v14 = vadd.f32 %v4160_v51, %v4142_v35  ;;  %v7420_v59 = vld [vmem:[%s8463_s10 + $0xbd4] sm:$0xf0]  ;;  %v6529_v30 = vor.u32 %v7356_v42, %v6528_v58  ;;  %v4198_v5 = vpop.f32.mrf.mxu3 }
 0x2ed   : > { %4513 = vmatpush.bf16.msra.mxu0 %v5809_v63  ;;  %v6400_v63 = vld [vmem:[%s8463_s10 + $0x8c8] sm:$0xf]  ;;  %4533 = vmatpush.bf16.msra.mxu1 %v5921_v21  ;;  %v7388_v21 = vld [vmem:[%s8463_s10 + $0xad4] sm:$0xf0] }
 0x2ee   : > { %v9390_v19 = vadd.f32 %v4195_v57, %v4177_v44  ;;  %4571 = vmatpush.bf16.msra.mxu3 %v6177_v10  ;;  %9929 = vst [vmem:[#allocation16_spill] sm:$0xff] %v9392_v14  ;;  %v6784_v10 = vld [vmem:[%s8463_s10 + $0xbc8] sm:$0xf]  ;;  %v6657_v50 = vor.u32 %v7388_v21, %v6656_v6  ;;  %v7384_v51 = vld [vmem:[%s8463_s10 + $0xab4] sm:$0xf0] }
 0x2ef   : > { %4551 = vmatpush.bf16.msra.mxu2 %v6065_v46  ;;  %v7324_v46 = vld [vmem:[%s8463_s10 + $0x8d4] sm:$0xf0]  ;;  %v6785_v44 = vor.u32 %v7420_v59, %v6784_v10  ;;  %v6512_v57 = vld [vmem:[%s8463_s10 + $0x9a8] sm:$0xf] }
 0x2f0   : > { %v6401_v36 = vor.u32 %v7324_v46, %v6400_v63  ;;  %v4143_v26 = vpop.f32.mrf.mxu0  ;;  %v6768_v63 = vld [vmem:[%s8463_s10 + $0xba8] sm:$0xf]  ;;  %v7416_v46 = vld [vmem:[%s8463_s10 + $0xbb4] sm:$0xf0]  ;;  %v6513_v6 = vor.u32 %v7352_v18, %v6512_v57 }
 0x2f1   : > { %4514 = vmatpush.bf16.msra.mxu0 %v5793_v16  ;;  %v6384_v16 = vld [vmem:[%s8463_s10 + $0x8a8] sm:$0xf]  ;;  %4602 = vmatpush.bf16.msrb.mxu1 %v6545_v13  ;;  %v4144_v13 = vadd.f32 %v4143_v26, %v9340_v31  ;;  %v7316_v58 = vld [vmem:[%s8463_s10 + $0x894] sm:$0xf0]  ;;  %v6769_v10 = vor.u32 %v7416_v46, %v6768_v63 }
 0x2f2   : > { %4640 = vmatpush.bf16.msrb.mxu3 %v6801_v17  ;;  %v6368_v17 = vld [vmem:[%s8463_s10 + $0x888] sm:$0xf]  ;;  %v7348_v31 = vld [vmem:[%s8463_s10 + $0x994] sm:$0xf0] }
 0x2f3   : > { %4552 = vmatpush.bf16.msra.mxu2 %v6049_v27  ;;  %v7320_v27 = vld [vmem:[%s8463_s10 + $0x8b4] sm:$0xf0]  ;;  %v4179_v33 = vpop.f32.mrf.mxu2  ;;  %v6496_v59 = vld [vmem:[%s8463_s10 + $0x988] sm:$0xf] }
 0x2f4   : > { %v4180_v55 = vadd.f32 %v4179_v33, %v9112_v15  ;;  %v6385_v35 = vor.u32 %v7320_v27, %v6384_v16  ;;  %v6624_v16 = vld [vmem:[%s8463_s10 + $0xa88] sm:$0xf]  ;;  %v6369_v27 = vor.u32 %v7316_v58, %v6368_v17  ;;  %v7380_v33 = vld [vmem:[%s8463_s10 + $0xa94] sm:$0xf0]  ;;  %v4200_v46 = vpop.f32.mrf.mxu3 }
 0x2f5   : > { %4583 = vmatpush.bf16.msrb.mxu0 %v6417_v62  ;;  %v6640_v62 = vld [vmem:[%s8463_s10 + $0xaa8] sm:$0xf]  ;;  %4603 = vmatpush.bf16.msrb.mxu1 %v6529_v30  ;;  %v7312_v26 = vld [vmem:[%s8463_s10 + $0x874] sm:$0xf0]  ;;  %v6625_v57 = vor.u32 %v7380_v33, %v6624_v16 }
 0x2f6   : > { %v9416_v42 = vadd.f32 %v4198_v5, %v4180_v55  ;;  %4641 = vmatpush.bf16.msrb.mxu3 %v6785_v44  ;;  %v6641_v21 = vor.u32 %v7384_v51, %v6640_v62  ;;  %v6752_v55 = vld [vmem:[%s8463_s10 + $0xb88] sm:$0xf]  ;;  %v7412_v5 = vld [vmem:[%s8463_s10 + $0xb94] sm:$0xf0]  ;;  %4515 = vmatmul.bf16.vlgmr.msra.gmra.mxu0 %v8712_v47 }
 0x2f7   : > { %4621 = vmatpush.bf16.msrb.mxu2 %v6673_v23  ;;  %v4162_v23 = vpop.f32.mrf.mxu1  ;;  %v6352_v30 = vld [vmem:[%s8463_s10 + $0x868] sm:$0xf]  ;;  %v6753_v18 = vor.u32 %v7412_v5, %v6752_v55  ;;  %v7376_v17 = vld [vmem:[%s8463_s10 + $0xa74] sm:$0xf0]  ;;  %4534 = vmatmul.bf16.vlgmr.msra.gmra.mxu1 %v8717_v52 }
 0x2f8   : > { %v6480_v62 = vld [vmem:[%s8463_s10 + $0x968] sm:$0xf]  ;;  %4553 = vmatmul.bf16.vlgmr.msra.gmra.mxu2 %v8719_v53  ;;  %v7364_v2 = vld [vmem:[%s8463_s10 + $0xa14] sm:$0xf0] }
 0x2f9   : > { %4584 = vmatpush.bf16.msrb.mxu0 %v6401_v36  ;;  %v9418_v36 = vadd.f32 %v4162_v23, %v4144_v13  ;;  %4604 = vmatpush.bf16.msrb.mxu1 %v6513_v6  ;;  %v6608_v51 = vld [vmem:[%s8463_s10 + $0xa68] sm:$0xf]  ;;  %v4212_v13 = vpop.f32.mrf.mxu0  ;;  %v6353_v23 = vor.u32 %v7312_v26, %v6352_v30  ;;  %v7408_v6 = vld [vmem:[%s8463_s10 + $0xb74] sm:$0xf0] }
 0x2fa   : > { %4642 = vmatpush.bf16.msrb.mxu3 %v6769_v10  ;;  %v6736_v58 = vld [vmem:[%s8463_s10 + $0xb68] sm:$0xf]  ;;  %v6609_v55 = vor.u32 %v7376_v17, %v6608_v51  ;;  %v7340_v26 = vld [vmem:[%s8463_s10 + $0x954] sm:$0xf0] }
 0x2fb   : > { %4622 = vmatpush.bf16.msrb.mxu2 %v6657_v50  ;;  %v6497_v50 = vor.u32 %v7348_v31, %v6496_v59  ;;  %v4181_v44 = vpop.f32.mrf.mxu2  ;;  %v6336_v59 = vld [vmem:[%s8463_s10 + $0x848] sm:$0xf]  ;;  %v7308_v31 = vld [vmem:[%s8463_s10 + $0x854] sm:$0xf0]  ;;  %v6737_v5 = vor.u32 %v7408_v6, %v6736_v58  ;;  %4572 = vmatmul.bf16.vlgmr.msra.gmra.mxu3 %v8723_v56 }
 0x2fc   : > { %v4182_v63 = vadd.f32 %v4181_v44, %v9087_v7  ;;  %v6464_v30 = vld [vmem:[%s8463_s10 + $0x948] sm:$0xf]  ;;  %v6337_v44 = vor.u32 %v7308_v31, %v6336_v59  ;;  %v7336_v17 = vld [vmem:[%s8463_s10 + $0x934] sm:$0xf0] }
 0x2fd   : > { %4585 = vmatpush.bf16.msrb.mxu0 %v6385_v35  ;;  %v7344_v35 = vld [vmem:[%s8463_s10 + $0x974] sm:$0xf0]  ;;  %4605 = vmatpush.bf16.msrb.mxu1 %v6497_v50  ;;  %v6576_v58 = vld [vmem:[%s8463_s10 + $0xa28] sm:$0xf] }
 0x2fe   : > { %v9438_v16 = vadd.f32 %v4200_v46, %v4182_v63  ;;  %4643 = vmatpush.bf16.msrb.mxu3 %v6753_v18  ;;  %v7372_v63 = vld [vmem:[%s8463_s10 + $0xa54] sm:$0xf0]  ;;  %v6720_v46 = vld [vmem:[%s8463_s10 + $0xb48] sm:$0xf] }
 0x2ff   : > { %4623 = vmatpush.bf16.msrb.mxu2 %v6641_v21  ;;  %v4213_v21 = vadd.f32 %v4212_v13, %v9366_v48  ;;  %v4231_v10 = vpop.f32.mrf.mxu1  ;;  %v6592_v48 = vld [vmem:[%s8463_s10 + $0xa48] sm:$0xf]  ;;  %v7404_v50 = vld [vmem:[%s8463_s10 + $0xb54] sm:$0xf0] }
 0x300   : > { %v7304_v18 = vld [vmem:[%s8463_s10 + $0x834] sm:$0xf0]  ;;  %v6593_v51 = vor.u32 %v7372_v63, %v6592_v48  ;;  %v6721_v13 = vor.u32 %v7404_v50, %v6720_v46  ;;  %v6688_v14 = vld [vmem:[%s8463_s10 + $0xb08] sm:$0xf] }
 0x301   : > { %4586 = vmatpush.bf16.msrb.mxu0 %v6369_v27  ;;  %v6481_v27 = vor.u32 %v7344_v35, %v6480_v62  ;;  %v4232_v33 = vadd.f32 %v4231_v10, %v4213_v21  ;;  %v6465_v62 = vor.u32 %v7340_v26, %v6464_v30  ;;  %v4269_v21 = vpop.f32.mrf.mxu3  ;;  %v4214_v10 = vpop.f32.mrf.mxu0  ;;  %v7368_v31 = vld [vmem:[%s8463_s10 + $0xa34] sm:$0xf0]  ;;  %v6304_v26 = vld [vmem:[%s8463_s10 + $0x808] sm:$0xf] }
 0x302   : > { %4644 = vmatpush.bf16.msrb.mxu3 %v6737_v5  ;;  %v7400_v30 = vld [vmem:[%s8463_s10 + $0xb34] sm:$0xf0] }
 0x303   : > { %4624 = vmatpush.bf16.msrb.mxu2 %v6625_v57  ;;  %v6320_v57 = vld [vmem:[%s8463_s10 + $0x828] sm:$0xf]  ;;  %4606 = vmatpush.bf16.msrb.mxu1 %v6481_v27  ;;  %v4250_v35 = vpop.f32.mrf.mxu2  ;;  %v7300_v48 = vld [vmem:[%s8463_s10 + $0x814] sm:$0xf0] }
 0x304   : > { %v4251_v6 = vadd.f32 %v4250_v35, %v4232_v33  ;;  %v6321_v59 = vor.u32 %v7304_v18, %v6320_v57  ;;  %v6704_v27 = vld [vmem:[%s8463_s10 + $0xb28] sm:$0xf]  ;;  %v6577_v57 = vor.u32 %v7368_v31, %v6576_v58  ;;  %v7332_v35 = vld [vmem:[%s8463_s10 + $0x914] sm:$0xf0]  ;;  %v6561_v31 = vor.u32 %v7364_v2, %v6560_v1 }
 0x305   : > { %4587 = vmatpush.bf16.msrb.mxu0 %v6353_v23  ;;  %v6448_v23 = vld [vmem:[%s8463_s10 + $0x928] sm:$0xf]  ;;  %v7452_v58 = vld [vmem:[%s8463_s10 + $0xcd4] sm:$0xf0] }
 0x306   : > { %v9461_v63 = vadd.f32 %v4269_v21, %v4251_v6  ;;  %v6928_v33 = vld [vmem:[%s8463_s10 + $0xce8] sm:$0xf]  ;;  %v6449_v46 = vor.u32 %v7336_v17, %v6448_v23  ;;  %4645 = vmatpush.bf16.msrb.mxu3 %v6721_v13  ;;  %v6305_v6 = vor.u32 %v7300_v48, %v6304_v26  ;;  %v7472_v21 = vld [vmem:[%s8463_s10 + $0xd74] sm:$0xf0]  ;;  %4520 = vmatmul.bf16.gmra.mxu0 %v8780_v54 }
 0x307   : > { %4625 = vmatpush.bf16.msrb.mxu2 %v6609_v55  ;;  %v4215_v55 = vadd.f32 %v4214_v10, %v9390_v19  ;;  %v4233_v5 = vpop.f32.mrf.mxu1  ;;  %4607 = vmatpush.bf16.msrb.mxu1 %v6465_v62  ;;  %v6705_v19 = vor.u32 %v7400_v30, %v6704_v27  ;;  %v6432_v18 = vld [vmem:[%s8463_s10 + $0x908] sm:$0xf]  ;;  %v7396_v23 = vld [vmem:[%s8463_s10 + $0xb14] sm:$0xf0] }
 0x308   : > { %v6992_v10 = vld [vmem:[%s8463_s10 + $0xd68] sm:$0xf]  ;;  %v6689_v26 = vor.u32 %v7396_v23, %v6688_v14  ;;  %v7468_v48 = vld [vmem:[%s8463_s10 + $0xd54] sm:$0xf0]  ;;  %4539 = vmatmul.bf16.gmra.mxu1 %v8785_v60  ;;  %v7066_v23 = vld [vmem:[%s8463_s10 + $0xcc] sm:$0xf]  ;;  %4558 = vmatmul.bf16.gmra.mxu2 %v8787_v61 }
 0x309   : > { %4588 = vmatpush.bf16.msrb.mxu0 %v6337_v44  ;;  %v7456_v44 = vld [vmem:[%s8463_s10 + $0xcf4] sm:$0xf0]  ;;  %v4234_v50 = vadd.f32 %v4233_v5, %v4215_v55  ;;  %v6912_v17 = vld [vmem:[%s8463_s10 + $0xcc8] sm:$0xf]  ;;  %v4271_v55 = vpop.f32.mrf.mxu3  ;;  %v4217_v5 = vpop.f32.mrf.mxu0 }
 0x30a   : > { %v6929_v62 = vor.u32 %v7456_v44, %v6928_v33  ;;  %4646 = vmatpush.bf16.msrb.mxu3 %v6705_v19  ;;  %v6976_v27 = vld [vmem:[%s8463_s10 + $0xd48] sm:$0xf]  ;;  %v7070_v33 = vld [vmem:[%s8463_s10 + $0xec] sm:$0xf]  ;;  %v5394_v44 = vld [vmem:[%s8463_s10 + $0xf8] sm:$0xf0]  ;;  %v6913_v2 = vor.u32 %v7452_v58, %v6912_v17 }
 0x30b   : > { %4626 = vmatpush.bf16.msrb.mxu2 %v6593_v51  ;;  %4608 = vmatpush.bf16.msrb.mxu1 %v6449_v46  ;;  %v6433_v51 = vor.u32 %v7332_v35, %v6432_v18  ;;  %v4252_v13 = vpop.f32.mrf.mxu2  ;;  %v4218_v46 = vadd.f32 %v4217_v5, %v9416_v42  ;;  %v7102_v19 = vld [vmem:[%s8463_s10 + $0x1ec] sm:$0xf]  ;;  %v5522_v18 = vld [vmem:[%s8463_s10 + $0x1f8] sm:$0xf0]  ;;  %v6896_v14 = vld [vmem:[%s8463_s10 + $0xca8] sm:$0xf] }
 0x30c   : > { %v4253_v30 = vadd.f32 %v4252_v13, %v4234_v50  ;;  %v7448_v35 = vld [vmem:[%s8463_s10 + $0xcb4] sm:$0xf0]  ;;  %v6960_v42 = vld [vmem:[%s8463_s10 + $0xd28] sm:$0xf]  ;;  %v7098_v13 = vld [vmem:[%s8463_s10 + $0x1cc] sm:$0xf]  ;;  %4577 = vmatmul.bf16.gmra.mxu3 %v8791_v0 }
 0x30d   : > { %4589 = vmatpush.bf16.msrb.mxu0 %v6321_v59  ;;  %v6993_v59 = vor.u32 %v7472_v21, %v6992_v10  ;;  %v6977_v10 = vor.u32 %v7468_v48, %v6976_v27  ;;  %v5525_v21 = vor.u32 %v7102_v19, %v5522_v18  ;;  %v5506_v17 = vld [vmem:[%s8463_s10 + $0x1d8] sm:$0xf0]  ;;  %v6897_v58 = vor.u32 %v7448_v35, %v6896_v14  ;;  %v7444_v27 = vld [vmem:[%s8463_s10 + $0xc94] sm:$0xf0]  ;;  %v6944_v5 = vld [vmem:[%s8463_s10 + $0xd08] sm:$0xf] }
 0x30e   : > { %v9482_v1 = vadd.f32 %v4271_v55, %v4253_v30  ;;  %4647 = vmatpush.bf16.msrb.mxu3 %v6689_v26  ;;  %v5362_v19 = vld [vmem:[%s8463_s10 + $0xb8] sm:$0xf0]  ;;  %v7094_v14 = vld [vmem:[%s8463_s10 + $0x1ac] sm:$0xf] }
 0x30f   : > { %4627 = vmatpush.bf16.msrb.mxu2 %v6577_v57  ;;  %v4236_v57 = vpop.f32.mrf.mxu1  ;;  %4609 = vmatpush.bf16.msrb.mxu1 %v6433_v51  ;;  %v5378_v51 = vld [vmem:[%s8463_s10 + $0xd8] sm:$0xf0] }
 0x310   : > { %v4237_v50 = vadd.f32 %v4236_v57, %v4218_v46  ;;  %v5381_v55 = vor.u32 %v7066_v23, %v5378_v51  ;;  %v7460_v46 = vld [vmem:[%s8463_s10 + $0xd14] sm:$0xf0]  ;;  %v7062_v57 = vld [vmem:[%s8463_s10 + $0xac] sm:$0xf]  ;;  %v5490_v35 = vld [vmem:[%s8463_s10 + $0x1b8] sm:$0xf0] }
 0x311   : > { %4590 = vmatpush.bf16.msrb.mxu0 %v6305_v6  ;;  %v5397_v6 = vor.u32 %v7070_v33, %v5394_v44  ;;  %v4274_v48 = vpop.f32.mrf.mxu3  ;;  %v4219_v33 = vpop.f32.mrf.mxu0  ;;  %v5509_v44 = vor.u32 %v7098_v13, %v5506_v17  ;;  %v5493_v23 = vor.u32 %v7094_v14, %v5490_v35  ;;  %v7058_v51 = vld [vmem:[%s8463_s10 + $0x8c] sm:$0xf]  ;;  %v5346_v13 = vld [vmem:[%s8463_s10 + $0x98] sm:$0xf0] }
 0x312   : > { %4716 = vmatpush.bf16.msra.mxu3 %v5525_v21  ;;  %v4220_v18 = vadd.f32 %v4219_v33, %v9438_v16  ;;  %v7440_v21 = vld [vmem:[%s8463_s10 + $0xc74] sm:$0xf0]  ;;  %v6945_v16 = vor.u32 %v7460_v46, %v6944_v5  ;;  %v7090_v17 = vld [vmem:[%s8463_s10 + $0x18c] sm:$0xf]  ;;  %v5458_v35 = vld [vmem:[%s8463_s10 + $0x178] sm:$0xf0] }
 0x313   : > { %4682 = vmatpush.bf16.msra.mxu1 %v6993_v59  ;;  %4628 = vmatpush.bf16.msrb.mxu2 %v6561_v31  ;;  %v4255_v59 = vpop.f32.mrf.mxu2  ;;  %v6880_v31 = vld [vmem:[%s8463_s10 + $0xc88] sm:$0xf]  ;;  %v7086_v14 = vld [vmem:[%s8463_s10 + $0x16c] sm:$0xf] }
 0x314   : > { %v4256_v26 = vadd.f32 %v4255_v59, %v4237_v50  ;;  %v6881_v50 = vor.u32 %v7444_v27, %v6880_v31  ;;  %v5474_v59 = vld [vmem:[%s8463_s10 + $0x198] sm:$0xf0]  ;;  %v6848_v27 = vld [vmem:[%s8463_s10 + $0xc48] sm:$0xf] }
 0x315   : > { %4659 = vmatpush.bf16.msra.mxu0 %v6929_v62  ;;  %v7464_v62 = vld [vmem:[%s8463_s10 + $0xd34] sm:$0xf0]  ;;  %v5477_v46 = vor.u32 %v7090_v17, %v5474_v59  ;;  %v7050_v17 = vld [vmem:[%s8463_s10 + $0x4c] sm:$0xf]  ;;  %v5314_v59 = vld [vmem:[%s8463_s10 + $0x58] sm:$0xf0] }
 0x316   : > { %v6961_v30 = vor.u32 %v7464_v62, %v6960_v42  ;;  %v6864_v42 = vld [vmem:[%s8463_s10 + $0xc68] sm:$0xf]  ;;  %v5365_v62 = vor.u32 %v7062_v57, %v5362_v19  ;;  %4717 = vmatpush.bf16.msra.mxu3 %v5509_v44  ;;  %v5778_v44 = vld [vmem:[%s8463_s10 + $0x3f8] sm:$0xf0]  ;;  %v7054_v57 = vld [vmem:[%s8463_s10 + $0x6c] sm:$0xf]  ;;  %4591 = vmatmul.bf16.vlgmr.msrb.gmra.mxu0 %v8848_v4 }
 0x317   : > { %4683 = vmatpush.bf16.msra.mxu1 %v6977_v10  ;;  %4697 = vmatpush.bf16.msra.mxu2 %v5397_v6  ;;  %v9505_v10 = vadd.f32 %v4274_v48, %v4256_v26  ;;  %v7436_v26 = vld [vmem:[%s8463_s10 + $0xc54] sm:$0xf0]  ;;  %v5330_v19 = vld [vmem:[%s8463_s10 + $0x78] sm:$0xf0] }
 0x318   : > { %4610 = vmatmul.bf16.vlgmr.msrb.gmra.mxu1 %v8853_v8  ;;  %4629 = vmatmul.bf16.vlgmr.msrb.gmra.mxu2 %v8855_v9 }
 0x319   : > { %4660 = vmatpush.bf16.msra.mxu0 %v6913_v2  ;;  %v4238_v2 = vpop.f32.mrf.mxu1  ;;  %v4276_v48 = vpop.f32.mrf.mxu3 }
 0x31a   : > { %v4239_v6 = vadd.f32 %v4238_v2, %v4220_v18  ;;  %v4288_v33 = vpop.f32.mrf.mxu0  ;;  %4718 = vmatpush.bf16.msra.mxu3 %v5493_v23  ;;  %v7162_v23 = vld [vmem:[%s8463_s10 + $0x3cc] sm:$0xf] }
 0x31b   : > { %4684 = vmatpush.bf16.msra.mxu1 %v6961_v30  ;;  %4698 = vmatpush.bf16.msra.mxu2 %v5381_v55  ;;  %v4257_v31 = vpop.f32.mrf.mxu2  ;;  %v7166_v30 = vld [vmem:[%s8463_s10 + $0x3ec] sm:$0xf]  ;;  %v5349_v55 = vor.u32 %v7058_v51, %v5346_v13  ;;  %v4289_v18 = vadd.f32 %v4288_v33, %v9461_v63  ;;  %v5333_v63 = vor.u32 %v7054_v57, %v5330_v19  ;;  %v5762_v51 = vld [vmem:[%s8463_s10 + $0x3d8] sm:$0xf0] }
 0x31c   : > { %v4258_v5 = vadd.f32 %v4257_v31, %v4239_v6  ;;  %v6849_v6 = vor.u32 %v7436_v26, %v6848_v27  ;;  %v5461_v13 = vor.u32 %v7086_v14, %v5458_v35  ;;  %v5442_v31 = vld [vmem:[%s8463_s10 + $0x158] sm:$0xf0]  ;;  %4648 = vmatmul.bf16.vlgmr.msrb.gmra.mxu3 %v8859_v12  ;;  %v6816_v26 = vld [vmem:[%s8463_s10 + $0xc08] sm:$0xf]  ;;  %v5765_v33 = vor.u32 %v7162_v23, %v5762_v51  ;;  %v7046_v35 = vld [vmem:[%s8463_s10 + $0x2c] sm:$0xf] }
 0x31d   : > { %4661 = vmatpush.bf16.msra.mxu0 %v6897_v58  ;;  %v6865_v58 = vor.u32 %v7440_v21, %v6864_v42  ;;  %v6832_v21 = vld [vmem:[%s8463_s10 + $0xc28] sm:$0xf]  ;;  %v5426_v23 = vld [vmem:[%s8463_s10 + $0x138] sm:$0xf0] }
 0x31e   : > { %4719 = vmatpush.bf16.msra.mxu3 %v5477_v46 }
 0x31f   : > { %4685 = vmatpush.bf16.msra.mxu1 %v6945_v16  ;;  %4699 = vmatpush.bf16.msra.mxu2 %v5365_v62  ;;  %v7432_v16 = vld [vmem:[%s8463_s10 + $0xc34] sm:$0xf0]  ;;  %v5781_v62 = vor.u32 %v7166_v30, %v5778_v44  ;;  %v5317_v44 = vor.u32 %v7050_v17, %v5314_v59  ;;  %v7130_v17 = vld [vmem:[%s8463_s10 + $0x2cc] sm:$0xf] }
 0x320   : > { %v6833_v27 = vor.u32 %v7432_v16, %v6832_v21  ;;  %v5298_v16 = vld [vmem:[%s8463_s10 + $0x38] sm:$0xf0] }
 0x321   : > { %4662 = vmatpush.bf16.msra.mxu0 %v6881_v50  ;;  %v4307_v2 = vpop.f32.mrf.mxu1  ;;  %v9522_v50 = vadd.f32 %v4276_v48, %v4258_v5  ;;  %v7134_v5 = vld [vmem:[%s8463_s10 + $0x2ec] sm:$0xf]  ;;  %v5650_v48 = vld [vmem:[%s8463_s10 + $0x2f8] sm:$0xf0]  ;;  %v4345_v57 = vpop.f32.mrf.mxu3 }
 0x322   : > { %v4308_v42 = vadd.f32 %v4307_v2, %v4289_v18  ;;  %v4290_v19 = vpop.f32.mrf.mxu0  ;;  %4720 = vmatpush.bf16.msra.mxu3 %v5461_v13  ;;  %v7158_v18 = vld [vmem:[%s8463_s10 + $0x3ac] sm:$0xf]  ;;  %v5746_v2 = vld [vmem:[%s8463_s10 + $0x3b8] sm:$0xf0]  ;;  %v5653_v13 = vor.u32 %v7134_v5, %v5650_v48 }
 0x323   : > { %4700 = vmatpush.bf16.msra.mxu2 %v5349_v55  ;;  %v4326_v30 = vpop.f32.mrf.mxu2  ;;  %v7428_v55 = vld [vmem:[%s8463_s10 + $0xc14] sm:$0xf0]  ;;  %4754 = vmatpush.bf16.msrb.mxu1 %v5781_v62  ;;  %v7078_v62 = vld [vmem:[%s8463_s10 + $0x12c] sm:$0xf]  ;;  %v5749_v59 = vor.u32 %v7158_v18, %v5746_v2 }
 0x324   : > { %v4327_v46 = vadd.f32 %v4326_v30, %v4308_v42  ;;  %v6817_v42 = vor.u32 %v7428_v55, %v6816_v26  ;;  %v5301_v30 = vor.u32 %v7046_v35, %v5298_v16  ;;  %v7126_v55 = vld [vmem:[%s8463_s10 + $0x2ac] sm:$0xf] }
 0x325   : > { %4663 = vmatpush.bf16.msra.mxu0 %v6865_v58  ;;  %v7082_v58 = vld [vmem:[%s8463_s10 + $0x14c] sm:$0xf] }
 0x326   : > { %v5445_v14 = vor.u32 %v7082_v58, %v5442_v31  ;;  %v7154_v58 = vld [vmem:[%s8463_s10 + $0x38c] sm:$0xf]  ;;  %v5730_v31 = vld [vmem:[%s8463_s10 + $0x398] sm:$0xf0]  ;;  %4596 = vmatmul.bf16.gmra.mxu0 %v8916_v20 }
 0x327   : > { %4701 = vmatpush.bf16.msra.mxu2 %v5333_v63  ;;  %v9547_v63 = vadd.f32 %v4345_v57, %v4327_v46  ;;  %4755 = vmatpush.bf16.msrb.mxu1 %v5765_v33  ;;  %v5429_v46 = vor.u32 %v7078_v62, %v5426_v23  ;;  %v7042_v57 = vld [vmem:[%s8463_s10 + $0xc] sm:$0xf]  ;;  %v5733_v5 = vor.u32 %v7154_v58, %v5730_v31  ;;  %v5906_v33 = vld [vmem:[%s8463_s10 + $0x4f8] sm:$0xf0] }
 0x328   : > { %4721 = vmatpush.bf16.msra.mxu3 %v5445_v14  ;;  %v7198_v48 = vld [vmem:[%s8463_s10 + $0x4ec] sm:$0xf]  ;;  %v5618_v14 = vld [vmem:[%s8463_s10 + $0x2b8] sm:$0xf0]  ;;  %4615 = vmatmul.bf16.gmra.mxu1 %v8921_v24 }
 0x329   : > { %4664 = vmatpush.bf16.msra.mxu0 %v6849_v6  ;;  %v4291_v6 = vadd.f32 %v4290_v19, %v9482_v1  ;;  %v4309_v21 = vpop.f32.mrf.mxu1  ;;  %v5634_v1 = vld [vmem:[%s8463_s10 + $0x2d8] sm:$0xf0]  ;;  %v4347_v18 = vpop.f32.mrf.mxu3  ;;  %v7150_v35 = vld [vmem:[%s8463_s10 + $0x36c] sm:$0xf]  ;;  %v5621_v58 = vor.u32 %v7126_v55, %v5618_v14  ;;  %4634 = vmatmul.bf16.gmra.mxu2 %v8923_v25 }
 0x32a   : > { %v5282_v19 = vld [vmem:[%s8463_s10 + $0x18] sm:$0xf0]  ;;  %v5637_v26 = vor.u32 %v7130_v17, %v5634_v1  ;;  %v4293_v2 = vpop.f32.mrf.mxu0  ;;  %v7074_v23 = vld [vmem:[%s8463_s10 + $0x10c] sm:$0xf] }
 0x32b   : > { %v4310_v51 = vadd.f32 %v4309_v21, %v4291_v6  ;;  %4702 = vmatpush.bf16.msra.mxu2 %v5317_v44  ;;  %4756 = vmatpush.bf16.msrb.mxu1 %v5749_v59  ;;  %v5714_v6 = vld [vmem:[%s8463_s10 + $0x378] sm:$0xf0]  ;;  %v5285_v21 = vor.u32 %v7042_v57, %v5282_v19  ;;  %v4294_v16 = vadd.f32 %v4293_v2, %v9505_v10  ;;  %v7230_v17 = vld [vmem:[%s8463_s10 + $0x5ec] sm:$0xf] }
 0x32c   : > { %4722 = vmatpush.bf16.msra.mxu3 %v5429_v46  ;;  %v6034_v59 = vld [vmem:[%s8463_s10 + $0x5f8] sm:$0xf0]  ;;  %v7122_v31 = vld [vmem:[%s8463_s10 + $0x28c] sm:$0xf] }
 0x32d   : > { %4665 = vmatpush.bf16.msra.mxu0 %v6833_v27  ;;  %v4328_v27 = vpop.f32.mrf.mxu2  ;;  %v7194_v10 = vld [vmem:[%s8463_s10 + $0x4cc] sm:$0xf]  ;;  %v5890_v46 = vld [vmem:[%s8463_s10 + $0x4d8] sm:$0xf0]  ;;  %4653 = vmatmul.bf16.gmra.mxu3 %v8927_v28 }
 0x32e   : > { %v4329_v44 = vadd.f32 %v4328_v27, %v4310_v51  ;;  %v5909_v51 = vor.u32 %v7198_v48, %v5906_v33  ;;  %v5602_v57 = vld [vmem:[%s8463_s10 + $0x298] sm:$0xf0]  ;;  %v7146_v27 = vld [vmem:[%s8463_s10 + $0x34c] sm:$0xf]  ;;  %v5893_v55 = vor.u32 %v7194_v10, %v5890_v46 }
 0x32f   : > { %4703 = vmatpush.bf16.msra.mxu2 %v5301_v30  ;;  %4757 = vmatpush.bf16.msrb.mxu1 %v5733_v5  ;;  %v5717_v30 = vor.u32 %v7150_v35, %v5714_v6  ;;  %v5698_v48 = vld [vmem:[%s8463_s10 + $0x358] sm:$0xf0]  ;;  %v7226_v5 = vld [vmem:[%s8463_s10 + $0x5cc] sm:$0xf] }
 0x330   : > { %v6018_v33 = vld [vmem:[%s8463_s10 + $0x5d8] sm:$0xf0]  ;;  %v7118_v2 = vld [vmem:[%s8463_s10 + $0x26c] sm:$0xf]  ;;  %v5701_v14 = vor.u32 %v7146_v27, %v5698_v48 }
 0x331   : > { %4666 = vmatpush.bf16.msra.mxu0 %v6817_v42  ;;  %v4312_v62 = vpop.f32.mrf.mxu1  ;;  %v5410_v42 = vld [vmem:[%s8463_s10 + $0x118] sm:$0xf0]  ;;  %v7190_v35 = vld [vmem:[%s8463_s10 + $0x4ac] sm:$0xf] }
 0x332   : > { %v4313_v1 = vadd.f32 %v4312_v62, %v4294_v16  ;;  %v5413_v19 = vor.u32 %v7074_v23, %v5410_v42  ;;  %v5874_v6 = vld [vmem:[%s8463_s10 + $0x4b8] sm:$0xf0]  ;;  %v4350_v16 = vpop.f32.mrf.mxu3  ;;  %v9583_v62 = vpop.f32.mrf.mxu0  ;;  %v7142_v42 = vld [vmem:[%s8463_s10 + $0x32c] sm:$0xf] }
 0x333   : > { %4704 = vmatpush.bf16.msra.mxu2 %v5285_v21  ;;  %4758 = vmatpush.bf16.msrb.mxu1 %v5717_v30  ;;  %v5586_v23 = vld [vmem:[%s8463_s10 + $0x278] sm:$0xf0]  ;;  %v7114_v46 = vld [vmem:[%s8463_s10 + $0x24c] sm:$0xf] }
 0x334   : > { %4723 = vmatpush.bf16.msra.mxu3 %v5413_v19  ;;  %v6002_v30 = vld [vmem:[%s8463_s10 + $0x5b8] sm:$0xf0]  ;;  %v5589_v10 = vor.u32 %v7118_v2, %v5586_v23  ;;  %v7186_v19 = vld [vmem:[%s8463_s10 + $0x48c] sm:$0xf] }
 0x335   : > { %4735 = vmatpush.bf16.msrb.mxu0 %v5653_v13  ;;  %v9564_v13 = vadd.f32 %v4347_v18, %v4329_v44  ;;  %v4331_v44 = vpop.f32.mrf.mxu2  ;;  %v5605_v18 = vor.u32 %v7122_v31, %v5602_v57  ;;  %v7222_v31 = vld [vmem:[%s8463_s10 + $0x5ac] sm:$0xf]  ;;  %v5858_v27 = vld [vmem:[%s8463_s10 + $0x498] sm:$0xf0] }
 0x336   : > { %v4332_v21 = vadd.f32 %v4331_v44, %v4313_v1  ;;  %v5877_v1 = vor.u32 %v7190_v35, %v5874_v6  ;;  %v5570_v48 = vld [vmem:[%s8463_s10 + $0x258] sm:$0xf0]  ;;  %v7110_v2 = vld [vmem:[%s8463_s10 + $0x22c] sm:$0xf]  ;;  %4667 = vmatmul.bf16.vlgmr.msra.gmra.mxu0 %v8972_v37 }
 0x337   : > { %4773 = vmatpush.bf16.msrb.mxu2 %v5909_v51  ;;  %v5682_v51 = vld [vmem:[%s8463_s10 + $0x338] sm:$0xf0]  ;;  %4759 = vmatpush.bf16.msrb.mxu1 %v5701_v14  ;;  %v7294_v35 = vld [vmem:[%s8463_s10 + $0x7ec] sm:$0xf] }
 0x338   : > { %v5685_v57 = vor.u32 %v7142_v42, %v5682_v51  ;;  %v6290_v6 = vld [vmem:[%s8463_s10 + $0x7f8] sm:$0xf0]  ;;  %v7218_v42 = vld [vmem:[%s8463_s10 + $0x58c] sm:$0xf]  ;;  %7002 = vmatmul.msk.bf16.vlgmr.msra.gmra.mxu1 %vm3892_vm0, %v8977_v49 }
 0x339   : > { %4736 = vmatpush.bf16.msrb.mxu0 %v5637_v26  ;;  %v6037_v26 = vor.u32 %v7230_v17, %v6034_v59  ;;  %v9588_v17 = vpop.f32.mrf.mxu1  ;;  %v6021_v59 = vor.u32 %v7226_v5, %v6018_v33  ;;  %v5666_v5 = vld [vmem:[%s8463_s10 + $0x318] sm:$0xf0]  ;;  %v5861_v33 = vor.u32 %v7186_v19, %v5858_v27  ;;  %4705 = vmatmul.bf16.vlgmr.msra.gmra.mxu2 %v8563_v34  ;;  %v7254_v25 = vld [vmem:[%s8463_s10 + $0x6ac] sm:$0xf] }
 0x33a   : > { %v5554_v23 = vld [vmem:[%s8463_s10 + $0x238] sm:$0xf0]  ;;  %v7274_v49 = vld [vmem:[%s8463_s10 + $0x74c] sm:$0xf] }
 0x33b   : > { %4792 = vmatpush.bf16.msrb.mxu3 %v6037_v26  ;;  %4774 = vmatpush.bf16.msrb.mxu2 %v5893_v55  ;;  %v7138_v26 = vld [vmem:[%s8463_s10 + $0x30c] sm:$0xf]  ;;  %v6005_v55 = vor.u32 %v7222_v31, %v6002_v30  ;;  %v5986_v51 = vld [vmem:[%s8463_s10 + $0x598] sm:$0xf0]  ;;  %v5557_v19 = vor.u32 %v7110_v2, %v5554_v23 }
 0x33c   : > { %4760 = vmatpush.bf16.msrb.mxu1 %v5685_v57  ;;  %v5669_v14 = vor.u32 %v7138_v26, %v5666_v5  ;;  %v7182_v31 = vld [vmem:[%s8463_s10 + $0x46c] sm:$0xf]  ;;  %v5842_v30 = vld [vmem:[%s8463_s10 + $0x478] sm:$0xf0]  ;;  %v5989_v26 = vor.u32 %v7218_v42, %v5986_v51 }
 0x33d   : > { %4737 = vmatpush.bf16.msrb.mxu0 %v5621_v58  ;;  %v9590_v58 = vadd.f32 %v4350_v16, %v4332_v21  ;;  %v9600_v44 = vpop.f32.mrf.mxu2  ;;  %v9605_v21 = vpop.f32.mrf.mxu3  ;;  %v5538_v27 = vld [vmem:[%s8463_s10 + $0x218] sm:$0xf0]  ;;  %v7262_v5 = vld [vmem:[%s8463_s10 + $0x6ec] sm:$0xf]  ;;  %4724 = vmatmul.bf16.vlgmr.msra.gmra.mxu3 %v8568_v39 }
 0x33e   : > { %v4364_v16 = vpop.f32.mrf.mxu0  ;;  %v7178_v2 = vld [vmem:[%s8463_s10 + $0x44c] sm:$0xf]  ;;  %v6258_v34 = vld [vmem:[%s8463_s10 + $0x7b8] sm:$0xf0] }
 0x33f   : > { %4793 = vmatpush.bf16.msrb.mxu3 %v6021_v59  ;;  %4775 = vmatpush.bf16.msrb.mxu2 %v5877_v1  ;;  %v4365_v59 = vadd.f32 %v4364_v16, %v9547_v63  ;;  %v7290_v63 = vld [vmem:[%s8463_s10 + $0x7cc] sm:$0xf]  ;;  %v6130_v28 = vld [vmem:[%s8463_s10 + $0x6b8] sm:$0xf0] }
 0x340   : > { %4761 = vmatpush.bf16.msrb.mxu1 %v5669_v14  ;;  %v5826_v14 = vld [vmem:[%s8463_s10 + $0x458] sm:$0xf0]  ;;  %v7286_v42 = vld [vmem:[%s8463_s10 + $0x7ac] sm:$0xf] }
 0x341   : > { %4738 = vmatpush.bf16.msrb.mxu0 %v5605_v18  ;;  %v5573_v18 = vor.u32 %v7114_v46, %v5570_v48  ;;  %v4383_v1 = vpop.f32.mrf.mxu1  ;;  %v6293_v46 = vor.u32 %v7294_v35, %v6290_v6  ;;  %v6274_v48 = vld [vmem:[%s8463_s10 + $0x7d8] sm:$0xf0]  ;;  %v7246_v37 = vld [vmem:[%s8463_s10 + $0x66c] sm:$0xf] }
 0x342   : > { %v9614_v57 = vadd.f32 %v4383_v1, %v4365_v59  ;;  %v5970_v35 = vld [vmem:[%s8463_s10 + $0x578] sm:$0xf0]  ;;  %v6277_v6 = vor.u32 %v7290_v63, %v6274_v48  ;;  %v7310_v24 = vld [vmem:[%s8463_s10 + $0x86c] sm:$0xf] }
 0x343   : > { %4794 = vmatpush.bf16.msrb.mxu3 %v6005_v55  ;;  %4776 = vmatpush.bf16.msrb.mxu2 %v5861_v33  ;;  %v5845_v55 = vor.u32 %v7182_v31, %v5842_v30  ;;  %v7214_v33 = vld [vmem:[%s8463_s10 + $0x56c] sm:$0xf]  ;;  %v5829_v30 = vor.u32 %v7178_v2, %v5826_v14  ;;  %v5810_v48 = vld [vmem:[%s8463_s10 + $0x438] sm:$0xf0] }
 0x344   : > { %4830 = vmatpush.bf16.msra.mxu1 %v6293_v46  ;;  %v5973_v51 = vor.u32 %v7214_v33, %v5970_v35  ;;  %v7258_v31 = vld [vmem:[%s8463_s10 + $0x6cc] sm:$0xf]  ;;  %v5938_v14 = vld [vmem:[%s8463_s10 + $0x538] sm:$0xf0] }
 0x345   : > { %4739 = vmatpush.bf16.msrb.mxu0 %v5589_v10  ;;  %v7106_v10 = vld [vmem:[%s8463_s10 + $0x20c] sm:$0xf]  ;;  %v9630_v16 = vpop.f32.mrf.mxu2  ;;  %v9634_v59 = vpop.f32.mrf.mxu3 }
 0x346   : > { %v5541_v23 = vor.u32 %v7106_v10, %v5538_v27  ;;  %v9636_v1 = vpop.f32.mrf.mxu0  ;;  %v7210_v46 = vld [vmem:[%s8463_s10 + $0x54c] sm:$0xf]  ;;  %v6146_v10 = vld [vmem:[%s8463_s10 + $0x6d8] sm:$0xf0]  ;;  %4672 = vmatmul.bf16.gmra.mxu0 %v9025_v3 }
 0x347   : > { %4795 = vmatpush.bf16.msrb.mxu3 %v5989_v26  ;;  %4777 = vmatpush.bf16.msrb.mxu2 %v5845_v55  ;;  %v7174_v27 = vld [vmem:[%s8463_s10 + $0x42c] sm:$0xf]  ;;  %v6261_v26 = vor.u32 %v7286_v42, %v6258_v34  ;;  %v6242_v55 = vld [vmem:[%s8463_s10 + $0x798] sm:$0xf0]  ;;  %v6149_v35 = vor.u32 %v7258_v31, %v6146_v10 }
 0x348   : > { %4831 = vmatpush.bf16.msra.mxu1 %v6277_v6  ;;  %v7206_v2 = vld [vmem:[%s8463_s10 + $0x52c] sm:$0xf]  ;;  %v5794_v10 = vld [vmem:[%s8463_s10 + $0x418] sm:$0xf0] }
 0x349   : > { %4740 = vmatpush.bf16.msrb.mxu0 %v5573_v18  ;;  %v6162_v18 = vld [vmem:[%s8463_s10 + $0x6f8] sm:$0xf0]  ;;  %v9641_v63 = vpop.f32.mrf.mxu1  ;;  %v7250_v42 = vld [vmem:[%s8463_s10 + $0x68c] sm:$0xf]  ;;  %7003 = vmatmul.msk.bf16.gmra.mxu1 %vm3892_vm0, %v9030_v11 }
 0x34a   : > { %v6165_v39 = vor.u32 %v7262_v5, %v6162_v18  ;;  %v7282_v5 = vld [vmem:[%s8463_s10 + $0x78c] sm:$0xf]  ;;  %v5813_v18 = vor.u32 %v7174_v27, %v5810_v48  ;;  %v5922_v48 = vld [vmem:[%s8463_s10 + $0x518] sm:$0xf0]  ;;  %4710 = vmatmul.bf16.gmra.mxu2 %v8637_v32 }
 0x34b   : > { %4796 = vmatpush.bf16.msrb.mxu3 %v5973_v51  ;;  %4778 = vmatpush.bf16.msrb.mxu2 %v5829_v30  ;;  %v6245_v6 = vor.u32 %v7282_v5, %v6242_v55  ;;  %v7278_v34 = vld [vmem:[%s8463_s10 + $0x76c] sm:$0xf]  ;;  %v6226_v51 = vld [vmem:[%s8463_s10 + $0x778] sm:$0xf0] }
 0x34c   : > { %4832 = vmatpush.bf16.msra.mxu1 %v6261_v26  ;;  %v7170_v31 = vld [vmem:[%s8463_s10 + $0x40c] sm:$0xf]  ;;  %v6114_v5 = vld [vmem:[%s8463_s10 + $0x698] sm:$0xf0] }
 0x34d   : > { %4741 = vmatpush.bf16.msrb.mxu0 %v5557_v19  ;;  %v5954_v19 = vld [vmem:[%s8463_s10 + $0x558] sm:$0xf0]  ;;  %v9658_v30 = vpop.f32.mrf.mxu3  ;;  %v7202_v27 = vld [vmem:[%s8463_s10 + $0x50c] sm:$0xf]  ;;  %v6117_v9 = vor.u32 %v7250_v42, %v6114_v5  ;;  %4729 = vmatmul.bf16.gmra.mxu3 %v8642_v38 }
 0x34e   : > { %v5957_v33 = vor.u32 %v7210_v46, %v5954_v19  ;;  %v9660_v46 = vpop.f32.mrf.mxu0  ;;  %v6133_v19 = vor.u32 %v7254_v25, %v6130_v28  ;;  %v7326_v55 = vld [vmem:[%s8463_s10 + $0x8ec] sm:$0xf]  ;;  %v6210_v25 = vld [vmem:[%s8463_s10 + $0x758] sm:$0xf0]  ;;  %v5797_v28 = vor.u32 %v7170_v31, %v5794_v10 }
 0x34f   : > { %4779 = vmatpush.bf16.msrb.mxu2 %v5813_v18  ;;  %v5925_v18 = vor.u32 %v7202_v27, %v5922_v48  ;;  %v6402_v31 = vld [vmem:[%s8463_s10 + $0x8d8] sm:$0xf0]  ;;  %v7354_v10 = vld [vmem:[%s8463_s10 + $0x9cc] sm:$0xf] }
 0x350   : > { %4797 = vmatpush.bf16.msrb.mxu3 %v5957_v33  ;;  %v6418_v33 = vld [vmem:[%s8463_s10 + $0x8f8] sm:$0xf0]  ;;  %4833 = vmatpush.bf16.msra.mxu1 %v6245_v6  ;;  %v7270_v48 = vld [vmem:[%s8463_s10 + $0x72c] sm:$0xf] }
 0x351   : > { %4742 = vmatpush.bf16.msrb.mxu0 %v5541_v23  ;;  %v9652_v23 = vpop.f32.mrf.mxu2  ;;  %v9665_v26 = vpop.f32.mrf.mxu1  ;;  %v6421_v6 = vor.u32 %v7326_v55, %v6418_v33  ;;  %v6530_v42 = vld [vmem:[%s8463_s10 + $0x9d8] sm:$0xf0]  ;;  %v7242_v55 = vld [vmem:[%s8463_s10 + $0x64c] sm:$0xf] }
 0x352   : > { %v6194_v32 = vld [vmem:[%s8463_s10 + $0x738] sm:$0xf0] }
 0x353   : > { %4780 = vmatpush.bf16.msrb.mxu2 %v5797_v28  ;;  %v6197_v28 = vor.u32 %v7270_v48, %v6194_v32  ;;  %v6514_v11 = vld [vmem:[%s8463_s10 + $0x9b8] sm:$0xf0]  ;;  %v7422_v48 = vld [vmem:[%s8463_s10 + $0xbec] sm:$0xf] }
 0x354   : > { %v6802_v32 = vld [vmem:[%s8463_s10 + $0xbf8] sm:$0xf0] }
 0x355   : > { %4811 = vmatpush.bf16.msra.mxu0 %v6165_v39  ;;  %v5941_v39 = vor.u32 %v7206_v2, %v5938_v14  ;;  %v7358_v2 = vld [vmem:[%s8463_s10 + $0x9ec] sm:$0xf]  ;;  %v6546_v14 = vld [vmem:[%s8463_s10 + $0x9f8] sm:$0xf0]  ;;  %v9689_v5 = vpop.f32.mrf.mxu3 }
 0x356   : > { %v9691_v38 = vpop.f32.mrf.mxu0  ;;  %4743 = vmatmul.bf16.vlgmr.msrb.gmra.mxu0 %v8570_v40  ;;  %v7306_v40 = vld [vmem:[%s8463_s10 + $0x84c] sm:$0xf] }
 0x357   : > { %4798 = vmatpush.bf16.msrb.mxu3 %v5941_v39  ;;  %v7322_v39 = vld [vmem:[%s8463_s10 + $0x8cc] sm:$0xf]  ;;  %4849 = vmatpush.bf16.msra.mxu2 %v6421_v6 }
 0x358   : > { %v6405_v33 = vor.u32 %v7322_v39, %v6402_v31  ;;  %v7238_v31 = vld [vmem:[%s8463_s10 + $0x62c] sm:$0xf] }
 0x359   : > { %4812 = vmatpush.bf16.msra.mxu0 %v6149_v35  ;;  %v6229_v35 = vor.u32 %v7278_v34, %v6226_v51  ;;  %v6098_v34 = vld [vmem:[%s8463_s10 + $0x678] sm:$0xf0]  ;;  %v6549_v51 = vor.u32 %v7358_v2, %v6546_v14  ;;  %v9685_v27 = vpop.f32.mrf.mxu2  ;;  %v6533_v14 = vor.u32 %v7354_v10, %v6530_v42  ;;  %4762 = vmatmul.bf16.vlgmr.msrb.gmra.mxu1 %v8574_v43  ;;  %v7414_v43 = vld [vmem:[%s8463_s10 + $0xbac] sm:$0xf] }
 0x35a   : > { %v6082_v2 = vld [vmem:[%s8463_s10 + $0x658] sm:$0xf0]  ;;  %4781 = vmatmul.bf16.vlgmr.msrb.gmra.mxu2 %v8712_v47 }
 0x35b   : > { %4834 = vmatpush.bf16.msra.mxu1 %v6229_v35  ;;  %4799 = vmatpush.bf16.msrb.mxu3 %v5925_v18  ;;  %v9694_v35 = vpop.f32.mrf.mxu1  ;;  %v7350_v18 = vld [vmem:[%s8463_s10 + $0x9ac] sm:$0xf]  ;;  %v6085_v6 = vor.u32 %v7242_v55, %v6082_v2  ;;  %v6370_v2 = vld [vmem:[%s8463_s10 + $0x898] sm:$0xf0] }
 0x35c   : > { %4850 = vmatpush.bf16.msra.mxu2 %v6405_v33  ;;  %v6517_v10 = vor.u32 %v7350_v18, %v6514_v11  ;;  %v7346_v11 = vld [vmem:[%s8463_s10 + $0x98c] sm:$0xf]  ;;  %v6050_v18 = vld [vmem:[%s8463_s10 + $0x618] sm:$0xf0] }
 0x35d   : > { %4813 = vmatpush.bf16.msra.mxu0 %v6133_v19  ;;  %v6213_v19 = vor.u32 %v7274_v49, %v6210_v25  ;;  %v6101_v49 = vor.u32 %v7246_v37, %v6098_v34  ;;  %v7318_v25 = vld [vmem:[%s8463_s10 + $0x8ac] sm:$0xf]  ;;  %v6178_v34 = vld [vmem:[%s8463_s10 + $0x718] sm:$0xf0]  ;;  %v9710_v55 = vpop.f32.mrf.mxu3 }
 0x35e   : > { %v7266_v37 = vld [vmem:[%s8463_s10 + $0x70c] sm:$0xf]  ;;  %4800 = vmatmul.bf16.vlgmr.msrb.gmra.mxu3 %v8717_v52  ;;  %v6338_v52 = vld [vmem:[%s8463_s10 + $0x858] sm:$0xf0] }
 0x35f   : > { %4868 = vmatpush.bf16.msra.mxu3 %v6549_v51  ;;  %4835 = vmatpush.bf16.msra.mxu1 %v6213_v19  ;;  %v6066_v51 = vld [vmem:[%s8463_s10 + $0x638] sm:$0xf0]  ;;  %v6181_v19 = vor.u32 %v7266_v37, %v6178_v34  ;;  %v7390_v34 = vld [vmem:[%s8463_s10 + $0xaec] sm:$0xf] }
 0x360   : > { %v6069_v33 = vor.u32 %v7238_v31, %v6066_v51  ;;  %v6805_v31 = vor.u32 %v7422_v48, %v6802_v32  ;;  %v7418_v51 = vld [vmem:[%s8463_s10 + $0xbcc] sm:$0xf] }
 0x361   : > { %4814 = vmatpush.bf16.msra.mxu0 %v6117_v9  ;;  %v6386_v9 = vld [vmem:[%s8463_s10 + $0x8b8] sm:$0xf0]  ;;  %v9705_v42 = vpop.f32.mrf.mxu2  ;;  %v7386_v32 = vld [vmem:[%s8463_s10 + $0xacc] sm:$0xf] }
 0x362   : > { %v6389_v39 = vor.u32 %v7318_v25, %v6386_v9  ;;  %v4440_v25 = vpop.f32.mrf.mxu0 }
 0x363   : > { %4869 = vmatpush.bf16.msra.mxu3 %v6533_v14  ;;  %4836 = vmatpush.bf16.msra.mxu1 %v6197_v28  ;;  %v6498_v14 = vld [vmem:[%s8463_s10 + $0x998] sm:$0xf0]  ;;  %v4459_v9 = vpop.f32.mrf.mxu1  ;;  %v7234_v28 = vld [vmem:[%s8463_s10 + $0x60c] sm:$0xf]  ;;  %v4441_v37 = vadd.f32 %v4440_v25, %v9067_v22 }
 0x364   : > { %4851 = vmatpush.bf16.msra.mxu2 %v6389_v39  ;;  %v6786_v39 = vld [vmem:[%s8463_s10 + $0xbd8] sm:$0xf0]  ;;  %v6501_v12 = vor.u32 %v7346_v11, %v6498_v14  ;;  %v7342_v22 = vld [vmem:[%s8463_s10 + $0x96c] sm:$0xf] }
 0x365   : > { %4815 = vmatpush.bf16.msra.mxu0 %v6101_v49  ;;  %v7314_v49 = vld [vmem:[%s8463_s10 + $0x88c] sm:$0xf]  ;;  %v4460_v61 = vadd.f32 %v4459_v9, %v4441_v37  ;;  %v6354_v25 = vld [vmem:[%s8463_s10 + $0x878] sm:$0xf0]  ;;  %v4497_v9 = vpop.f32.mrf.mxu3 }
 0x366   : > { %v6373_v3 = vor.u32 %v7314_v49, %v6370_v2  ;;  %v6658_v49 = vld [vmem:[%s8463_s10 + $0xad8] sm:$0xf0]  ;;  %v6357_v11 = vor.u32 %v7310_v24, %v6354_v25  ;;  %v6341_v25 = vor.u32 %v7306_v40, %v6338_v52  ;;  %4748 = vmatmul.bf16.gmra.mxu0 %v8644_v41 }
 0x367   : > { %4870 = vmatpush.bf16.msra.mxu3 %v6517_v10  ;;  %4837 = vmatpush.bf16.msra.mxu1 %v6181_v19  ;;  %v6053_v10 = vor.u32 %v7234_v28, %v6050_v18  ;;  %v6482_v19 = vld [vmem:[%s8463_s10 + $0x978] sm:$0xf0]  ;;  %v7338_v28 = vld [vmem:[%s8463_s10 + $0x94c] sm:$0xf] }
 0x368   : > { %v6770_v2 = vld [vmem:[%s8463_s10 + $0xbb8] sm:$0xf0]  ;;  %4852 = vmatpush.bf16.msra.mxu2 %v6373_v3  ;;  %v6485_v14 = vor.u32 %v7342_v22, %v6482_v19  ;;  %v6661_v3 = vor.u32 %v7386_v32, %v6658_v49  ;;  %v7382_v22 = vld [vmem:[%s8463_s10 + $0xaac] sm:$0xf] }
 0x369   : > { %4816 = vmatpush.bf16.msra.mxu0 %v6085_v6  ;;  %v6674_v6 = vld [vmem:[%s8463_s10 + $0xaf8] sm:$0xf0]  ;;  %v4478_v47 = vpop.f32.mrf.mxu2  ;;  %v7334_v32 = vld [vmem:[%s8463_s10 + $0x92c] sm:$0xf]  ;;  %4767 = vmatmul.bf16.gmra.mxu1 %v8648_v45 }
 0x36a   : > { %v6677_v48 = vor.u32 %v7390_v34, %v6674_v6  ;;  %v6466_v18 = vld [vmem:[%s8463_s10 + $0x958] sm:$0xf0]  ;;  %v4479_v37 = vadd.f32 %v4478_v47, %v4460_v61  ;;  %v4442_v34 = vpop.f32.mrf.mxu0  ;;  %v7410_v61 = vld [vmem:[%s8463_s10 + $0xb8c] sm:$0xf]  ;;  %4786 = vmatmul.bf16.gmra.mxu2 %v8780_v54 }
 0x36b   : > { %4906 = vmatpush.bf16.msrb.mxu1 %v6805_v31  ;;  %4871 = vmatpush.bf16.msra.mxu3 %v6501_v12  ;;  %v4461_v6 = vpop.f32.mrf.mxu1  ;;  %v4296_v12 = vadd.f32 %v9583_v62, %v9522_v50  ;;  %v4443_v24 = vadd.f32 %v4442_v34, %v9044_v29  ;;  %v6642_v31 = vld [vmem:[%s8463_s10 + $0xab8] sm:$0xf0]  ;;  %v6469_v50 = vor.u32 %v7338_v28, %v6466_v18  ;;  %v7302_v62 = vld [vmem:[%s8463_s10 + $0x82c] sm:$0xf] }
 0x36c   : > { %4853 = vmatpush.bf16.msra.mxu2 %v6357_v11  ;;  %v6450_v49 = vld [vmem:[%s8463_s10 + $0x938] sm:$0xf0]  ;;  %v7370_v45 = vld [vmem:[%s8463_s10 + $0xa4c] sm:$0xf] }
 0x36d   : > { %4817 = vmatpush.bf16.msra.mxu0 %v6069_v33  ;;  %v6789_v33 = vor.u32 %v7418_v51, %v6786_v39  ;;  %v6773_v51 = vor.u32 %v7414_v43, %v6770_v2  ;;  %v9743_v39 = vadd.f32 %v4497_v9, %v4479_v37  ;;  %v4462_v19 = vadd.f32 %v4461_v6, %v4443_v24  ;;  %v7378_v2 = vld [vmem:[%s8463_s10 + $0xa8c] sm:$0xf]  ;;  %v6626_v11 = vld [vmem:[%s8463_s10 + $0xa98] sm:$0xf0] }
 0x36e   : > { %v4315_v43 = vadd.f32 %v9588_v17, %v4296_v12  ;;  %v6738_v40 = vld [vmem:[%s8463_s10 + $0xb78] sm:$0xf0]  ;;  %v6453_v52 = vor.u32 %v7334_v32, %v6450_v49  ;;  %v4499_v17 = vpop.f32.mrf.mxu3  ;;  %v7298_v37 = vld [vmem:[%s8463_s10 + $0x80c] sm:$0xf]  ;;  %v6629_v24 = vor.u32 %v7378_v2, %v6626_v11  ;;  %4805 = vmatmul.bf16.gmra.mxu3 %v8785_v60 }
 0x36f   : > { %4907 = vmatpush.bf16.msrb.mxu1 %v6789_v33  ;;  %4872 = vmatpush.bf16.msra.mxu3 %v6485_v14  ;;  %v6645_v33 = vor.u32 %v7382_v22, %v6642_v31  ;;  %v7406_v14 = vld [vmem:[%s8463_s10 + $0xb6c] sm:$0xf]  ;;  %v6306_v34 = vld [vmem:[%s8463_s10 + $0x818] sm:$0xf0] }
 0x370   : > { %4854 = vmatpush.bf16.msra.mxu2 %v6341_v25  ;;  %v4334_v28 = vadd.f32 %v9600_v44, %v4315_v43  ;;  %v7330_v6 = vld [vmem:[%s8463_s10 + $0x90c] sm:$0xf]  ;;  %v6434_v22 = vld [vmem:[%s8463_s10 + $0x918] sm:$0xf0]  ;;  %v6741_v44 = vor.u32 %v7406_v14, %v6738_v40 }
 0x371   : > { %4818 = vmatpush.bf16.msra.mxu0 %v6053_v10  ;;  %v6754_v10 = vld [vmem:[%s8463_s10 + $0xb98] sm:$0xf0]  ;;  %v4480_v18 = vpop.f32.mrf.mxu2  ;;  %v7454_v31 = vld [vmem:[%s8463_s10 + $0xcec] sm:$0xf] }
 0x372   : > { %v6757_v47 = vor.u32 %v7410_v61, %v6754_v10  ;;  %v4445_v61 = vpop.f32.mrf.mxu0  ;;  %v7374_v10 = vld [vmem:[%s8463_s10 + $0xa6c] sm:$0xf]  ;;  %v6610_v25 = vld [vmem:[%s8463_s10 + $0xa78] sm:$0xf0] }
 0x373   : > { %4908 = vmatpush.bf16.msrb.mxu1 %v6773_v51  ;;  %4873 = vmatpush.bf16.msra.mxu3 %v6469_v50  ;;  %v4464_v12 = vpop.f32.mrf.mxu1  ;;  %v6930_v51 = vld [vmem:[%s8463_s10 + $0xcf8] sm:$0xf0]  ;;  %v7402_v32 = vld [vmem:[%s8463_s10 + $0xb4c] sm:$0xf]  ;;  %v6613_v11 = vor.u32 %v7374_v10, %v6610_v25 }
 0x374   : > { %v6722_v49 = vld [vmem:[%s8463_s10 + $0xb58] sm:$0xf0]  ;;  %v6933_v43 = vor.u32 %v7454_v31, %v6930_v51  ;;  %v7470_v40 = vld [vmem:[%s8463_s10 + $0xd6c] sm:$0xf] }
 0x375   : > { %4887 = vmatpush.bf16.msrb.mxu0 %v6677_v48  ;;  %v6322_v48 = vld [vmem:[%s8463_s10 + $0x838] sm:$0xf0]  ;;  %v7366_v51 = vld [vmem:[%s8463_s10 + $0xa2c] sm:$0xf] }
 0x376   : > { %v6325_v9 = vor.u32 %v7302_v62, %v6322_v48  ;;  %v4446_v62 = vadd.f32 %v4445_v61, %v9112_v15  ;;  %v4353_v48 = vadd.f32 %v9605_v21, %v4334_v28  ;;  %v6914_v14 = vld [vmem:[%s8463_s10 + $0xcd8] sm:$0xf0]  ;;  %v6725_v28 = vor.u32 %v7402_v32, %v6722_v49  ;;  %4819 = vmatmul.bf16.vlgmr.msra.gmra.mxu0 %v8719_v53 }
 0x377   : > { %4909 = vmatpush.bf16.msrb.mxu1 %v6757_v47  ;;  %4874 = vmatpush.bf16.msra.mxu3 %v6453_v52  ;;  %v7450_v47 = vld [vmem:[%s8463_s10 + $0xccc] sm:$0xf]  ;;  %v6994_v52 = vld [vmem:[%s8463_s10 + $0xd78] sm:$0xf0] }
 0x378   : > { %4855 = vmatpush.bf16.msra.mxu2 %v6325_v9  ;;  %v4465_v2 = vadd.f32 %v4464_v12, %v4446_v62  ;;  %v4372_v21 = vadd.f32 %v9691_v38, %v4353_v48  ;;  %v6594_v9 = vld [vmem:[%s8463_s10 + $0xa58] sm:$0xf0]  ;;  %v6997_v54 = vor.u32 %v7470_v40, %v6994_v52  ;;  %v6917_v41 = vor.u32 %v7450_v47, %v6914_v14  ;;  %v7446_v12 = vld [vmem:[%s8463_s10 + $0xcac] sm:$0xf] }
 0x379   : > { %4888 = vmatpush.bf16.msrb.mxu0 %v6661_v3  ;;  %v4481_v3 = vadd.f32 %v4480_v18, %v4462_v19  ;;  %v6309_v19 = vor.u32 %v7298_v37, %v6306_v34  ;;  %v4370_v18 = vadd.f32 %v9660_v46, %v9590_v58  ;;  %v7398_v37 = vld [vmem:[%s8463_s10 + $0xb2c] sm:$0xf]  ;;  %v6706_v38 = vld [vmem:[%s8463_s10 + $0xb38] sm:$0xf0]  ;;  %v4502_v34 = vpop.f32.mrf.mxu3  ;;  %v4367_v46 = vadd.f32 %v9636_v1, %v9564_v13 }
 0x37a   : > { %v7466_v58 = vld [vmem:[%s8463_s10 + $0xd4c] sm:$0xf]  ;;  %v4447_v31 = vpop.f32.mrf.mxu0  ;;  %v6578_v61 = vld [vmem:[%s8463_s10 + $0xa38] sm:$0xf0]  ;;  %v6709_v62 = vor.u32 %v7398_v37, %v6706_v38  ;;  %4838 = vmatmul.bf16.vlgmr.msra.gmra.mxu1 %v8723_v56 }
 0x37b   : > { %v9765_v50 = vadd.f32 %v4499_v17, %v4481_v3  ;;  %4910 = vmatpush.bf16.msrb.mxu1 %v6741_v44  ;;  %v4483_v17 = vpop.f32.mrf.mxu2  ;;  %v6597_v3 = vor.u32 %v7370_v45, %v6594_v9  ;;  %v6978_v10 = vld [vmem:[%s8463_s10 + $0xd58] sm:$0xf0]  ;;  %v4448_v44 = vadd.f32 %v4447_v31, %v9087_v7  ;;  %v4389_v13 = vadd.f32 %v9665_v26, %v4370_v18  ;;  %v7394_v1 = vld [vmem:[%s8463_s10 + $0xb0c] sm:$0xf] }
 0x37c   : > { %4856 = vmatpush.bf16.msra.mxu2 %v6309_v19  ;;  %v4484_v60 = vadd.f32 %v4483_v17, %v4465_v2  ;;  %v6981_v19 = vor.u32 %v7466_v58, %v6978_v10  ;;  %v6882_v2 = vld [vmem:[%s8463_s10 + $0xc98] sm:$0xf0]  ;;  %v4386_v47 = vadd.f32 %v9641_v63, %v4367_v46  ;;  %v7362_v14 = vld [vmem:[%s8463_s10 + $0xa0c] sm:$0xf] }
 0x37d   : > { %4889 = vmatpush.bf16.msrb.mxu0 %v6645_v33  ;;  %v6437_v33 = vor.u32 %v7330_v6, %v6434_v22  ;;  %v4466_v6 = vpop.f32.mrf.mxu1  ;;  %v4391_v22 = vadd.f32 %v9694_v35, %v4372_v21  ;;  %v6690_v35 = vld [vmem:[%s8463_s10 + $0xb18] sm:$0xf0]  ;;  %v4408_v21 = vadd.f32 %v9685_v27, %v4389_v13  ;;  %v7438_v38 = vld [vmem:[%s8463_s10 + $0xc6c] sm:$0xf] }
 0x37e   : > { %v9795_v25 = vadd.f32 %v4502_v34, %v4484_v60  ;;  %v4467_v49 = vadd.f32 %v4466_v6, %v4448_v44  ;;  %v6562_v40 = vld [vmem:[%s8463_s10 + $0xa18] sm:$0xf0]  ;;  %v6693_v45 = vor.u32 %v7394_v1, %v6690_v35  ;;  %v4405_v9 = vadd.f32 %v9652_v23, %v4386_v47  ;;  %v7430_v10 = vld [vmem:[%s8463_s10 + $0xc2c] sm:$0xf] }
 0x37f   : > { %4875 = vmatpush.bf16.msra.mxu3 %v6437_v33  ;;  %4911 = vmatpush.bf16.msrb.mxu1 %v6725_v28  ;;  %v4410_v32 = vadd.f32 %v9705_v42, %v4391_v22  ;;  %v6581_v33 = vor.u32 %v7366_v51, %v6578_v61  ;;  %v6962_v26 = vld [vmem:[%s8463_s10 + $0xd38] sm:$0xf0]  ;;  %v6565_v37 = vor.u32 %v7362_v14, %v6562_v40  ;;  %v7434_v22 = vld [vmem:[%s8463_s10 + $0xc4c] sm:$0xf] }
 0x380   : > { %4925 = vmatpush.bf16.msrb.mxu2 %v6933_v43  ;;  %v7442_v43 = vld [vmem:[%s8463_s10 + $0xc8c] sm:$0xf]  ;;  %v6866_v27 = vld [vmem:[%s8463_s10 + $0xc78] sm:$0xf0]  ;;  %v4403_v34 = vadd.f32 %v9630_v16, %v9614_v57  ;;  %v4424_v58 = vadd.f32 %v9658_v30, %v4405_v9 }
 0x381   : > { %4890 = vmatpush.bf16.msrb.mxu0 %v6629_v24  ;;  %v6898_v24 = vld [vmem:[%s8463_s10 + $0xcb8] sm:$0xf0]  ;;  %v6885_v28 = vor.u32 %v7442_v43, %v6882_v2  ;;  %v4504_v18 = vpop.f32.mrf.mxu3  ;;  %4857 = vmatmul.bf16.vlgmr.msra.gmra.mxu2 %v8848_v4  ;;  %v9930_v16 = vld [vmem:[#allocation16_spill] sm:$0xff]  ;;  %v9931_v4 = vld [vmem:[#allocation15_spill] sm:$0xff] }
 0x382   : > { %v6901_v48 = vor.u32 %v7446_v12, %v6898_v24  ;;  %v9817_v60 = vpop.f32.mrf.mxu0  ;;  %v6946_v23 = vld [vmem:[%s8463_s10 + $0xd18] sm:$0xf0]  ;;  %v4975_v24 = vmax.f32 %v9418_v36, 0.0  ;;  %4876 = vmatmul.bf16.vlgmr.msra.gmra.mxu3 %v8853_v8  ;;  %v4971_v56 = vmax.f32 %v9930_v16, 0.0  ;;  %v4967_v51 = vmax.f32 %v9931_v4, 0.0 }
 0x383   : > { %4948 = vmatpush.bf16.msrb.mxu3 %v6997_v54  ;;  %4912 = vmatpush.bf16.msrb.mxu1 %v6709_v62  ;;  %v4485_v52 = vpop.f32.mrf.mxu2  ;;  %v4429_v54 = vadd.f32 %v9710_v55, %v4410_v32  ;;  %v4427_v55 = vadd.f32 %v9689_v5, %v4408_v21  ;;  %v6850_v57 = vld [vmem:[%s8463_s10 + $0xc58] sm:$0xf0]  ;;  %v4422_v5 = vadd.f32 %v9634_v59, %v4403_v34  ;;  %v4968_v61 = vmax.f32 %v4424_v58, 0.0  ;;  %v7426_v32 = vld [vmem:[%s8463_s10 + $0xc0c] sm:$0xf]  ;;  %v9940_v58 = vld [vmem:[#allocation11_spill] sm:$0xff] }
 0x384   : > { %4926 = vmatpush.bf16.msrb.mxu2 %v6917_v41  ;;  %v4486_v63 = vadd.f32 %v4485_v52, %v4467_v49  ;;  %v7458_v41 = vld [vmem:[%s8463_s10 + $0xd0c] sm:$0xf]  ;;  %v6853_v30 = vor.u32 %v7434_v22, %v6850_v57  ;;  %v6834_v59 = vld [vmem:[%s8463_s10 + $0xc38] sm:$0xf0] }
 0x385   : > { %4891 = vmatpush.bf16.msrb.mxu0 %v6613_v11  ;;  %v7462_v11 = vld [vmem:[%s8463_s10 + $0xd2c] sm:$0xf]  ;;  %v9812_v17 = vpop.f32.mrf.mxu1  ;;  %v6949_v12 = vor.u32 %v7458_v41, %v6946_v23  ;;  %v4976_v46 = vmax.f32 %v4429_v54, 0.0  ;;  %v4972_v31 = vmax.f32 %v4427_v55, 0.0  ;;  %v9932_v62 = vld [vmem:[#allocation14_spill] sm:$0xff]  ;;  %v4964_v13 = vmax.f32 %v4422_v5, 0.0 }
 0x386   : > { %v6965_v42 = vor.u32 %v7462_v11, %v6962_v26  ;;  %v9823_v6 = vadd.f32 %v4504_v18, %v4486_v63  ;;  %v6837_v35 = vor.u32 %v7430_v10, %v6834_v59  ;;  %v6818_v49 = vld [vmem:[%s8463_s10 + $0xc18] sm:$0xf0]  ;;  %v9935_v18 = vld [vmem:[#allocation5_spill] sm:$0xff]  ;;  %v9942_v22 = vld [vmem:[#allocation12_spill] sm:$0xff]  ;;  %v4517_v10 = vadd.f32 %v9817_v60, %v9743_v39 }
 0x387   : > { %4949 = vmatpush.bf16.msrb.mxu3 %v6981_v19  ;;  %4913 = vmatpush.bf16.msrb.mxu1 %v6693_v45  ;;  %v4963_v19 = vmax.f32 %v9932_v62, 0.0  ;;  %v6821_v43 = vor.u32 %v7426_v32, %v6818_v49  ;;  %v9934_v26 = vld [vmem:[#allocation6_spill] sm:$0xff] }
 0x388   : > { %4927 = vmatpush.bf16.msrb.mxu2 %v6901_v48 }
 0x389   : > { %4892 = vmatpush.bf16.msrb.mxu0 %v6597_v3  ;;  %v6869_v3 = vor.u32 %v7438_v38, %v6866_v27  ;;  %v9838_v53 = vpop.f32.mrf.mxu3  ;;  %v9938_v38 = vld [vmem:[#allocation10_spill] sm:$0xff] }
 0x38a   : > { %v4518_v44 = vpop.f32.mrf.mxu0  ;;  %4843 = vmatmul.bf16.gmra.mxu1 %v8791_v0  ;;  %v9937_v0 = vld [vmem:[#allocation4_spill] sm:$0xff] }
 0x38b   : > { %4950 = vmatpush.bf16.msrb.mxu3 %v6965_v42  ;;  %5022 = vmatpush.msra.mxu1 %v4976_v46  ;;  %v9835_v36 = vpop.f32.mrf.mxu2  ;;  %v4519_v1 = vadd.f32 %v4518_v44, %v9765_v50  ;;  %v9933_v50 = vld [vmem:[#allocation3_spill] sm:$0xff] }
 0x38c   : > { %4928 = vmatpush.bf16.msrb.mxu2 %v6885_v28  ;;  %4824 = vmatmul.bf16.gmra.mxu0 %v9933_v50  ;;  %v9941_v46 = vld [vmem:[#allocation7_spill] sm:$0xff] }
 0x38d   : > { %4893 = vmatpush.bf16.msrb.mxu0 %v6581_v33  ;;  %5023 = vmatpush.msra.mxu1 %v4972_v31  ;;  %v4537_v8 = vpop.f32.mrf.mxu1 }
 0x38e   : > { %v4538_v48 = vadd.f32 %v4537_v8, %v4519_v1 }
 0x38f   : > { %4951 = vmatpush.bf16.msrb.mxu3 %v6949_v12  ;;  %5024 = vmatpush.msra.mxu1 %v4968_v61 }
 0x390   : > { %4929 = vmatpush.bf16.msrb.mxu2 %v6869_v3 }
 0x391   : > { %4894 = vmatpush.bf16.msrb.mxu0 %v6565_v37  ;;  %5025 = vmatpush.msra.mxu1 %v4964_v13  ;;  %v4575_v11 = vpop.f32.mrf.mxu3  ;;  %v9936_v37 = vld [vmem:[#allocation9_spill] sm:$0xff]  ;;  %v4536_v13 = vadd.f32 %v9812_v17, %v4517_v10 }
 0x392   : > { %v4521_v14 = vpop.f32.mrf.mxu0  ;;  %4862 = vmatmul.bf16.gmra.mxu2 %v8916_v20  ;;  %4881 = vmatmul.bf16.gmra.mxu3 %v9934_v26 }
 0x393   : > { %v4556_v33 = vpop.f32.mrf.mxu2 }
 0x394   : > { %4930 = vmatpush.bf16.msrb.mxu2 %v6853_v30  ;;  %v4557_v2 = vadd.f32 %v4556_v33, %v4538_v48  ;;  %v4522_v30 = vadd.f32 %v4521_v14, %v9795_v25  ;;  %v4555_v33 = vadd.f32 %v9835_v36, %v4536_v13 }
 0x395   : > { %5002 = vmatpush.msra.mxu0 %v4975_v24  ;;  %v4540_v47 = vpop.f32.mrf.mxu1  ;;  %v9939_v24 = vld [vmem:[#allocation8_spill] sm:$0xff] }
 0x396   : > { %v4576_v40 = vadd.f32 %v4575_v11, %v4557_v2  ;;  %v4541_v59 = vadd.f32 %v4540_v47, %v4522_v30  ;;  %v4574_v39 = vadd.f32 %v9838_v53, %v4555_v33 }
 0x397   : > { %5003 = vmatpush.msra.mxu0 %v4971_v56 }
 0x398   : > { %4931 = vmatpush.bf16.msrb.mxu2 %v6837_v35  ;;  %v9943_v35 = vld [vmem:[#allocation13_spill] sm:$0xff] }
 0x399   : > { %5004 = vmatpush.msra.mxu0 %v4967_v51  ;;  %v4578_v45 = vpop.f32.mrf.mxu3 }
 0x39a   : > { %v4523_v9 = vpop.f32.mrf.mxu0  ;;  %4914 = vmatmul.bf16.vlgmr.msrb.gmra.mxu1 %v9935_v18 }
 0x39b   : > { %5005 = vmatpush.msra.mxu0 %v4963_v19  ;;  %v4559_v21 = vpop.f32.mrf.mxu2  ;;  %v4524_v8 = vadd.f32 %v4523_v9, %v9823_v6 }
 0x39c   : > { %4932 = vmatpush.bf16.msrb.mxu2 %v6821_v43  ;;  %4895 = vmatmul.bf16.vlgmr.msrb.gmra.mxu0 %v9937_v0  ;;  %v4560_v44 = vadd.f32 %v4559_v21, %v4541_v59 }
 0x39d   : > { %v4542_v42 = vpop.f32.mrf.mxu1 }
 0x39e   : > { %v4543_v62 = vadd.f32 %v4542_v42, %v4524_v8  ;;  %v4579_v43 = vadd.f32 %v4578_v45, %v4560_v44 }
 0x3a1   : > { %v4580_v28 = vpop.f32.mrf.mxu3 }
 0x3a2   : > { %v4592_v63 = vpop.f32.mrf.mxu0  ;;  %4933 = vmatmul.bf16.vlgmr.msrb.gmra.mxu2 %v9936_v37  ;;  %7004 = vmatmul.msk.bf16.vlgmr.msrb.gmra.mxu3 %vm3892_vm0, %v9938_v38 }
 0x3a3   : > { %v4561_v52 = vpop.f32.mrf.mxu2  ;;  %v4593_v50 = vadd.f32 %v4592_v63, %v4574_v39 }
 0x3a4   : > { %v4562_v1 = vadd.f32 %v4561_v52, %v4543_v62 }
 0x3a5   : > { %v4611_v54 = vpop.f32.mrf.mxu1 }
 0x3a6   : > { %v4581_v6 = vadd.f32 %v4580_v28, %v4562_v1  ;;  %v4612_v45 = vadd.f32 %v4611_v54, %v4593_v50 }
 0x3a9   : > { %v9855_v27 = vpop.f32.mrf.mxu3 }
 0x3aa   : > { %v4594_v23 = vpop.f32.mrf.mxu0  ;;  %4919 = vmatmul.bf16.gmra.mxu1 %v9939_v24 }
 0x3ab   : > { %v4630_v20 = vpop.f32.mrf.mxu2  ;;  %v4595_v60 = vadd.f32 %v4594_v23, %v4576_v40 }
 0x3ac   : > { %4900 = vmatmul.bf16.gmra.mxu0 %v9941_v46  ;;  %v4631_v38 = vadd.f32 %v4630_v20, %v4612_v45 }
 0x3ad   : > { %v4613_v41 = vpop.f32.mrf.mxu1 }
 0x3ae   : > { %v4614_v52 = vadd.f32 %v4613_v41, %v4595_v60  ;;  %v4650_v46 = vadd.f32 %v9855_v27, %v4631_v38 }
 0x3b1   : > { %v4651_v55 = vpop.f32.mrf.mxu3 }
 0x3b2   : > { %v4597_v12 = vpop.f32.mrf.mxu0  ;;  %4938 = vmatmul.bf16.gmra.mxu2 %v9940_v58  ;;  %7005 = vmatmul.msk.bf16.gmra.mxu3 %vm3892_vm0, %v9942_v22 }
 0x3b3   : > { %v4632_v34 = vpop.f32.mrf.mxu2  ;;  %v4598_v11 = vadd.f32 %v4597_v12, %v4579_v43 }
 0x3b4   : > { %v4633_v0 = vadd.f32 %v4632_v34, %v4614_v52 }
 0x3b5   : > { %v4616_v3 = vpop.f32.mrf.mxu1 }
 0x3b6   : > { %v4617_v26 = vadd.f32 %v4616_v3, %v4598_v11  ;;  %v4652_v40 = vadd.f32 %v4651_v55, %v4633_v0 }
 0x3b9   : > { %v4654_v16 = vpop.f32.mrf.mxu3 }
 0x3ba   : > { %v4599_v5 = vpop.f32.mrf.mxu0 }
 0x3bb   : > { %v4635_v57 = vpop.f32.mrf.mxu2  ;;  %v4600_v47 = vadd.f32 %v4599_v5, %v4581_v6 }
 0x3bc   : > { %v4636_v18 = vadd.f32 %v4635_v57, %v4617_v26 }
 0x3bd   : > { %v4618_v56 = vpop.f32.mrf.mxu1 }
 0x3be   : > { %v4619_v37 = vadd.f32 %v4618_v56, %v4600_v47  ;;  %v4655_v12 = vadd.f32 %v4654_v16, %v4636_v18 }
 0x3c1   : > { %v4656_v4 = vpop.f32.mrf.mxu3 }
 0x3c2   : > { %v4668_v61 = vpop.f32.mrf.mxu0 }
 0x3c3   : > { %v4637_v31 = vpop.f32.mrf.mxu2  ;;  %v4669_v56 = vadd.f32 %v4668_v61, %v4650_v46 }
 0x3c4   : > { %v4638_v28 = vadd.f32 %v4637_v31, %v4619_v37 }
 0x3c5   : > { %v4687_v51 = vpop.f32.mrf.mxu1 }
 0x3c6   : > { %v4657_v23 = vadd.f32 %v4656_v4, %v4638_v28  ;;  %v4688_v31 = vadd.f32 %v4687_v51, %v4669_v56 }
 0x3c8   : > { %v4965_v44 = vmax.f32 %v4688_v31, 0.0 }
 0x3c9   : > { %v4725_v32 = vpop.f32.mrf.mxu3 }
 0x3ca   : > { %v4670_v25 = vpop.f32.mrf.mxu0 }
 0x3cb   : > { %v4706_v19 = vpop.f32.mrf.mxu2  ;;  %v4671_v41 = vadd.f32 %v4670_v25, %v4652_v40 }
 0x3cc   : > { %v4707_v48 = vadd.f32 %v4706_v19, %v9943_v35 }
 0x3cd   : > { %v4689_v49 = vpop.f32.mrf.mxu1 }
 0x3ce   : > { %v4726_v2 = vadd.f32 %v4725_v32, %v4707_v48  ;;  %v4690_v5 = vadd.f32 %v4689_v49, %v4671_v41 }
 0x3d0   : > { %v4969_v10 = vmax.f32 %v4690_v5, 0.0 }
 0x3d1   : > { %v4727_v21 = vpop.f32.mrf.mxu3 }
 0x3d2   : > { %v4673_v9 = vpop.f32.mrf.mxu0 }
 0x3d3   : > { %v4708_v14 = vpop.f32.mrf.mxu2  ;;  %v4674_v24 = vadd.f32 %v4673_v9, %v4655_v12 }
 0x3d4   : > { %v4709_v17 = vadd.f32 %v4708_v14, %v9044_v29 }
 0x3d5   : > { %v4692_v42 = vpop.f32.mrf.mxu1 }
 0x3d6   : > { %v4728_v36 = vadd.f32 %v4727_v21, %v4709_v17  ;;  %v4693_v54 = vadd.f32 %v4692_v42, %v4674_v24 }
 0x3d8   : > { %v4973_v55 = vmax.f32 %v4693_v54, 0.0 }
 0x3d9   : > { %v4730_v3 = vpop.f32.mrf.mxu3 }
 0x3da   : > { %v4675_v58 = vpop.f32.mrf.mxu0 }
 0x3db   : > { %v4711_v53 = vpop.f32.mrf.mxu2  ;;  %v4676_v57 = vadd.f32 %v4675_v58, %v4657_v23 }
 0x3dc   : > { %v4712_v63 = vadd.f32 %v4711_v53, %v9112_v15 }
 0x3dd   : > { %v4694_v29 = vpop.f32.mrf.mxu1 }
 0x3de   : > { %v4731_v22 = vadd.f32 %v4730_v3, %v4712_v63  ;;  %v4695_v34 = vadd.f32 %v4694_v29, %v4676_v57 }
 0x3e0   : > { %v4977_v20 = vmax.f32 %v4695_v34, 0.0 }
 0x3e1   : > { %v4732_v4 = vpop.f32.mrf.mxu3 }
 0x3e2   : > { %5042 = vmatpush.msra.mxu2 %v4977_v20  ;;  %v4744_v8 = vpop.f32.mrf.mxu0  ;;  %v4979_v20 = vld [vmem:[%s9902_s3] sm:$0x7] }
 0x3e3   : > { %v4713_v16 = vpop.f32.mrf.mxu2  ;;  %v4745_v27 = vadd.f32 %v4744_v8, %v4726_v2  ;;  %7007 = vmatmul.msk.f32.vlgmr.msra.gmra.mxu1 %vm4986_vm1, %v4979_v20  ;;  %7006 = vmatmul.msk.f32.vlgmr.msra.gmra.mxu0 %vm4986_vm1, %v4979_v20 }
 0x3e4   : > { %v4714_v30 = vadd.f32 %v4713_v16, %v9087_v7  ;;  %5043 = vmatpush.msra.mxu2 %v4973_v55  ;;  %v4980_v16 = vld [vmem:[%s9903_s4] sm:$0x7] }
 0x3e5   : > { %v4763_v15 = vpop.f32.mrf.mxu1  ;;  %4983 = vperm.xlu2 %7502, %v4980_v16  }
 0x3e6   : > { %v4733_v59 = vadd.f32 %v4732_v4, %v4714_v30  ;;  %v4764_v62 = vadd.f32 %v4763_v15, %v4745_v27  ;;  %5044 = vmatpush.msra.mxu2 %v4969_v10 }
 0x3e8   : > { %5045 = vmatpush.msra.mxu2 %v4965_v44 }
 0x3e9   : > { %v4801_v13 = vpop.f32.mrf.mxu3  ;;  %7008 = vmatmul.msk.f32.vlgmr.msra.gmra.mxu2 %vm4986_vm1, %v4979_v20 }
 0x3ea   : > { %v4746_v51 = vpop.f32.mrf.mxu0 }
 0x3eb   : > { %v4782_v61 = vpop.f32.mrf.mxu2  ;;  %v4747_v48 = vadd.f32 %v4746_v51, %v4728_v36 }
 0x3ec   : > { %v4783_v19 = vadd.f32 %v4782_v61, %v4764_v62 }
 0x3ed   : > { %v4765_v1 = vpop.f32.mrf.mxu1 }
 0x3ee   : > { %v4802_v35 = vadd.f32 %v4801_v13, %v4783_v19  ;;  %v4766_v7 = vadd.f32 %v4765_v1, %v4747_v48 }
 0x3f1   : > { %v4803_v25 = vpop.f32.mrf.mxu3 }
 0x3f2   : > { %v4749_v6 = vpop.f32.mrf.mxu0 }
 0x3f3   : > { %v4784_v32 = vpop.f32.mrf.mxu2  ;;  %v4750_v53 = vadd.f32 %v4749_v6, %v4731_v22 }
 0x3f4   : > { %v4785_v49 = vadd.f32 %v4784_v32, %v4766_v7 }
 0x3f5   : > { %v4768_v33 = vpop.f32.mrf.mxu1 }
 0x3f6   : > { %v4804_v43 = vadd.f32 %v4803_v25, %v4785_v49  ;;  %v4769_v3 = vadd.f32 %v4768_v33, %v4750_v53 }
 0x3f9   : > { %v4806_v11 = vpop.f32.mrf.mxu3 }
 0x3fa   : > { %v4751_v60 = vpop.f32.mrf.mxu0 }
 0x3fb   : > { %v4787_v2 = vpop.f32.mrf.mxu2  ;;  %v4752_v63 = vadd.f32 %v4751_v60, %v4733_v59 }
 0x3fc   : > { %v4788_v29 = vadd.f32 %v4787_v2, %v4769_v3 }
 0x3fd   : > { %v4770_v39 = vpop.f32.mrf.mxu1 }
 0x3fe   : > { %v4771_v58 = vadd.f32 %v4770_v39, %v4752_v63  ;;  %v4807_v54 = vadd.f32 %v4806_v11, %v4788_v29 }
 0x401   : > { %v4808_v14 = vpop.f32.mrf.mxu3 }
 0x402   : > { %v4820_v26 = vpop.f32.mrf.mxu0 }
 0x403   : > { %v4789_v47 = vpop.f32.mrf.mxu2  ;;  %v4821_v4 = vadd.f32 %v4820_v26, %v4802_v35 }
 0x404   : > { %v4790_v57 = vadd.f32 %v4789_v47, %v4771_v58 }
 0x405   : > { %v4839_v50 = vpop.f32.mrf.mxu1 }
 0x406   : > { %v4809_v22 = vadd.f32 %v4808_v14, %v4790_v57  ;;  %v4840_v61 = vadd.f32 %v4839_v50, %v4821_v4 }
 0x409   : > { %v4877_v21 = vpop.f32.mrf.mxu3 }
 0x40a   : > { %v4822_v9 = vpop.f32.mrf.mxu0 }
 0x40b   : > { %v4858_v17 = vpop.f32.mrf.mxu2  ;;  %v4823_v31 = vadd.f32 %v4822_v9, %v4804_v43 }
 0x40c   : > { %v4859_v1 = vadd.f32 %v4858_v17, %v4840_v61 }
 0x40d   : > { %v4841_v42 = vpop.f32.mrf.mxu1 }
 0x40e   : > { %v4842_v10 = vadd.f32 %v4841_v42, %v4823_v31  ;;  %v4878_v33 = vadd.f32 %v4877_v21, %v4859_v1 }
 0x411   : > { %v4879_v18 = vpop.f32.mrf.mxu3 }
 0x412   : > { %v4825_v36 = vpop.f32.mrf.mxu0 }
 0x413   : > { %v4860_v52 = vpop.f32.mrf.mxu2  ;;  %v4826_v5 = vadd.f32 %v4825_v36, %v4807_v54 }
 0x414   : > { %v4861_v19 = vadd.f32 %v4860_v52, %v4842_v10 }
 0x415   : > { %v4844_v37 = vpop.f32.mrf.mxu1 }
 0x416   : > { %v4845_v15 = vadd.f32 %v4844_v37, %v4826_v5  ;;  %v4880_v7 = vadd.f32 %v4879_v18, %v4861_v19 }
 0x419   : > { %v4882_v0 = vpop.f32.mrf.mxu3 }
 0x41a   : > { %v4827_v38 = vpop.f32.mrf.mxu0 }
 0x41b   : > { %v4863_v45 = vpop.f32.mrf.mxu2  ;;  %v4828_v55 = vadd.f32 %v4827_v38, %v4809_v22 }
 0x41c   : > { %v4864_v59 = vadd.f32 %v4863_v45, %v4845_v15 }
 0x41d   : > { %v4846_v28 = vpop.f32.mrf.mxu1 }
 0x41e   : > { %v4847_v44 = vadd.f32 %v4846_v28, %v4828_v55  ;;  %v4883_v51 = vadd.f32 %v4882_v0, %v4864_v59 }
 0x421   : > { %v4884_v40 = vpop.f32.mrf.mxu3 }
 0x422   : > { %v4896_v24 = vpop.f32.mrf.mxu0 }
 0x423   : > { %v4865_v12 = vpop.f32.mrf.mxu2  ;;  %v4897_v2 = vadd.f32 %v4896_v24, %v4878_v33 }
 0x424   : > { %v4866_v13 = vadd.f32 %v4865_v12, %v4847_v44 }
 0x425   : > { %v4915_v23 = vpop.f32.mrf.mxu1 }
 0x426   : > { %v4885_v25 = vadd.f32 %v4884_v40, %v4866_v13  ;;  %v4916_v26 = vadd.f32 %v4915_v23, %v4897_v2 }
 0x429   : > { %v4953_v41 = vpop.f32.mrf.mxu3 }
 0x42a   : > { %v4898_v34 = vpop.f32.mrf.mxu0 }
 0x42b   : > { %v4934_v46 = vpop.f32.mrf.mxu2  ;;  %v4899_v43 = vadd.f32 %v4898_v34, %v4880_v7 }
 0x42c   : > { %v4935_v52 = vadd.f32 %v4934_v46, %v4916_v26 }
 0x42d   : > { %v4917_v56 = vpop.f32.mrf.mxu1 }
 0x42e   : > { %v4918_v60 = vadd.f32 %v4917_v56, %v4899_v43  ;;  %v4954_v45 = vadd.f32 %v4953_v41, %v4935_v52 }
 0x430   : > { %v4966_v38 = vmax.f32 %v4954_v45, 0.0 }
 0x431   : > { %v4955_v8 = vpop.f32.mrf.mxu3 }
 0x432   : > { %v4901_v27 = vpop.f32.mrf.mxu0 }
 0x433   : > { %v4936_v30 = vpop.f32.mrf.mxu2  ;;  %v4902_v32 = vadd.f32 %v4901_v27, %v4883_v51 }
 0x434   : > { %v4937_v42 = vadd.f32 %v4936_v30, %v4918_v60 }
 0x435   : > { %v4920_v62 = vpop.f32.mrf.mxu1 }
 0x436   : > { %v4921_v11 = vadd.f32 %v4920_v62, %v4902_v32  ;;  %v4956_v36 = vadd.f32 %v4955_v8, %v4937_v42 }
 0x438   : > { %v4970_v28 = vmax.f32 %v4956_v36, 0.0 }
 0x439   : > { %v4958_v49 = vpop.f32.mrf.mxu3 }
 0x43a   : > { %v4903_v35 = vpop.f32.mrf.mxu0 }
 0x43b   : > { %v4939_v48 = vpop.f32.mrf.mxu2  ;;  %v4904_v6 = vadd.f32 %v4903_v35, %v4885_v25 }
 0x43c   : > { %v4940_v47 = vadd.f32 %v4939_v48, %v4921_v11 }
 0x43d   : > { %v4922_v39 = vpop.f32.mrf.mxu1 }
 0x43e   : > { %v4923_v14 = vadd.f32 %v4922_v39, %v4904_v6  ;;  %v4959_v18 = vadd.f32 %v4958_v49, %v4940_v47 }
 0x43f   : > { %v4984_v12 = vpop.permute.xlu2 %4983 }
 0x440   : > { %v4974_v0 = vmax.f32 %v4959_v18, 0.0 }
 0x441   : > { %v4960_v9 = vpop.f32.mrf.mxu3 }
 0x443   : > { %v4941_v50 = vpop.f32.mrf.mxu2 }
 0x444   : > { %v4942_v17 = vadd.f32 %v4941_v50, %v4923_v14 }
 0x446   : > { %v4961_v37 = vadd.f32 %v4960_v9, %v4942_v17 }
 0x448   : > { %v4978_v21 = vmax.f32 %v4961_v37, 0.0 }
 0x44a   : > { %5062 = vmatpush.msra.mxu3 %v4978_v21 }
 0x44c   : > { %5063 = vmatpush.msra.mxu3 %v4974_v0 }
 0x44e   : > { %5064 = vmatpush.msra.mxu3 %v4970_v28 }
 0x450   : > { %5065 = vmatpush.msra.mxu3 %v4966_v38 }
 0x451   : > { %7009 = vmatmul.msk.f32.vlgmr.msra.gmra.mxu3 %vm4986_vm1, %v4979_v20 }
 0x460   : > { %v5027_v53 = vpop.f32.mrf.mxu1  ;;  %v5007_v24 = vpop.f32.mrf.mxu0 }
 0x461   : > { %v5028_v40 = vadd.f32 %v5027_v53, %v4984_v12  ;;  %v5008_v3 = vadd.f32 %v5007_v24, %v4984_v12 }
 0x463   : > { %v5071_v23 = vmul.f32 5.0, %v5028_v40  ;;  %v5070_v29 = vmul.f32 5.0, %v5008_v3 }
 0x465   : > { %v5078_v63 = vrot.slane %v5071_v23, 4 }
 0x467   : > { %v5081_v58 = vsel %vm5080_vm2, %v5070_v29, %v5078_v63 }
 0x468   : > { %5085 = vst [vmem:[%s1107_s29] sm:$0x77] %v5081_v58 }
 0x46c   : > { %v5047_v46 = vpop.f32.mrf.mxu2 }
 0x46d   : > { %v5048_v56 = vadd.f32 %v5047_v46, %v4984_v12 }
 0x46f   : > { %v5072_v5 = vmul.f32 5.0, %v5048_v56 }
 0x4d4   : > { %v5067_v41 = vpop.f32.mrf.mxu3 }
 0x4d5   : > { %v5068_v57 = vadd.f32 %v5067_v41, %v4984_v12 }
 0x4d7   : > { %v5073_v54 = vmul.f32 5.0, %v5068_v57 }
 0x4d9   : > { %v5079_v34 = vrot.slane %v5073_v54, 4 }
 0x4db   : > { %v5082_v20 = vsel %vm5080_vm2, %v5072_v5, %v5079_v34 }
 0x4dc   : > { %5086 = vst [vmem:[%s1107_s29 + $0x8] sm:$0x77] %v5082_v20 }
 0x4dd PF: > { %p12_p9 = scmp.ge.s32.totalorder %s7575_s22, 4   ;;  %s9944_s18 = smov %s7521_s19 }
 0x4de   : > { %s9945_s19 = smov %s7584_s25  ;;  %s9946_s20 = smov %s7575_s22 }
 0x4df   :  { %14 = sbr.rel (!%p12_p9) target bundleno = 2 (0x2), region = 98 }

</bundles_post_ra>
